<compile_context>
chip_gen: v7x
topology: tpu7x:2x2x1
jax: 0.10.0
libtpu: 0.0.40
codegen_flags: <defaults>
</compile_context>

<pallas_src>
import functools

import jax
import jax.numpy as jnp
from jax.experimental import pallas as pl
from jax.experimental.pallas import tpu as pltpu

BN_EPS = 1e-5
LEAKY_SLOPE = 0.01          # nn.LeakyReLU() default
POOL_SIZES = (5, 9, 13)


# ----------------------------------------------------------------------------
# Helpers
# ----------------------------------------------------------------------------
def _pick_tile(m, cap=256):
    """Largest tile that divides m, is a multiple of 8 (sublanes) and <= cap."""
    if m <= cap:
        return m
    for t in range(cap, 7, -1):
        if t % 8 == 0 and m % t == 0:
            return t
    # TODO(synk): mask partial tiles instead of falling back to one block.
    return m


def _cparams(block_bytes, scratch_bytes=0):
    """Parallel 1-D grid + explicit scoped-VMEM limit sized from the footprint."""
    need = 2 * int(block_bytes) + int(scratch_bytes) + (2 << 20)
    return pltpu.CompilerParams(
        dimension_semantics=("parallel",),
        vmem_limit_bytes=int(min(max(need, 32 << 20), 100 << 20)),
    )


def _finalize_stats(partials, count):
    """(g, 2, C) per-tile [sum, sum_sq] -> BN scale/shift (gamma=1, beta=0)."""
    s = jnp.sum(partials, axis=0)                     # (2, C)
    mean = s[0] / count
    var = jnp.maximum(s[1] / count - mean * mean, 0.0)  # biased variance
    scale = jax.lax.rsqrt(var + BN_EPS)
    shift = -mean * scale
    return scale[None, :], shift[None, :]             # (1, C) each


# ----------------------------------------------------------------------------
# Kernel 1: 1x1 conv (no activation before it) + BN partial stats
# ----------------------------------------------------------------------------
def _conv1x1_kernel(x_ref, w_ref, a_ref, stats_ref):
    a = jnp.dot(x_ref[...], w_ref[...], preferred_element_type=jnp.float32)
    a_ref[...] = a
    stats_ref[0, 0:1, :] = jnp.sum(a, axis=0, keepdims=True)
    stats_ref[0, 1:2, :] = jnp.sum(a * a, axis=0, keepdims=True)


def conv1x1(x2d, w, *, tm):
    m, cin = x2d.shape
    cout = w.shape[1]
    gm = m // tm
    blk = tm * cin * 2 + cin * cout * 2 + tm * cout * 4 + 2 * cout * 4
    return pl.pallas_call(
        _conv1x1_kernel,
        out_shape=(jax.ShapeDtypeStruct((m, cout), jnp.float32),
                   jax.ShapeDtypeStruct((gm, 2, cout), jnp.float32)),
        grid=(gm,),
        in_specs=[pl.BlockSpec((tm, cin), lambda i: (i, 0)),
                  pl.BlockSpec((cin, cout), lambda i: (0, 0))],
        out_specs=(pl.BlockSpec((tm, cout), lambda i: (i, 0)),
                   pl.BlockSpec((1, 2, cout), lambda i: (i, 0, 0))),
        compiler_params=_cparams(blk),
    )(x2d, w)


# ----------------------------------------------------------------------------
# Kernel 2: BN + LeakyReLU + 1x1 conv + BN partial stats
# ----------------------------------------------------------------------------
def _bn_act_conv1x1_kernel(x_ref, scale_ref, shift_ref, w_ref, a_ref, stats_ref):
    h = x_ref[...] * scale_ref[...] + shift_ref[...]
    h = jnp.maximum(h, LEAKY_SLOPE * h)
    a = jnp.dot(h.astype(jnp.bfloat16), w_ref[...],
                preferred_element_type=jnp.float32)
    a_ref[...] = a
    stats_ref[0, 0:1, :] = jnp.sum(a, axis=0, keepdims=True)
    stats_ref[0, 1:2, :] = jnp.sum(a * a, axis=0, keepdims=True)


def bn_conv1x1(x2d, scale, shift, w, *, tm):
    m, cin = x2d.shape
    cout = w.shape[1]
    gm = m // tm
    blk = tm * cin * 4 + 2 * cin * 4 + cin * cout * 2 + tm * cout * 4 + 2 * cout * 4
    return pl.pallas_call(
        _bn_act_conv1x1_kernel,
        out_shape=(jax.ShapeDtypeStruct((m, cout), jnp.float32),
                   jax.ShapeDtypeStruct((gm, 2, cout), jnp.float32)),
        grid=(gm,),
        in_specs=[pl.BlockSpec((tm, cin), lambda i: (i, 0)),
                  pl.BlockSpec((1, cin), lambda i: (0, 0)),
                  pl.BlockSpec((1, cin), lambda i: (0, 0)),
                  pl.BlockSpec((cin, cout), lambda i: (0, 0))],
        out_specs=(pl.BlockSpec((tm, cout), lambda i: (i, 0)),
                   pl.BlockSpec((1, 2, cout), lambda i: (i, 0, 0))),
        compiler_params=_cparams(blk),
    )(x2d, scale, shift, w)


# ----------------------------------------------------------------------------
# Kernel 3: BN + LeakyReLU + 3x3 conv (per image, halo built in VMEM) + stats
# ----------------------------------------------------------------------------
def _bn_act_conv3x3_kernel(x_ref, scale_ref, shift_ref, w_ref, a_ref, stats_ref,
                           pad_ref, acc_ref, *, H, W):
    C2 = x_ref.shape[-1]
    HW = H * W
    h = x_ref[0] * scale_ref[...] + shift_ref[...]          # (HW, C2) f32
    h = jnp.maximum(h, LEAKY_SLOPE * h)

    dt = pad_ref.dtype
    # Zero only the halo the 9 taps actually read (interior is overwritten
    # below).  Done every grid step so the kernel stays correct when the
    # batch axis is split across TensorCores (each core owns its scratch).
    pad_ref[:, 0:8, :] = jnp.zeros((H + 2, 8, C2), dt)
    pad_ref[:, 8 + W:8 + W + 2, :] = jnp.zeros((H + 2, 2, C2), dt)
    pad_ref[0:1, 8:8 + W, :] = jnp.zeros((1, W, C2), dt)
    pad_ref[H + 1:H + 2, 8:8 + W, :] = jnp.zeros((1, W, C2), dt)
    pad_ref[1:1 + H, 8:8 + W, :] = h.reshape(H, W, C2)       # aligned interior

    # 9 shifted taps, accumulated on the MXU into a VMEM f32 scratch.
    for t in range(9):
        kh, kw = divmod(t, 3)
        tap = pad_ref[kh:kh + H, 7 + kw:7 + kw + W, :].reshape(HW, C2)
        contrib = jnp.dot(tap.astype(jnp.bfloat16), w_ref[t],
                          preferred_element_type=jnp.float32)
        if t == 0:
            acc_ref[...] = contrib
        else:
            acc_ref[...] += contrib
    # TODO(synk): fold the 3 kw taps into the matmul K dim / use a bf16 pad
    # scratch once unaligned packed-sublane relayouts are guaranteed; plain
    # f32 slices are kept here as the proven lowering path.

    a = acc_ref[...]
    a_ref[0] = a
    stats_ref[0, 0:1, :] = jnp.sum(a, axis=0, keepdims=True)
    stats_ref[0, 1:2, :] = jnp.sum(a * a, axis=0, keepdims=True)


def bn_conv3x3(x3d, scale, shift, w2, *, H, W):
    n, hw, c2 = x3d.shape
    c = w2.shape[2]
    blk = hw * c2 * 4 + 2 * c2 * 4 + 9 * c2 * c * 2 + hw * c * 4 + 2 * c * 4
    scratch = (H + 2) * (W + 10) * c2 * 4 + hw * c * 4
    return pl.pallas_call(
        functools.partial(_bn_act_conv3x3_kernel, H=H, W=W),
        out_shape=(jax.ShapeDtypeStruct((n, hw, c), jnp.float32),
                   jax.ShapeDtypeStruct((n, 2, c), jnp.float32)),
        grid=(n,),
        in_specs=[pl.BlockSpec((1, hw, c2), lambda b: (b, 0, 0)),
                  pl.BlockSpec((1, c2), lambda b: (0, 0)),
                  pl.BlockSpec((1, c2), lambda b: (0, 0)),
                  pl.BlockSpec((9, c2, c), lambda b: (0, 0, 0))],
        out_specs=(pl.BlockSpec((1, hw, c), lambda b: (b, 0, 0)),
                   pl.BlockSpec((1, 2, c), lambda b: (b, 0, 0))),
        scratch_shapes=[pltpu.VMEM((H + 2, W + 10, c2), jnp.float32),
                        pltpu.VMEM((hw, c), jnp.float32)],
        compiler_params=_cparams(blk, scratch),
    )(x3d, scale, shift, w2)


# ----------------------------------------------------------------------------
# Kernel 4: BN + LeakyReLU + maxpool 5/9/13 + channel concat (per image)
# ----------------------------------------------------------------------------
def _bn_act_pool_kernel(x_ref, scale_ref, shift_ref, o_ref, padh_ref, padw_ref,
                        *, H, W):
    C2 = x_ref.shape[-1]
    HW = H * W
    x = x_ref[0] * scale_ref[...] + shift_ref[...]
    x = jnp.maximum(x, LEAKY_SLOPE * x)                      # (HW, C2) head out
    xs = x.reshape(H, W, C2)

    ninf = -jnp.inf
    # Row pass: -inf halo of radius 6 (re-written every step; interior always
    # overwritten), running 5-max -> k=5/9/13 row maxes.
    padh_ref[0:6, :, :] = jnp.full((6, W, C2), ninf, padh_ref.dtype)
    padh_ref[H + 6:H + 12, :, :] = jnp.full((6, W, C2), ninf, padh_ref.dtype)
    padh_ref[6:6 + H, :, :] = xs
    ph = padh_ref[...]
    r5 = ph[0:H + 8]
    for d in range(1, 5):
        r5 = jnp.maximum(r5, ph[d:d + H + 8])                # r5[t] = max ph[t:t+5]
    rmid = r5[4:4 + H]
    row5 = rmid
    row9 = jnp.maximum(r5[2:2 + H], r5[6:6 + H])
    row13 = jnp.maximum(jnp.maximum(r5[0:H], rmid), r5[8:8 + H])

    # Column pass: one shared scratch; halo filled once per step, interior
    # rewritten for each of the three pool sizes.
    padw_ref[:, 0:8, :] = jnp.full((H, 8, C2), ninf, padw_ref.dtype)
    padw_ref[:, 8 + W:8 + W + 6, :] = jnp.full((H, 6, C2), ninf, padw_ref.dtype)

    def colmax(rowk, starts):
        padw_ref[:, 8:8 + W, :] = rowk                       # aligned interior
        pw = padw_ref[...]
        c5 = pw[:, 0:W + 10]
        for d in range(1, 5):
            c5 = jnp.maximum(c5, pw[:, d:d + W + 10])        # c5[:,t]=max pw[:,t:t+5]
        out = c5[:, starts[0]:starts[0] + W]
        for s in starts[1:]:
            out = jnp.maximum(out, c5[:, s:s + W])
        return out.reshape(HW, C2)

    p5 = colmax(row5, (6,))
    p9 = colmax(row9, (4, 8))
    p13 = colmax(row13, (2, 6, 10))
    # Single lane-dense channels-last store: [head, pool5, pool9, pool13].
    o_ref[0] = jnp.concatenate([x, p5, p9, p13], axis=1)


def bn_pool_concat(x3d, scale, shift, *, H, W):
    n, hw, c2 = x3d.shape
    blk = hw * c2 * 4 + 2 * c2 * 4 + hw * 4 * c2 * 4
    scratch = (H + 12) * W * c2 * 4 + H * (W + 14) * c2 * 4
    return pl.pallas_call(
        functools.partial(_bn_act_pool_kernel, H=H, W=W),
        out_shape=jax.ShapeDtypeStruct((n, hw, 4 * c2), jnp.float32),
        grid=(n,),
        in_specs=[pl.BlockSpec((1, hw, c2), lambda b: (b, 0, 0)),
                  pl.BlockSpec((1, c2), lambda b: (0, 0)),
                  pl.BlockSpec((1, c2), lambda b: (0, 0))],
        out_specs=pl.BlockSpec((1, hw, 4 * c2), lambda b: (b, 0, 0)),
        scratch_shapes=[pltpu.VMEM((H + 12, W, c2), jnp.float32),
                        pltpu.VMEM((H, W + 14, c2), jnp.float32)],
        compiler_params=_cparams(blk, scratch),
    )(x3d, scale, shift)


# ----------------------------------------------------------------------------
# Parameters + module forward
# ----------------------------------------------------------------------------
def init_spp_params(key, feature_channels):
    """Conv weights ~ N(0, 0.01) per __initialize_weights (no conv bias);
    BN gamma=1 / beta=0 are implicit in the kernels.  Matmul layout (bf16):
    w1 (C, C2), w2 (9, C2, C) with tap index 3*kh + kw, w3 (C, C2)."""
    C = feature_channels[-1]
    C2 = C // 2
    k1, k2, k3 = jax.random.split(key, 3)
    w1 = 0.01 * jax.random.normal(k1, (C2, C, 1, 1), jnp.float32)
    w2 = 0.01 * jax.random.normal(k2, (C, C2, 3, 3), jnp.float32)
    w3 = 0.01 * jax.random.normal(k3, (C2, C, 1, 1), jnp.float32)
    w1_m = jnp.transpose(w1[:, :, 0, 0], (1, 0)).astype(jnp.bfloat16)
    w2_m = jnp.transpose(w2, (2, 3, 1, 0)).reshape(9, C2, C).astype(jnp.bfloat16)
    w3_m = jnp.transpose(w3[:, :, 0, 0], (1, 0)).astype(jnp.bfloat16)
    return w1_m, w2_m, w3_m


def spatial_pyramid_pooling(x_nchw, params):
    """x_nchw: (N, C, H, W) -> (N, 2*C, H, W), matching the torch module.
    NOTE: BatchNorm uses training-mode batch statistics with gamma=1/beta=0."""
    N, C, H, W = x_nchw.shape
    C2 = C // 2
    M = N * H * W
    HW = H * W
    w1, w2, w3 = params

    # Boundary transpose to channels-last; bf16 operands for the MXU.
    x2d = jnp.transpose(x_nchw, (0, 2, 3, 1)).reshape(M, C).astype(jnp.bfloat16)
    tm = _pick_tile(M)

    a1, st1 = conv1x1(x2d, w1, tm=tm)                          # (M, C2) raw
    scale1, shift1 = _finalize_stats(st1, M)
    a2, st2 = bn_conv3x3(a1.reshape(N, HW, C2), scale1, shift1, w2, H=H, W=W)
    scale2, shift2 = _finalize_stats(st2, M)
    a3, st3 = bn_conv1x1(a2.reshape(M, C), scale2, shift2, w3, tm=tm)
    scale3, shift3 = _finalize_stats(st3, M)
    out = bn_pool_concat(a3.reshape(N, HW, C2), scale3, shift3, H=H, W=W)

    out = out.reshape(N, H, W, 4 * C2)
    return jnp.transpose(out, (0, 3, 1, 2))                    # -> NCHW (N, 2C, H, W)


# ----------------------------------------------------------------------------
# Pure-JAX reference (same bf16 rounding points) for a numerical self-check.
# ----------------------------------------------------------------------------
def _bn_lrelu_ref(a):
    mean = jnp.mean(a, axis=0, keepdims=True)
    var = jnp.mean(jnp.square(a - mean), axis=0, keepdims=True)
    y = (a - mean) * jax.lax.rsqrt(var + BN_EPS)
    return jnp.maximum(y, LEAKY_SLOPE * y)


def _reference(x_nchw, params):
    N, C, H, W = x_nchw.shape
    C2 = C // 2
    w1, w2, w3 = [w.astype(jnp.float32) for w in params]
    x = jnp.transpose(x_nchw, (0, 2, 3, 1)).reshape(N * H * W, C)
    x = x.astype(jnp.bfloat16).astype(jnp.float32)

    h1 = _bn_lrelu_ref(x @ w1)
    h1p = jnp.pad(h1.astype(jnp.bfloat16).astype(jnp.float32).reshape(N, H, W, C2),
                  ((0, 0), (1, 1), (1, 1), (0, 0)))
    acc = jnp.zeros((N * H * W, C), jnp.float32)
    for t in range(9):
        a, b = divmod(t, 3)
        acc = acc + h1p[:, a:a + H, b:b + W, :].reshape(N * H * W, C2) @ w2[t]
    h2 = _bn_lrelu_ref(acc)
    xh = _bn_lrelu_ref(h2.astype(jnp.bfloat16).astype(jnp.float32) @ w3)
    xh = xh.reshape(N, H, W, C2)

    feats = [xh]
    for k in POOL_SIZES:
        r = k // 2
        xp = jnp.pad(xh, ((0, 0), (r, r), (r, r), (0, 0)),
                     constant_values=-jnp.inf)
        out = None
        for a in range(k):
            for b in range(k):
                v = xp[:, a:a + H, b:b + W, :]
                out = v if out is None else jnp.maximum(out, v)
        feats.append(out)
    return jnp.transpose(jnp.concatenate(feats, axis=-1), (0, 3, 1, 2))


# ----------------------------------------------------------------------------
if __name__ == "__main__":
    key = jax.random.PRNGKey(0)
    kx, kp = jax.random.split(key)

    feature_channels = [64, 128, 16]        # only the last entry is used
    N, C, H, W = 2, feature_channels[-1], 16, 16

    x = jax.random.normal(kx, (N, C, H, W), jnp.float32)
    params = init_spp_params(kp, feature_channels)

    out = jax.jit(spatial_pyramid_pooling)(x, params)
    out = jax.block_until_ready(out)

    assert out.shape == (N, 2 * C, H, W), out.shape
    assert bool(jnp.all(jnp.isfinite(out)))

    ref = _reference(x, params)
    assert bool(jnp.allclose(out, ref, atol=2e-2, rtol=2e-2)), \
        float(jnp.max(jnp.abs(out - ref)))

    print("KERNEL_OK")
</pallas_src>

<mosaic_0001>
module attributes {stable_mosaic.version = 11 : i64} {
  func.func @_bn_act_conv3x3_kernel(%arg0: i32, %arg1: memref<1x256x8xf32, #tpu.memory_space<vmem>>, %arg2: memref<1x8xf32, #tpu.memory_space<vmem>>, %arg3: memref<1x8xf32, #tpu.memory_space<vmem>>, %arg4: memref<9x8x16xbf16, #tpu.memory_space<vmem>>, %arg5: memref<1x256x16xf32, #tpu.memory_space<vmem>>, %arg6: memref<1x2x16xf32, #tpu.memory_space<vmem>>, %arg7: memref<18x26x8xf32, #tpu.memory_space<vmem>>, %arg8: memref<256x16xf32, #tpu.memory_space<vmem>>) attributes {dimension_semantics = [#tpu.dimension_semantics<parallel>], iteration_bounds = array<i64: 2>, scalar_prefetch = 0 : i64, scratch_operands = 2 : i64, tpu.core_type = #tpu.core_type<tc>, window_params = [{transform_indices = @transform_0, window_bounds = array<i64: 1, 256, 8>}, {pipeline_mode = #tpu.pipeline_mode<synchronous>, transform_indices = @transform_1, window_bounds = array<i64: 1, 8>}, {pipeline_mode = #tpu.pipeline_mode<synchronous>, transform_indices = @transform_2, window_bounds = array<i64: 1, 8>}, {pipeline_mode = #tpu.pipeline_mode<synchronous>, transform_indices = @transform_3, window_bounds = array<i64: 9, 8, 16>}, {transform_indices = @transform_4, window_bounds = array<i64: 1, 256, 16>}, {transform_indices = @transform_5, window_bounds = array<i64: 1, 2, 16>}]} {
    %c0 = arith.constant 0 : index
    %c0_0 = arith.constant 0 : index
    %c0_1 = arith.constant 0 : index
    %0 = vector.load %arg1[%c0, %c0_0, %c0_1] : memref<1x256x8xf32, #tpu.memory_space<vmem>>, vector<1x256x8xf32>
    %1 = vector.shape_cast %0 : vector<1x256x8xf32> to vector<256x8xf32>
    %c0_2 = arith.constant 0 : index
    %c0_3 = arith.constant 0 : index
    %2 = vector.load %arg2[%c0_2, %c0_3] : memref<1x8xf32, #tpu.memory_space<vmem>>, vector<1x8xf32>
    %3 = vector.broadcast %2 : vector<1x8xf32> to vector<256x8xf32>
    %4 = arith.mulf %1, %3 : vector<256x8xf32>
    %c0_4 = arith.constant 0 : index
    %c0_5 = arith.constant 0 : index
    %5 = vector.load %arg3[%c0_4, %c0_5] : memref<1x8xf32, #tpu.memory_space<vmem>>, vector<1x8xf32>
    %6 = vector.broadcast %5 : vector<1x8xf32> to vector<256x8xf32>
    %7 = arith.addf %4, %6 : vector<256x8xf32>
    %cst = arith.constant 0.00999999977 : f32
    %8 = vector.broadcast %cst : f32 to vector<256x8xf32>
    %9 = arith.mulf %8, %7 : vector<256x8xf32>
    %10 = arith.maximumf %7, %9 : vector<256x8xf32>
    %cst_6 = arith.constant 0.000000e+00 : f32
    %11 = vector.broadcast %cst_6 : f32 to vector<18x8x8xf32>
    %c0_7 = arith.constant 0 : index
    %c0_8 = arith.constant 0 : index
    %c0_9 = arith.constant 0 : index
    %12 = vector.load %arg7[%c0_7, %c0_8, %c0_9] : memref<18x26x8xf32, #tpu.memory_space<vmem>>, vector<18x8x8xf32>
    tpu.vector_store %arg7[%c0_7, %c0_8, %c0_9], %11 {strides = array<i32>} : memref<18x26x8xf32, #tpu.memory_space<vmem>>, vector<18x8x8xf32>,
    %cst_10 = arith.constant 0.000000e+00 : f32
    %13 = vector.broadcast %cst_10 : f32 to vector<18x2x8xf32>
    %c0_11 = arith.constant 0 : index
    %c24 = arith.constant 24 : index
    %c0_12 = arith.constant 0 : index
    %14 = vector.load %arg7[%c0_11, %c24, %c0_12] : memref<18x26x8xf32, #tpu.memory_space<vmem>>, vector<18x2x8xf32>
    tpu.vector_store %arg7[%c0_11, %c24, %c0_12], %13 {strides = array<i32>} : memref<18x26x8xf32, #tpu.memory_space<vmem>>, vector<18x2x8xf32>,
    %cst_13 = arith.constant 0.000000e+00 : f32
    %15 = vector.broadcast %cst_13 : f32 to vector<1x16x8xf32>
    %c0_14 = arith.constant 0 : index
    %c8 = arith.constant 8 : index
    %c0_15 = arith.constant 0 : index
    %16 = vector.load %arg7[%c0_14, %c8, %c0_15] : memref<18x26x8xf32, #tpu.memory_space<vmem>>, vector<1x16x8xf32>
    tpu.vector_store %arg7[%c0_14, %c8, %c0_15], %15 {strides = array<i32>} : memref<18x26x8xf32, #tpu.memory_space<vmem>>, vector<1x16x8xf32>,
    %cst_16 = arith.constant 0.000000e+00 : f32
    %17 = vector.broadcast %cst_16 : f32 to vector<1x16x8xf32>
    %c17 = arith.constant 17 : index
    %c8_17 = arith.constant 8 : index
    %c0_18 = arith.constant 0 : index
    %18 = vector.load %arg7[%c17, %c8_17, %c0_18] : memref<18x26x8xf32, #tpu.memory_space<vmem>>, vector<1x16x8xf32>
    tpu.vector_store %arg7[%c17, %c8_17, %c0_18], %17 {strides = array<i32>} : memref<18x26x8xf32, #tpu.memory_space<vmem>>, vector<1x16x8xf32>,
    %19 = vector.shape_cast %10 : vector<256x8xf32> to vector<16x16x8xf32>
    %c1 = arith.constant 1 : index
    %c8_19 = arith.constant 8 : index
    %c0_20 = arith.constant 0 : index
    %20 = vector.load %arg7[%c1, %c8_19, %c0_20] : memref<18x26x8xf32, #tpu.memory_space<vmem>>, vector<16x16x8xf32>
    tpu.vector_store %arg7[%c1, %c8_19, %c0_20], %19 {strides = array<i32>} : memref<18x26x8xf32, #tpu.memory_space<vmem>>, vector<16x16x8xf32>,
    %c0_21 = arith.constant 0 : index
    %c7 = arith.constant 7 : index
    %c0_22 = arith.constant 0 : index
    %21 = vector.load %arg7[%c0_21, %c7, %c0_22] : memref<18x26x8xf32, #tpu.memory_space<vmem>>, vector<16x16x8xf32>
    %22 = vector.shape_cast %21 : vector<16x16x8xf32> to vector<256x8xf32>
    %23 = arith.truncf %22 : vector<256x8xf32> to vector<256x8xbf16>
    %c0_23 = arith.constant 0 : index
    %c0_24 = arith.constant 0 : index
    %c0_25 = arith.constant 0 : index
    %24 = vector.load %arg4[%c0_23, %c0_24, %c0_25] : memref<9x8x16xbf16, #tpu.memory_space<vmem>>, vector<1x8x16xbf16>
    %25 = vector.shape_cast %24 : vector<1x8x16xbf16> to vector<8x16xbf16>
    %cst_26 = arith.constant dense<0.000000e+00> : vector<256x16xf32>
    %26 = tpu.matmul %23, %25, %cst_26 {dimension_numbers = #tpu.dot_dimension_numbers<[1], [0], [0], [1], [0, 0, 1, 1], [], []>} : vector<256x8xbf16>, vector<8x16xbf16>, vector<256x16xf32> -> vector<256x16xf32>
    %c0_27 = arith.constant 0 : index
    %c0_28 = arith.constant 0 : index
    %27 = vector.load %arg8[%c0_27, %c0_28] : memref<256x16xf32, #tpu.memory_space<vmem>>, vector<256x16xf32>
    tpu.vector_store %arg8[%c0_27, %c0_28], %26 {strides = array<i32>} : memref<256x16xf32, #tpu.memory_space<vmem>>, vector<256x16xf32>,
    %c0_29 = arith.constant 0 : index
    %c8_30 = arith.constant 8 : index
    %c0_31 = arith.constant 0 : index
    %28 = vector.load %arg7[%c0_29, %c8_30, %c0_31] : memref<18x26x8xf32, #tpu.memory_space<vmem>>, vector<16x16x8xf32>
    %29 = vector.shape_cast %28 : vector<16x16x8xf32> to vector<256x8xf32>
    %30 = arith.truncf %29 : vector<256x8xf32> to vector<256x8xbf16>
    %c1_32 = arith.constant 1 : index
    %c0_33 = arith.constant 0 : index
    %c0_34 = arith.constant 0 : index
    %31 = vector.load %arg4[%c1_32, %c0_33, %c0_34] : memref<9x8x16xbf16, #tpu.memory_space<vmem>>, vector<1x8x16xbf16>
    %32 = vector.shape_cast %31 : vector<1x8x16xbf16> to vector<8x16xbf16>
    %cst_35 = arith.constant dense<0.000000e+00> : vector<256x16xf32>
    %33 = tpu.matmul %30, %32, %cst_35 {dimension_numbers = #tpu.dot_dimension_numbers<[1], [0], [0], [1], [0, 0, 1, 1], [], []>} : vector<256x8xbf16>, vector<8x16xbf16>, vector<256x16xf32> -> vector<256x16xf32>
    %c0_36 = arith.constant 0 : index
    %c0_37 = arith.constant 0 : index
    %34 = vector.load %arg8[%c0_36, %c0_37] : memref<256x16xf32, #tpu.memory_space<vmem>>, vector<256x16xf32>
    %35 = arith.addf %34, %33 : vector<256x16xf32>
    %c0_38 = arith.constant 0 : index
    %c0_39 = arith.constant 0 : index
    %36 = vector.load %arg8[%c0_38, %c0_39] : memref<256x16xf32, #tpu.memory_space<vmem>>, vector<256x16xf32>
    tpu.vector_store %arg8[%c0_38, %c0_39], %35 {strides = array<i32>} : memref<256x16xf32, #tpu.memory_space<vmem>>, vector<256x16xf32>,
    %c0_40 = arith.constant 0 : index
    %c9 = arith.constant 9 : index
    %c0_41 = arith.constant 0 : index
    %37 = vector.load %arg7[%c0_40, %c9, %c0_41] : memref<18x26x8xf32, #tpu.memory_space<vmem>>, vector<16x16x8xf32>
    %38 = vector.shape_cast %37 : vector<16x16x8xf32> to vector<256x8xf32>
    %39 = arith.truncf %38 : vector<256x8xf32> to vector<256x8xbf16>
    %c2 = arith.constant 2 : index
    %c0_42 = arith.constant 0 : index
    %c0_43 = arith.constant 0 : index
    %40 = vector.load %arg4[%c2, %c0_42, %c0_43] : memref<9x8x16xbf16, #tpu.memory_space<vmem>>, vector<1x8x16xbf16>
    %41 = vector.shape_cast %40 : vector<1x8x16xbf16> to vector<8x16xbf16>
    %cst_44 = arith.constant dense<0.000000e+00> : vector<256x16xf32>
    %42 = tpu.matmul %39, %41, %cst_44 {dimension_numbers = #tpu.dot_dimension_numbers<[1], [0], [0], [1], [0, 0, 1, 1], [], []>} : vector<256x8xbf16>, vector<8x16xbf16>, vector<256x16xf32> -> vector<256x16xf32>
    %c0_45 = arith.constant 0 : index
    %c0_46 = arith.constant 0 : index
    %43 = vector.load %arg8[%c0_45, %c0_46] : memref<256x16xf32, #tpu.memory_space<vmem>>, vector<256x16xf32>
    %44 = arith.addf %43, %42 : vector<256x16xf32>
    %c0_47 = arith.constant 0 : index
    %c0_48 = arith.constant 0 : index
    %45 = vector.load %arg8[%c0_47, %c0_48] : memref<256x16xf32, #tpu.memory_space<vmem>>, vector<256x16xf32>
    tpu.vector_store %arg8[%c0_47, %c0_48], %44 {strides = array<i32>} : memref<256x16xf32, #tpu.memory_space<vmem>>, vector<256x16xf32>,
    %c1_49 = arith.constant 1 : index
    %c7_50 = arith.constant 7 : index
    %c0_51 = arith.constant 0 : index
    %46 = vector.load %arg7[%c1_49, %c7_50, %c0_51] : memref<18x26x8xf32, #tpu.memory_space<vmem>>, vector<16x16x8xf32>
    %47 = vector.shape_cast %46 : vector<16x16x8xf32> to vector<256x8xf32>
    %48 = arith.truncf %47 : vector<256x8xf32> to vector<256x8xbf16>
    %c3 = arith.constant 3 : index
    %c0_52 = arith.constant 0 : index
    %c0_53 = arith.constant 0 : index
    %49 = vector.load %arg4[%c3, %c0_52, %c0_53] : memref<9x8x16xbf16, #tpu.memory_space<vmem>>, vector<1x8x16xbf16>
    %50 = vector.shape_cast %49 : vector<1x8x16xbf16> to vector<8x16xbf16>
    %cst_54 = arith.constant dense<0.000000e+00> : vector<256x16xf32>
    %51 = tpu.matmul %48, %50, %cst_54 {dimension_numbers = #tpu.dot_dimension_numbers<[1], [0], [0], [1], [0, 0, 1, 1], [], []>} : vector<256x8xbf16>, vector<8x16xbf16>, vector<256x16xf32> -> vector<256x16xf32>
    %c0_55 = arith.constant 0 : index
    %c0_56 = arith.constant 0 : index
    %52 = vector.load %arg8[%c0_55, %c0_56] : memref<256x16xf32, #tpu.memory_space<vmem>>, vector<256x16xf32>
    %53 = arith.addf %52, %51 : vector<256x16xf32>
    %c0_57 = arith.constant 0 : index
    %c0_58 = arith.constant 0 : index
    %54 = vector.load %arg8[%c0_57, %c0_58] : memref<256x16xf32, #tpu.memory_space<vmem>>, vector<256x16xf32>
    tpu.vector_store %arg8[%c0_57, %c0_58], %53 {strides = array<i32>} : memref<256x16xf32, #tpu.memory_space<vmem>>, vector<256x16xf32>,
    %c1_59 = arith.constant 1 : index
    %c8_60 = arith.constant 8 : index
    %c0_61 = arith.constant 0 : index
    %55 = vector.load %arg7[%c1_59, %c8_60, %c0_61] : memref<18x26x8xf32, #tpu.memory_space<vmem>>, vector<16x16x8xf32>
    %56 = vector.shape_cast %55 : vector<16x16x8xf32> to vector<256x8xf32>
    %57 = arith.truncf %56 : vector<256x8xf32> to vector<256x8xbf16>
    %c4 = arith.constant 4 : index
    %c0_62 = arith.constant 0 : index
    %c0_63 = arith.constant 0 : index
    %58 = vector.load %arg4[%c4, %c0_62, %c0_63] : memref<9x8x16xbf16, #tpu.memory_space<vmem>>, vector<1x8x16xbf16>
    %59 = vector.shape_cast %58 : vector<1x8x16xbf16> to vector<8x16xbf16>
    %cst_64 = arith.constant dense<0.000000e+00> : vector<256x16xf32>
    %60 = tpu.matmul %57, %59, %cst_64 {dimension_numbers = #tpu.dot_dimension_numbers<[1], [0], [0], [1], [0, 0, 1, 1], [], []>} : vector<256x8xbf16>, vector<8x16xbf16>, vector<256x16xf32> -> vector<256x16xf32>
    %c0_65 = arith.constant 0 : index
    %c0_66 = arith.constant 0 : index
    %61 = vector.load %arg8[%c0_65, %c0_66] : memref<256x16xf32, #tpu.memory_space<vmem>>, vector<256x16xf32>
    %62 = arith.addf %61, %60 : vector<256x16xf32>
    %c0_67 = arith.constant 0 : index
    %c0_68 = arith.constant 0 : index
    %63 = vector.load %arg8[%c0_67, %c0_68] : memref<256x16xf32, #tpu.memory_space<vmem>>, vector<256x16xf32>
    tpu.vector_store %arg8[%c0_67, %c0_68], %62 {strides = array<i32>} : memref<256x16xf32, #tpu.memory_space<vmem>>, vector<256x16xf32>,
    %c1_69 = arith.constant 1 : index
    %c9_70 = arith.constant 9 : index
    %c0_71 = arith.constant 0 : index
    %64 = vector.load %arg7[%c1_69, %c9_70, %c0_71] : memref<18x26x8xf32, #tpu.memory_space<vmem>>, vector<16x16x8xf32>
    %65 = vector.shape_cast %64 : vector<16x16x8xf32> to vector<256x8xf32>
    %66 = arith.truncf %65 : vector<256x8xf32> to vector<256x8xbf16>
    %c5 = arith.constant 5 : index
    %c0_72 = arith.constant 0 : index
    %c0_73 = arith.constant 0 : index
    %67 = vector.load %arg4[%c5, %c0_72, %c0_73] : memref<9x8x16xbf16, #tpu.memory_space<vmem>>, vector<1x8x16xbf16>
    %68 = vector.shape_cast %67 : vector<1x8x16xbf16> to vector<8x16xbf16>
    %cst_74 = arith.constant dense<0.000000e+00> : vector<256x16xf32>
    %69 = tpu.matmul %66, %68, %cst_74 {dimension_numbers = #tpu.dot_dimension_numbers<[1], [0], [0], [1], [0, 0, 1, 1], [], []>} : vector<256x8xbf16>, vector<8x16xbf16>, vector<256x16xf32> -> vector<256x16xf32>
    %c0_75 = arith.constant 0 : index
    %c0_76 = arith.constant 0 : index
    %70 = vector.load %arg8[%c0_75, %c0_76] : memref<256x16xf32, #tpu.memory_space<vmem>>, vector<256x16xf32>
    %71 = arith.addf %70, %69 : vector<256x16xf32>
    %c0_77 = arith.constant 0 : index
    %c0_78 = arith.constant 0 : index
    %72 = vector.load %arg8[%c0_77, %c0_78] : memref<256x16xf32, #tpu.memory_space<vmem>>, vector<256x16xf32>
    tpu.vector_store %arg8[%c0_77, %c0_78], %71 {strides = array<i32>} : memref<256x16xf32, #tpu.memory_space<vmem>>, vector<256x16xf32>,
    %c2_79 = arith.constant 2 : index
    %c7_80 = arith.constant 7 : index
    %c0_81 = arith.constant 0 : index
    %73 = vector.load %arg7[%c2_79, %c7_80, %c0_81] : memref<18x26x8xf32, #tpu.memory_space<vmem>>, vector<16x16x8xf32>
    %74 = vector.shape_cast %73 : vector<16x16x8xf32> to vector<256x8xf32>
    %75 = arith.truncf %74 : vector<256x8xf32> to vector<256x8xbf16>
    %c6 = arith.constant 6 : index
    %c0_82 = arith.constant 0 : index
    %c0_83 = arith.constant 0 : index
    %76 = vector.load %arg4[%c6, %c0_82, %c0_83] : memref<9x8x16xbf16, #tpu.memory_space<vmem>>, vector<1x8x16xbf16>
    %77 = vector.shape_cast %76 : vector<1x8x16xbf16> to vector<8x16xbf16>
    %cst_84 = arith.constant dense<0.000000e+00> : vector<256x16xf32>
    %78 = tpu.matmul %75, %77, %cst_84 {dimension_numbers = #tpu.dot_dimension_numbers<[1], [0], [0], [1], [0, 0, 1, 1], [], []>} : vector<256x8xbf16>, vector<8x16xbf16>, vector<256x16xf32> -> vector<256x16xf32>
    %c0_85 = arith.constant 0 : index
    %c0_86 = arith.constant 0 : index
    %79 = vector.load %arg8[%c0_85, %c0_86] : memref<256x16xf32, #tpu.memory_space<vmem>>, vector<256x16xf32>
    %80 = arith.addf %79, %78 : vector<256x16xf32>
    %c0_87 = arith.constant 0 : index
    %c0_88 = arith.constant 0 : index
    %81 = vector.load %arg8[%c0_87, %c0_88] : memref<256x16xf32, #tpu.memory_space<vmem>>, vector<256x16xf32>
    tpu.vector_store %arg8[%c0_87, %c0_88], %80 {strides = array<i32>} : memref<256x16xf32, #tpu.memory_space<vmem>>, vector<256x16xf32>,
    %c2_89 = arith.constant 2 : index
    %c8_90 = arith.constant 8 : index
    %c0_91 = arith.constant 0 : index
    %82 = vector.load %arg7[%c2_89, %c8_90, %c0_91] : memref<18x26x8xf32, #tpu.memory_space<vmem>>, vector<16x16x8xf32>
    %83 = vector.shape_cast %82 : vector<16x16x8xf32> to vector<256x8xf32>
    %84 = arith.truncf %83 : vector<256x8xf32> to vector<256x8xbf16>
    %c7_92 = arith.constant 7 : index
    %c0_93 = arith.constant 0 : index
    %c0_94 = arith.constant 0 : index
    %85 = vector.load %arg4[%c7_92, %c0_93, %c0_94] : memref<9x8x16xbf16, #tpu.memory_space<vmem>>, vector<1x8x16xbf16>
    %86 = vector.shape_cast %85 : vector<1x8x16xbf16> to vector<8x16xbf16>
    %cst_95 = arith.constant dense<0.000000e+00> : vector<256x16xf32>
    %87 = tpu.matmul %84, %86, %cst_95 {dimension_numbers = #tpu.dot_dimension_numbers<[1], [0], [0], [1], [0, 0, 1, 1], [], []>} : vector<256x8xbf16>, vector<8x16xbf16>, vector<256x16xf32> -> vector<256x16xf32>
    %c0_96 = arith.constant 0 : index
    %c0_97 = arith.constant 0 : index
    %88 = vector.load %arg8[%c0_96, %c0_97] : memref<256x16xf32, #tpu.memory_space<vmem>>, vector<256x16xf32>
    %89 = arith.addf %88, %87 : vector<256x16xf32>
    %c0_98 = arith.constant 0 : index
    %c0_99 = arith.constant 0 : index
    %90 = vector.load %arg8[%c0_98, %c0_99] : memref<256x16xf32, #tpu.memory_space<vmem>>, vector<256x16xf32>
    tpu.vector_store %arg8[%c0_98, %c0_99], %89 {strides = array<i32>} : memref<256x16xf32, #tpu.memory_space<vmem>>, vector<256x16xf32>,
    %c2_100 = arith.constant 2 : index
    %c9_101 = arith.constant 9 : index
    %c0_102 = arith.constant 0 : index
    %91 = vector.load %arg7[%c2_100, %c9_101, %c0_102] : memref<18x26x8xf32, #tpu.memory_space<vmem>>, vector<16x16x8xf32>
    %92 = vector.shape_cast %91 : vector<16x16x8xf32> to vector<256x8xf32>
    %93 = arith.truncf %92 : vector<256x8xf32> to vector<256x8xbf16>
    %c8_103 = arith.constant 8 : index
    %c0_104 = arith.constant 0 : index
    %c0_105 = arith.constant 0 : index
    %94 = vector.load %arg4[%c8_103, %c0_104, %c0_105] : memref<9x8x16xbf16, #tpu.memory_space<vmem>>, vector<1x8x16xbf16>
    %95 = vector.shape_cast %94 : vector<1x8x16xbf16> to vector<8x16xbf16>
    %cst_106 = arith.constant dense<0.000000e+00> : vector<256x16xf32>
    %96 = tpu.matmul %93, %95, %cst_106 {dimension_numbers = #tpu.dot_dimension_numbers<[1], [0], [0], [1], [0, 0, 1, 1], [], []>} : vector<256x8xbf16>, vector<8x16xbf16>, vector<256x16xf32> -> vector<256x16xf32>
    %c0_107 = arith.constant 0 : index
    %c0_108 = arith.constant 0 : index
    %97 = vector.load %arg8[%c0_107, %c0_108] : memref<256x16xf32, #tpu.memory_space<vmem>>, vector<256x16xf32>
    %98 = arith.addf %97, %96 : vector<256x16xf32>
    %c0_109 = arith.constant 0 : index
    %c0_110 = arith.constant 0 : index
    %99 = vector.load %arg8[%c0_109, %c0_110] : memref<256x16xf32, #tpu.memory_space<vmem>>, vector<256x16xf32>
    tpu.vector_store %arg8[%c0_109, %c0_110], %98 {strides = array<i32>} : memref<256x16xf32, #tpu.memory_space<vmem>>, vector<256x16xf32>,
    %c0_111 = arith.constant 0 : index
    %c0_112 = arith.constant 0 : index
    %100 = vector.load %arg8[%c0_111, %c0_112] : memref<256x16xf32, #tpu.memory_space<vmem>>, vector<256x16xf32>
    %c0_113 = arith.constant 0 : index
    %c0_114 = arith.constant 0 : index
    %c0_115 = arith.constant 0 : index
    %101 = vector.load %arg5[%c0_113, %c0_114, %c0_115] : memref<1x256x16xf32, #tpu.memory_space<vmem>>, vector<1x256x16xf32>
    %102 = vector.shape_cast %101 : vector<1x256x16xf32> to vector<256x16xf32>
    %103 = vector.shape_cast %100 : vector<256x16xf32> to vector<1x256x16xf32>
    tpu.vector_store %arg5[%c0_113, %c0_114, %c0_115], %103 {strides = array<i32>} : memref<1x256x16xf32, #tpu.memory_space<vmem>>, vector<1x256x16xf32>,
    %cst_116 = arith.constant dense<0.000000e+00> : vector<16xf32>
    %104 = vector.multi_reduction <add>, %100, %cst_116 [0] : vector<256x16xf32> to vector<16xf32>
    %105 = vector.shape_cast %104 : vector<16xf32> to vector<1x16xf32>
    %c0_117 = arith.constant 0 : index
    %c0_118 = arith.constant 0 : index
    %c0_119 = arith.constant 0 : index
    %106 = vector.load %arg6[%c0_117, %c0_118, %c0_119] : memref<1x2x16xf32, #tpu.memory_space<vmem>>, vector<1x1x16xf32>
    %107 = vector.shape_cast %106 : vector<1x1x16xf32> to vector<1x16xf32>
    %108 = vector.shape_cast %105 : vector<1x16xf32> to vector<1x1x16xf32>
    tpu.vector_store %arg6[%c0_117, %c0_118, %c0_119], %108 {strides = array<i32>} : memref<1x2x16xf32, #tpu.memory_space<vmem>>, vector<1x1x16xf32>,
    %109 = arith.mulf %100, %100 : vector<256x16xf32>
    %cst_120 = arith.constant dense<0.000000e+00> : vector<16xf32>
    %110 = vector.multi_reduction <add>, %109, %cst_120 [0] : vector<256x16xf32> to vector<16xf32>
    %111 = vector.shape_cast %110 : vector<16xf32> to vector<1x16xf32>
    %c0_121 = arith.constant 0 : index
    %c1_122 = arith.constant 1 : index
    %c0_123 = arith.constant 0 : index
    %112 = vector.load %arg6[%c0_121, %c1_122, %c0_123] : memref<1x2x16xf32, #tpu.memory_space<vmem>>, vector<1x1x16xf32>
    %113 = vector.shape_cast %112 : vector<1x1x16xf32> to vector<1x16xf32>
    %114 = vector.shape_cast %111 : vector<1x16xf32> to vector<1x1x16xf32>
    tpu.vector_store %arg6[%c0_121, %c1_122, %c0_123], %114 {strides = array<i32>} : memref<1x2x16xf32, #tpu.memory_space<vmem>>, vector<1x1x16xf32>,
    return
  }
  func.func @transform_0(%arg0: i32) -> (i32, i32, i32) {
    %c0_i32 = arith.constant 0 : i32
    %c0_i32_0 = arith.constant 0 : i32
    %c0_i32_1 = arith.constant 0 : i32
    return %arg0, %c0_i32, %c0_i32_0 : i32, i32, i32
  }
  func.func @transform_1(%arg0: i32) -> (i32, i32) {
    %c0_i32 = arith.constant 0 : i32
    %c0_i32_0 = arith.constant 0 : i32
    %c0_i32_1 = arith.constant 0 : i32
    return %c0_i32, %c0_i32_0 : i32, i32
  }
  func.func @transform_2(%arg0: i32) -> (i32, i32) {
    %c0_i32 = arith.constant 0 : i32
    %c0_i32_0 = arith.constant 0 : i32
    %c0_i32_1 = arith.constant 0 : i32
    return %c0_i32, %c0_i32_0 : i32, i32
  }
  func.func @transform_3(%arg0: i32) -> (i32, i32, i32) {
    %c0_i32 = arith.constant 0 : i32
    %c0_i32_0 = arith.constant 0 : i32
    %c0_i32_1 = arith.constant 0 : i32
    %c0_i32_2 = arith.constant 0 : i32
    return %c0_i32, %c0_i32_0, %c0_i32_1 : i32, i32, i32
  }
  func.func @transform_4(%arg0: i32) -> (i32, i32, i32) {
    %c0_i32 = arith.constant 0 : i32
    %c0_i32_0 = arith.constant 0 : i32
    %c0_i32_1 = arith.constant 0 : i32
    return %arg0, %c0_i32, %c0_i32_0 : i32, i32, i32
  }
  func.func @transform_5(%arg0: i32) -> (i32, i32, i32) {
    %c0_i32 = arith.constant 0 : i32
    %c0_i32_0 = arith.constant 0 : i32
    %c0_i32_1 = arith.constant 0 : i32
    return %arg0, %c0_i32, %c0_i32_0 : i32, i32, i32
  }
}

module attributes {stable_mosaic.version = 11 : i64} {
  func.func @_conv1x1_kernel(%arg0: i32, %arg1: memref<256x16xbf16, #tpu.memory_space<vmem>>, %arg2: memref<16x8xbf16, #tpu.memory_space<vmem>>, %arg3: memref<256x8xf32, #tpu.memory_space<vmem>>, %arg4: memref<1x2x8xf32, #tpu.memory_space<vmem>>) attributes {dimension_semantics = [#tpu.dimension_semantics<parallel>], iteration_bounds = array<i64: 2>, scalar_prefetch = 0 : i64, scratch_operands = 0 : i64, tpu.core_type = #tpu.core_type<tc>, window_params = [{transform_indices = @transform_0, window_bounds = array<i64: 256, 16>}, {pipeline_mode = #tpu.pipeline_mode<synchronous>, transform_indices = @transform_1, window_bounds = array<i64: 16, 8>}, {transform_indices = @transform_2, window_bounds = array<i64: 256, 8>}, {transform_indices = @transform_3, window_bounds = array<i64: 1, 2, 8>}]} {
    %c0 = arith.constant 0 : index
    %c0_0 = arith.constant 0 : index
    %0 = vector.load %arg1[%c0, %c0_0] : memref<256x16xbf16, #tpu.memory_space<vmem>>, vector<256x16xbf16>
    %c0_1 = arith.constant 0 : index
    %c0_2 = arith.constant 0 : index
    %1 = vector.load %arg2[%c0_1, %c0_2] : memref<16x8xbf16, #tpu.memory_space<vmem>>, vector<16x8xbf16>
    %cst = arith.constant dense<0.000000e+00> : vector<256x8xf32>
    %2 = tpu.matmul %0, %1, %cst {dimension_numbers = #tpu.dot_dimension_numbers<[1], [0], [0], [1], [0, 0, 1, 1], [], []>} : vector<256x16xbf16>, vector<16x8xbf16>, vector<256x8xf32> -> vector<256x8xf32>
    %c0_3 = arith.constant 0 : index
    %c0_4 = arith.constant 0 : index
    %3 = vector.load %arg3[%c0_3, %c0_4] : memref<256x8xf32, #tpu.memory_space<vmem>>, vector<256x8xf32>
    tpu.vector_store %arg3[%c0_3, %c0_4], %2 {strides = array<i32>} : memref<256x8xf32, #tpu.memory_space<vmem>>, vector<256x8xf32>,
    %cst_5 = arith.constant dense<0.000000e+00> : vector<8xf32>
    %4 = vector.multi_reduction <add>, %2, %cst_5 [0] : vector<256x8xf32> to vector<8xf32>
    %5 = vector.shape_cast %4 : vector<8xf32> to vector<1x8xf32>
    %c0_6 = arith.constant 0 : index
    %c0_7 = arith.constant 0 : index
    %c0_8 = arith.constant 0 : index
    %6 = vector.load %arg4[%c0_6, %c0_7, %c0_8] : memref<1x2x8xf32, #tpu.memory_space<vmem>>, vector<1x1x8xf32>
    %7 = vector.shape_cast %6 : vector<1x1x8xf32> to vector<1x8xf32>
    %8 = vector.shape_cast %5 : vector<1x8xf32> to vector<1x1x8xf32>
    tpu.vector_store %arg4[%c0_6, %c0_7, %c0_8], %8 {strides = array<i32>} : memref<1x2x8xf32, #tpu.memory_space<vmem>>, vector<1x1x8xf32>,
    %9 = arith.mulf %2, %2 : vector<256x8xf32>
    %cst_9 = arith.constant dense<0.000000e+00> : vector<8xf32>
    %10 = vector.multi_reduction <add>, %9, %cst_9 [0] : vector<256x8xf32> to vector<8xf32>
    %11 = vector.shape_cast %10 : vector<8xf32> to vector<1x8xf32>
    %c0_10 = arith.constant 0 : index
    %c1 = arith.constant 1 : index
    %c0_11 = arith.constant 0 : index
    %12 = vector.load %arg4[%c0_10, %c1, %c0_11] : memref<1x2x8xf32, #tpu.memory_space<vmem>>, vector<1x1x8xf32>
    %13 = vector.shape_cast %12 : vector<1x1x8xf32> to vector<1x8xf32>
    %14 = vector.shape_cast %11 : vector<1x8xf32> to vector<1x1x8xf32>
    tpu.vector_store %arg4[%c0_10, %c1, %c0_11], %14 {strides = array<i32>} : memref<1x2x8xf32, #tpu.memory_space<vmem>>, vector<1x1x8xf32>,
    return
  }
  func.func @transform_0(%arg0: i32) -> (i32, i32) {
    %c0_i32 = arith.constant 0 : i32
    %c0_i32_0 = arith.constant 0 : i32
    return %arg0, %c0_i32 : i32, i32
  }
  func.func @transform_1(%arg0: i32) -> (i32, i32) {
    %c0_i32 = arith.constant 0 : i32
    %c0_i32_0 = arith.constant 0 : i32
    %c0_i32_1 = arith.constant 0 : i32
    return %c0_i32, %c0_i32_0 : i32, i32
  }
  func.func @transform_2(%arg0: i32) -> (i32, i32) {
    %c0_i32 = arith.constant 0 : i32
    %c0_i32_0 = arith.constant 0 : i32
    return %arg0, %c0_i32 : i32, i32
  }
  func.func @transform_3(%arg0: i32) -> (i32, i32, i32) {
    %c0_i32 = arith.constant 0 : i32
    %c0_i32_0 = arith.constant 0 : i32
    %c0_i32_1 = arith.constant 0 : i32
    return %arg0, %c0_i32, %c0_i32_0 : i32, i32, i32
  }
}

module attributes {stable_mosaic.version = 11 : i64} {
  func.func @_bn_act_conv1x1_kernel(%arg0: i32, %arg1: memref<256x16xf32, #tpu.memory_space<vmem>>, %arg2: memref<1x16xf32, #tpu.memory_space<vmem>>, %arg3: memref<1x16xf32, #tpu.memory_space<vmem>>, %arg4: memref<16x8xbf16, #tpu.memory_space<vmem>>, %arg5: memref<256x8xf32, #tpu.memory_space<vmem>>, %arg6: memref<1x2x8xf32, #tpu.memory_space<vmem>>) attributes {dimension_semantics = [#tpu.dimension_semantics<parallel>], iteration_bounds = array<i64: 2>, scalar_prefetch = 0 : i64, scratch_operands = 0 : i64, tpu.core_type = #tpu.core_type<tc>, window_params = [{transform_indices = @transform_0, window_bounds = array<i64: 256, 16>}, {pipeline_mode = #tpu.pipeline_mode<synchronous>, transform_indices = @transform_1, window_bounds = array<i64: 1, 16>}, {pipeline_mode = #tpu.pipeline_mode<synchronous>, transform_indices = @transform_2, window_bounds = array<i64: 1, 16>}, {pipeline_mode = #tpu.pipeline_mode<synchronous>, transform_indices = @transform_3, window_bounds = array<i64: 16, 8>}, {transform_indices = @transform_4, window_bounds = array<i64: 256, 8>}, {transform_indices = @transform_5, window_bounds = array<i64: 1, 2, 8>}]} {
    %c0 = arith.constant 0 : index
    %c0_0 = arith.constant 0 : index
    %0 = vector.load %arg1[%c0, %c0_0] : memref<256x16xf32, #tpu.memory_space<vmem>>, vector<256x16xf32>
    %c0_1 = arith.constant 0 : index
    %c0_2 = arith.constant 0 : index
    %1 = vector.load %arg2[%c0_1, %c0_2] : memref<1x16xf32, #tpu.memory_space<vmem>>, vector<1x16xf32>
    %2 = vector.broadcast %1 : vector<1x16xf32> to vector<256x16xf32>
    %3 = arith.mulf %0, %2 : vector<256x16xf32>
    %c0_3 = arith.constant 0 : index
    %c0_4 = arith.constant 0 : index
    %4 = vector.load %arg3[%c0_3, %c0_4] : memref<1x16xf32, #tpu.memory_space<vmem>>, vector<1x16xf32>
    %5 = vector.broadcast %4 : vector<1x16xf32> to vector<256x16xf32>
    %6 = arith.addf %3, %5 : vector<256x16xf32>
    %cst = arith.constant 0.00999999977 : f32
    %7 = vector.broadcast %cst : f32 to vector<256x16xf32>
    %8 = arith.mulf %7, %6 : vector<256x16xf32>
    %9 = arith.maximumf %6, %8 : vector<256x16xf32>
    %10 = arith.truncf %9 : vector<256x16xf32> to vector<256x16xbf16>
    %c0_5 = arith.constant 0 : index
    %c0_6 = arith.constant 0 : index
    %11 = vector.load %arg4[%c0_5, %c0_6] : memref<16x8xbf16, #tpu.memory_space<vmem>>, vector<16x8xbf16>
    %cst_7 = arith.constant dense<0.000000e+00> : vector<256x8xf32>
    %12 = tpu.matmul %10, %11, %cst_7 {dimension_numbers = #tpu.dot_dimension_numbers<[1], [0], [0], [1], [0, 0, 1, 1], [], []>} : vector<256x16xbf16>, vector<16x8xbf16>, vector<256x8xf32> -> vector<256x8xf32>
    %c0_8 = arith.constant 0 : index
    %c0_9 = arith.constant 0 : index
    %13 = vector.load %arg5[%c0_8, %c0_9] : memref<256x8xf32, #tpu.memory_space<vmem>>, vector<256x8xf32>
    tpu.vector_store %arg5[%c0_8, %c0_9], %12 {strides = array<i32>} : memref<256x8xf32, #tpu.memory_space<vmem>>, vector<256x8xf32>,
    %cst_10 = arith.constant dense<0.000000e+00> : vector<8xf32>
    %14 = vector.multi_reduction <add>, %12, %cst_10 [0] : vector<256x8xf32> to vector<8xf32>
    %15 = vector.shape_cast %14 : vector<8xf32> to vector<1x8xf32>
    %c0_11 = arith.constant 0 : index
    %c0_12 = arith.constant 0 : index
    %c0_13 = arith.constant 0 : index
    %16 = vector.load %arg6[%c0_11, %c0_12, %c0_13] : memref<1x2x8xf32, #tpu.memory_space<vmem>>, vector<1x1x8xf32>
    %17 = vector.shape_cast %16 : vector<1x1x8xf32> to vector<1x8xf32>
    %18 = vector.shape_cast %15 : vector<1x8xf32> to vector<1x1x8xf32>
    tpu.vector_store %arg6[%c0_11, %c0_12, %c0_13], %18 {strides = array<i32>} : memref<1x2x8xf32, #tpu.memory_space<vmem>>, vector<1x1x8xf32>,
    %19 = arith.mulf %12, %12 : vector<256x8xf32>
    %cst_14 = arith.constant dense<0.000000e+00> : vector<8xf32>
    %20 = vector.multi_reduction <add>, %19, %cst_14 [0] : vector<256x8xf32> to vector<8xf32>
    %21 = vector.shape_cast %20 : vector<8xf32> to vector<1x8xf32>
    %c0_15 = arith.constant 0 : index
    %c1 = arith.constant 1 : index
    %c0_16 = arith.constant 0 : index
    %22 = vector.load %arg6[%c0_15, %c1, %c0_16] : memref<1x2x8xf32, #tpu.memory_space<vmem>>, vector<1x1x8xf32>
    %23 = vector.shape_cast %22 : vector<1x1x8xf32> to vector<1x8xf32>
    %24 = vector.shape_cast %21 : vector<1x8xf32> to vector<1x1x8xf32>
    tpu.vector_store %arg6[%c0_15, %c1, %c0_16], %24 {strides = array<i32>} : memref<1x2x8xf32, #tpu.memory_space<vmem>>, vector<1x1x8xf32>,
    return
  }
  func.func @transform_0(%arg0: i32) -> (i32, i32) {
    %c0_i32 = arith.constant 0 : i32
    %c0_i32_0 = arith.constant 0 : i32
    return %arg0, %c0_i32 : i32, i32
  }
  func.func @transform_1(%arg0: i32) -> (i32, i32) {
    %c0_i32 = arith.constant 0 : i32
    %c0_i32_0 = arith.constant 0 : i32
    %c0_i32_1 = arith.constant 0 : i32
    return %c0_i32, %c0_i32_0 : i32, i32
  }
  func.func @transform_2(%arg0: i32) -> (i32, i32) {
    %c0_i32 = arith.constant 0 : i32
    %c0_i32_0 = arith.constant 0 : i32
    %c0_i32_1 = arith.constant 0 : i32
    return %c0_i32, %c0_i32_0 : i32, i32
  }
  func.func @transform_3(%arg0: i32) -> (i32, i32) {
    %c0_i32 = arith.constant 0 : i32
    %c0_i32_0 = arith.constant 0 : i32
    %c0_i32_1 = arith.constant 0 : i32
    return %c0_i32, %c0_i32_0 : i32, i32
  }
  func.func @transform_4(%arg0: i32) -> (i32, i32) {
    %c0_i32 = arith.constant 0 : i32
    %c0_i32_0 = arith.constant 0 : i32
    return %arg0, %c0_i32 : i32, i32
  }
  func.func @transform_5(%arg0: i32) -> (i32, i32, i32) {
    %c0_i32 = arith.constant 0 : i32
    %c0_i32_0 = arith.constant 0 : i32
    %c0_i32_1 = arith.constant 0 : i32
    return %arg0, %c0_i32, %c0_i32_0 : i32, i32, i32
  }
}

module attributes {stable_mosaic.version = 11 : i64} {
  func.func @_bn_act_pool_kernel(%arg0: i32, %arg1: memref<1x256x8xf32, #tpu.memory_space<vmem>>, %arg2: memref<1x8xf32, #tpu.memory_space<vmem>>, %arg3: memref<1x8xf32, #tpu.memory_space<vmem>>, %arg4: memref<1x256x32xf32, #tpu.memory_space<vmem>>, %arg5: memref<28x16x8xf32, #tpu.memory_space<vmem>>, %arg6: memref<16x30x8xf32, #tpu.memory_space<vmem>>) attributes {dimension_semantics = [#tpu.dimension_semantics<parallel>], iteration_bounds = array<i64: 2>, scalar_prefetch = 0 : i64, scratch_operands = 2 : i64, tpu.core_type = #tpu.core_type<tc>, window_params = [{transform_indices = @transform_0, window_bounds = array<i64: 1, 256, 8>}, {pipeline_mode = #tpu.pipeline_mode<synchronous>, transform_indices = @transform_1, window_bounds = array<i64: 1, 8>}, {pipeline_mode = #tpu.pipeline_mode<synchronous>, transform_indices = @transform_2, window_bounds = array<i64: 1, 8>}, {transform_indices = @transform_3, window_bounds = array<i64: 1, 256, 32>}]} {
    %c0 = arith.constant 0 : index
    %c0_0 = arith.constant 0 : index
    %c0_1 = arith.constant 0 : index
    %0 = vector.load %arg1[%c0, %c0_0, %c0_1] : memref<1x256x8xf32, #tpu.memory_space<vmem>>, vector<1x256x8xf32>
    %1 = vector.shape_cast %0 : vector<1x256x8xf32> to vector<256x8xf32>
    %c0_2 = arith.constant 0 : index
    %c0_3 = arith.constant 0 : index
    %2 = vector.load %arg2[%c0_2, %c0_3] : memref<1x8xf32, #tpu.memory_space<vmem>>, vector<1x8xf32>
    %3 = vector.broadcast %2 : vector<1x8xf32> to vector<256x8xf32>
    %4 = arith.mulf %1, %3 : vector<256x8xf32>
    %c0_4 = arith.constant 0 : index
    %c0_5 = arith.constant 0 : index
    %5 = vector.load %arg3[%c0_4, %c0_5] : memref<1x8xf32, #tpu.memory_space<vmem>>, vector<1x8xf32>
    %6 = vector.broadcast %5 : vector<1x8xf32> to vector<256x8xf32>
    %7 = arith.addf %4, %6 : vector<256x8xf32>
    %cst = arith.constant 0.00999999977 : f32
    %8 = vector.broadcast %cst : f32 to vector<256x8xf32>
    %9 = arith.mulf %8, %7 : vector<256x8xf32>
    %10 = arith.maximumf %7, %9 : vector<256x8xf32>
    %11 = vector.shape_cast %10 : vector<256x8xf32> to vector<16x16x8xf32>
    %cst_6 = arith.constant 0xFF800000 : f32
    %12 = vector.broadcast %cst_6 : f32 to vector<6x16x8xf32>
    %c0_7 = arith.constant 0 : index
    %c0_8 = arith.constant 0 : index
    %c0_9 = arith.constant 0 : index
    %13 = vector.load %arg5[%c0_7, %c0_8, %c0_9] : memref<28x16x8xf32, #tpu.memory_space<vmem>>, vector<6x16x8xf32>
    tpu.vector_store %arg5[%c0_7, %c0_8, %c0_9], %12 {strides = array<i32>} : memref<28x16x8xf32, #tpu.memory_space<vmem>>, vector<6x16x8xf32>,
    %cst_10 = arith.constant 0xFF800000 : f32
    %14 = vector.broadcast %cst_10 : f32 to vector<6x16x8xf32>
    %c22 = arith.constant 22 : index
    %c0_11 = arith.constant 0 : index
    %c0_12 = arith.constant 0 : index
    %15 = vector.load %arg5[%c22, %c0_11, %c0_12] : memref<28x16x8xf32, #tpu.memory_space<vmem>>, vector<6x16x8xf32>
    tpu.vector_store %arg5[%c22, %c0_11, %c0_12], %14 {strides = array<i32>} : memref<28x16x8xf32, #tpu.memory_space<vmem>>, vector<6x16x8xf32>,
    %c6 = arith.constant 6 : index
    %c0_13 = arith.constant 0 : index
    %c0_14 = arith.constant 0 : index
    %16 = vector.load %arg5[%c6, %c0_13, %c0_14] : memref<28x16x8xf32, #tpu.memory_space<vmem>>, vector<16x16x8xf32>
    tpu.vector_store %arg5[%c6, %c0_13, %c0_14], %11 {strides = array<i32>} : memref<28x16x8xf32, #tpu.memory_space<vmem>>, vector<16x16x8xf32>,
    %c0_15 = arith.constant 0 : index
    %c0_16 = arith.constant 0 : index
    %c0_17 = arith.constant 0 : index
    %17 = vector.load %arg5[%c0_15, %c0_16, %c0_17] : memref<28x16x8xf32, #tpu.memory_space<vmem>>, vector<28x16x8xf32>
    %18 = vector.extract_strided_slice %17 {offsets = [0, 0, 0], sizes = [24, 16, 8], strides = [1, 1, 1]} : vector<28x16x8xf32> to vector<24x16x8xf32>
    %19 = vector.extract_strided_slice %17 {offsets = [1, 0, 0], sizes = [24, 16, 8], strides = [1, 1, 1]} : vector<28x16x8xf32> to vector<24x16x8xf32>
    %20 = arith.maximumf %18, %19 : vector<24x16x8xf32>
    %21 = vector.extract_strided_slice %17 {offsets = [2, 0, 0], sizes = [24, 16, 8], strides = [1, 1, 1]} : vector<28x16x8xf32> to vector<24x16x8xf32>
    %22 = arith.maximumf %20, %21 : vector<24x16x8xf32>
    %23 = vector.extract_strided_slice %17 {offsets = [3, 0, 0], sizes = [24, 16, 8], strides = [1, 1, 1]} : vector<28x16x8xf32> to vector<24x16x8xf32>
    %24 = arith.maximumf %22, %23 : vector<24x16x8xf32>
    %25 = vector.extract_strided_slice %17 {offsets = [4, 0, 0], sizes = [24, 16, 8], strides = [1, 1, 1]} : vector<28x16x8xf32> to vector<24x16x8xf32>
    %26 = arith.maximumf %24, %25 : vector<24x16x8xf32>
    %27 = vector.extract_strided_slice %26 {offsets = [4, 0, 0], sizes = [16, 16, 8], strides = [1, 1, 1]} : vector<24x16x8xf32> to vector<16x16x8xf32>
    %28 = vector.extract_strided_slice %26 {offsets = [2, 0, 0], sizes = [16, 16, 8], strides = [1, 1, 1]} : vector<24x16x8xf32> to vector<16x16x8xf32>
    %29 = vector.extract_strided_slice %26 {offsets = [6, 0, 0], sizes = [16, 16, 8], strides = [1, 1, 1]} : vector<24x16x8xf32> to vector<16x16x8xf32>
    %30 = arith.maximumf %28, %29 : vector<16x16x8xf32>
    %31 = vector.extract_strided_slice %26 {offsets = [0, 0, 0], sizes = [16, 16, 8], strides = [1, 1, 1]} : vector<24x16x8xf32> to vector<16x16x8xf32>
    %32 = arith.maximumf %31, %27 : vector<16x16x8xf32>
    %33 = vector.extract_strided_slice %26 {offsets = [8, 0, 0], sizes = [16, 16, 8], strides = [1, 1, 1]} : vector<24x16x8xf32> to vector<16x16x8xf32>
    %34 = arith.maximumf %32, %33 : vector<16x16x8xf32>
    %cst_18 = arith.constant 0xFF800000 : f32
    %35 = vector.broadcast %cst_18 : f32 to vector<16x8x8xf32>
    %c0_19 = arith.constant 0 : index
    %c0_20 = arith.constant 0 : index
    %c0_21 = arith.constant 0 : index
    %36 = vector.load %arg6[%c0_19, %c0_20, %c0_21] : memref<16x30x8xf32, #tpu.memory_space<vmem>>, vector<16x8x8xf32>
    tpu.vector_store %arg6[%c0_19, %c0_20, %c0_21], %35 {strides = array<i32>} : memref<16x30x8xf32, #tpu.memory_space<vmem>>, vector<16x8x8xf32>,
    %cst_22 = arith.constant 0xFF800000 : f32
    %37 = vector.broadcast %cst_22 : f32 to vector<16x6x8xf32>
    %c0_23 = arith.constant 0 : index
    %c24 = arith.constant 24 : index
    %c0_24 = arith.constant 0 : index
    %38 = vector.load %arg6[%c0_23, %c24, %c0_24] : memref<16x30x8xf32, #tpu.memory_space<vmem>>, vector<16x6x8xf32>
    tpu.vector_store %arg6[%c0_23, %c24, %c0_24], %37 {strides = array<i32>} : memref<16x30x8xf32, #tpu.memory_space<vmem>>, vector<16x6x8xf32>,
    %c0_25 = arith.constant 0 : index
    %c8 = arith.constant 8 : index
    %c0_26 = arith.constant 0 : index
    %39 = vector.load %arg6[%c0_25, %c8, %c0_26] : memref<16x30x8xf32, #tpu.memory_space<vmem>>, vector<16x16x8xf32>
    tpu.vector_store %arg6[%c0_25, %c8, %c0_26], %27 {strides = array<i32>} : memref<16x30x8xf32, #tpu.memory_space<vmem>>, vector<16x16x8xf32>,
    %c0_27 = arith.constant 0 : index
    %c0_28 = arith.constant 0 : index
    %c0_29 = arith.constant 0 : index
    %40 = vector.load %arg6[%c0_27, %c0_28, %c0_29] : memref<16x30x8xf32, #tpu.memory_space<vmem>>, vector<16x30x8xf32>
    %41 = vector.extract_strided_slice %40 {offsets = [0, 0, 0], sizes = [16, 26, 8], strides = [1, 1, 1]} : vector<16x30x8xf32> to vector<16x26x8xf32>
    %42 = vector.extract_strided_slice %40 {offsets = [0, 1, 0], sizes = [16, 26, 8], strides = [1, 1, 1]} : vector<16x30x8xf32> to vector<16x26x8xf32>
    %43 = arith.maximumf %41, %42 : vector<16x26x8xf32>
    %44 = vector.extract_strided_slice %40 {offsets = [0, 2, 0], sizes = [16, 26, 8], strides = [1, 1, 1]} : vector<16x30x8xf32> to vector<16x26x8xf32>
    %45 = arith.maximumf %43, %44 : vector<16x26x8xf32>
    %46 = vector.extract_strided_slice %40 {offsets = [0, 3, 0], sizes = [16, 26, 8], strides = [1, 1, 1]} : vector<16x30x8xf32> to vector<16x26x8xf32>
    %47 = arith.maximumf %45, %46 : vector<16x26x8xf32>
    %48 = vector.extract_strided_slice %40 {offsets = [0, 4, 0], sizes = [16, 26, 8], strides = [1, 1, 1]} : vector<16x30x8xf32> to vector<16x26x8xf32>
    %49 = arith.maximumf %47, %48 : vector<16x26x8xf32>
    %50 = vector.extract_strided_slice %49 {offsets = [0, 6, 0], sizes = [16, 16, 8], strides = [1, 1, 1]} : vector<16x26x8xf32> to vector<16x16x8xf32>
    %51 = vector.shape_cast %50 : vector<16x16x8xf32> to vector<256x8xf32>
    %c0_30 = arith.constant 0 : index
    %c8_31 = arith.constant 8 : index
    %c0_32 = arith.constant 0 : index
    %52 = vector.load %arg6[%c0_30, %c8_31, %c0_32] : memref<16x30x8xf32, #tpu.memory_space<vmem>>, vector<16x16x8xf32>
    tpu.vector_store %arg6[%c0_30, %c8_31, %c0_32], %30 {strides = array<i32>} : memref<16x30x8xf32, #tpu.memory_space<vmem>>, vector<16x16x8xf32>,
    %c0_33 = arith.constant 0 : index
    %c0_34 = arith.constant 0 : index
    %c0_35 = arith.constant 0 : index
    %53 = vector.load %arg6[%c0_33, %c0_34, %c0_35] : memref<16x30x8xf32, #tpu.memory_space<vmem>>, vector<16x30x8xf32>
    %54 = vector.extract_strided_slice %53 {offsets = [0, 0, 0], sizes = [16, 26, 8], strides = [1, 1, 1]} : vector<16x30x8xf32> to vector<16x26x8xf32>
    %55 = vector.extract_strided_slice %53 {offsets = [0, 1, 0], sizes = [16, 26, 8], strides = [1, 1, 1]} : vector<16x30x8xf32> to vector<16x26x8xf32>
    %56 = arith.maximumf %54, %55 : vector<16x26x8xf32>
    %57 = vector.extract_strided_slice %53 {offsets = [0, 2, 0], sizes = [16, 26, 8], strides = [1, 1, 1]} : vector<16x30x8xf32> to vector<16x26x8xf32>
    %58 = arith.maximumf %56, %57 : vector<16x26x8xf32>
    %59 = vector.extract_strided_slice %53 {offsets = [0, 3, 0], sizes = [16, 26, 8], strides = [1, 1, 1]} : vector<16x30x8xf32> to vector<16x26x8xf32>
    %60 = arith.maximumf %58, %59 : vector<16x26x8xf32>
    %61 = vector.extract_strided_slice %53 {offsets = [0, 4, 0], sizes = [16, 26, 8], strides = [1, 1, 1]} : vector<16x30x8xf32> to vector<16x26x8xf32>
    %62 = arith.maximumf %60, %61 : vector<16x26x8xf32>
    %63 = vector.extract_strided_slice %62 {offsets = [0, 4, 0], sizes = [16, 16, 8], strides = [1, 1, 1]} : vector<16x26x8xf32> to vector<16x16x8xf32>
    %64 = vector.extract_strided_slice %62 {offsets = [0, 8, 0], sizes = [16, 16, 8], strides = [1, 1, 1]} : vector<16x26x8xf32> to vector<16x16x8xf32>
    %65 = arith.maximumf %63, %64 : vector<16x16x8xf32>
    %66 = vector.shape_cast %65 : vector<16x16x8xf32> to vector<256x8xf32>
    %c0_36 = arith.constant 0 : index
    %c8_37 = arith.constant 8 : index
    %c0_38 = arith.constant 0 : index
    %67 = vector.load %arg6[%c0_36, %c8_37, %c0_38] : memref<16x30x8xf32, #tpu.memory_space<vmem>>, vector<16x16x8xf32>
    tpu.vector_store %arg6[%c0_36, %c8_37, %c0_38], %34 {strides = array<i32>} : memref<16x30x8xf32, #tpu.memory_space<vmem>>, vector<16x16x8xf32>,
    %c0_39 = arith.constant 0 : index
    %c0_40 = arith.constant 0 : index
    %c0_41 = arith.constant 0 : index
    %68 = vector.load %arg6[%c0_39, %c0_40, %c0_41] : memref<16x30x8xf32, #tpu.memory_space<vmem>>, vector<16x30x8xf32>
    %69 = vector.extract_strided_slice %68 {offsets = [0, 0, 0], sizes = [16, 26, 8], strides = [1, 1, 1]} : vector<16x30x8xf32> to vector<16x26x8xf32>
    %70 = vector.extract_strided_slice %68 {offsets = [0, 1, 0], sizes = [16, 26, 8], strides = [1, 1, 1]} : vector<16x30x8xf32> to vector<16x26x8xf32>
    %71 = arith.maximumf %69, %70 : vector<16x26x8xf32>
    %72 = vector.extract_strided_slice %68 {offsets = [0, 2, 0], sizes = [16, 26, 8], strides = [1, 1, 1]} : vector<16x30x8xf32> to vector<16x26x8xf32>
    %73 = arith.maximumf %71, %72 : vector<16x26x8xf32>
    %74 = vector.extract_strided_slice %68 {offsets = [0, 3, 0], sizes = [16, 26, 8], strides = [1, 1, 1]} : vector<16x30x8xf32> to vector<16x26x8xf32>
    %75 = arith.maximumf %73, %74 : vector<16x26x8xf32>
    %76 = vector.extract_strided_slice %68 {offsets = [0, 4, 0], sizes = [16, 26, 8], strides = [1, 1, 1]} : vector<16x30x8xf32> to vector<16x26x8xf32>
    %77 = arith.maximumf %75, %76 : vector<16x26x8xf32>
    %78 = vector.extract_strided_slice %77 {offsets = [0, 2, 0], sizes = [16, 16, 8], strides = [1, 1, 1]} : vector<16x26x8xf32> to vector<16x16x8xf32>
    %79 = vector.extract_strided_slice %77 {offsets = [0, 6, 0], sizes = [16, 16, 8], strides = [1, 1, 1]} : vector<16x26x8xf32> to vector<16x16x8xf32>
    %80 = arith.maximumf %78, %79 : vector<16x16x8xf32>
    %81 = vector.extract_strided_slice %77 {offsets = [0, 10, 0], sizes = [16, 16, 8], strides = [1, 1, 1]} : vector<16x26x8xf32> to vector<16x16x8xf32>
    %82 = arith.maximumf %80, %81 : vector<16x16x8xf32>
    %83 = vector.shape_cast %82 : vector<16x16x8xf32> to vector<256x8xf32>
    %84 = tpu.concatenate %10, %51, %66, %83 in 1 : vector<256x8xf32>, vector<256x8xf32>, vector<256x8xf32>, vector<256x8xf32> -> vector<256x32xf32>
    %c0_42 = arith.constant 0 : index
    %c0_43 = arith.constant 0 : index
    %c0_44 = arith.constant 0 : index
    %85 = vector.load %arg4[%c0_42, %c0_43, %c0_44] : memref<1x256x32xf32, #tpu.memory_space<vmem>>, vector<1x256x32xf32>
    %86 = vector.shape_cast %85 : vector<1x256x32xf32> to vector<256x32xf32>
    %87 = vector.shape_cast %84 : vector<256x32xf32> to vector<1x256x32xf32>
    tpu.vector_store %arg4[%c0_42, %c0_43, %c0_44], %87 {strides = array<i32>} : memref<1x256x32xf32, #tpu.memory_space<vmem>>, vector<1x256x32xf32>,
    return
  }
  func.func @transform_0(%arg0: i32) -> (i32, i32, i32) {
    %c0_i32 = arith.constant 0 : i32
    %c0_i32_0 = arith.constant 0 : i32
    %c0_i32_1 = arith.constant 0 : i32
    return %arg0, %c0_i32, %c0_i32_0 : i32, i32, i32
  }
  func.func @transform_1(%arg0: i32) -> (i32, i32) {
    %c0_i32 = arith.constant 0 : i32
    %c0_i32_0 = arith.constant 0 : i32
    %c0_i32_1 = arith.constant 0 : i32
    return %c0_i32, %c0_i32_0 : i32, i32
  }
  func.func @transform_2(%arg0: i32) -> (i32, i32) {
    %c0_i32 = arith.constant 0 : i32
    %c0_i32_0 = arith.constant 0 : i32
    %c0_i32_1 = arith.constant 0 : i32
    return %c0_i32, %c0_i32_0 : i32, i32
  }
  func.func @transform_3(%arg0: i32) -> (i32, i32, i32) {
    %c0_i32 = arith.constant 0 : i32
    %c0_i32_0 = arith.constant 0 : i32
    %c0_i32_1 = arith.constant 0 : i32
    return %arg0, %c0_i32, %c0_i32_0 : i32, i32, i32
  }
}

</mosaic_0001>

<bundles_post_ra>
// kernel: spatial_pyramid_pooling.6
= control target key start
LH: loop header
LB: loop body
LE: loop exit
PB: predicated region body
PF: predicated region fallthrough
CT: control target
= control target key end

     0   :  { %s1072_s18 = smov 0   ;;  %s1414_s0 = inlined_call_operand.vmem [shape: f32[512,16], index: 0, kind: input, shape index: {}]   ;;  %s1415_s1 = inlined_call_operand.vmem [shape: f32[1,16], index: 1, kind: input, shape index: {}]   ;;  %s1416_s2 = inlined_call_operand.vmem [shape: f32[1,16], index: 2, kind: input, shape index: {}]   ;;  %s1417_s3 = inlined_call_operand.vmem [shape: bf16[16,8], index: 3, kind: input, shape index: {}]   ;;  %s1418_s4 = inlined_call_operand.vmem [shape: f32[512,8], index: 4, kind: output, shape index: {0}]   ;;  %s1419_s5 = inlined_call_operand.vmem [shape: f32[2,2,8], index: 5, kind: output, shape index: {1}]  }
   0x1 LB: > { %s1078_s19 = sadd.s32 4294967295, %s1040_s18   ;;  %p945_p0 = scmp.ge.s32.totalorder %s1040_s18, 1  ;;  %s1040_s18 = sphi %s1072_s18, %s16_s18  }
   0x2   : > { %p191_p1 = scmp.lt.s32.totalorder %s1040_s18, 3 }
   0x4   : > { %p192_p2 = pnand %p945_p0, %p191_p1 }
   0x5   : > { %v1033_v0 = vld [vmem:[%s1417_s3] sm:$0xff] (!%p192_p2)   ;;  %s946_s22 = sshll.u32 (!%p192_p2), %s1078_s19, 5  ;;  %vm438_vm0 = vcmask (!%p192_p2), 130048   ;;  %vm648_vm1 = vcmask (!%p192_p2), 64512   ;;  %p235_p4 = scmp.lt.s32.totalorder (!%p192_p2), %s1078_s19, 1  ;;  %vm750_vm2 = vcmask (!%p192_p2), 57344  }
   0x6   : > { %195 = sbr.rel (%p192_p2) target bundleno = 321 (0x141), region = 36  ;;  %p224_p3 = scmp.lt.s32.totalorder (!%p192_p2), %s946_s22, 63  ;;  %989 = vmatprep.subr.bf16.mxu0 (!%p192_p2), %v1033_v0  ;;  %1023 = vmatprep.subr.bf16.mxu1 (!%p192_p2), %v1033_v0  ;;  %v1092_v1 = vld [vmem:[%s1415_s1] ss:$0 sm:$0xff] (!%p192_p2) }
   0x7   : > { %990 = vmatpush3.bf16.msra.mxu0 (!%p192_p2), %v1033_v0  ;;  %1024 = vmatpush3.bf16.msra.mxu1 (!%p192_p2), %v1033_v0  ;;  %v1104_v2 = vld [vmem:[%s1416_s2] ss:$0 sm:$0xff] (!%p192_p2) }
   0xd   : > { %s1421_s22 = smov (!%p224_p3, %s946_s22), 63  ;;  %s1423_s19 = smov (!%p235_p4, %s1078_s19), 1 }
   0xe   : > { %s947_s23 = sshll.u32 %s1421_s22, 3  ;;  %s950_s9 = sshll.u32 %s1423_s19, 1 }
   0xf   : > { %s1099_s28 = scalar_lea.vmem %s1414_s0, %s947_s23  ;;  %s1240_s8 = scalar_lea.vmem %s1418_s4, %s947_s23 }
  0x10   : > { %v240_v3 = vld [vmem:[%s1099_s28] sm:$0xff]  ;;  %v241_v4 = vld [vmem:[%s1099_s28 + $0x8] sm:$0xff]  ;;  %v242_v5 = vld [vmem:[%s1099_s28 + $0x10] sm:$0xff]  ;;  %s238_s12 = scalar_lea.vmem %s1419_s5, %s950_s9 }
  0x11   : > { %v279_v6 = vmul.f32 %v1092_v1, %v240_v3  ;;  %v280_v7 = vmul.f32 %v1092_v1, %v241_v4  ;;  %v243_v8 = vld [vmem:[%s1099_s28 + $0x18] sm:$0xff]  ;;  %v281_v9 = vmul.f32 %v1092_v1, %v242_v5  ;;  %v244_v10 = vld [vmem:[%s1099_s28 + $0x20] sm:$0xff]  ;;  %v245_v11 = vld [vmem:[%s1099_s28 + $0x28] sm:$0xff] }
  0x12   : > { %v282_v12 = vmul.f32 %v1092_v1, %v243_v8  ;;  %v283_v13 = vmul.f32 %v1092_v1, %v244_v10  ;;  %v284_v14 = vmul.f32 %v1092_v1, %v245_v11  ;;  %v246_v15 = vld [vmem:[%s1099_s28 + $0x30] sm:$0xff]  ;;  %v247_v16 = vld [vmem:[%s1099_s28 + $0x38] sm:$0xff]  ;;  %v248_v25 = vld [vmem:[%s1099_s28 + $0x40] sm:$0xff] }
  0x13   : > { %v318_v17 = vadd.f32 %v1104_v2, %v279_v6  ;;  %v319_v18 = vadd.f32 %v1104_v2, %v280_v7  ;;  %v320_v19 = vadd.f32 %v1104_v2, %v281_v9  ;;  %v285_v20 = vmul.f32 %v1092_v1, %v246_v15  ;;  %v249_v26 = vld [vmem:[%s1099_s28 + $0x48] sm:$0xff]  ;;  %v250_v39 = vld [vmem:[%s1099_s28 + $0x50] sm:$0xff]  ;;  %v251_v44 = vld [vmem:[%s1099_s28 + $0x58] sm:$0xff] }
  0x14   : > { %v321_v21 = vadd.f32 %v1104_v2, %v282_v12  ;;  %v322_v22 = vadd.f32 %v1104_v2, %v283_v13  ;;  %v323_v23 = vadd.f32 %v1104_v2, %v284_v14  ;;  %v286_v24 = vmul.f32 %v1092_v1, %v247_v16  ;;  %v252_v45 = vld [vmem:[%s1099_s28 + $0x60] sm:$0xff]  ;;  %v253_v50 = vld [vmem:[%s1099_s28 + $0x68] sm:$0xff]  ;;  %v254_v51 = vld [vmem:[%s1099_s28 + $0x70] sm:$0xff] }
  0x15   : > { %v350_v27 = vmul.f32 0.01, %v318_v17  ;;  %v351_v28 = vmul.f32 0.01, %v319_v18  ;;  %v352_v29 = vmul.f32 0.01, %v320_v19  ;;  %v324_v30 = vadd.f32 %v1104_v2, %v285_v20 }
  0x16   : > { %v353_v31 = vmul.f32 0.01, %v321_v21  ;;  %v354_v32 = vmul.f32 0.01, %v322_v22  ;;  %v355_v33 = vmul.f32 0.01, %v323_v23  ;;  %v325_v34 = vadd.f32 %v1104_v2, %v286_v24 }
  0x17   : > { %v382_v35 = vmax.f32 %v318_v17, %v350_v27  ;;  %v383_v36 = vmax.f32 %v319_v18, %v351_v28  ;;  %v384_v37 = vmax.f32 %v320_v19, %v352_v29  ;;  %v356_v38 = vmul.f32 0.01, %v324_v30  ;;  %v255_v60 = vld [vmem:[%s1099_s28 + $0x78] sm:$0xff]  ;;  %v256_v11 = vld [vmem:[%s1099_s28 + $0x80] sm:$0xff]  ;;  %v257_v16 = vld [vmem:[%s1099_s28 + $0x88] sm:$0xff] }
  0x18   : > { %v385_v40 = vmax.f32 %v321_v21, %v353_v31  ;;  %v386_v41 = vmax.f32 %v322_v22, %v354_v32  ;;  %v387_v42 = vmax.f32 %v323_v23, %v355_v33  ;;  %v357_v43 = vmul.f32 0.01, %v325_v34  ;;  %v258_v21 = vld [vmem:[%s1099_s28 + $0x90] sm:$0xff]  ;;  %v259_v22 = vld [vmem:[%s1099_s28 + $0x98] sm:$0xff]  ;;  %v260_v27 = vld [vmem:[%s1099_s28 + $0xa0] sm:$0xff] }
  0x19   : > { %v414_v46 = vpack.c.bf16 %v383_v36, %v382_v35  ;;  %v388_v47 = vmax.f32 %v324_v30, %v356_v38  ;;  %v287_v48 = vmul.f32 %v1092_v1, %v248_v25  ;;  %v288_v49 = vmul.f32 %v1092_v1, %v249_v26  ;;  %v261_v31 = vld [vmem:[%s1099_s28 + $0xa8] sm:$0xff]  ;;  %v262_v36 = vld [vmem:[%s1099_s28 + $0xb0] sm:$0xff] }
  0x1a   : > { %v415_v52 = vpack.c.bf16 %v385_v40, %v384_v37  ;;  %v416_v53 = vpack.c.bf16 %v387_v42, %v386_v41  ;;  %v389_v54 = vmax.f32 %v325_v34, %v357_v43  ;;  %v289_v55 = vmul.f32 %v1092_v1, %v250_v39 }
  0x1b   : > { %991 = vmatprep.mubr.msk.bf16.mxu0 %vm438_vm0, %v414_v46  ;;  %v326_v56 = vadd.f32 %v1104_v2, %v287_v48  ;;  %v327_v57 = vadd.f32 %v1104_v2, %v288_v49  ;;  %v290_v58 = vmul.f32 %v1092_v1, %v251_v44  ;;  %v291_v59 = vmul.f32 %v1092_v1, %v252_v45  ;;  %v263_v45 = vld [vmem:[%s1099_s28 + $0xb8] sm:$0xff] }
  0x1c   : > { %992 = vmatmul.mubr.msk.bf16.vlgmr.msra.gmra.mrb[0].mxu0 %vm438_vm0, %v415_v52  ;;  %v417_v61 = vpack.c.bf16 %v389_v54, %v388_v47  ;;  %v328_v62 = vadd.f32 %v1104_v2, %v289_v55  ;;  %v292_v63 = vmul.f32 %v1092_v1, %v253_v50  ;;  %v293_v0 = vmul.f32 %v1092_v1, %v254_v51  ;;  %v264_v50 = vld [vmem:[%s1099_s28 + $0xc0] sm:$0xff] }
  0x1d   : > { %995 = vmatprep.mubr.msk.bf16.mxu0 %vm438_vm0, %v416_v53  ;;  %v358_v3 = vmul.f32 0.01, %v326_v56  ;;  %v359_v4 = vmul.f32 0.01, %v327_v57  ;;  %v329_v5 = vadd.f32 %v1104_v2, %v290_v58  ;;  %v330_v6 = vadd.f32 %v1104_v2, %v291_v59  ;;  %v265_v59 = vld [vmem:[%s1099_s28 + $0xc8] sm:$0xff] }
  0x1e   : > { %v360_v7 = vmul.f32 0.01, %v328_v62  ;;  %v331_v8 = vadd.f32 %v1104_v2, %v292_v63  ;;  %v294_v9 = vmul.f32 %v1092_v1, %v255_v60  ;;  %v1156_v10 = vadd.f32 %v1104_v2, %v293_v0  ;;  %v266_v0 = vld [vmem:[%s1099_s28 + $0xd0] sm:$0xff] }
  0x1f   : > { %v390_v12 = vmax.f32 %v326_v56, %v358_v3  ;;  %v391_v13 = vmax.f32 %v327_v57, %v359_v4  ;;  %v361_v14 = vmul.f32 0.01, %v329_v5  ;;  %v362_v15 = vmul.f32 0.01, %v330_v6  ;;  %v267_v3 = vld [vmem:[%s1099_s28 + $0xd8] sm:$0xff] }
  0x20   : > { %v392_v17 = vmax.f32 %v328_v62, %v360_v7  ;;  %v363_v18 = vmul.f32 0.01, %v331_v8  ;;  %v1161_v19 = vadd.f32 %v1104_v2, %v294_v9  ;;  %v1164_v20 = vmul.f32 0.01, %v1156_v10 }
  0x21   : > { %v418_v23 = vpack.c.bf16 %v391_v13, %v390_v12  ;;  %v393_v24 = vmax.f32 %v329_v5, %v361_v14  ;;  %v394_v25 = vmax.f32 %v330_v6, %v362_v15  ;;  %v295_v26 = vmul.f32 %v1092_v1, %v256_v11  ;;  %v269_v14 = vld [vmem:[%s1099_s28 + $0xe8] sm:$0xff] }
  0x22   : > { %v395_v28 = vmax.f32 %v331_v8, %v363_v18  ;;  %v1171_v29 = vmul.f32 0.01, %v1161_v19  ;;  %v296_v30 = vmul.f32 %v1092_v1, %v257_v16  ;;  %v396_v32 = vmax.f32 %v1156_v10, %v1164_v20  ;;  %v268_v8 = vld [vmem:[%s1099_s28 + $0xe0] sm:$0xff] }
  0x23   : > { %v334_v33 = vadd.f32 %v1104_v2, %v295_v26  ;;  %v297_v34 = vmul.f32 %v1092_v1, %v258_v21  ;;  %v298_v35 = vmul.f32 %v1092_v1, %v259_v22  ;;  %v419_v37 = vpack.c.bf16 %v393_v24, %v392_v17  ;;  %v270_v24 = vld [vmem:[%s1099_s28 + $0xf0] sm:$0xff] }
  0x24   : > { %996 = vmatmul.mubr.msk.bf16.gmra.mrb[4].mxu0 %vm438_vm0, %v417_v61  ;;  %v420_v38 = vpack.c.bf16 %v395_v28, %v394_v25  ;;  %v335_v39 = vadd.f32 %v1104_v2, %v296_v30  ;;  %v299_v40 = vmul.f32 %v1092_v1, %v260_v27  ;;  %v300_v44 = vmul.f32 %v1092_v1, %v261_v31 }
  0x25   : > { %999 = vmatprep.mubr.msk.bf16.mxu0 %vm438_vm0, %v418_v23  ;;  %v366_v41 = vmul.f32 0.01, %v334_v33  ;;  %v336_v42 = vadd.f32 %v1104_v2, %v297_v34  ;;  %v337_v43 = vadd.f32 %v1104_v2, %v298_v35  ;;  %v397_v46 = vmax.f32 %v1161_v19, %v1171_v29  ;;  %v271_v29 = vld [vmem:[%s1099_s28 + $0xf8] sm:$0xff] }
  0x26   : > { %v367_v47 = vmul.f32 0.01, %v335_v39  ;;  %v338_v48 = vadd.f32 %v1104_v2, %v299_v40  ;;  %v301_v49 = vmul.f32 %v1092_v1, %v262_v36  ;;  %v339_v54 = vadd.f32 %v1104_v2, %v300_v44 }
  0x27   : > { %v398_v51 = vmax.f32 %v334_v33, %v366_v41  ;;  %v368_v52 = vmul.f32 0.01, %v336_v42  ;;  %v369_v53 = vmul.f32 0.01, %v337_v43  ;;  %v302_v57 = vmul.f32 %v1092_v1, %v263_v45 }
  0x28   : > { %v399_v55 = vmax.f32 %v335_v39, %v367_v47  ;;  %v370_v56 = vmul.f32 0.01, %v338_v48  ;;  %v340_v58 = vadd.f32 %v1104_v2, %v301_v49  ;;  %v371_v62 = vmul.f32 0.01, %v339_v54 }
  0x29   : > { %v400_v60 = vmax.f32 %v336_v42, %v368_v52  ;;  %v401_v61 = vmax.f32 %v337_v43, %v369_v53  ;;  %v303_v63 = vmul.f32 %v1092_v1, %v264_v50  ;;  %v341_v6 = vadd.f32 %v1104_v2, %v302_v57 }
  0x2a   : > { %v422_v4 = vpack.c.bf16 %v399_v55, %v398_v51  ;;  %v402_v5 = vmax.f32 %v338_v48, %v370_v56  ;;  %v372_v7 = vmul.f32 0.01, %v340_v58  ;;  %v403_v11 = vmax.f32 %v339_v54, %v371_v62 }
  0x2b   : > { %v423_v9 = vpack.c.bf16 %v401_v61, %v400_v60  ;;  %v304_v12 = vmul.f32 %v1092_v1, %v265_v59  ;;  %v342_v13 = vadd.f32 %v1104_v2, %v303_v63  ;;  %v373_v15 = vmul.f32 0.01, %v341_v6 }
  0x2c   : > { %1000 = vmatmul.mubr.msk.bf16.gmra.mrb[8].mxu0 %vm438_vm0, %v419_v37  ;;  %1007 = vmatprep.mubr.msk.bf16.mxu1 %vm438_vm0, %v422_v4  ;;  %v404_v16 = vmax.f32 %v340_v58, %v372_v7  ;;  %v305_v17 = vmul.f32 %v1092_v1, %v266_v0  ;;  %v306_v18 = vmul.f32 %v1092_v1, %v267_v3 }
  0x2d   : > { %1003 = vmatprep.mubr.msk.bf16.mxu0 %vm438_vm0, %v420_v38  ;;  %1008 = vmatmul.mubr.msk.bf16.vlgmr.msra.gmra.mrb[0].mxu1 %vm438_vm0, %v423_v9  ;;  %v424_v19 = vpack.c.bf16 %v403_v11, %v402_v5  ;;  %v343_v21 = vadd.f32 %v1104_v2, %v304_v12  ;;  %v374_v22 = vmul.f32 0.01, %v342_v13  ;;  %v307_v23 = vmul.f32 %v1092_v1, %v268_v8 }
  0x2e   : > { %v405_v25 = vmax.f32 %v341_v6, %v373_v15  ;;  %v344_v26 = vadd.f32 %v1104_v2, %v305_v17  ;;  %v345_v27 = vadd.f32 %v1104_v2, %v306_v18  ;;  %v308_v28 = vmul.f32 %v1092_v1, %v269_v14 }
  0x2f   : > { %1011 = vmatprep.mubr.msk.bf16.mxu1 %vm438_vm0, %v424_v19  ;;  %v375_v30 = vmul.f32 0.01, %v343_v21  ;;  %v406_v31 = vmax.f32 %v342_v13, %v374_v22  ;;  %v346_v33 = vadd.f32 %v1104_v2, %v307_v23  ;;  %v421_v34 = vpack.c.bf16 %v397_v46, %v396_v32 }
  0x30   : > { %v425_v35 = vpack.c.bf16 %v405_v25, %v404_v16  ;;  %v347_v36 = vadd.f32 %v1104_v2, %v308_v28  ;;  %v309_v37 = vmul.f32 %v1092_v1, %v270_v24  ;;  %v376_v39 = vmul.f32 0.01, %v344_v26 }
  0x31   : > { %v407_v38 = vmax.f32 %v343_v21, %v375_v30  ;;  %v377_v40 = vmul.f32 0.01, %v345_v27  ;;  %v310_v41 = vmul.f32 %v1092_v1, %v271_v29  ;;  %v378_v42 = vmul.f32 0.01, %v346_v33 }
  0x32   : > { %v379_v43 = vmul.f32 0.01, %v347_v36  ;;  %v408_v45 = vmax.f32 %v344_v26, %v376_v39  ;;  %v348_v20 = vadd.f32 %v1104_v2, %v309_v37 }
  0x33   : > { %v426_v44 = vpack.c.bf16 %v407_v38, %v406_v31  ;;  %v409_v10 = vmax.f32 %v345_v27, %v377_v40  ;;  %v349_v32 = vadd.f32 %v1104_v2, %v310_v41  ;;  %v410_v46 = vmax.f32 %v346_v33, %v378_v42 }
  0x34   : > { %1004 = vmatmul.mubr.msk.bf16.gmra.mrb[12].mxu0 %vm438_vm0, %v421_v34  ;;  %v411_v47 = vmax.f32 %v347_v36, %v379_v43  ;;  %v380_v1 = vmul.f32 0.01, %v348_v20 }
  0x35   : > { %1012 = vmatmul.mubr.msk.bf16.gmra.mrb[4].mxu1 %vm438_vm0, %v425_v35  ;;  %v427_v48 = vpack.c.bf16 %v409_v10, %v408_v45  ;;  %v381_v49 = vmul.f32 0.01, %v349_v32 }
  0x36   : > { %1015 = vmatprep.mubr.msk.bf16.mxu1 %vm438_vm0, %v426_v44  ;;  %v428_v50 = vpack.c.bf16 %v411_v47, %v410_v46  ;;  %v412_v51 = vmax.f32 %v348_v20, %v380_v1 }
  0x37   : > { %v413_v52 = vmax.f32 %v349_v32, %v381_v49 }
  0x39   : > { %v429_v53 = vpack.c.bf16 %v413_v52, %v412_v51 }
  0x3d   : > { %1016 = vmatmul.mubr.msk.bf16.gmra.mrb[8].mxu1 %vm438_vm0, %v427_v48 }
  0x3e   : > { %1019 = vmatprep.mubr.msk.bf16.mxu1 %vm438_vm0, %v428_v50 }
  0x45   : > { %1020 = vmatmul.mubr.msk.bf16.gmra.mrb[12].mxu1 %vm438_vm0, %v429_v53 }
  0xef   : > { %v993_v2 = vpop.f32.mrb[0].mxu0 }
  0xf0   : > { %651 = vst.msk [vmem:[%s1240_s8 + $0x10] sm:$0xff] %vm648_vm1, %v993_v2  ;;  %v521_v54 = vpop.f32.mrb[1].mxu0  ;;  %v754_v58 = vmul.f32 %v993_v2, %v993_v2  ;;  %v684_v63 = vsel %vm648_vm1, %v993_v2, 0.0 }
  0xf1   : > { %649 = vst.msk [vmem:[%s1240_s8] sm:$0xff] %vm648_vm1, %v521_v54  ;;  %v752_v55 = vmul.f32 %v521_v54, %v521_v54  ;;  %v994_v56 = vpop.f32.mrb[2].mxu0  ;;  %v681_v59 = vsel %vm648_vm1, %v521_v54, 0.0 }
  0xf2   : > { %652 = vst.msk [vmem:[%s1240_s8 + $0x18] sm:$0xff] %vm648_vm1, %v994_v56  ;;  %v524_v57 = vpop.f32.mrb[3].mxu0  ;;  %v755_v3 = vmul.f32 %v994_v56, %v994_v56  ;;  %v787_v7 = vsel %vm648_vm1, %v754_v58, 0.0  ;;  %v686_v8 = vsel %vm648_vm1, %v994_v56, 0.0 }
  0xf3   : > { %650 = vst.msk [vmem:[%s1240_s8 + $0x8] sm:$0xff] %vm648_vm1, %v524_v57  ;;  %v682_v60 = vsel %vm648_vm1, %v524_v57, 0.0  ;;  %v753_v61 = vmul.f32 %v524_v57, %v524_v57  ;;  %v784_v0 = vsel %vm648_vm1, %v752_v55, 0.0 }
  0xf4   : > { %v683_v62 = vadd.f32 %v682_v60, %v681_v59  ;;  %v789_v14 = vsel %vm648_vm1, %v755_v3, 0.0 }
  0xf5   : > { %v785_v4 = vsel %vm648_vm1, %v753_v61, 0.0 }
  0xf6   : > { %v685_v5 = vadd.f32 %v684_v63, %v683_v62  ;;  %v786_v6 = vadd.f32 %v785_v4, %v784_v0 }
  0xf7   : > { %v997_v9 = vpop.f32.mrb[4].mxu0 }
  0xf8   : > { %v788_v11 = vadd.f32 %v787_v7, %v786_v6  ;;  %655 = vst.msk [vmem:[%s1240_s8 + $0x30] sm:$0xff] %vm648_vm1, %v997_v9  ;;  %v537_v12 = vpop.f32.mrb[5].mxu0  ;;  %v687_v13 = vadd.f32 %v686_v8, %v685_v5  ;;  %v758_v22 = vmul.f32 %v997_v9, %v997_v9  ;;  %v692_v28 = vsel %vm648_vm1, %v997_v9, 0.0 }
  0xf9   : > { %653 = vst.msk [vmem:[%s1240_s8 + $0x20] sm:$0xff] %vm648_vm1, %v537_v12  ;;  %v688_v15 = vsel %vm648_vm1, %v537_v12, 0.0  ;;  %v756_v16 = vmul.f32 %v537_v12, %v537_v12  ;;  %v998_v17 = vpop.f32.mrb[6].mxu0 }
  0xfa   : > { %v689_v18 = vadd.f32 %v688_v15, %v687_v13  ;;  %v790_v19 = vadd.f32 %v789_v14, %v788_v11  ;;  %656 = vst.msk [vmem:[%s1240_s8 + $0x38] sm:$0xff] %vm648_vm1, %v998_v17  ;;  %v540_v21 = vpop.f32.mrb[7].mxu0  ;;  %v759_v29 = vmul.f32 %v998_v17, %v998_v17  ;;  %v795_v34 = vsel %vm648_vm1, %v758_v22, 0.0 }
  0xfb   : > { %v791_v23 = vsel %vm648_vm1, %v756_v16, 0.0  ;;  %654 = vst.msk [vmem:[%s1240_s8 + $0x28] sm:$0xff] %vm648_vm1, %v540_v21  ;;  %v690_v24 = vsel %vm648_vm1, %v540_v21, 0.0  ;;  %v757_v25 = vmul.f32 %v540_v21, %v540_v21  ;;  %v694_v35 = vsel %vm648_vm1, %v998_v17, 0.0 }
  0xfc   : > { %v792_v26 = vadd.f32 %v791_v23, %v790_v19  ;;  %v691_v27 = vadd.f32 %v690_v24, %v689_v18  ;;  %v797_v41 = vsel %vm648_vm1, %v759_v29, 0.0 }
  0xfd   : > { %v793_v30 = vsel %vm648_vm1, %v757_v25, 0.0 }
  0xfe   : > { %v693_v31 = vadd.f32 %v692_v28, %v691_v27  ;;  %v794_v33 = vadd.f32 %v793_v30, %v792_v26 }
  0xff   : > { %v1001_v36 = vpop.f32.mrb[8].mxu0 }
 0x100   : > { %v796_v37 = vadd.f32 %v795_v34, %v794_v33  ;;  %659 = vst.msk [vmem:[%s1240_s8 + $0x50] sm:$0xff] %vm648_vm1, %v1001_v36  ;;  %v553_v38 = vpop.f32.mrb[9].mxu0  ;;  %v695_v39 = vadd.f32 %v694_v35, %v693_v31  ;;  %v1275_v40 = vpop.f32.mrb[0].mxu1  ;;  %v762_v47 = vmul.f32 %v1001_v36, %v1001_v36  ;;  %v700_v53 = vsel %vm648_vm1, %v1001_v36, 0.0 }
 0x101   : > { %657 = vst.msk [vmem:[%s1240_s8 + $0x40] sm:$0xff] %vm648_vm1, %v553_v38  ;;  %v696_v42 = vsel %vm648_vm1, %v553_v38, 0.0  ;;  %v760_v43 = vmul.f32 %v553_v38, %v553_v38  ;;  %v1002_v44 = vpop.f32.mrb[10].mxu0  ;;  %667 = vst.msk [vmem:[%s1240_s8 + $0x90] sm:$0xff] %vm648_vm1, %v1275_v40  ;;  %v585_v45 = vpop.f32.mrb[1].mxu1 }
 0x102   : > { %v697_v10 = vadd.f32 %v696_v42, %v695_v39  ;;  %v798_v20 = vadd.f32 %v797_v41, %v796_v37  ;;  %660 = vst.msk [vmem:[%s1240_s8 + $0x58] sm:$0xff] %vm648_vm1, %v1002_v44  ;;  %v556_v32 = vpop.f32.mrb[11].mxu0  ;;  %665 = vst.msk [vmem:[%s1240_s8 + $0x80] sm:$0xff] %vm648_vm1, %v585_v45  ;;  %v1288_v46 = vpop.f32.mrb[2].mxu1  ;;  %v763_v2 = vmul.f32 %v1002_v44, %v1002_v44  ;;  %v803_v57 = vsel %vm648_vm1, %v762_v47, 0.0 }
 0x103   : > { %v799_v48 = vsel %vm648_vm1, %v760_v43, 0.0  ;;  %658 = vst.msk [vmem:[%s1240_s8 + $0x48] sm:$0xff] %vm648_vm1, %v556_v32  ;;  %v698_v1 = vsel %vm648_vm1, %v556_v32, 0.0  ;;  %v761_v49 = vmul.f32 %v556_v32, %v556_v32  ;;  %668 = vst.msk [vmem:[%s1240_s8 + $0x98] sm:$0xff] %vm648_vm1, %v1288_v46  ;;  %v588_v50 = vpop.f32.mrb[3].mxu1  ;;  %v702_v58 = vsel %vm648_vm1, %v1002_v44, 0.0 }
 0x104   : > { %v800_v51 = vadd.f32 %v799_v48, %v798_v20  ;;  %v699_v52 = vadd.f32 %v698_v1, %v697_v10  ;;  %666 = vst.msk [vmem:[%s1240_s8 + $0x88] sm:$0xff] %vm648_vm1, %v588_v50  ;;  %v805_v0 = vsel %vm648_vm1, %v763_v2, 0.0  ;;  %v768_v23 = vmul.f32 %v585_v45, %v585_v45 }
 0x105   : > { %v801_v54 = vsel %vm648_vm1, %v761_v49, 0.0  ;;  %v712_v28 = vsel %vm648_vm1, %v585_v45, 0.0  ;;  %v769_v35 = vmul.f32 %v588_v50, %v588_v50  ;;  %v770_v41 = vmul.f32 %v1275_v40, %v1275_v40 }
 0x106   : > { %v701_v55 = vadd.f32 %v700_v53, %v699_v52  ;;  %v802_v56 = vadd.f32 %v801_v54, %v800_v51  ;;  %v815_v34 = vsel %vm648_vm1, %v768_v23, 0.0  ;;  %v714_v42 = vsel %vm648_vm1, %v588_v50, 0.0 }
 0x107   : > { %v1005_v59 = vpop.f32.mrb[12].mxu0  ;;  %v716_v10 = vsel %vm648_vm1, %v1275_v40, 0.0  ;;  %v771_v20 = vmul.f32 %v1288_v46, %v1288_v46  ;;  %v817_v32 = vsel %vm648_vm1, %v769_v35, 0.0  ;;  %v819_v49 = vsel %vm648_vm1, %v770_v41, 0.0 }
 0x108   : > { %v804_v60 = vadd.f32 %v803_v57, %v802_v56  ;;  %663 = vst.msk [vmem:[%s1240_s8 + $0x70] sm:$0xff] %vm648_vm1, %v1005_v59  ;;  %v569_v61 = vpop.f32.mrb[13].mxu0  ;;  %v703_v62 = vadd.f32 %v702_v58, %v701_v55  ;;  %v1305_v63 = vpop.f32.mrb[4].mxu1  ;;  %v766_v12 = vmul.f32 %v1005_v59, %v1005_v59  ;;  %v708_v19 = vsel %vm648_vm1, %v1005_v59, 0.0 }
 0x109   : > { %661 = vst.msk [vmem:[%s1240_s8 + $0x60] sm:$0xff] %vm648_vm1, %v569_v61  ;;  %v704_v3 = vsel %vm648_vm1, %v569_v61, 0.0  ;;  %v764_v4 = vmul.f32 %v569_v61, %v569_v61  ;;  %v1006_v5 = vpop.f32.mrb[14].mxu0  ;;  %671 = vst.msk [vmem:[%s1240_s8 + $0xb0] sm:$0xff] %vm648_vm1, %v1305_v63  ;;  %v601_v6 = vpop.f32.mrb[5].mxu1  ;;  %v718_v50 = vsel %vm648_vm1, %v1288_v46, 0.0  ;;  %v774_v59 = vmul.f32 %v1305_v63, %v1305_v63 }
 0x10a   : > { %v705_v7 = vadd.f32 %v704_v3, %v703_v62  ;;  %v806_v8 = vadd.f32 %v805_v0, %v804_v60  ;;  %664 = vst.msk [vmem:[%s1240_s8 + $0x78] sm:$0xff] %vm648_vm1, %v1006_v5  ;;  %v572_v9 = vpop.f32.mrb[15].mxu0  ;;  %669 = vst.msk [vmem:[%s1240_s8 + $0xa0] sm:$0xff] %vm648_vm1, %v601_v6  ;;  %v1318_v11 = vpop.f32.mrb[6].mxu1  ;;  %v767_v21 = vmul.f32 %v1006_v5, %v1006_v5  ;;  %v811_v26 = vsel %vm648_vm1, %v766_v12, 0.0 }
 0x10b   : > { %v807_v13 = vsel %vm648_vm1, %v764_v4, 0.0  ;;  %662 = vst.msk [vmem:[%s1240_s8 + $0x68] sm:$0xff] %vm648_vm1, %v572_v9  ;;  %v706_v14 = vsel %vm648_vm1, %v572_v9, 0.0  ;;  %v765_v15 = vmul.f32 %v572_v9, %v572_v9  ;;  %672 = vst.msk [vmem:[%s1240_s8 + $0xb8] sm:$0xff] %vm648_vm1, %v1318_v11  ;;  %v604_v16 = vpop.f32.mrb[7].mxu1  ;;  %v710_v27 = vsel %vm648_vm1, %v1006_v5, 0.0 }
 0x10c   : > { %v808_v17 = vadd.f32 %v807_v13, %v806_v8  ;;  %v707_v18 = vadd.f32 %v706_v14, %v705_v7  ;;  %670 = vst.msk [vmem:[%s1240_s8 + $0xa8] sm:$0xff] %vm648_vm1, %v604_v16  ;;  %v813_v33 = vsel %vm648_vm1, %v767_v21, 0.0  ;;  %v772_v47 = vmul.f32 %v601_v6, %v601_v6 }
 0x10d   : > { %v809_v22 = vsel %vm648_vm1, %v765_v15, 0.0  ;;  %v720_v51 = vsel %vm648_vm1, %v601_v6, 0.0  ;;  %v821_v2 = vsel %vm648_vm1, %v771_v20, 0.0  ;;  %v773_v55 = vmul.f32 %v604_v16, %v604_v16 }
 0x10e   : > { %v709_v24 = vadd.f32 %v708_v19, %v707_v18  ;;  %v810_v25 = vadd.f32 %v809_v22, %v808_v17  ;;  %v823_v54 = vsel %vm648_vm1, %v772_v47, 0.0  ;;  %v722_v60 = vsel %vm648_vm1, %v604_v16, 0.0 }
 0x10f   : > { %v724_v0 = vsel %vm648_vm1, %v1305_v63, 0.0  ;;  %v775_v5 = vmul.f32 %v1318_v11, %v1318_v11  ;;  %v825_v6 = vsel %vm648_vm1, %v773_v55, 0.0  ;;  %v827_v13 = vsel %vm648_vm1, %v774_v59, 0.0 }
 0x110   : > { %v812_v29 = vadd.f32 %v811_v26, %v810_v25  ;;  %v711_v30 = vadd.f32 %v710_v27, %v709_v24  ;;  %v1334_v31 = vpop.f32.mrb[8].mxu1  ;;  %v726_v14 = vsel %vm648_vm1, %v1318_v11, 0.0 }
 0x111   : > { %675 = vst.msk [vmem:[%s1240_s8 + $0xd0] sm:$0xff] %vm648_vm1, %v1334_v31  ;;  %v617_v36 = vpop.f32.mrb[9].mxu1  ;;  %v829_v17 = vsel %vm648_vm1, %v775_v5, 0.0  ;;  %v778_v23 = vmul.f32 %v1334_v31, %v1334_v31  ;;  %v732_v11 = vsel %vm648_vm1, %v1334_v31, 0.0 }
 0x112   : > { %v713_v37 = vadd.f32 %v712_v28, %v711_v30  ;;  %v814_v38 = vadd.f32 %v813_v33, %v812_v29  ;;  %673 = vst.msk [vmem:[%s1240_s8 + $0xc0] sm:$0xff] %vm648_vm1, %v617_v36  ;;  %v1343_v39 = vpop.f32.mrb[10].mxu1  ;;  %v776_v7 = vmul.f32 %v617_v36, %v617_v36  ;;  %v728_v63 = vsel %vm648_vm1, %v617_v36, 0.0 }
 0x113   : > { %676 = vst.msk [vmem:[%s1240_s8 + $0xd8] sm:$0xff] %vm648_vm1, %v1343_v39  ;;  %v620_v43 = vpop.f32.mrb[11].mxu1  ;;  %v779_v27 = vmul.f32 %v1343_v39, %v1343_v39  ;;  %v734_v35 = vsel %vm648_vm1, %v1343_v39, 0.0 }
 0x114   : > { %v816_v44 = vadd.f32 %v815_v34, %v814_v38  ;;  %v715_v45 = vadd.f32 %v714_v42, %v713_v37  ;;  %674 = vst.msk [vmem:[%s1240_s8 + $0xc8] sm:$0xff] %vm648_vm1, %v620_v43  ;;  %v831_v18 = vsel %vm648_vm1, %v776_v7, 0.0  ;;  %v777_v19 = vmul.f32 %v620_v43, %v620_v43 }
 0x115   : > { %v730_v24 = vsel %vm648_vm1, %v620_v43, 0.0  ;;  %v835_v34 = vsel %vm648_vm1, %v778_v23, 0.0  ;;  %v837_v31 = vsel %vm648_vm1, %v779_v27, 0.0 }
 0x116   : > { %v717_v48 = vadd.f32 %v716_v10, %v715_v45  ;;  %v818_v1 = vadd.f32 %v817_v32, %v816_v44  ;;  %v833_v28 = vsel %vm648_vm1, %v777_v19, 0.0 }
 0x118   : > { %v820_v52 = vadd.f32 %v819_v49, %v818_v1  ;;  %v719_v53 = vadd.f32 %v718_v50, %v717_v48  ;;  %v1021_v40 = vpop.f32.mrb[12].mxu1 }
 0x119   : > { %679 = vst.msk [vmem:[%s1240_s8 + $0xf0] sm:$0xff] %vm648_vm1, %v1021_v40  ;;  %v633_v56 = vpop.f32.mrb[13].mxu1  ;;  %v782_v45 = vmul.f32 %v1021_v40, %v1021_v40  ;;  %v740_v39 = vsel %vm648_vm1, %v1021_v40, 0.0 }
 0x11a   : > { %v721_v57 = vadd.f32 %v720_v51, %v719_v53  ;;  %v822_v58 = vadd.f32 %v821_v2, %v820_v52  ;;  %677 = vst.msk [vmem:[%s1240_s8 + $0xe0] sm:$0xff] %vm648_vm1, %v633_v56  ;;  %v1022_v46 = vpop.f32.mrb[14].mxu1  ;;  %v780_v29 = vmul.f32 %v633_v56, %v633_v56  ;;  %v736_v36 = vsel %vm648_vm1, %v633_v56, 0.0 }
 0x11b   : > { %680 = vst.msk [vmem:[%s1240_s8 + $0xf8] sm:$0xff] %vm648_vm1, %v1022_v46  ;;  %v783_v61 = vmul.f32 %v1022_v46, %v1022_v46  ;;  %v636_v62 = vpop.f32.mrb[15].mxu1  ;;  %v843_v49 = vsel %vm648_vm1, %v782_v45, 0.0  ;;  %v742_v50 = vsel %vm648_vm1, %v1022_v46, 0.0 }
 0x11c   : > { %v824_v3 = vadd.f32 %v823_v54, %v822_v58  ;;  %v723_v4 = vadd.f32 %v722_v60, %v721_v57  ;;  %678 = vst.msk [vmem:[%s1240_s8 + $0xe8] sm:$0xff] %vm648_vm1, %v636_v62  ;;  %v839_v41 = vsel %vm648_vm1, %v780_v29, 0.0  ;;  %v781_v42 = vmul.f32 %v636_v62, %v636_v62 }
 0x11d   : > { %v845_v8 = vsel %vm648_vm1, %v783_v61, 0.0  ;;  %v738_v10 = vsel %vm648_vm1, %v636_v62, 0.0 }
 0x11e   : > { %v725_v9 = vadd.f32 %v724_v0, %v723_v4  ;;  %v826_v12 = vadd.f32 %v825_v6, %v824_v3  ;;  %v841_v47 = vsel %vm648_vm1, %v781_v42, 0.0 }
 0x120   : > { %v828_v15 = vadd.f32 %v827_v13, %v826_v12  ;;  %v727_v16 = vadd.f32 %v726_v14, %v725_v9 }
 0x122   : > { %v729_v21 = vadd.f32 %v728_v63, %v727_v16  ;;  %v830_v22 = vadd.f32 %v829_v17, %v828_v15 }
 0x124   : > { %v832_v25 = vadd.f32 %v831_v18, %v830_v22  ;;  %v731_v26 = vadd.f32 %v730_v24, %v729_v21 }
 0x126   : > { %v733_v30 = vadd.f32 %v732_v11, %v731_v26  ;;  %v834_v33 = vadd.f32 %v833_v28, %v832_v25 }
 0x128   : > { %v836_v37 = vadd.f32 %v835_v34, %v834_v33  ;;  %v735_v38 = vadd.f32 %v734_v35, %v733_v30 }
 0x12a   : > { %v737_v43 = vadd.f32 %v736_v36, %v735_v38  ;;  %v838_v44 = vadd.f32 %v837_v31, %v836_v37 }
 0x12c   : > { %v840_v20 = vadd.f32 %v839_v41, %v838_v44  ;;  %v739_v32 = vadd.f32 %v738_v10, %v737_v43 }
 0x12e   : > { %v741_v48 = vadd.f32 %v740_v39, %v739_v32  ;;  %v842_v1 = vadd.f32 %v841_v47, %v840_v20 }
 0x130   : > { %v743_v51 = vadd.f32 %v742_v50, %v741_v48  ;;  %v844_v52 = vadd.f32 %v843_v49, %v842_v1 }
 0x132   : > { %v744_v53 = vrot.slane %v743_v51, 4  ;;  %v846_v2 = vadd.f32 %v845_v8, %v844_v52 }
 0x134   : > { %v745_v54 = vadd.f32 %v744_v53, %v743_v51  ;;  %v847_v55 = vrot.slane %v846_v2, 4 }
 0x136   : > { %v746_v56 = vrot.slane %v745_v54, 2  ;;  %v848_v57 = vadd.f32 %v847_v55, %v846_v2 }
 0x138   : > { %v747_v40 = vadd.f32 %v746_v56, %v745_v54  ;;  %v849_v58 = vrot.slane %v848_v57, 2 }
 0x13a   : > { %v748_v59 = vrot.slane %v747_v40, 1  ;;  %v850_v60 = vadd.f32 %v849_v58, %v848_v57 }
 0x13c   : > { %v749_v46 = vadd.f32 %v748_v59, %v747_v40  ;;  %v851_v61 = vrot.slane %v850_v60, 1 }
 0x13e   : > { %751 = vst.msk [vmem:[%s238_s12] sm:$0x1] %vm750_vm2, %v749_v46  ;;  %v852_v62 = vadd.f32 %v851_v61, %v850_v60 }
 0x140   : > { %853 = vst.msk [vmem:[%s238_s12 + $0x1] sm:$0x1] %vm750_vm2, %v852_v62 }
 0x141 PF: > { %s16_s18 = sadd.s32 1, %s1040_s18  }
 0x142   : > { %p13_p5 = scmp.ge.s32.totalorder %s16_s18, 4  }
 0x144   :  { %15 = sbr.rel (!%p13_p5) target bundleno = 1 (0x1), region = 78 }

// kernel: spatial_pyramid_pooling.4
= control target key start
LH: loop header
LB: loop body
LE: loop exit
PB: predicated region body
PF: predicated region fallthrough
CT: control target
= control target key end

     0   :  { %s960_s12 = smov 0   ;;  %s1255_s0 = inlined_call_operand.vmem [shape: bf16[512,16], index: 0, kind: input, shape index: {}]   ;;  %s1256_s1 = inlined_call_operand.vmem [shape: bf16[16,8], index: 1, kind: input, shape index: {}]   ;;  %s1257_s2 = inlined_call_operand.vmem [shape: f32[512,8], index: 2, kind: output, shape index: {0}]   ;;  %s1258_s3 = inlined_call_operand.vmem [shape: f32[2,2,8], index: 3, kind: output, shape index: {1}]  }
   0x1 LB: > { %s966_s13 = sadd.s32 4294967295, %s938_s12   ;;  %p813_p0 = scmp.ge.s32.totalorder %s938_s12, 1  ;;  %s938_s12 = sphi %s960_s12, %s14_s12  }
   0x2   : > { %p141_p1 = scmp.lt.s32.totalorder %s938_s12, 3 }
   0x4   : > { %p142_p2 = pnand %p813_p0, %p141_p1 }
   0x5   : > { %v915_v0 = vld [vmem:[%s1256_s1] sm:$0xff] (!%p142_p2)   ;;  %s814_s16 = sshll.u32 (!%p142_p2), %s966_s13, 5  ;;  %vm306_vm0 = vcmask (!%p142_p2), 130048   ;;  %vm516_vm1 = vcmask (!%p142_p2), 64512   ;;  %p181_p4 = scmp.lt.s32.totalorder (!%p142_p2), %s966_s13, 1  ;;  %vm618_vm2 = vcmask (!%p142_p2), 57344  }
   0x6   : > { %145 = sbr.rel (%p142_p2) target bundleno = 311 (0x137), region = 28  ;;  %p170_p3 = scmp.lt.s32.totalorder (!%p142_p2), %s814_s16, 63  ;;  %871 = vmatprep.subr.bf16.mxu0 (!%p142_p2), %v915_v0  ;;  %905 = vmatprep.subr.bf16.mxu1 (!%p142_p2), %v915_v0 }
   0x7   : > { %872 = vmatpush3.bf16.msra.mxu0 (!%p142_p2), %v915_v0  ;;  %906 = vmatpush3.bf16.msra.mxu1 (!%p142_p2), %v915_v0 }
   0xd   : > { %s1260_s16 = smov (!%p170_p3, %s814_s16), 63  ;;  %s1262_s13 = smov (!%p181_p4, %s966_s13), 1 }
   0xe   : > { %s815_s17 = sshll.u32 %s1260_s16, 2  ;;  %s817_s21 = sshll.u32 %s1260_s16, 3 }
   0xf   : > { %s980_s20 = scalar_lea.vmem %s1255_s0, %s815_s17  ;;  %s1018_s24 = scalar_lea.vmem %s1257_s2, %s817_s21 }
  0x10   : > { %v916_v1 = vld [vmem:[%s980_s20] sm:$0xff]   ;;  %v917_v2 = vld [vmem:[%s980_s20 + $0x8] sm:$0xff]   ;;  %v918_v3 = vld [vmem:[%s980_s20 + $0x10] sm:$0xff]   ;;  %s818_s25 = sshll.u32 %s1262_s13, 1 }
  0x11   : > { %873 = vmatprep.mubr.msk.bf16.mxu0 %vm306_vm0, %v916_v1  ;;  %v919_v4 = vld [vmem:[%s980_s20 + $0x18] sm:$0xff]   ;;  %v920_v5 = vld [vmem:[%s980_s20 + $0x20] sm:$0xff]   ;;  %v925_v7 = vld [vmem:[%s980_s20 + $0x48] sm:$0xff]   ;;  %s184_s28 = scalar_lea.vmem %s1258_s3, %s818_s25 }
  0x12   : > { %874 = vmatmul.mubr.msk.bf16.vlgmr.msra.gmra.mrb[0].mxu0 %vm306_vm0, %v917_v2  ;;  %v924_v6 = vld [vmem:[%s980_s20 + $0x40] sm:$0xff]   ;;  %v926_v8 = vld [vmem:[%s980_s20 + $0x50] sm:$0xff]   ;;  %v921_v9 = vld [vmem:[%s980_s20 + $0x28] sm:$0xff]  }
  0x13   : > { %877 = vmatprep.mubr.msk.bf16.mxu0 %vm306_vm0, %v918_v3  ;;  %889 = vmatprep.mubr.msk.bf16.mxu1 %vm306_vm0, %v924_v6  ;;  %v927_v10 = vld [vmem:[%s980_s20 + $0x58] sm:$0xff]   ;;  %v922_v11 = vld [vmem:[%s980_s20 + $0x30] sm:$0xff]   ;;  %v928_v12 = vld [vmem:[%s980_s20 + $0x60] sm:$0xff]  }
  0x14   : > { %890 = vmatmul.mubr.msk.bf16.vlgmr.msra.gmra.mrb[0].mxu1 %vm306_vm0, %v925_v7  ;;  %v923_v13 = vld [vmem:[%s980_s20 + $0x38] sm:$0xff]   ;;  %v929_v14 = vld [vmem:[%s980_s20 + $0x68] sm:$0xff]   ;;  %v930_v15 = vld [vmem:[%s980_s20 + $0x70] sm:$0xff]  }
  0x15   : > { %893 = vmatprep.mubr.msk.bf16.mxu1 %vm306_vm0, %v926_v8  ;;  %v931_v16 = vld [vmem:[%s980_s20 + $0x78] sm:$0xff]  }
  0x1a   : > { %878 = vmatmul.mubr.msk.bf16.gmra.mrb[4].mxu0 %vm306_vm0, %v919_v4 }
  0x1b   : > { %881 = vmatprep.mubr.msk.bf16.mxu0 %vm306_vm0, %v920_v5 }
  0x1c   : > { %894 = vmatmul.mubr.msk.bf16.gmra.mrb[4].mxu1 %vm306_vm0, %v927_v10 }
  0x1d   : > { %897 = vmatprep.mubr.msk.bf16.mxu1 %vm306_vm0, %v928_v12 }
  0x22   : > { %882 = vmatmul.mubr.msk.bf16.gmra.mrb[8].mxu0 %vm306_vm0, %v921_v9 }
  0x23   : > { %885 = vmatprep.mubr.msk.bf16.mxu0 %vm306_vm0, %v922_v11 }
  0x24   : > { %898 = vmatmul.mubr.msk.bf16.gmra.mrb[8].mxu1 %vm306_vm0, %v929_v14 }
  0x25   : > { %901 = vmatprep.mubr.msk.bf16.mxu1 %vm306_vm0, %v930_v15 }
  0x2a   : > { %886 = vmatmul.mubr.msk.bf16.gmra.mrb[12].mxu0 %vm306_vm0, %v923_v13 }
  0x2c   : > { %902 = vmatmul.mubr.msk.bf16.gmra.mrb[12].mxu1 %vm306_vm0, %v931_v16 }
  0xe5   : > { %v875_v17 = vpop.f32.mrb[0].mxu0 }
  0xe6   : > { %519 = vst.msk [vmem:[%s1018_s24 + $0x10] sm:$0xff] %vm516_vm1, %v875_v17  ;;  %v389_v18 = vpop.f32.mrb[1].mxu0  ;;  %v622_v22 = vmul.f32 %v875_v17, %v875_v17  ;;  %v552_v27 = vsel %vm516_vm1, %v875_v17, 0.0 }
  0xe7   : > { %517 = vst.msk [vmem:[%s1018_s24] sm:$0xff] %vm516_vm1, %v389_v18  ;;  %v620_v19 = vmul.f32 %v389_v18, %v389_v18  ;;  %v876_v20 = vpop.f32.mrb[2].mxu0  ;;  %v549_v23 = vsel %vm516_vm1, %v389_v18, 0.0  ;;  %v1035_v36 = vpop.f32.mrb[0].mxu1 }
  0xe8   : > { %520 = vst.msk [vmem:[%s1018_s24 + $0x18] sm:$0xff] %vm516_vm1, %v876_v20  ;;  %v392_v21 = vpop.f32.mrb[3].mxu0  ;;  %v623_v29 = vmul.f32 %v876_v20, %v876_v20  ;;  %v655_v33 = vsel %vm516_vm1, %v622_v22, 0.0  ;;  %v554_v34 = vsel %vm516_vm1, %v876_v20, 0.0  ;;  %535 = vst.msk [vmem:[%s1018_s24 + $0x90] sm:$0xff] %vm516_vm1, %v1035_v36  ;;  %v1042_v40 = vpop.f32.mrb[1].mxu1 }
  0xe9   : > { %518 = vst.msk [vmem:[%s1018_s24 + $0x8] sm:$0xff] %vm516_vm1, %v392_v21  ;;  %v550_v24 = vsel %vm516_vm1, %v392_v21, 0.0  ;;  %v621_v25 = vmul.f32 %v392_v21, %v392_v21  ;;  %v652_v28 = vsel %vm516_vm1, %v620_v19, 0.0  ;;  %533 = vst.msk [vmem:[%s1018_s24 + $0x80] sm:$0xff] %vm516_vm1, %v1042_v40  ;;  %v1051_v45 = vpop.f32.mrb[2].mxu1 }
  0xea   : > { %v551_v26 = vadd.f32 %v550_v24, %v549_v23  ;;  %v657_v41 = vsel %vm516_vm1, %v623_v29, 0.0  ;;  %536 = vst.msk [vmem:[%s1018_s24 + $0x98] sm:$0xff] %vm516_vm1, %v1051_v45  ;;  %v1058_v49 = vpop.f32.mrb[3].mxu1 }
  0xeb   : > { %v653_v30 = vsel %vm516_vm1, %v621_v25, 0.0  ;;  %534 = vst.msk [vmem:[%s1018_s24 + $0x88] sm:$0xff] %vm516_vm1, %v1058_v49 }
  0xec   : > { %v553_v31 = vadd.f32 %v552_v27, %v551_v26  ;;  %v654_v32 = vadd.f32 %v653_v30, %v652_v28 }
  0xed   : > { %v879_v35 = vpop.f32.mrb[4].mxu0 }
  0xee   : > { %v656_v37 = vadd.f32 %v655_v33, %v654_v32  ;;  %523 = vst.msk [vmem:[%s1018_s24 + $0x30] sm:$0xff] %vm516_vm1, %v879_v35  ;;  %v405_v38 = vpop.f32.mrb[5].mxu0  ;;  %v555_v39 = vadd.f32 %v554_v34, %v553_v31  ;;  %v626_v50 = vmul.f32 %v879_v35, %v879_v35  ;;  %v560_v56 = vsel %vm516_vm1, %v879_v35, 0.0 }
  0xef   : > { %521 = vst.msk [vmem:[%s1018_s24 + $0x20] sm:$0xff] %vm516_vm1, %v405_v38  ;;  %v556_v42 = vsel %vm516_vm1, %v405_v38, 0.0  ;;  %v624_v43 = vmul.f32 %v405_v38, %v405_v38  ;;  %v880_v44 = vpop.f32.mrb[6].mxu0  ;;  %v1071_v0 = vpop.f32.mrb[4].mxu1 }
  0xf0   : > { %v557_v46 = vadd.f32 %v556_v42, %v555_v39  ;;  %v658_v47 = vadd.f32 %v657_v41, %v656_v37  ;;  %524 = vst.msk [vmem:[%s1018_s24 + $0x38] sm:$0xff] %vm516_vm1, %v880_v44  ;;  %v408_v48 = vpop.f32.mrb[7].mxu0  ;;  %v627_v57 = vmul.f32 %v880_v44, %v880_v44  ;;  %v663_v61 = vsel %vm516_vm1, %v626_v50, 0.0  ;;  %539 = vst.msk [vmem:[%s1018_s24 + $0xb0] sm:$0xff] %vm516_vm1, %v1071_v0  ;;  %v1078_v4 = vpop.f32.mrb[5].mxu1 }
  0xf1   : > { %v659_v51 = vsel %vm516_vm1, %v624_v43, 0.0  ;;  %522 = vst.msk [vmem:[%s1018_s24 + $0x28] sm:$0xff] %vm516_vm1, %v408_v48  ;;  %v558_v52 = vsel %vm516_vm1, %v408_v48, 0.0  ;;  %v625_v53 = vmul.f32 %v408_v48, %v408_v48  ;;  %v562_v62 = vsel %vm516_vm1, %v880_v44, 0.0  ;;  %537 = vst.msk [vmem:[%s1018_s24 + $0xa0] sm:$0xff] %vm516_vm1, %v1078_v4  ;;  %v1087_v9 = vpop.f32.mrb[6].mxu1 }
  0xf2   : > { %v660_v54 = vadd.f32 %v659_v51, %v658_v47  ;;  %v559_v55 = vadd.f32 %v558_v52, %v557_v46  ;;  %v665_v5 = vsel %vm516_vm1, %v627_v57, 0.0  ;;  %540 = vst.msk [vmem:[%s1018_s24 + $0xb8] sm:$0xff] %vm516_vm1, %v1087_v9  ;;  %v1094_v13 = vpop.f32.mrb[7].mxu1 }
  0xf3   : > { %v661_v58 = vsel %vm516_vm1, %v625_v53, 0.0  ;;  %538 = vst.msk [vmem:[%s1018_s24 + $0xa8] sm:$0xff] %vm516_vm1, %v1094_v13 }
  0xf4   : > { %v561_v59 = vadd.f32 %v560_v56, %v559_v55  ;;  %v662_v60 = vadd.f32 %v661_v58, %v660_v54  ;;  %v636_v55 = vmul.f32 %v1042_v40, %v1042_v40 }
  0xf5   : > { %v883_v63 = vpop.f32.mrb[8].mxu0 }
  0xf6   : > { %v664_v1 = vadd.f32 %v663_v61, %v662_v60  ;;  %527 = vst.msk [vmem:[%s1018_s24 + $0x50] sm:$0xff] %vm516_vm1, %v883_v63  ;;  %v421_v2 = vpop.f32.mrb[9].mxu0  ;;  %v563_v3 = vadd.f32 %v562_v62, %v561_v59  ;;  %v630_v14 = vmul.f32 %v883_v63, %v883_v63  ;;  %v568_v20 = vsel %vm516_vm1, %v883_v63, 0.0 }
  0xf7   : > { %525 = vst.msk [vmem:[%s1018_s24 + $0x40] sm:$0xff] %vm516_vm1, %v421_v2  ;;  %v564_v6 = vsel %vm516_vm1, %v421_v2, 0.0  ;;  %v628_v7 = vmul.f32 %v421_v2, %v421_v2  ;;  %v884_v8 = vpop.f32.mrb[10].mxu0  ;;  %v1107_v28 = vpop.f32.mrb[8].mxu1  ;;  %v580_v60 = vsel %vm516_vm1, %v1042_v40, 0.0 }
  0xf8   : > { %v565_v10 = vadd.f32 %v564_v6, %v563_v3  ;;  %v666_v11 = vadd.f32 %v665_v5, %v664_v1  ;;  %528 = vst.msk [vmem:[%s1018_s24 + $0x58] sm:$0xff] %vm516_vm1, %v884_v8  ;;  %v424_v12 = vpop.f32.mrb[11].mxu0  ;;  %v631_v21 = vmul.f32 %v884_v8, %v884_v8  ;;  %v671_v25 = vsel %vm516_vm1, %v630_v14, 0.0  ;;  %543 = vst.msk [vmem:[%s1018_s24 + $0xd0] sm:$0xff] %vm516_vm1, %v1107_v28  ;;  %v1114_v32 = vpop.f32.mrb[9].mxu1 }
  0xf9   : > { %v667_v15 = vsel %vm516_vm1, %v628_v7, 0.0  ;;  %526 = vst.msk [vmem:[%s1018_s24 + $0x48] sm:$0xff] %vm516_vm1, %v424_v12  ;;  %v566_v16 = vsel %vm516_vm1, %v424_v12, 0.0  ;;  %v629_v17 = vmul.f32 %v424_v12, %v424_v12  ;;  %v570_v26 = vsel %vm516_vm1, %v884_v8, 0.0  ;;  %541 = vst.msk [vmem:[%s1018_s24 + $0xc0] sm:$0xff] %vm516_vm1, %v1114_v32  ;;  %v1123_v38 = vpop.f32.mrb[10].mxu1 }
  0xfa   : > { %v668_v18 = vadd.f32 %v667_v15, %v666_v11  ;;  %v567_v19 = vadd.f32 %v566_v16, %v565_v10  ;;  %v673_v33 = vsel %vm516_vm1, %v631_v21, 0.0  ;;  %544 = vst.msk [vmem:[%s1018_s24 + $0xd8] sm:$0xff] %vm516_vm1, %v1123_v38  ;;  %v1130_v43 = vpop.f32.mrb[11].mxu1  ;;  %v683_v3 = vsel %vm516_vm1, %v636_v55, 0.0 }
  0xfb   : > { %v669_v22 = vsel %vm516_vm1, %v629_v17, 0.0  ;;  %542 = vst.msk [vmem:[%s1018_s24 + $0xc8] sm:$0xff] %vm516_vm1, %v1130_v43  ;;  %v637_v5 = vmul.f32 %v1058_v49, %v1058_v49  ;;  %v638_v10 = vmul.f32 %v1035_v36, %v1035_v36  ;;  %v582_v11 = vsel %vm516_vm1, %v1058_v49, 0.0 }
  0xfc   : > { %v569_v23 = vadd.f32 %v568_v20, %v567_v19  ;;  %v670_v24 = vadd.f32 %v669_v22, %v668_v18  ;;  %v584_v14 = vsel %vm516_vm1, %v1035_v36, 0.0  ;;  %v639_v17 = vmul.f32 %v1051_v45, %v1051_v45 }
  0xfd   : > { %v887_v27 = vpop.f32.mrb[12].mxu0  ;;  %v685_v18 = vsel %vm516_vm1, %v637_v5, 0.0  ;;  %v640_v19 = vmul.f32 %v1078_v4, %v1078_v4  ;;  %v687_v22 = vsel %vm516_vm1, %v638_v10, 0.0  ;;  %v586_v36 = vsel %vm516_vm1, %v1051_v45, 0.0 }
  0xfe   : > { %v672_v29 = vadd.f32 %v671_v25, %v670_v24  ;;  %531 = vst.msk [vmem:[%s1018_s24 + $0x70] sm:$0xff] %vm516_vm1, %v887_v27  ;;  %v437_v30 = vpop.f32.mrb[13].mxu0  ;;  %v571_v31 = vadd.f32 %v570_v26, %v569_v23  ;;  %v634_v44 = vmul.f32 %v887_v27, %v887_v27  ;;  %v576_v52 = vsel %vm516_vm1, %v887_v27, 0.0 }
  0xff   : > { %529 = vst.msk [vmem:[%s1018_s24 + $0x60] sm:$0xff] %vm516_vm1, %v437_v30  ;;  %v572_v34 = vsel %vm516_vm1, %v437_v30, 0.0  ;;  %v632_v35 = vmul.f32 %v437_v30, %v437_v30  ;;  %v888_v37 = vpop.f32.mrb[14].mxu0  ;;  %v1147_v61 = vpop.f32.mrb[12].mxu1  ;;  %v588_v23 = vsel %vm516_vm1, %v1078_v4, 0.0  ;;  %v689_v26 = vsel %vm516_vm1, %v639_v17, 0.0 }
 0x100   : > { %v573_v39 = vadd.f32 %v572_v34, %v571_v31  ;;  %v674_v41 = vadd.f32 %v673_v33, %v672_v29  ;;  %532 = vst.msk [vmem:[%s1018_s24 + $0x78] sm:$0xff] %vm516_vm1, %v888_v37  ;;  %v440_v42 = vpop.f32.mrb[15].mxu0  ;;  %v635_v53 = vmul.f32 %v888_v37, %v888_v37  ;;  %v679_v58 = vsel %vm516_vm1, %v634_v44, 0.0  ;;  %547 = vst.msk [vmem:[%s1018_s24 + $0xf0] sm:$0xff] %vm516_vm1, %v1147_v61  ;;  %v1152_v1 = vpop.f32.mrb[13].mxu1 }
 0x101   : > { %v675_v46 = vsel %vm516_vm1, %v632_v35, 0.0  ;;  %530 = vst.msk [vmem:[%s1018_s24 + $0x68] sm:$0xff] %vm516_vm1, %v440_v42  ;;  %v574_v47 = vsel %vm516_vm1, %v440_v42, 0.0  ;;  %v633_v48 = vmul.f32 %v440_v42, %v440_v42  ;;  %v578_v59 = vsel %vm516_vm1, %v888_v37, 0.0  ;;  %545 = vst.msk [vmem:[%s1018_s24 + $0xe0] sm:$0xff] %vm516_vm1, %v1152_v1  ;;  %v1161_v40 = vpop.f32.mrb[14].mxu1 }
 0x102   : > { %v676_v50 = vadd.f32 %v675_v46, %v674_v41  ;;  %v575_v51 = vadd.f32 %v574_v47, %v573_v39  ;;  %v681_v2 = vsel %vm516_vm1, %v635_v53, 0.0  ;;  %548 = vst.msk [vmem:[%s1018_s24 + $0xf8] sm:$0xff] %vm516_vm1, %v1161_v40  ;;  %v1166_v8 = vpop.f32.mrb[15].mxu1  ;;  %v651_v12 = vmul.f32 %v1161_v40, %v1161_v40 }
 0x103   : > { %v677_v54 = vsel %vm516_vm1, %v633_v48, 0.0  ;;  %546 = vst.msk [vmem:[%s1018_s24 + $0xe8] sm:$0xff] %vm516_vm1, %v1166_v8  ;;  %v691_v27 = vsel %vm516_vm1, %v640_v19, 0.0  ;;  %v641_v29 = vmul.f32 %v1094_v13, %v1094_v13  ;;  %v642_v33 = vmul.f32 %v1071_v0, %v1071_v0 }
 0x104   : > { %v577_v56 = vadd.f32 %v576_v52, %v575_v51  ;;  %v678_v57 = vadd.f32 %v677_v54, %v676_v50  ;;  %v1185_v49 = vsel %vm516_vm1, %v651_v12, 0.0  ;;  %v590_v45 = vsel %vm516_vm1, %v1094_v13, 0.0 }
 0x105   : > { %v592_v4 = vsel %vm516_vm1, %v1071_v0, 0.0  ;;  %v643_v37 = vmul.f32 %v1087_v9, %v1087_v9  ;;  %v693_v39 = vsel %vm516_vm1, %v641_v29, 0.0  ;;  %v644_v41 = vmul.f32 %v1114_v32, %v1114_v32 }
 0x106   : > { %v680_v62 = vadd.f32 %v679_v58, %v678_v57  ;;  %v579_v63 = vadd.f32 %v578_v59, %v577_v56  ;;  %v695_v46 = vsel %vm516_vm1, %v642_v33, 0.0  ;;  %v594_v13 = vsel %vm516_vm1, %v1087_v9, 0.0 }
 0x107   : > { %v596_v47 = vsel %vm516_vm1, %v1114_v32, 0.0  ;;  %v697_v50 = vsel %vm516_vm1, %v643_v37, 0.0  ;;  %v699_v51 = vsel %vm516_vm1, %v644_v41, 0.0  ;;  %v645_v52 = vmul.f32 %v1130_v43, %v1130_v43 }
 0x108   : > { %v581_v6 = vadd.f32 %v580_v60, %v579_v63  ;;  %v682_v7 = vadd.f32 %v681_v2, %v680_v62  ;;  %v646_v55 = vmul.f32 %v1107_v28, %v1107_v28  ;;  %v598_v9 = vsel %vm516_vm1, %v1130_v43, 0.0 }
 0x109   : > { %v600_v32 = vsel %vm516_vm1, %v1107_v28, 0.0  ;;  %v647_v58 = vmul.f32 %v1123_v38, %v1123_v38  ;;  %v701_v59 = vsel %vm516_vm1, %v645_v52, 0.0  ;;  %v648_v60 = vmul.f32 %v1152_v1, %v1152_v1 }
 0x10a   : > { %v684_v15 = vadd.f32 %v683_v3, %v682_v7  ;;  %v583_v16 = vadd.f32 %v582_v11, %v581_v6  ;;  %v703_v2 = vsel %vm516_vm1, %v646_v55, 0.0  ;;  %v602_v43 = vsel %vm516_vm1, %v1123_v38, 0.0 }
 0x10b   : > { %v604_v3 = vsel %vm516_vm1, %v1152_v1, 0.0  ;;  %v705_v6 = vsel %vm516_vm1, %v647_v58, 0.0  ;;  %v707_v7 = vsel %vm516_vm1, %v648_v60, 0.0  ;;  %v649_v10 = vmul.f32 %v1166_v8, %v1166_v8 }
 0x10c   : > { %v585_v20 = vadd.f32 %v584_v14, %v583_v16  ;;  %v686_v21 = vadd.f32 %v685_v18, %v684_v15  ;;  %v650_v14 = vmul.f32 %v1147_v61, %v1147_v61  ;;  %v606_v38 = vsel %vm516_vm1, %v1166_v8, 0.0 }
 0x10d   : > { %v608_v16 = vsel %vm516_vm1, %v1147_v61, 0.0  ;;  %v709_v17 = vsel %vm516_vm1, %v649_v10, 0.0 }
 0x10e   : > { %v688_v24 = vadd.f32 %v687_v22, %v686_v21  ;;  %v587_v25 = vadd.f32 %v586_v36, %v585_v20  ;;  %v711_v20 = vsel %vm516_vm1, %v650_v14, 0.0  ;;  %v610_v21 = vsel %vm516_vm1, %v1161_v40, 0.0 }
 0x110   : > { %v589_v30 = vadd.f32 %v588_v23, %v587_v25  ;;  %v690_v31 = vadd.f32 %v689_v26, %v688_v24 }
 0x112   : > { %v692_v34 = vadd.f32 %v691_v27, %v690_v31  ;;  %v591_v35 = vadd.f32 %v590_v45, %v589_v30 }
 0x114   : > { %v593_v42 = vadd.f32 %v592_v4, %v591_v35  ;;  %v694_v44 = vadd.f32 %v693_v39, %v692_v34 }
 0x116   : > { %v696_v48 = vadd.f32 %v695_v46, %v694_v44  ;;  %v595_v0 = vadd.f32 %v594_v13, %v593_v42 }
 0x118   : > { %v597_v53 = vadd.f32 %v596_v47, %v595_v0  ;;  %v698_v54 = vadd.f32 %v697_v50, %v696_v48 }
 0x11a   : > { %v700_v56 = vadd.f32 %v699_v51, %v698_v54  ;;  %v599_v57 = vadd.f32 %v598_v9, %v597_v53 }
 0x11c   : > { %v601_v62 = vadd.f32 %v600_v32, %v599_v57  ;;  %v702_v63 = vadd.f32 %v701_v59, %v700_v56 }
 0x11e   : > { %v704_v5 = vadd.f32 %v703_v2, %v702_v63  ;;  %v603_v28 = vadd.f32 %v602_v43, %v601_v62 }
 0x120   : > { %v605_v11 = vadd.f32 %v604_v3, %v603_v28  ;;  %v706_v12 = vadd.f32 %v705_v6, %v704_v5 }
 0x122   : > { %v708_v1 = vadd.f32 %v707_v7, %v706_v12  ;;  %v607_v15 = vadd.f32 %v606_v38, %v605_v11 }
 0x124   : > { %v609_v18 = vadd.f32 %v608_v16, %v607_v15  ;;  %v710_v19 = vadd.f32 %v709_v17, %v708_v1 }
 0x126   : > { %v611_v22 = vadd.f32 %v610_v21, %v609_v18  ;;  %v712_v36 = vadd.f32 %v711_v20, %v710_v19 }
 0x128   : > { %v612_v23 = vrot.slane %v611_v22, 4  ;;  %v714_v8 = vadd.f32 %v1185_v49, %v712_v36 }
 0x12a   : > { %v613_v24 = vadd.f32 %v612_v23, %v611_v22  ;;  %v715_v25 = vrot.slane %v714_v8, 4 }
 0x12c   : > { %v614_v26 = vrot.slane %v613_v24, 2  ;;  %v716_v61 = vadd.f32 %v715_v25, %v714_v8 }
 0x12e   : > { %v615_v27 = vadd.f32 %v614_v26, %v613_v24  ;;  %v717_v29 = vrot.slane %v716_v61, 2 }
 0x130   : > { %v616_v30 = vrot.slane %v615_v27, 1  ;;  %v718_v31 = vadd.f32 %v717_v29, %v716_v61 }
 0x132   : > { %v617_v40 = vadd.f32 %v616_v30, %v615_v27  ;;  %v719_v33 = vrot.slane %v718_v31, 1 }
 0x134   : > { %619 = vst.msk [vmem:[%s184_s28] sm:$0x1] %vm618_vm2, %v617_v40  ;;  %v720_v45 = vadd.f32 %v719_v33, %v718_v31 }
 0x136   : > { %721 = vst.msk [vmem:[%s184_s28 + $0x1] sm:$0x1] %vm618_vm2, %v720_v45 }
 0x137 PF: > { %s14_s12 = sadd.s32 1, %s938_s12  }
 0x138   : > { %p11_p5 = scmp.ge.s32.totalorder %s14_s12, 4  }
 0x13a   :  { %13 = sbr.rel (!%p11_p5) target bundleno = 1 (0x1), region = 70 }

// kernel: spatial_pyramid_pooling.5
= control target key start
LH: loop header
LB: loop body
LE: loop exit
PB: predicated region body
PF: predicated region fallthrough
CT: control target
= control target key end

     0   :  { %s4657_s18 = smov 0   ;;  %s5711_s0 = inlined_call_operand.vmem [shape: f32[2,256,8], index: 0, kind: input, shape index: {}]   ;;  %s5712_s1 = inlined_call_operand.vmem [shape: f32[1,8], index: 1, kind: input, shape index: {}]   ;;  %s5713_s2 = inlined_call_operand.vmem [shape: f32[1,8], index: 2, kind: input, shape index: {}]   ;;  %s5714_s3 = inlined_call_operand.vmem [shape: bf16[9,8,16], index: 3, kind: input, shape index: {}]   ;;  %s5715_s4 = inlined_call_operand.vmem [shape: f32[2,256,16], index: 4, kind: output, shape index: {0}]   ;;  %s5716_s5 = inlined_call_operand.vmem [shape: f32[2,2,16], index: 5, kind: output, shape index: {1}]  }
   0x1 LB: > { %s3970_s19 = sadd.s32 4294967295, %s4624_s18   ;;  %p3974_p0 = scmp.ge.s32.totalorder %s4624_s18, 1  ;;  %s4624_s18 = sphi %s4657_s18, %s16_s18  }
   0x2   : > { %p190_p1 = scmp.lt.s32.totalorder %s4624_s18, 3 }
   0x4   : > { %p191_p2 = pnand %p3974_p0, %p190_p1 }
   0x5   : > { %v535_v0 = vld [vmem:[%s5714_s3] sm:$0xf] (!%p191_p2)  ;;  %vm584_vm0 = vcmask (!%p191_p2), 1043456   ;;  %p222_p3 = scmp.lt.s32.totalorder (!%p191_p2), %s3970_s19, 1  ;;  %vm411_vm1 = vcmask (!%p191_p2), 64512   ;;  %vm430_vm2 = vcmask (!%p191_p2), 58368  }
   0x6   : > { %194 = sbr.rel (%p191_p2) target bundleno = 579 (0x243), region = 36  ;;  %4600 = vmatprep.subr.msk.bf16.mxu1 (!%p191_p2), %vm584_vm0, %v535_v0  ;;  %v586_v1 = vsel (!%p191_p2), %vm584_vm0, %v535_v0, 0  ;;  %4599 = vmatprep.subr.msk.bf16.mxu0 (!%p191_p2), %vm584_vm0, %v535_v0  ;;  %v4626_v2 = vmov (!%p191_p2), 0.0   ;;  %v3998_v3 = vld [vmem:[%s5714_s3 + $0x4] sm:$0xf] (!%p191_p2)  ;;  %vm749_vm3 = vcmask (!%p191_p2), 130048  }
   0x7   : > { %4598 = vmatpush3.bf16.msra.mxu1 (!%p191_p2), %v586_v1  ;;  %420 = vst.msk [vmem:[#allocation2 + $0x100] sm:$0xff] (!%p191_p2), %vm411_vm1, %v4626_v2  ;;  %412 = vst.msk [vmem:[#allocation2] sm:$0xff] (!%p191_p2), %vm411_vm1, %v4626_v2  ;;  %4292 = vmatpush3.bf16.msra.mxu0 (!%p191_p2), %v586_v1  ;;  %v4015_v4 = vld [vmem:[%s5714_s3 + $0x8] sm:$0xf] (!%p191_p2)  ;;  %v4725_v5 = vld [vmem:[%s5712_s1] ss:$0 sm:$0xff] (!%p191_p2) }
   0x8   : > { %413 = vst.msk [vmem:[#allocation2 + $0x20] sm:$0xff] (!%p191_p2), %vm411_vm1, %v4626_v2  ;;  %414 = vst.msk [vmem:[#allocation2 + $0x40] sm:$0xff] (!%p191_p2), %vm411_vm1, %v4626_v2  ;;  %4601 = vmatprep.subr.msk.bf16.mxu1 (!%p191_p2), %vm584_vm0, %v3998_v3  ;;  %4602 = vmatprep.subr.msk.bf16.mxu0 (!%p191_p2), %vm584_vm0, %v4015_v4  ;;  %v4737_v6 = vld [vmem:[%s5713_s2] ss:$0 sm:$0xff] (!%p191_p2)  ;;  %v4747_v14 = vsel (!%p191_p2), %vm584_vm0, %v3998_v3, 0  ;;  %v4757_v22 = vsel (!%p191_p2), %vm584_vm0, %v4015_v4, 0 }
   0x9   : > { %415 = vst.msk [vmem:[#allocation2 + $0x60] sm:$0xff] (!%p191_p2), %vm411_vm1, %v4626_v2  ;;  %416 = vst.msk [vmem:[#allocation2 + $0x80] sm:$0xff] (!%p191_p2), %vm411_vm1, %v4626_v2  ;;  %vm3780_vm4 = vcmask (!%p191_p2), 122880  }
   0xa   : > { %417 = vst.msk [vmem:[#allocation2 + $0xa0] sm:$0xff] (!%p191_p2), %vm411_vm1, %v4626_v2  ;;  %418 = vst.msk [vmem:[#allocation2 + $0xc0] sm:$0xff] (!%p191_p2), %vm411_vm1, %v4626_v2 }
   0xb   : > { %419 = vst.msk [vmem:[#allocation2 + $0xe0] sm:$0xff] (!%p191_p2), %vm411_vm1, %v4626_v2  ;;  %421 = vst.msk [vmem:[#allocation2 + $0x120] sm:$0xff] (!%p191_p2), %vm411_vm1, %v4626_v2 }
   0xc   : > { %422 = vst.msk [vmem:[#allocation2 + $0x140] sm:$0xff] (!%p191_p2), %vm411_vm1, %v4626_v2  ;;  %423 = vst.msk [vmem:[#allocation2 + $0x160] sm:$0xff] (!%p191_p2), %vm411_vm1, %v4626_v2 }
   0xd   : > { %s5718_s19 = smov (!%p222_p3, %s3970_s19), 1  ;;  %424 = vst.msk [vmem:[#allocation2 + $0x180] sm:$0xff] %vm411_vm1, %v4626_v2  ;;  %425 = vst.msk [vmem:[#allocation2 + $0x1a0] sm:$0xff] %vm411_vm1, %v4626_v2 }
   0xe   : > { %426 = vst.msk [vmem:[#allocation2 + $0x1c0] sm:$0xff] %vm411_vm1, %v4626_v2  ;;  %427 = vst.msk [vmem:[#allocation2 + $0x1e0] sm:$0xff] %vm411_vm1, %v4626_v2  ;;  %s4136_s26 = sshll.u32 %s5718_s19, 8 }
   0xf   : > { %428 = vst.msk [vmem:[#allocation2 + $0x200] sm:$0xff] %vm411_vm1, %v4626_v2  ;;  %429 = vst.msk [vmem:[#allocation2 + $0x220] sm:$0xff] %vm411_vm1, %v4626_v2  ;;  %s4732_s6 = scalar_lea.vmem %s5711_s0, %s4136_s26  ;;  %s5513_s25 = scalar_lea.vmem %s5715_s4, %s4136_s26 }
  0x10   : > { %449 = vst.msk [vmem:[#allocation2 + $0x8] sm:$0xff] %vm411_vm1, %v4626_v2  ;;  %450 = vst.msk [vmem:[#allocation2 + $0x10] sm:$0xff] %vm411_vm1, %v4626_v2  ;;  %v251_v7 = vld [vmem:[%s4732_s6 + $0x70] sm:$0xff]  ;;  %v252_v8 = vld [vmem:[%s4732_s6 + $0x78] sm:$0xff]  ;;  %s3979_s26 = sshll.u32 %s5718_s19, 1 }
  0x11   : > { %452 = vst.msk [vmem:[#allocation2 + $0x228] sm:$0xff] %vm411_vm1, %v4626_v2  ;;  %453 = vst.msk [vmem:[#allocation2 + $0x230] sm:$0xff] %vm411_vm1, %v4626_v2  ;;  %v253_v9 = vld [vmem:[%s4732_s6 + $0x80] sm:$0xff]  ;;  %v290_v10 = vmul.f32 %v4725_v5, %v251_v7  ;;  %v291_v11 = vmul.f32 %v4725_v5, %v252_v8  ;;  %v254_v12 = vld [vmem:[%s4732_s6 + $0x88] sm:$0xff]  ;;  %s235_s29 = scalar_lea.vmem %s5716_s5, %s3979_s26 }
  0x12   : > { %431 = vst.msk [vmem:[#allocation2 + $0x18] sm:$0x3] %vm430_vm2, %v4626_v2  ;;  %432 = vst.msk [vmem:[#allocation2 + $0x38] sm:$0x3] %vm430_vm2, %v4626_v2  ;;  %v292_v13 = vmul.f32 %v4725_v5, %v253_v9  ;;  %v237_v15 = vld [vmem:[%s4732_s6] sm:$0xff]  ;;  %v238_v16 = vld [vmem:[%s4732_s6 + $0x8] sm:$0xff]  ;;  %v293_v17 = vmul.f32 %v4725_v5, %v254_v12 }
  0x13   : > { %433 = vst.msk [vmem:[#allocation2 + $0x58] sm:$0x3] %vm430_vm2, %v4626_v2  ;;  %434 = vst.msk [vmem:[#allocation2 + $0x78] sm:$0x3] %vm430_vm2, %v4626_v2  ;;  %v276_v18 = vmul.f32 %v4725_v5, %v237_v15  ;;  %v277_v19 = vmul.f32 %v4725_v5, %v238_v16  ;;  %v255_v20 = vld [vmem:[%s4732_s6 + $0x90] sm:$0xff]  ;;  %v256_v21 = vld [vmem:[%s4732_s6 + $0x98] sm:$0xff]  ;;  %v329_v23 = vadd.f32 %v4737_v6, %v290_v10 }
  0x14   : > { %435 = vst.msk [vmem:[#allocation2 + $0x98] sm:$0x3] %vm430_vm2, %v4626_v2  ;;  %436 = vst.msk [vmem:[#allocation2 + $0xb8] sm:$0x3] %vm430_vm2, %v4626_v2  ;;  %v330_v24 = vadd.f32 %v4737_v6, %v291_v11  ;;  %v331_v25 = vadd.f32 %v4737_v6, %v292_v13  ;;  %v294_v28 = vmul.f32 %v4725_v5, %v255_v20  ;;  %v257_v33 = vld [vmem:[%s4732_s6 + $0xa0] sm:$0xff]  ;;  %v258_v34 = vld [vmem:[%s4732_s6 + $0xa8] sm:$0xff] }
  0x15   : > { %437 = vst.msk [vmem:[#allocation2 + $0xd8] sm:$0x3] %vm430_vm2, %v4626_v2  ;;  %438 = vst.msk [vmem:[#allocation2 + $0xf8] sm:$0x3] %vm430_vm2, %v4626_v2  ;;  %v332_v29 = vadd.f32 %v4737_v6, %v293_v17  ;;  %v315_v31 = vadd.f32 %v4737_v6, %v276_v18  ;;  %v316_v32 = vadd.f32 %v4737_v6, %v277_v19  ;;  %v239_v35 = vld [vmem:[%s4732_s6 + $0x10] sm:$0xff]  ;;  %v240_v48 = vld [vmem:[%s4732_s6 + $0x18] sm:$0xff] }
  0x16   : > { %439 = vst.msk [vmem:[#allocation2 + $0x118] sm:$0x3] %vm430_vm2, %v4626_v2  ;;  %440 = vst.msk [vmem:[#allocation2 + $0x138] sm:$0x3] %vm430_vm2, %v4626_v2  ;;  %v361_v36 = vmul.f32 0.01, %v329_v23  ;;  %v295_v39 = vmul.f32 %v4725_v5, %v256_v21  ;;  %v333_v43 = vadd.f32 %v4737_v6, %v294_v28  ;;  %v296_v56 = vmul.f32 %v4725_v5, %v257_v33 }
  0x17   : > { %441 = vst.msk [vmem:[#allocation2 + $0x158] sm:$0x3] %vm430_vm2, %v4626_v2  ;;  %442 = vst.msk [vmem:[#allocation2 + $0x178] sm:$0x3] %vm430_vm2, %v4626_v2  ;;  %v487_v26 = vld [vmem:[#allocation2 + $0x7] sm:$0xff]  ;;  %v488_v27 = vld [vmem:[#allocation2 + $0xf] sm:$0xff]  ;;  %v297_v57 = vmul.f32 %v4725_v5, %v258_v34  ;;  %v278_v58 = vmul.f32 %v4725_v5, %v239_v35  ;;  %v279_v61 = vmul.f32 %v4725_v5, %v240_v48 }
  0x18   : > { %443 = vst.msk [vmem:[#allocation2 + $0x198] sm:$0x3] %vm430_vm2, %v4626_v2  ;;  %444 = vst.msk [vmem:[#allocation2 + $0x1b8] sm:$0x3] %vm430_vm2, %v4626_v2  ;;  %v519_v30 = vpack.c.bf16 %v488_v27, %v487_v26  ;;  %v362_v37 = vmul.f32 0.01, %v330_v24  ;;  %v393_v44 = vmax.f32 %v329_v23, %v361_v36  ;;  %v334_v47 = vadd.f32 %v4737_v6, %v295_v39 }
  0x19   : > { %445 = vst.msk [vmem:[#allocation2 + $0x1d8] sm:$0x3] %vm430_vm2, %v4626_v2  ;;  %446 = vst.msk [vmem:[#allocation2 + $0x1f8] sm:$0x3] %vm430_vm2, %v4626_v2  ;;  %v363_v38 = vmul.f32 0.01, %v331_v25  ;;  %v336_v3 = vadd.f32 %v4737_v6, %v297_v57  ;;  %v317_v4 = vadd.f32 %v4737_v6, %v278_v58  ;;  %v318_v7 = vadd.f32 %v4737_v6, %v279_v61 }
  0x1a   : > { %447 = vst.msk [vmem:[#allocation2 + $0x218] sm:$0x3] %vm430_vm2, %v4626_v2  ;;  %448 = vst.msk [vmem:[#allocation2 + $0x238] sm:$0x3] %vm430_vm2, %v4626_v2  ;;  %v364_v40 = vmul.f32 0.01, %v332_v29  ;;  %4293 = vmatprep.mubr.msk.bf16.mxu0 %vm411_vm1, %v519_v30  ;;  %v394_v45 = vmax.f32 %v330_v24, %v362_v37  ;;  %v335_v2 = vadd.f32 %v4737_v6, %v296_v56 }
  0x1b   : > { %v347_v41 = vmul.f32 0.01, %v315_v31  ;;  %v348_v42 = vmul.f32 0.01, %v316_v32  ;;  %v395_v46 = vmax.f32 %v331_v25, %v363_v38  ;;  %v241_v49 = vld [vmem:[%s4732_s6 + $0x20] sm:$0xff]  ;;  %v242_v50 = vld [vmem:[%s4732_s6 + $0x28] sm:$0xff] }
  0x1c   : > { %v396_v51 = vmax.f32 %v332_v29, %v364_v40  ;;  %v365_v54 = vmul.f32 0.01, %v333_v43  ;;  %469 = vst.msk [vmem:[#allocation2 + $0x108] sm:$0xff] %vm411_vm1, %v393_v44  ;;  %470 = vst.msk [vmem:[#allocation2 + $0x110] sm:$0xff] %vm411_vm1, %v394_v45  ;;  %v366_v55 = vmul.f32 0.01, %v334_v47  ;;  %v280_v62 = vmul.f32 %v4725_v5, %v241_v49 }
  0x1d   : > { %v379_v52 = vmax.f32 %v315_v31, %v347_v41  ;;  %v380_v53 = vmax.f32 %v316_v32, %v348_v42  ;;  %471 = vst.msk [vmem:[#allocation2 + $0x128] sm:$0xff] %vm411_vm1, %v395_v46  ;;  %v259_v59 = vld [vmem:[%s4732_s6 + $0xb0] sm:$0xff]  ;;  %v281_v63 = vmul.f32 %v4725_v5, %v242_v50  ;;  %v260_v0 = vld [vmem:[%s4732_s6 + $0xb8] sm:$0xff]  ;;  %v261_v11 = vld [vmem:[%s4732_s6 + $0xc0] sm:$0xff]  ;;  %v367_v13 = vmul.f32 0.01, %v335_v2 }
  0x1e   : > { %472 = vst.msk [vmem:[#allocation2 + $0x130] sm:$0xff] %vm411_vm1, %v396_v51  ;;  %v397_v60 = vmax.f32 %v333_v43, %v365_v54  ;;  %v398_v1 = vmax.f32 %v334_v47, %v366_v55  ;;  %v319_v8 = vadd.f32 %v4737_v6, %v280_v62  ;;  %v298_v10 = vmul.f32 %v4725_v5, %v259_v59  ;;  %v262_v12 = vld [vmem:[%s4732_s6 + $0xc8] sm:$0xff]  ;;  %v243_v18 = vld [vmem:[%s4732_s6 + $0x30] sm:$0xff]  ;;  %v244_v28 = vld [vmem:[%s4732_s6 + $0x38] sm:$0xff] }
  0x1f   : > { %455 = vst.msk [vmem:[#allocation2 + $0x28] sm:$0xff] %vm411_vm1, %v379_v52  ;;  %456 = vst.msk [vmem:[#allocation2 + $0x30] sm:$0xff] %vm411_vm1, %v380_v53  ;;  %v320_v9 = vadd.f32 %v4737_v6, %v281_v63  ;;  %v368_v15 = vmul.f32 0.01, %v336_v3  ;;  %v349_v16 = vmul.f32 0.01, %v317_v4  ;;  %v299_v17 = vmul.f32 %v4725_v5, %v260_v0 }
  0x20   : > { %473 = vst.msk [vmem:[#allocation2 + $0x148] sm:$0xff] %vm411_vm1, %v397_v60  ;;  %474 = vst.msk [vmem:[#allocation2 + $0x150] sm:$0xff] %vm411_vm1, %v398_v1  ;;  %v350_v19 = vmul.f32 0.01, %v318_v7  ;;  %v351_v20 = vmul.f32 0.01, %v319_v8  ;;  %v337_v23 = vadd.f32 %v4737_v6, %v298_v10  ;;  %v399_v24 = vmax.f32 %v335_v2, %v367_v13 }
  0x21   : > { %v352_v21 = vmul.f32 0.01, %v320_v9  ;;  %v400_v25 = vmax.f32 %v336_v3, %v368_v15  ;;  %v381_v26 = vmax.f32 %v317_v4, %v349_v16  ;;  %v338_v27 = vadd.f32 %v4737_v6, %v299_v17  ;;  %v245_v29 = vld [vmem:[%s4732_s6 + $0x40] sm:$0xff]  ;;  %v246_v30 = vld [vmem:[%s4732_s6 + $0x48] sm:$0xff]  ;;  %v263_v55 = vld [vmem:[%s4732_s6 + $0xd0] sm:$0xff] }
  0x22   : > { %v382_v34 = vmax.f32 %v318_v7, %v350_v19  ;;  %v383_v35 = vmax.f32 %v319_v8, %v351_v20  ;;  %v369_v37 = vmul.f32 0.01, %v337_v23  ;;  %475 = vst.msk [vmem:[#allocation2 + $0x168] sm:$0xff] %vm411_vm1, %v399_v24  ;;  %v300_v43 = vmul.f32 %v4725_v5, %v261_v11  ;;  %v4826_v49 = vld [vmem:[%s5714_s3 + $0xc] sm:$0xf]  ;;  %v264_v61 = vld [vmem:[%s4732_s6 + $0xd8] sm:$0xff] }
  0x23   : > { %v503_v31 = vld [vmem:[#allocation2 + $0x107] sm:$0xff]  ;;  %v504_v32 = vld [vmem:[#allocation2 + $0x10f] sm:$0xff]  ;;  %v384_v36 = vmax.f32 %v320_v9, %v352_v21  ;;  %476 = vst.msk [vmem:[#allocation2 + $0x170] sm:$0xff] %vm411_vm1, %v400_v25  ;;  %457 = vst.msk [vmem:[#allocation2 + $0x48] sm:$0xff] %vm411_vm1, %v381_v26  ;;  %v370_v42 = vmul.f32 0.01, %v338_v27  ;;  %v301_v44 = vmul.f32 %v4725_v5, %v262_v12  ;;  %v282_v48 = vmul.f32 %v4725_v5, %v243_v18 }
  0x24   : > { %v505_v33 = vld [vmem:[#allocation2 + $0x127] sm:$0xff]  ;;  %v4808_v38 = vpack.c.bf16 %v504_v32, %v503_v31  ;;  %458 = vst.msk [vmem:[#allocation2 + $0x50] sm:$0xff] %vm411_vm1, %v382_v34  ;;  %459 = vst.msk [vmem:[#allocation2 + $0x68] sm:$0xff] %vm411_vm1, %v383_v35  ;;  %v401_v47 = vmax.f32 %v337_v23, %v369_v37  ;;  %v339_v52 = vadd.f32 %v4737_v6, %v300_v43  ;;  %v4837_v56 = vld [vmem:[%s5714_s3 + $0x10] sm:$0xf] }
  0x25   : > { %v506_v39 = vld [vmem:[#allocation2 + $0x12f] sm:$0xff]  ;;  %460 = vst.msk [vmem:[#allocation2 + $0x70] sm:$0xff] %vm411_vm1, %v384_v36  ;;  %v402_v51 = vmax.f32 %v338_v27, %v370_v42  ;;  %v340_v53 = vadd.f32 %v4737_v6, %v301_v44  ;;  %v283_v54 = vmul.f32 %v4725_v5, %v244_v28  ;;  %v321_v58 = vadd.f32 %v4737_v6, %v282_v48  ;;  %v265_v2 = vld [vmem:[%s4732_s6 + $0xe0] sm:$0xff]  ;;  %v248_v13 = vld [vmem:[%s4732_s6 + $0x58] sm:$0xff] }
  0x26   : > { %v489_v40 = vld [vmem:[#allocation2 + $0x27] sm:$0xff]  ;;  %v490_v41 = vld [vmem:[#allocation2 + $0x2f] sm:$0xff]  ;;  %v4815_v45 = vpack.c.bf16 %v506_v39, %v505_v33  ;;  %4309 = vmatprep.mubr.msk.bf16.mxu1 %vm411_vm1, %v4808_v38  ;;  %477 = vst.msk [vmem:[#allocation2 + $0x188] sm:$0xff] %vm411_vm1, %v401_v47  ;;  %v284_v59 = vmul.f32 %v4725_v5, %v245_v29  ;;  %v285_v60 = vmul.f32 %v4725_v5, %v246_v30  ;;  %v371_v63 = vmul.f32 0.01, %v339_v52 }
  0x27   : > { %v4817_v46 = vpack.c.bf16 %v490_v41, %v489_v40  ;;  %v507_v50 = vld [vmem:[#allocation2 + $0x147] sm:$0xff]  ;;  %v508_v57 = vld [vmem:[#allocation2 + $0x14f] sm:$0xff]  ;;  %478 = vst.msk [vmem:[#allocation2 + $0x190] sm:$0xff] %vm411_vm1, %v402_v51  ;;  %v372_v0 = vmul.f32 0.01, %v340_v53  ;;  %v322_v1 = vadd.f32 %v4737_v6, %v283_v54  ;;  %v303_v10 = vmul.f32 %v4725_v5, %v264_v61 }
  0x28   : > { %4310 = vmatmul.mubr.msk.bf16.vlgmr.msra.gmra.mrb[0].mxu1 %vm411_vm1, %v4815_v45  ;;  %v4849_v62 = vpack.c.bf16 %v508_v57, %v507_v50  ;;  %v353_v3 = vmul.f32 0.01, %v321_v58  ;;  %v323_v4 = vadd.f32 %v4737_v6, %v284_v59  ;;  %v324_v7 = vadd.f32 %v4737_v6, %v285_v60  ;;  %v266_v11 = vld [vmem:[%s4732_s6 + $0xe8] sm:$0xff]  ;;  %v247_v12 = vld [vmem:[%s4732_s6 + $0x50] sm:$0xff]  ;;  %v249_v40 = vld [vmem:[%s4732_s6 + $0x60] sm:$0xff] }
  0x29   : > { %4294 = vmatmul.mubr.msk.bf16.vlgmr.msra.gmra.mrb[0].mxu0 %vm411_vm1, %v4817_v46  ;;  %4326 = vmatpush3.bf16.msra.mxu1 %v4747_v14  ;;  %v302_v14 = vmul.f32 %v4725_v5, %v263_v55  ;;  %v404_v8 = vmax.f32 %v340_v53, %v372_v0  ;;  %v354_v9 = vmul.f32 0.01, %v322_v1  ;;  %v509_v15 = vld [vmem:[#allocation2 + $0x167] sm:$0xff]  ;;  %v304_v21 = vmul.f32 %v4725_v5, %v265_v2 }
  0x2a   : > { %4360 = vmatpush3.bf16.msra.mxu0 %v4757_v22  ;;  %4603 = vmatprep.subr.msk.bf16.mxu1 %vm584_vm0, %v4826_v49  ;;  %v403_v22 = vmax.f32 %v339_v52, %v371_v63  ;;  %v510_v16 = vld [vmem:[#allocation2 + $0x16f] sm:$0xff]  ;;  %v491_v17 = vld [vmem:[#allocation2 + $0x47] sm:$0xff]  ;;  %v385_v18 = vmax.f32 %v321_v58, %v353_v3  ;;  %v355_v19 = vmul.f32 0.01, %v323_v4  ;;  %v356_v28 = vmul.f32 0.01, %v324_v7 }
  0x2b   : > { %4604 = vmatprep.subr.msk.bf16.mxu0 %vm584_vm0, %v4837_v56  ;;  %4313 = vmatprep.mubr.msk.bf16.mxu1 %vm411_vm1, %v4849_v62  ;;  %v341_v20 = vadd.f32 %v4737_v6, %v302_v14  ;;  %v4870_v23 = vpack.c.bf16 %v510_v16, %v509_v15  ;;  %v492_v24 = vld [vmem:[#allocation2 + $0x4f] sm:$0xff]  ;;  %v493_v25 = vld [vmem:[#allocation2 + $0x67] sm:$0xff]  ;;  %480 = vst.msk [vmem:[#allocation2 + $0x1b0] sm:$0xff] %vm411_vm1, %v404_v8 }
  0x2c   : > { %v494_v26 = vld [vmem:[#allocation2 + $0x6f] sm:$0xff]  ;;  %479 = vst.msk [vmem:[#allocation2 + $0x1a8] sm:$0xff] %vm411_vm1, %v403_v22  ;;  %v386_v27 = vmax.f32 %v322_v1, %v354_v9  ;;  %v342_v29 = vadd.f32 %v4737_v6, %v303_v10  ;;  %v4875_v30 = vpack.c.bf16 %v492_v24, %v491_v17  ;;  %461 = vst.msk [vmem:[#allocation2 + $0x88] sm:$0xff] %vm411_vm1, %v385_v18 }
  0x2d   : > { %v4877_v31 = vpack.c.bf16 %v494_v26, %v493_v25  ;;  %v387_v32 = vmax.f32 %v323_v4, %v355_v19  ;;  %v373_v33 = vmul.f32 0.01, %v341_v20  ;;  %v511_v34 = vld [vmem:[#allocation2 + $0x187] sm:$0xff]  ;;  %v388_v35 = vmax.f32 %v324_v7, %v356_v28  ;;  %v783_v24 = vld [vmem:[#allocation2 + $0x10] sm:$0xff] }
  0x2e   : > { %462 = vst.msk [vmem:[#allocation2 + $0x90] sm:$0xff] %vm411_vm1, %v386_v27  ;;  %v374_v36 = vmul.f32 0.01, %v342_v29  ;;  %v305_v37 = vmul.f32 %v4725_v5, %v266_v11  ;;  %v343_v39 = vadd.f32 %v4737_v6, %v304_v21  ;;  %v250_v41 = vld [vmem:[%s4732_s6 + $0x68] sm:$0xff]  ;;  %4297 = vmatprep.mubr.msk.bf16.mxu0 %vm411_vm1, %v4875_v30  ;;  %v286_v44 = vmul.f32 %v4725_v5, %v247_v12  ;;  %v267_v26 = vld [vmem:[%s4732_s6 + $0xf0] sm:$0xff] }
  0x2f   : > { %v512_v42 = vld [vmem:[#allocation2 + $0x18f] sm:$0xff]  ;;  %463 = vst.msk [vmem:[#allocation2 + $0xa8] sm:$0xff] %vm411_vm1, %v387_v32  ;;  %v405_v43 = vmax.f32 %v341_v20, %v373_v33  ;;  %v287_v47 = vmul.f32 %v4725_v5, %v248_v13  ;;  %464 = vst.msk [vmem:[#allocation2 + $0xb0] sm:$0xff] %vm411_vm1, %v388_v35  ;;  %v288_v55 = vmul.f32 %v4725_v5, %v249_v40 }
  0x30   : > { %4314 = vmatmul.mubr.msk.bf16.gmra.mrb[4].mxu1 %vm411_vm1, %v4870_v23  ;;  %v4894_v48 = vpack.c.bf16 %v512_v42, %v511_v34  ;;  %v406_v50 = vmax.f32 %v342_v29, %v374_v36  ;;  %v344_v51 = vadd.f32 %v4737_v6, %v305_v37  ;;  %v375_v52 = vmul.f32 0.01, %v343_v39  ;;  %v782_v21 = vld [vmem:[#allocation2 + $0x8] sm:$0xff]  ;;  %v1141_v32 = vld [vmem:[#allocation2 + $0x11] sm:$0xff] }
  0x31   : > { %4298 = vmatmul.mubr.msk.bf16.gmra.mrb[4].mxu0 %vm411_vm1, %v4877_v31  ;;  %481 = vst.msk [vmem:[#allocation2 + $0x1c8] sm:$0xff] %vm411_vm1, %v405_v43  ;;  %v325_v53 = vadd.f32 %v4737_v6, %v286_v44  ;;  %v326_v54 = vadd.f32 %v4737_v6, %v287_v47  ;;  %v289_v57 = vmul.f32 %v4725_v5, %v250_v41  ;;  %v1140_v29 = vld [vmem:[#allocation2 + $0x9] sm:$0xff] }
  0x32   : > { %4317 = vmatprep.mubr.msk.bf16.mxu1 %vm411_vm1, %v4894_v48  ;;  %482 = vst.msk [vmem:[#allocation2 + $0x1d0] sm:$0xff] %vm411_vm1, %v406_v50  ;;  %v376_v58 = vmul.f32 0.01, %v344_v51  ;;  %v407_v59 = vmax.f32 %v343_v39, %v375_v52  ;;  %v327_v1 = vadd.f32 %v4737_v6, %v288_v55  ;;  %v814_v28 = vpack.c.bf16 %v783_v24, %v782_v21  ;;  %v784_v44 = vld [vmem:[#allocation2 + $0x28] sm:$0xff]  ;;  %v785_v47 = vld [vmem:[#allocation2 + $0x30] sm:$0xff] }
  0x33   : > { %v513_v60 = vld [vmem:[#allocation2 + $0x1a7] sm:$0xff]  ;;  %v514_v61 = vld [vmem:[#allocation2 + $0x1af] sm:$0xff]  ;;  %v357_v63 = vmul.f32 0.01, %v325_v53  ;;  %v358_v0 = vmul.f32 0.01, %v326_v54  ;;  %v328_v2 = vadd.f32 %v4737_v6, %v289_v57  ;;  %v306_v33 = vmul.f32 %v4725_v5, %v267_v26 }
  0x34   : > { %v4908_v3 = vpack.c.bf16 %v514_v61, %v513_v60  ;;  %v495_v4 = vld [vmem:[#allocation2 + $0x87] sm:$0xff]  ;;  %v408_v7 = vmax.f32 %v344_v51, %v376_v58  ;;  %483 = vst.msk [vmem:[#allocation2 + $0x1e8] sm:$0xff] %vm411_vm1, %v407_v59  ;;  %v359_v9 = vmul.f32 0.01, %v327_v1  ;;  %v1172_v42 = vpack.c.bf16 %v1141_v32, %v1140_v29  ;;  %v787_v52 = vld [vmem:[#allocation2 + $0x50] sm:$0xff] }
  0x35   : > { %v496_v14 = vld [vmem:[#allocation2 + $0x8f] sm:$0xff]  ;;  %v389_v22 = vmax.f32 %v325_v53, %v357_v63  ;;  %v390_v8 = vmax.f32 %v326_v54, %v358_v0  ;;  %v360_v10 = vmul.f32 0.01, %v328_v2  ;;  %v345_v39 = vadd.f32 %v4737_v6, %v306_v33  ;;  %v268_v53 = vld [vmem:[%s4732_s6 + $0xf8] sm:$0xff] }
  0x36   : > { %v4911_v11 = vpack.c.bf16 %v496_v14, %v495_v4  ;;  %v497_v12 = vld [vmem:[#allocation2 + $0xa7] sm:$0xff]  ;;  %484 = vst.msk [vmem:[#allocation2 + $0x1f0] sm:$0xff] %vm411_vm1, %v408_v7  ;;  %v498_v13 = vld [vmem:[#allocation2 + $0xaf] sm:$0xff]  ;;  %v391_v15 = vmax.f32 %v327_v1, %v359_v9  ;;  %v307_v54 = vmul.f32 %v4725_v5, %v268_v53  ;;  %v4948_v57 = vpack.c.bf16 %v785_v47, %v784_v44 }
  0x37   : > { %465 = vst.msk [vmem:[#allocation2 + $0xc8] sm:$0xff] %vm411_vm1, %v389_v22  ;;  %466 = vst.msk [vmem:[#allocation2 + $0xd0] sm:$0xff] %vm411_vm1, %v390_v8  ;;  %v392_v16 = vmax.f32 %v328_v2, %v360_v10  ;;  %v4920_v17 = vpack.c.bf16 %v498_v13, %v497_v12  ;;  %v377_v50 = vmul.f32 0.01, %v345_v39  ;;  %v786_v51 = vld [vmem:[#allocation2 + $0x48] sm:$0xff]  ;;  %v1143_v59 = vld [vmem:[#allocation2 + $0x31] sm:$0xff] }
  0x38   : > { %4318 = vmatmul.mubr.msk.bf16.gmra.mrb[8].mxu1 %vm411_vm1, %v4908_v3  ;;  %4301 = vmatprep.mubr.msk.bf16.mxu0 %vm411_vm1, %v4911_v11  ;;  %v515_v18 = vld [vmem:[#allocation2 + $0x1c7] sm:$0xff]  ;;  %467 = vst.msk [vmem:[#allocation2 + $0xe8] sm:$0xff] %vm411_vm1, %v391_v15  ;;  %v4951_v60 = vpack.c.bf16 %v787_v52, %v786_v51  ;;  %v1145_v63 = vld [vmem:[#allocation2 + $0x51] sm:$0xff]  ;;  %v346_v0 = vadd.f32 %v4737_v6, %v307_v54  ;;  %v1597_v1 = vsel %vm584_vm0, %v4826_v49, 0  ;;  %v1955_v49 = vsel %vm584_vm0, %v4837_v56, 0 }
  0x39   : > { %v516_v19 = vld [vmem:[#allocation2 + $0x1cf] sm:$0xff]  ;;  %468 = vst.msk [vmem:[#allocation2 + $0xf0] sm:$0xff] %vm411_vm1, %v392_v16  ;;  %4302 = vmatmul.mubr.msk.bf16.gmra.mrb[8].mxu0 %vm411_vm1, %v4920_v17  ;;  %v409_v55 = vmax.f32 %v345_v39, %v377_v50  ;;  %v4977_v10 = vld [vmem:[%s5714_s3 + $0x18] sm:$0xf] }
  0x3a   : > { %v4926_v20 = vpack.c.bf16 %v516_v19, %v515_v18  ;;  %v1142_v58 = vld [vmem:[#allocation2 + $0x29] sm:$0xff]  ;;  %v4962_v5 = vld [vmem:[%s5714_s3 + $0x14] sm:$0xf]  ;;  %v378_v4 = vmul.f32 0.01, %v346_v0 }
  0x3b   : > { %v517_v25 = vld [vmem:[#allocation2 + $0x1e7] sm:$0xff]  ;;  %485 = vst.msk [vmem:[#allocation2 + $0x208] sm:$0xff] %vm411_vm1, %v409_v55  ;;  %v4957_v2 = vpack.c.bf16 %v1143_v59, %v1142_v58  ;;  %v789_v14 = vld [vmem:[#allocation2 + $0x70] sm:$0xff] }
  0x3c   : > { %4321 = vmatprep.mubr.msk.bf16.mxu1 %vm411_vm1, %v4926_v20  ;;  %v1144_v61 = vld [vmem:[#allocation2 + $0x49] sm:$0xff]  ;;  %v410_v22 = vmax.f32 %v346_v0, %v378_v4  ;;  %v1147_v13 = vld [vmem:[#allocation2 + $0x71] sm:$0xff] }
  0x3d   : > { %v518_v27 = vld [vmem:[#allocation2 + $0x1ef] sm:$0xff]  ;;  %v4966_v7 = vpack.c.bf16 %v1145_v63, %v1144_v61 }
  0x3e   : > { %v4932_v34 = vpack.c.bf16 %v518_v27, %v517_v25  ;;  %v499_v35 = vld [vmem:[#allocation2 + $0xc7] sm:$0xff]  ;;  %v500_v36 = vld [vmem:[#allocation2 + $0xcf] sm:$0xff]  ;;  %486 = vst.msk [vmem:[#allocation2 + $0x210] sm:$0xff] %vm411_vm1, %v410_v22 }
  0x3f   : > { %v4934_v37 = vpack.c.bf16 %v500_v36, %v499_v35  ;;  %v501_v40 = vld [vmem:[#allocation2 + $0xe7] sm:$0xff]  ;;  %v791_v9 = vld [vmem:[#allocation2 + $0x90] sm:$0xff] }
  0x40   : > { %4322 = vmatmul.mubr.msk.bf16.gmra.mrb[12].mxu1 %vm411_vm1, %v4932_v34  ;;  %v502_v41 = vld [vmem:[#allocation2 + $0xef] sm:$0xff] }
  0x41   : > { %4305 = vmatprep.mubr.msk.bf16.mxu0 %vm411_vm1, %v4934_v37  ;;  %v4941_v43 = vpack.c.bf16 %v502_v41, %v501_v40  ;;  %4327 = vmatprep.mubr.msk.bf16.mxu1 %vm411_vm1, %v814_v28  ;;  %v788_v6 = vld [vmem:[#allocation2 + $0x68] sm:$0xff]  ;;  %v1149_v18 = vld [vmem:[#allocation2 + $0x91] sm:$0xff] }
  0x42   : > { %v790_v8 = vld [vmem:[#allocation2 + $0x88] sm:$0xff]  ;;  %v4982_v12 = vpack.c.bf16 %v789_v14, %v788_v6  ;;  %v793_v25 = vld [vmem:[#allocation2 + $0xb0] sm:$0xff] }
  0x43   : > { %4306 = vmatmul.mubr.msk.bf16.gmra.mrb[12].mxu0 %vm411_vm1, %v4941_v43  ;;  %v1146_v56 = vld [vmem:[#allocation2 + $0x69] sm:$0xff]  ;;  %v4986_v15 = vpack.c.bf16 %v791_v9, %v790_v8  ;;  %v1151_v32 = vld [vmem:[#allocation2 + $0xb1] sm:$0xff] }
  0x44   : > { %4361 = vmatprep.mubr.msk.bf16.mxu0 %vm411_vm1, %v1172_v42  ;;  %v1148_v16 = vld [vmem:[#allocation2 + $0x89] sm:$0xff]  ;;  %v4990_v19 = vpack.c.bf16 %v1147_v13, %v1146_v56  ;;  %v1153_v36 = vld [vmem:[#allocation2 + $0xd1] sm:$0xff] }
  0x45   : > { %v4994_v21 = vpack.c.bf16 %v1149_v18, %v1148_v16  ;;  %v792_v24 = vld [vmem:[#allocation2 + $0xa8] sm:$0xff]  ;;  %v795_v27 = vld [vmem:[#allocation2 + $0xd0] sm:$0xff] }
  0x46   : > { %v794_v26 = vld [vmem:[#allocation2 + $0xc8] sm:$0xff]  ;;  %v5000_v28 = vpack.c.bf16 %v793_v25, %v792_v24  ;;  %v797_v42 = vld [vmem:[#allocation2 + $0xf0] sm:$0xff] }
  0x47   : > { %v1150_v29 = vld [vmem:[#allocation2 + $0xa9] sm:$0xff]  ;;  %v5004_v33 = vpack.c.bf16 %v795_v27, %v794_v26  ;;  %v1155_v52 = vld [vmem:[#allocation2 + $0xf1] sm:$0xff] }
  0x48   : > { %4328 = vmatmul.mubr.msk.bf16.vlgmr.msra.gmra.mrb[16].mxu1 %vm411_vm1, %v4948_v57  ;;  %v1152_v35 = vld [vmem:[#allocation2 + $0xc9] sm:$0xff]  ;;  %v5006_v39 = vpack.c.bf16 %v1151_v32, %v1150_v29  ;;  %v1157_v55 = vld [vmem:[#allocation2 + $0x111] sm:$0xff] }
  0x49   : > { %4394 = vmatpush3.bf16.msra.mxu1 %v1597_v1  ;;  %4331 = vmatprep.mubr.msk.bf16.mxu1 %vm411_vm1, %v4951_v60  ;;  %v5010_v40 = vpack.c.bf16 %v1153_v36, %v1152_v35  ;;  %v796_v41 = vld [vmem:[#allocation2 + $0xe8] sm:$0xff]  ;;  %v799_v47 = vld [vmem:[#allocation2 + $0x110] sm:$0xff] }
  0x4a   : > { %4605 = vmatprep.subr.msk.bf16.mxu1 %vm584_vm0, %v4962_v5  ;;  %v798_v44 = vld [vmem:[#allocation2 + $0x108] sm:$0xff]  ;;  %v5016_v50 = vpack.c.bf16 %v797_v42, %v796_v41  ;;  %v801_v63 = vld [vmem:[#allocation2 + $0x130] sm:$0xff] }
  0x4b   : > { %4362 = vmatmul.mubr.msk.bf16.vlgmr.msra.gmra.mrb[16].mxu0 %vm411_vm1, %v4957_v2  ;;  %v1154_v51 = vld [vmem:[#allocation2 + $0xe9] sm:$0xff]  ;;  %v5020_v53 = vpack.c.bf16 %v799_v47, %v798_v44  ;;  %v1159_v14 = vld [vmem:[#allocation2 + $0x131] sm:$0xff] }
  0x4c   : > { %4428 = vmatpush3.bf16.msra.mxu0 %v1955_v49  ;;  %4365 = vmatprep.mubr.msk.bf16.mxu0 %vm411_vm1, %v4966_v7  ;;  %v1156_v54 = vld [vmem:[#allocation2 + $0x109] sm:$0xff]  ;;  %v5022_v58 = vpack.c.bf16 %v1155_v52, %v1154_v51  ;;  %v1161_v8 = vld [vmem:[#allocation2 + $0x151] sm:$0xff] }
  0x4d   : > { %4606 = vmatprep.subr.msk.bf16.mxu0 %vm584_vm0, %v4977_v10  ;;  %v5026_v59 = vpack.c.bf16 %v1157_v55, %v1156_v54  ;;  %v800_v61 = vld [vmem:[#allocation2 + $0x128] sm:$0xff]  ;;  %v803_v1 = vld [vmem:[#allocation2 + $0x150] sm:$0xff] }
  0x4e   : > { %v802_v0 = vld [vmem:[#allocation2 + $0x148] sm:$0xff]  ;;  %v5032_v4 = vpack.c.bf16 %v801_v63, %v800_v61  ;;  %v805_v16 = vld [vmem:[#allocation2 + $0x170] sm:$0xff] }
  0x4f   : > { %v1158_v6 = vld [vmem:[#allocation2 + $0x129] sm:$0xff]  ;;  %v5036_v49 = vpack.c.bf16 %v803_v1, %v802_v0  ;;  %v1163_v27 = vld [vmem:[#allocation2 + $0x171] sm:$0xff] }
  0x50   : > { %4332 = vmatmul.mubr.msk.bf16.gmra.mrb[20].mxu1 %vm411_vm1, %v4982_v12  ;;  %v1160_v22 = vld [vmem:[#allocation2 + $0x149] sm:$0xff]  ;;  %v5038_v9 = vpack.c.bf16 %v1159_v14, %v1158_v6  ;;  %v1165_v35 = vld [vmem:[#allocation2 + $0x191] sm:$0xff] }
  0x51   : > { %4335 = vmatprep.mubr.msk.bf16.mxu1 %vm411_vm1, %v4986_v15  ;;  %v5042_v56 = vpack.c.bf16 %v1161_v8, %v1160_v22  ;;  %v804_v13 = vld [vmem:[#allocation2 + $0x168] sm:$0xff]  ;;  %v807_v24 = vld [vmem:[#allocation2 + $0x190] sm:$0xff] }
  0x52   : > { %v806_v18 = vld [vmem:[#allocation2 + $0x188] sm:$0xff]  ;;  %v5048_v25 = vpack.c.bf16 %v805_v16, %v804_v13  ;;  %v809_v44 = vld [vmem:[#allocation2 + $0x1b0] sm:$0xff] }
  0x53   : > { %4366 = vmatmul.mubr.msk.bf16.gmra.mrb[20].mxu0 %vm411_vm1, %v4990_v19  ;;  %v1162_v26 = vld [vmem:[#allocation2 + $0x169] sm:$0xff]  ;;  %v5052_v29 = vpack.c.bf16 %v807_v24, %v806_v18  ;;  %v1167_v55 = vld [vmem:[#allocation2 + $0x1b1] sm:$0xff]  ;;  %v2313_v24 = vsel %vm584_vm0, %v4962_v5, 0 }
  0x54   : > { %4369 = vmatprep.mubr.msk.bf16.mxu0 %vm411_vm1, %v4994_v21  ;;  %v1164_v32 = vld [vmem:[#allocation2 + $0x189] sm:$0xff]  ;;  %v5054_v36 = vpack.c.bf16 %v1163_v27, %v1162_v26  ;;  %v1169_v0 = vld [vmem:[#allocation2 + $0x1d1] sm:$0xff]  ;;  %v4100_v26 = vld [vmem:[%s5714_s3 + $0x1c] sm:$0xf] }
  0x55   : > { %v5058_v41 = vpack.c.bf16 %v1165_v35, %v1164_v32  ;;  %v808_v42 = vld [vmem:[#allocation2 + $0x1a8] sm:$0xff]  ;;  %v811_v51 = vld [vmem:[#allocation2 + $0x1d0] sm:$0xff] }
  0x56   : > { %v810_v47 = vld [vmem:[#allocation2 + $0x1c8] sm:$0xff]  ;;  %v827_v52 = vpack.c.bf16 %v809_v44, %v808_v42  ;;  %v813_v22 = vld [vmem:[#allocation2 + $0x1f0] sm:$0xff] }
  0x57   : > { %v1166_v54 = vld [vmem:[#allocation2 + $0x1a9] sm:$0xff]  ;;  %v828_v61 = vpack.c.bf16 %v811_v51, %v810_v47  ;;  %v1171_v16 = vld [vmem:[#allocation2 + $0x1f1] sm:$0xff] }
  0x58   : > { %4336 = vmatmul.mubr.msk.bf16.gmra.mrb[24].mxu1 %vm411_vm1, %v5000_v28  ;;  %v1168_v63 = vld [vmem:[#allocation2 + $0x1c9] sm:$0xff]  ;;  %v5066_v1 = vpack.c.bf16 %v1167_v55, %v1166_v54 }
  0x59   : > { %4339 = vmatprep.mubr.msk.bf16.mxu1 %vm411_vm1, %v5004_v33  ;;  %v5069_v6 = vpack.c.bf16 %v1169_v0, %v1168_v63  ;;  %v812_v14 = vld [vmem:[#allocation2 + $0x1e8] sm:$0xff] }
  0x5a   : > { %v829_v8 = vpack.c.bf16 %v813_v22, %v812_v14  ;;  %v1170_v13 = vld [vmem:[#allocation2 + $0x1e9] sm:$0xff] }
  0x5b   : > { %4370 = vmatmul.mubr.msk.bf16.gmra.mrb[24].mxu0 %vm411_vm1, %v5006_v39  ;;  %v5076_v18 = vpack.c.bf16 %v1171_v16, %v1170_v13  ;;  %v2590_v32 = vld [vmem:[#allocation2 + $0x14f] sm:$0xff]  ;;  %v2591_v42 = vld [vmem:[#allocation2 + $0x167] sm:$0xff] }
  0x5c   : > { %4373 = vmatprep.mubr.msk.bf16.mxu0 %vm411_vm1, %v5010_v40  ;;  %v2593_v44 = vld [vmem:[#allocation2 + $0x187] sm:$0xff]  ;;  %v2594_v47 = vld [vmem:[#allocation2 + $0x18f] sm:$0xff] }
  0x5d   : > { %v2603_v0 = vld [vmem:[#allocation2 + $0x227] sm:$0xff] }
  0x60   : > { %4340 = vmatmul.mubr.msk.bf16.gmra.mrb[28].mxu1 %vm411_vm1, %v5016_v50 }
  0x61   : > { %4343 = vmatprep.mubr.msk.bf16.mxu1 %vm411_vm1, %v5020_v53 }
  0x63   : > { %4374 = vmatmul.mubr.msk.bf16.gmra.mrb[28].mxu0 %vm411_vm1, %v5022_v58 }
  0x64   : > { %4377 = vmatprep.mubr.msk.bf16.mxu0 %vm411_vm1, %v5026_v59 }
  0x68   : > { %4344 = vmatmul.mubr.msk.bf16.gmra.mrb[32].mxu1 %vm411_vm1, %v5032_v4 }
  0x69   : > { %4347 = vmatprep.mubr.msk.bf16.mxu1 %vm411_vm1, %v5036_v49 }
  0x6b   : > { %4378 = vmatmul.mubr.msk.bf16.gmra.mrb[32].mxu0 %vm411_vm1, %v5038_v9 }
  0x6c   : > { %4381 = vmatprep.mubr.msk.bf16.mxu0 %vm411_vm1, %v5042_v56 }
  0x70   : > { %4348 = vmatmul.mubr.msk.bf16.gmra.mrb[36].mxu1 %vm411_vm1, %v5048_v25 }
  0x71   : > { %4351 = vmatprep.mubr.msk.bf16.mxu1 %vm411_vm1, %v5052_v29 }
  0x73   : > { %4382 = vmatmul.mubr.msk.bf16.gmra.mrb[36].mxu0 %vm411_vm1, %v5054_v36 }
  0x74   : > { %4385 = vmatprep.mubr.msk.bf16.mxu0 %vm411_vm1, %v5058_v41 }
  0x78   : > { %4352 = vmatmul.mubr.msk.bf16.gmra.mrb[40].mxu1 %vm411_vm1, %v827_v52 }
  0x79   : > { %4355 = vmatprep.mubr.msk.bf16.mxu1 %vm411_vm1, %v828_v61 }
  0x7b   : > { %4386 = vmatmul.mubr.msk.bf16.gmra.mrb[40].mxu0 %vm411_vm1, %v5066_v1 }
  0x7c   : > { %4389 = vmatprep.mubr.msk.bf16.mxu0 %vm411_vm1, %v5069_v6 }
  0x80   : > { %4356 = vmatmul.mubr.msk.bf16.gmra.mrb[44].mxu1 %vm411_vm1, %v829_v8 }
  0x81   : > { %4395 = vmatprep.mubr.msk.bf16.mxu1 %vm411_vm1, %v4817_v46  ;;  %v2672_v46 = vsel %vm584_vm0, %v4977_v10, 0  ;;  %v3030_v10 = vsel %vm584_vm0, %v4100_v26, 0 }
  0x83   : > { %4390 = vmatmul.mubr.msk.bf16.gmra.mrb[44].mxu0 %vm411_vm1, %v5076_v18 }
  0x84   : > { %4429 = vmatprep.mubr.msk.bf16.mxu0 %vm411_vm1, %v4948_v57  ;;  %v4117_v57 = vld [vmem:[%s5714_s3 + $0x20] sm:$0xf] }
  0x85   : > { %v3388_v27 = vsel %vm584_vm0, %v4117_v57, 0 }
  0x88   : > { %4396 = vmatmul.mubr.msk.bf16.vlgmr.msra.gmra.mrb[48].mxu1 %vm411_vm1, %v4875_v30 }
  0x89   : > { %4462 = vmatpush3.bf16.msra.mxu1 %v2313_v24  ;;  %4399 = vmatprep.mubr.msk.bf16.mxu1 %vm411_vm1, %v4877_v31 }
  0x8a   : > { %4607 = vmatprep.subr.msk.bf16.mxu1 %vm584_vm0, %v4100_v26 }
  0x8b   : > { %4430 = vmatmul.mubr.msk.bf16.vlgmr.msra.gmra.mrb[48].mxu0 %vm411_vm1, %v4951_v60 }
  0x8c   : > { %4496 = vmatpush3.bf16.msra.mxu0 %v2672_v46  ;;  %4433 = vmatprep.mubr.msk.bf16.mxu0 %vm411_vm1, %v4982_v12 }
  0x8d   : > { %4608 = vmatprep.subr.msk.bf16.mxu0 %vm584_vm0, %v4117_v57 }
  0x90   : > { %4400 = vmatmul.mubr.msk.bf16.gmra.mrb[52].mxu1 %vm411_vm1, %v4911_v11 }
  0x91   : > { %4403 = vmatprep.mubr.msk.bf16.mxu1 %vm411_vm1, %v4920_v17 }
  0x93   : > { %4434 = vmatmul.mubr.msk.bf16.gmra.mrb[52].mxu0 %vm411_vm1, %v4986_v15 }
  0x94   : > { %4437 = vmatprep.mubr.msk.bf16.mxu0 %vm411_vm1, %v5000_v28 }
  0x98   : > { %4404 = vmatmul.mubr.msk.bf16.gmra.mrb[56].mxu1 %vm411_vm1, %v4934_v37 }
  0x99   : > { %4407 = vmatprep.mubr.msk.bf16.mxu1 %vm411_vm1, %v4941_v43 }
  0x9b   : > { %4438 = vmatmul.mubr.msk.bf16.gmra.mrb[56].mxu0 %vm411_vm1, %v5004_v33 }
  0x9c   : > { %4441 = vmatprep.mubr.msk.bf16.mxu0 %vm411_vm1, %v5016_v50 }
  0xa0   : > { %4408 = vmatmul.mubr.msk.bf16.gmra.mrb[60].mxu1 %vm411_vm1, %v4808_v38  ;;  %v1528_v38 = vld [vmem:[#allocation2 + $0x207] sm:$0xff] }
  0xa1   : > { %4411 = vmatprep.mubr.msk.bf16.mxu1 %vm411_vm1, %v4815_v45  ;;  %v1529_v45 = vld [vmem:[#allocation2 + $0x20f] sm:$0xff] }
  0xa3   : > { %4442 = vmatmul.mubr.msk.bf16.gmra.mrb[60].mxu0 %vm411_vm1, %v5020_v53 }
  0xa4   : > { %4445 = vmatprep.mubr.msk.bf16.mxu0 %vm411_vm1, %v5032_v4 }
  0xa8   : > { %4412 = vmatmul.mubr.msk.bf16.gmra.mrb[64].mxu1 %vm411_vm1, %v4849_v62  ;;  %v5149_v62 = vpack.c.bf16 %v1529_v45, %v1528_v38 }
  0xa9   : > { %4415 = vmatprep.mubr.msk.bf16.mxu1 %vm411_vm1, %v4870_v23  ;;  %v1886_v23 = vld [vmem:[#allocation2 + $0x208] sm:$0xff] }
  0xab   : > { %4446 = vmatmul.mubr.msk.bf16.gmra.mrb[64].mxu0 %vm411_vm1, %v5036_v49 }
  0xac   : > { %4449 = vmatprep.mubr.msk.bf16.mxu0 %vm411_vm1, %v5048_v25 }
  0xb0   : > { %4416 = vmatmul.mubr.msk.bf16.gmra.mrb[68].mxu1 %vm411_vm1, %v4894_v48  ;;  %v1887_v48 = vld [vmem:[#allocation2 + $0x210] sm:$0xff] }
  0xb1   : > { %4419 = vmatprep.mubr.msk.bf16.mxu1 %vm411_vm1, %v4908_v3  ;;  %v5152_v5 = vpack.c.bf16 %v1887_v48, %v1886_v23 }
  0xb3   : > { %4450 = vmatmul.mubr.msk.bf16.gmra.mrb[68].mxu0 %vm411_vm1, %v5052_v29  ;;  %v2588_v29 = vld [vmem:[#allocation2 + $0x12f] sm:$0xff] }
  0xb4   : > { %4453 = vmatprep.mubr.msk.bf16.mxu0 %vm411_vm1, %v827_v52  ;;  %v2615_v52 = vpack.c.bf16 %v2594_v47, %v2593_v44 }
  0xb8   : > { %4420 = vmatmul.mubr.msk.bf16.gmra.mrb[72].mxu1 %vm411_vm1, %v4926_v20 }
  0xb9   : > { %4423 = vmatprep.mubr.msk.bf16.mxu1 %vm411_vm1, %v4932_v34 }
  0xbb   : > { %4454 = vmatmul.mubr.msk.bf16.gmra.mrb[72].mxu0 %vm411_vm1, %v828_v61 }
  0xbc   : > { %4457 = vmatprep.mubr.msk.bf16.mxu0 %vm411_vm1, %v829_v8 }
  0xc0   : > { %4424 = vmatmul.mubr.msk.bf16.gmra.mrb[76].mxu1 %vm411_vm1, %v5149_v62 }
  0xc1   : > { %4463 = vmatprep.mubr.msk.bf16.mxu1 %vm411_vm1, %v4957_v2  ;;  %v2586_v2 = vld [vmem:[#allocation2 + $0x10f] sm:$0xff] }
  0xc3   : > { %4458 = vmatmul.mubr.msk.bf16.gmra.mrb[76].mxu0 %vm411_vm1, %v5152_v5 }
  0xc4   : > { %4497 = vmatprep.mubr.msk.bf16.mxu0 %vm411_vm1, %v4875_v30  ;;  %v2585_v30 = vld [vmem:[#allocation2 + $0x107] sm:$0xff] }
  0xc8   : > { %4464 = vmatmul.mubr.msk.bf16.vlgmr.msra.gmra.mrb[80].mxu1 %vm411_vm1, %v4966_v7 }
  0xc9   : > { %4530 = vmatpush3.bf16.msra.mxu1 %v3030_v10  ;;  %4467 = vmatprep.mubr.msk.bf16.mxu1 %vm411_vm1, %v4990_v19 }
  0xcb   : > { %4498 = vmatmul.mubr.msk.bf16.vlgmr.msra.gmra.mrb[80].mxu0 %vm411_vm1, %v4877_v31  ;;  %v2611_v31 = vpack.c.bf16 %v2586_v2, %v2585_v30 }
  0xcc   : > { %4564 = vmatpush3.bf16.msra.mxu0 %v3388_v27  ;;  %4501 = vmatprep.mubr.msk.bf16.mxu0 %vm411_vm1, %v4911_v11  ;;  %v2587_v11 = vld [vmem:[#allocation2 + $0x127] sm:$0xff] }
  0xcd   : > { %v2612_v35 = vpack.c.bf16 %v2588_v29, %v2587_v11 }
  0xd0   : > { %4468 = vmatmul.mubr.msk.bf16.gmra.mrb[84].mxu1 %vm411_vm1, %v4994_v21 }
  0xd1   : > { %4471 = vmatprep.mubr.msk.bf16.mxu1 %vm411_vm1, %v5006_v39 }
  0xd3   : > { %4502 = vmatmul.mubr.msk.bf16.gmra.mrb[84].mxu0 %vm411_vm1, %v4920_v17  ;;  %v2589_v17 = vld [vmem:[#allocation2 + $0x147] sm:$0xff] }
  0xd4   : > { %4505 = vmatprep.mubr.msk.bf16.mxu0 %vm411_vm1, %v4934_v37  ;;  %v2613_v37 = vpack.c.bf16 %v2590_v32, %v2589_v17  ;;  %v3305_v17 = vld [vmem:[#allocation2 + $0x149] sm:$0xff]  ;;  %v3306_v32 = vld [vmem:[#allocation2 + $0x151] sm:$0xff] }
  0xd5   : > { %v3329_v44 = vpack.c.bf16 %v3306_v32, %v3305_v17  ;;  %v3314_v17 = vld [vmem:[#allocation2 + $0x1d1] sm:$0xff] }
  0xd8   : > { %4472 = vmatmul.mubr.msk.bf16.gmra.mrb[88].mxu1 %vm411_vm1, %v5010_v40 }
  0xd9   : > { %4475 = vmatprep.mubr.msk.bf16.mxu1 %vm411_vm1, %v5022_v58 }
  0xdb   : > { %4506 = vmatmul.mubr.msk.bf16.gmra.mrb[88].mxu0 %vm411_vm1, %v4941_v43  ;;  %v2592_v43 = vld [vmem:[#allocation2 + $0x16f] sm:$0xff] }
  0xdc   : > { %4509 = vmatprep.mubr.msk.bf16.mxu0 %vm411_vm1, %v2611_v31  ;;  %v2614_v51 = vpack.c.bf16 %v2592_v43, %v2591_v42 }
  0xe0   : > { %4476 = vmatmul.mubr.msk.bf16.gmra.mrb[92].mxu1 %vm411_vm1, %v5026_v59 }
  0xe1   : > { %4479 = vmatprep.mubr.msk.bf16.mxu1 %vm411_vm1, %v5038_v9 }
  0xe3   : > { %4510 = vmatmul.mubr.msk.bf16.gmra.mrb[92].mxu0 %vm411_vm1, %v2612_v35 }
  0xe4   : > { %4513 = vmatprep.mubr.msk.bf16.mxu0 %vm411_vm1, %v2613_v37 }
  0xe8   : > { %4480 = vmatmul.mubr.msk.bf16.gmra.mrb[96].mxu1 %vm411_vm1, %v5042_v56  ;;  %v2244_v56 = vld [vmem:[#allocation2 + $0x209] sm:$0xff] }
  0xe9   : > { %4483 = vmatprep.mubr.msk.bf16.mxu1 %vm411_vm1, %v5054_v36  ;;  %v2245_v36 = vld [vmem:[#allocation2 + $0x211] sm:$0xff] }
  0xea   : > { %v5216_v61 = vpack.c.bf16 %v2245_v36, %v2244_v56 }
  0xeb   : > { %4514 = vmatmul.mubr.msk.bf16.gmra.mrb[96].mxu0 %vm411_vm1, %v2614_v51  ;;  %v2951_v51 = vld [vmem:[#allocation2 + $0x188] sm:$0xff] }
  0xec   : > { %4517 = vmatprep.mubr.msk.bf16.mxu0 %vm411_vm1, %v2615_v52  ;;  %v2952_v52 = vld [vmem:[#allocation2 + $0x190] sm:$0xff] }
  0xf0   : > { %4484 = vmatmul.mubr.msk.bf16.gmra.mrb[100].mxu1 %vm411_vm1, %v5058_v41 }
  0xf1   : > { %4487 = vmatprep.mubr.msk.bf16.mxu1 %vm411_vm1, %v5066_v1  ;;  %v2604_v1 = vld [vmem:[#allocation2 + $0x22f] sm:$0xff] }
  0xf2   : > { %v2620_v14 = vpack.c.bf16 %v2604_v1, %v2603_v0 }
  0xf3   : > { %4518 = vmatmul.mubr.msk.bf16.gmra.mrb[100].mxu0 %vm411_vm1, %v4908_v3 }
  0xf4   : > { %4521 = vmatprep.mubr.msk.bf16.mxu0 %vm411_vm1, %v4926_v20 }
  0xf8   : > { %4488 = vmatmul.mubr.msk.bf16.gmra.mrb[104].mxu1 %vm411_vm1, %v5069_v6 }
  0xf9   : > { %4491 = vmatprep.mubr.msk.bf16.mxu1 %vm411_vm1, %v5076_v18 }
  0xfb   : > { %v4311_v54 = vpop.f32.mrb[0].mxu1  ;;  %4522 = vmatmul.mubr.msk.bf16.gmra.mrb[104].mxu0 %vm411_vm1, %v4932_v34 }
  0xfc   : > { %v4295_v41 = vpop.f32.mrb[0].mxu0  ;;  %768 = vst.msk [vmem:[#allocation3 + $0x90] sm:$0xff] %vm749_vm3, %v4311_v54  ;;  %v686_v55 = vpop.f32.mrb[1].mxu1  ;;  %4525 = vmatprep.mubr.msk.bf16.mxu0 %vm411_vm1, %v5149_v62  ;;  %v3307_v54 = vld [vmem:[#allocation2 + $0x169] sm:$0xff] }
  0xfd   : > { %752 = vst.msk [vmem:[#allocation3 + $0x10] sm:$0xff] %vm749_vm3, %v4295_v41  ;;  %v622_v3 = vpop.f32.mrb[1].mxu0  ;;  %766 = vst.msk [vmem:[#allocation3 + $0x80] sm:$0xff] %vm749_vm3, %v686_v55  ;;  %v4312_v20 = vpop.f32.mrb[2].mxu1 }
  0xfe   : > { %750 = vst.msk [vmem:[#allocation3] sm:$0xff] %vm749_vm3, %v622_v3  ;;  %v4296_v63 = vpop.f32.mrb[2].mxu0  ;;  %769 = vst.msk [vmem:[#allocation3 + $0x98] sm:$0xff] %vm749_vm3, %v4312_v20  ;;  %v689_v6 = vpop.f32.mrb[3].mxu1  ;;  %v3309_v20 = vld [vmem:[#allocation2 + $0x189] sm:$0xff] }
  0xff   : > { %753 = vst.msk [vmem:[#allocation3 + $0x18] sm:$0xff] %vm749_vm3, %v4296_v63  ;;  %v625_v34 = vpop.f32.mrb[3].mxu0  ;;  %767 = vst.msk [vmem:[#allocation3 + $0x88] sm:$0xff] %vm749_vm3, %v689_v6 }
 0x100   : > { %751 = vst.msk [vmem:[#allocation3 + $0x8] sm:$0xff] %vm749_vm3, %v625_v34  ;;  %4492 = vmatmul.mubr.msk.bf16.gmra.mrb[108].mxu1 %vm411_vm1, %v5216_v61  ;;  %v3310_v34 = vld [vmem:[#allocation2 + $0x191] sm:$0xff] }
 0x101   : > { %4531 = vmatprep.mubr.msk.bf16.mxu1 %vm411_vm1, %v4951_v60 }
 0x103   : > { %v4315_v22 = vpop.f32.mrb[4].mxu1  ;;  %4526 = vmatmul.mubr.msk.bf16.gmra.mrb[108].mxu0 %vm411_vm1, %v2620_v14 }
 0x104   : > { %772 = vst.msk [vmem:[#allocation3 + $0xb0] sm:$0xff] %vm749_vm3, %v4315_v22  ;;  %v702_v8 = vpop.f32.mrb[5].mxu1  ;;  %v4299_v13 = vpop.f32.mrb[4].mxu0  ;;  %4565 = vmatprep.mubr.msk.bf16.mxu0 %vm411_vm1, %v4966_v7  ;;  %v1046_v27 = vld [vmem:[#allocation3 + $0x10] sm:$0xff] }
 0x105   : > { %770 = vst.msk [vmem:[#allocation3 + $0xa0] sm:$0xff] %vm749_vm3, %v702_v8  ;;  %v4316_v16 = vpop.f32.mrb[6].mxu1  ;;  %756 = vst.msk [vmem:[#allocation3 + $0x30] sm:$0xff] %vm749_vm3, %v4299_v13  ;;  %v638_v18 = vpop.f32.mrb[5].mxu0  ;;  %v1044_v31 = vld [vmem:[#allocation3] sm:$0xff] }
 0x106   : > { %773 = vst.msk [vmem:[#allocation3 + $0xb8] sm:$0xff] %vm749_vm3, %v4316_v16  ;;  %v705_v24 = vpop.f32.mrb[7].mxu1  ;;  %754 = vst.msk [vmem:[#allocation3 + $0x20] sm:$0xff] %vm749_vm3, %v638_v18  ;;  %v4300_v60 = vpop.f32.mrb[6].mxu0  ;;  %v1047_v29 = vld [vmem:[#allocation3 + $0x18] sm:$0xff] }
 0x107   : > { %771 = vst.msk [vmem:[#allocation3 + $0xa8] sm:$0xff] %vm749_vm3, %v705_v24  ;;  %757 = vst.msk [vmem:[#allocation3 + $0x38] sm:$0xff] %vm749_vm3, %v4300_v60  ;;  %v641_v26 = vpop.f32.mrb[7].mxu0  ;;  %v1045_v37 = vld [vmem:[#allocation3 + $0x8] sm:$0xff] }
 0x108   : > { %755 = vst.msk [vmem:[#allocation3 + $0x28] sm:$0xff] %vm749_vm3, %v641_v26  ;;  %4532 = vmatmul.mubr.msk.bf16.vlgmr.msra.gmra.mrb[112].mxu1 %vm411_vm1, %v4982_v12 }
 0x109   : > { %4535 = vmatprep.mubr.msk.bf16.mxu1 %vm411_vm1, %v4986_v15 }
 0x10b   : > { %v4319_v7 = vpop.f32.mrb[8].mxu1  ;;  %4566 = vmatmul.mubr.msk.bf16.vlgmr.msra.gmra.mrb[112].mxu0 %vm411_vm1, %v4990_v19 }
 0x10c   : > { %776 = vst.msk [vmem:[#allocation3 + $0xd0] sm:$0xff] %vm749_vm3, %v4319_v7  ;;  %v718_v46 = vpop.f32.mrb[9].mxu1  ;;  %4569 = vmatprep.mubr.msk.bf16.mxu0 %vm411_vm1, %v4994_v21  ;;  %v4303_v12 = vpop.f32.mrb[8].mxu0  ;;  %v1050_v36 = vld [vmem:[#allocation3 + $0x30] sm:$0xff] }
 0x10d   : > { %774 = vst.msk [vmem:[#allocation3 + $0xc0] sm:$0xff] %vm749_vm3, %v718_v46  ;;  %v4320_v57 = vpop.f32.mrb[10].mxu1  ;;  %760 = vst.msk [vmem:[#allocation3 + $0x50] sm:$0xff] %vm749_vm3, %v4303_v12  ;;  %v654_v15 = vpop.f32.mrb[9].mxu0  ;;  %v1048_v3 = vld [vmem:[#allocation3 + $0x20] sm:$0xff]  ;;  %v3331_v12 = vpack.c.bf16 %v3310_v34, %v3309_v20  ;;  %v3315_v34 = vld [vmem:[#allocation2 + $0x1e9] sm:$0xff] }
 0x10e   : > { %777 = vst.msk [vmem:[#allocation3 + $0xd8] sm:$0xff] %vm749_vm3, %v4320_v57  ;;  %v721_v38 = vpop.f32.mrb[11].mxu1  ;;  %758 = vst.msk [vmem:[#allocation3 + $0x40] sm:$0xff] %vm749_vm3, %v654_v15  ;;  %v4304_v45 = vpop.f32.mrb[10].mxu0  ;;  %v1051_v6 = vld [vmem:[#allocation3 + $0x38] sm:$0xff] }
 0x10f   : > { %775 = vst.msk [vmem:[#allocation3 + $0xc8] sm:$0xff] %vm749_vm3, %v721_v38  ;;  %761 = vst.msk [vmem:[#allocation3 + $0x58] sm:$0xff] %vm749_vm3, %v4304_v45  ;;  %v657_v19 = vpop.f32.mrb[11].mxu0  ;;  %v1049_v13 = vld [vmem:[#allocation3 + $0x28] sm:$0xff] }
 0x110   : > { %4536 = vmatmul.mubr.msk.bf16.gmra.mrb[116].mxu1 %vm411_vm1, %v5000_v28  ;;  %759 = vst.msk [vmem:[#allocation3 + $0x48] sm:$0xff] %vm749_vm3, %v657_v19  ;;  %v2953_v19 = vld [vmem:[#allocation2 + $0x1a8] sm:$0xff] }
 0x111   : > { %4539 = vmatprep.mubr.msk.bf16.mxu1 %vm411_vm1, %v5004_v33 }
 0x113   : > { %v4323_v21 = vpop.f32.mrb[12].mxu1  ;;  %4570 = vmatmul.mubr.msk.bf16.gmra.mrb[116].mxu0 %vm411_vm1, %v5006_v39 }
 0x114   : > { %780 = vst.msk [vmem:[#allocation3 + $0xf0] sm:$0xff] %vm749_vm3, %v4323_v21  ;;  %v734_v62 = vpop.f32.mrb[13].mxu1  ;;  %4573 = vmatprep.mubr.msk.bf16.mxu0 %vm411_vm1, %v5010_v40  ;;  %v2954_v21 = vld [vmem:[#allocation2 + $0x1b0] sm:$0xff] }
 0x115   : > { %778 = vst.msk [vmem:[#allocation3 + $0xe0] sm:$0xff] %vm749_vm3, %v734_v62  ;;  %v4324_v28 = vpop.f32.mrb[14].mxu1  ;;  %v2955_v62 = vld [vmem:[#allocation2 + $0x1c8] sm:$0xff] }
 0x116   : > { %781 = vst.msk [vmem:[#allocation3 + $0xf8] sm:$0xff] %vm749_vm3, %v4324_v28  ;;  %v737_v23 = vpop.f32.mrb[15].mxu1  ;;  %v4307_v48 = vpop.f32.mrb[12].mxu0  ;;  %v2956_v28 = vld [vmem:[#allocation2 + $0x1d0] sm:$0xff] }
 0x117   : > { %779 = vst.msk [vmem:[#allocation3 + $0xe8] sm:$0xff] %vm749_vm3, %v737_v23  ;;  %764 = vst.msk [vmem:[#allocation3 + $0x70] sm:$0xff] %vm749_vm3, %v4307_v48  ;;  %v670_v33 = vpop.f32.mrb[13].mxu0  ;;  %v3311_v48 = vld [vmem:[#allocation2 + $0x1a9] sm:$0xff] }
 0x118   : > { %4540 = vmatmul.mubr.msk.bf16.gmra.mrb[120].mxu1 %vm411_vm1, %v5016_v50  ;;  %762 = vst.msk [vmem:[#allocation3 + $0x60] sm:$0xff] %vm749_vm3, %v670_v33  ;;  %v4308_v39 = vpop.f32.mrb[14].mxu0 }
 0x119   : > { %765 = vst.msk [vmem:[#allocation3 + $0x78] sm:$0xff] %vm749_vm3, %v4308_v39  ;;  %v673_v40 = vpop.f32.mrb[15].mxu0  ;;  %4543 = vmatprep.mubr.msk.bf16.mxu1 %vm411_vm1, %v5020_v53 }
 0x11a   : > { %763 = vst.msk [vmem:[#allocation3 + $0x68] sm:$0xff] %vm749_vm3, %v673_v40  ;;  %v1052_v40 = vld [vmem:[#allocation3 + $0x40] sm:$0xff] }
 0x11b   : > { %v4329_v10 = vpop.f32.mrb[16].mxu1  ;;  %4574 = vmatmul.mubr.msk.bf16.gmra.mrb[120].mxu0 %vm411_vm1, %v5022_v58 }
 0x11c   : > { %v1078_v30 = vadd.f32 %v4329_v10, %v1046_v27  ;;  %v917_v2 = vpop.f32.mrb[17].mxu1  ;;  %4577 = vmatprep.mubr.msk.bf16.mxu0 %vm411_vm1, %v5026_v59  ;;  %v2974_v10 = vpack.c.bf16 %v2954_v21, %v2953_v19  ;;  %v3312_v27 = vld [vmem:[#allocation2 + $0x1b1] sm:$0xff] }
 0x11d   : > { %v1076_v50 = vadd.f32 %v1044_v31, %v917_v2  ;;  %v4330_v11 = vpop.f32.mrb[18].mxu1 }
 0x11e   : > { %1110 = vst.msk [vmem:[#allocation3 + $0x10] sm:$0xff] %vm749_vm3, %v1078_v30  ;;  %v1079_v53 = vadd.f32 %v4330_v11, %v1047_v29  ;;  %v920_v35 = vpop.f32.mrb[19].mxu1  ;;  %v4363_v42 = vpop.f32.mrb[16].mxu0  ;;  %v3313_v30 = vld [vmem:[#allocation2 + $0x1c9] sm:$0xff]  ;;  %v1055_v11 = vld [vmem:[#allocation3 + $0x58] sm:$0xff]  ;;  %v2975_v29 = vpack.c.bf16 %v2956_v28, %v2955_v62 }
 0x11f   : > { %1108 = vst.msk [vmem:[#allocation3] sm:$0xff] %vm749_vm3, %v1076_v50  ;;  %v1077_v58 = vadd.f32 %v1045_v37, %v920_v35  ;;  %v1275_v43 = vpop.f32.mrb[17].mxu0 }
 0x120   : > { %1111 = vst.msk [vmem:[#allocation3 + $0x18] sm:$0xff] %vm749_vm3, %v1079_v53  ;;  %4544 = vmatmul.mubr.msk.bf16.gmra.mrb[124].mxu1 %vm411_vm1, %v5032_v4  ;;  %v4364_v59 = vpop.f32.mrb[18].mxu0  ;;  %v3308_v4 = vld [vmem:[#allocation2 + $0x171] sm:$0xff] }
 0x121   : > { %1109 = vst.msk [vmem:[#allocation3 + $0x8] sm:$0xff] %vm749_vm3, %v1077_v58  ;;  %v1278_v47 = vpop.f32.mrb[19].mxu0  ;;  %4547 = vmatprep.mubr.msk.bf16.mxu1 %vm411_vm1, %v5036_v49  ;;  %v2973_v49 = vpack.c.bf16 %v2952_v52, %v2951_v51  ;;  %v3330_v7 = vpack.c.bf16 %v3308_v4, %v3307_v54  ;;  %v3332_v51 = vpack.c.bf16 %v3312_v27, %v3311_v48  ;;  %v2958_v4 = vld [vmem:[#allocation2 + $0x1f0] sm:$0xff] }
 0x122   : > { %v3333_v54 = vpack.c.bf16 %v3314_v17, %v3313_v30  ;;  %v3319_v30 = vld [vmem:[#allocation2 + $0x229] sm:$0xff] }
 0x123   : > { %v4333_v56 = vpop.f32.mrb[20].mxu1  ;;  %4578 = vmatmul.mubr.msk.bf16.gmra.mrb[124].mxu0 %vm411_vm1, %v5038_v9 }
 0x124   : > { %v1082_v41 = vadd.f32 %v4333_v56, %v1050_v36  ;;  %v933_v55 = vpop.f32.mrb[21].mxu1  ;;  %4581 = vmatprep.mubr.msk.bf16.mxu0 %vm411_vm1, %v3329_v44 }
 0x125   : > { %v1404_v63 = vld [vmem:[#allocation3 + $0x10] sm:$0xff]  ;;  %v1080_v0 = vadd.f32 %v1048_v3, %v933_v55  ;;  %v4334_v1 = vpop.f32.mrb[22].mxu1  ;;  %v2957_v3 = vld [vmem:[#allocation2 + $0x1e8] sm:$0xff] }
 0x126   : > { %v1436_v14 = vadd.f32 %v4363_v42, %v1404_v63  ;;  %1114 = vst.msk [vmem:[#allocation3 + $0x30] sm:$0xff] %vm749_vm3, %v1082_v41  ;;  %v1402_v22 = vld [vmem:[#allocation3] sm:$0xff]  ;;  %v1083_v8 = vadd.f32 %v4334_v1, %v1051_v6  ;;  %v936_v9 = vpop.f32.mrb[23].mxu1  ;;  %v4367_v16 = vpop.f32.mrb[20].mxu0  ;;  %v1053_v42 = vld [vmem:[#allocation3 + $0x48] sm:$0xff]  ;;  %v1058_v63 = vld [vmem:[#allocation3 + $0x70] sm:$0xff] }
 0x127   : > { %v1434_v18 = vadd.f32 %v1402_v22, %v1275_v43  ;;  %1112 = vst.msk [vmem:[#allocation3 + $0x20] sm:$0xff] %vm749_vm3, %v1080_v0  ;;  %v1405_v24 = vld [vmem:[#allocation3 + $0x18] sm:$0xff]  ;;  %v1081_v60 = vadd.f32 %v1049_v13, %v936_v9  ;;  %v1291_v26 = vpop.f32.mrb[21].mxu0  ;;  %v1056_v6 = vld [vmem:[#allocation3 + $0x60] sm:$0xff] }
 0x128   : > { %1468 = vst.msk [vmem:[#allocation3 + $0x10] sm:$0xff] %vm749_vm3, %v1436_v14  ;;  %v1437_v46 = vadd.f32 %v4364_v59, %v1405_v24  ;;  %1115 = vst.msk [vmem:[#allocation3 + $0x38] sm:$0xff] %vm749_vm3, %v1083_v8  ;;  %v1403_v57 = vld [vmem:[#allocation3 + $0x8] sm:$0xff]  ;;  %4548 = vmatmul.mubr.msk.bf16.gmra.mrb[128].mxu1 %vm411_vm1, %v5048_v25  ;;  %v4368_v38 = vpop.f32.mrb[22].mxu0  ;;  %v1054_v25 = vld [vmem:[#allocation3 + $0x50] sm:$0xff] }
 0x129   : > { %1466 = vst.msk [vmem:[#allocation3] sm:$0xff] %vm749_vm3, %v1434_v18  ;;  %v1435_v15 = vadd.f32 %v1403_v57, %v1278_v47  ;;  %1113 = vst.msk [vmem:[#allocation3 + $0x28] sm:$0xff] %vm749_vm3, %v1081_v60  ;;  %v1294_v45 = vpop.f32.mrb[23].mxu0  ;;  %4551 = vmatprep.mubr.msk.bf16.mxu1 %vm411_vm1, %v2973_v49  ;;  %v2976_v49 = vpack.c.bf16 %v2958_v4, %v2957_v3  ;;  %v3316_v14 = vld [vmem:[#allocation2 + $0x1f1] sm:$0xff]  ;;  %v1064_v3 = vld [vmem:[#allocation3 + $0xa0] sm:$0xff] }
 0x12a   : > { %1469 = vst.msk [vmem:[#allocation3 + $0x18] sm:$0xff] %vm749_vm3, %v1437_v46  ;;  %v1059_v13 = vld [vmem:[#allocation3 + $0x78] sm:$0xff] }
 0x12b   : > { %1467 = vst.msk [vmem:[#allocation3 + $0x8] sm:$0xff] %vm749_vm3, %v1435_v15  ;;  %v4337_v23 = vpop.f32.mrb[24].mxu1  ;;  %4582 = vmatmul.mubr.msk.bf16.gmra.mrb[128].mxu0 %vm411_vm1, %v3330_v7  ;;  %v3334_v15 = vpack.c.bf16 %v3316_v14, %v3315_v34  ;;  %v1065_v14 = vld [vmem:[#allocation3 + $0xa8] sm:$0xff] }
 0x12c   : > { %v1086_v33 = vadd.f32 %v4337_v23, %v1054_v25  ;;  %v949_v39 = vpop.f32.mrb[25].mxu1  ;;  %4585 = vmatprep.mubr.msk.bf16.mxu0 %vm411_vm1, %v3331_v12  ;;  %v2961_v23 = vld [vmem:[#allocation2 + $0x228] sm:$0xff]  ;;  %v2962_v25 = vld [vmem:[#allocation2 + $0x230] sm:$0xff] }
 0x12d   : > { %v1408_v2 = vld [vmem:[#allocation3 + $0x30] sm:$0xff]  ;;  %v1084_v31 = vadd.f32 %v1052_v40, %v949_v39  ;;  %v4338_v50 = vpop.f32.mrb[26].mxu1  ;;  %v2978_v27 = vpack.c.bf16 %v2962_v25, %v2961_v23 }
 0x12e   : > { %v1440_v32 = vadd.f32 %v4367_v16, %v1408_v2  ;;  %1118 = vst.msk [vmem:[#allocation3 + $0x50] sm:$0xff] %vm749_vm3, %v1086_v33  ;;  %v1406_v53 = vld [vmem:[#allocation3 + $0x20] sm:$0xff]  ;;  %v1087_v35 = vadd.f32 %v4338_v50, %v1055_v11  ;;  %v952_v37 = vpop.f32.mrb[27].mxu1  ;;  %v4371_v58 = vpop.f32.mrb[24].mxu0  ;;  %v1062_v33 = vld [vmem:[#allocation3 + $0x90] sm:$0xff]  ;;  %v1063_v11 = vld [vmem:[#allocation3 + $0x98] sm:$0xff] }
 0x12f   : > { %v1438_v43 = vadd.f32 %v1406_v53, %v1291_v26  ;;  %1116 = vst.msk [vmem:[#allocation3 + $0x40] sm:$0xff] %vm749_vm3, %v1084_v31  ;;  %v1409_v59 = vld [vmem:[#allocation3 + $0x38] sm:$0xff]  ;;  %v1085_v44 = vadd.f32 %v1053_v42, %v952_v37  ;;  %v1307_v47 = vpop.f32.mrb[25].mxu0  ;;  %v1057_v26 = vld [vmem:[#allocation3 + $0x68] sm:$0xff] }
 0x130   : > { %1472 = vst.msk [vmem:[#allocation3 + $0x30] sm:$0xff] %vm749_vm3, %v1440_v32  ;;  %v1441_v52 = vadd.f32 %v4368_v38, %v1409_v59  ;;  %1119 = vst.msk [vmem:[#allocation3 + $0x58] sm:$0xff] %vm749_vm3, %v1087_v35  ;;  %v1407_v56 = vld [vmem:[#allocation3 + $0x28] sm:$0xff]  ;;  %4552 = vmatmul.mubr.msk.bf16.gmra.mrb[132].mxu1 %vm411_vm1, %v2974_v10  ;;  %v4372_v36 = vpop.f32.mrb[26].mxu0  ;;  %v1060_v10 = vld [vmem:[#allocation3 + $0x80] sm:$0xff] }
 0x131   : > { %1470 = vst.msk [vmem:[#allocation3 + $0x20] sm:$0xff] %vm749_vm3, %v1438_v43  ;;  %v1439_v41 = vadd.f32 %v1407_v56, %v1294_v45  ;;  %1117 = vst.msk [vmem:[#allocation3 + $0x48] sm:$0xff] %vm749_vm3, %v1085_v44  ;;  %v1310_v55 = vpop.f32.mrb[27].mxu0  ;;  %4555 = vmatprep.mubr.msk.bf16.mxu1 %vm411_vm1, %v2975_v29  ;;  %v3320_v2 = vld [vmem:[#allocation2 + $0x231] sm:$0xff]  ;;  %v1061_v35 = vld [vmem:[#allocation3 + $0x88] sm:$0xff] }
 0x132   : > { %1473 = vst.msk [vmem:[#allocation3 + $0x38] sm:$0xff] %vm749_vm3, %v1441_v52  ;;  %v3336_v59 = vpack.c.bf16 %v3320_v2, %v3319_v30 }
 0x133   : > { %1471 = vst.msk [vmem:[#allocation3 + $0x28] sm:$0xff] %vm749_vm3, %v1439_v41  ;;  %v4341_v20 = vpop.f32.mrb[28].mxu1  ;;  %4586 = vmatmul.mubr.msk.bf16.gmra.mrb[132].mxu0 %vm411_vm1, %v3332_v51 }
 0x134   : > { %v1090_v0 = vadd.f32 %v4341_v20, %v1058_v63  ;;  %v965_v1 = vpop.f32.mrb[29].mxu1  ;;  %4589 = vmatprep.mubr.msk.bf16.mxu0 %vm411_vm1, %v3333_v54  ;;  %v1066_v54 = vld [vmem:[#allocation3 + $0xb0] sm:$0xff] }
 0x135   : > { %v1412_v22 = vld [vmem:[#allocation3 + $0x50] sm:$0xff]  ;;  %v1088_v8 = vadd.f32 %v1056_v6, %v965_v1  ;;  %v4342_v9 = vpop.f32.mrb[30].mxu1 }
 0x136   : > { %v1444_v16 = vadd.f32 %v4371_v58, %v1412_v22  ;;  %1122 = vst.msk [vmem:[#allocation3 + $0x70] sm:$0xff] %vm749_vm3, %v1090_v0  ;;  %v1410_v18 = vld [vmem:[#allocation3 + $0x40] sm:$0xff]  ;;  %v1091_v24 = vadd.f32 %v4342_v9, %v1059_v13  ;;  %v968_v60 = vpop.f32.mrb[31].mxu1  ;;  %v4375_v7 = vpop.f32.mrb[28].mxu0  ;;  %v1067_v0 = vld [vmem:[#allocation3 + $0xb8] sm:$0xff] }
 0x137   : > { %v1442_v46 = vadd.f32 %v1410_v18, %v1307_v47  ;;  %1120 = vst.msk [vmem:[#allocation3 + $0x60] sm:$0xff] %vm749_vm3, %v1088_v8  ;;  %v1413_v57 = vld [vmem:[#allocation3 + $0x58] sm:$0xff]  ;;  %v1089_v38 = vadd.f32 %v1057_v26, %v968_v60  ;;  %v1323_v12 = vpop.f32.mrb[29].mxu0 }
 0x138   : > { %1476 = vst.msk [vmem:[#allocation3 + $0x50] sm:$0xff] %vm749_vm3, %v1444_v16  ;;  %v1445_v45 = vadd.f32 %v4372_v36, %v1413_v57  ;;  %1123 = vst.msk [vmem:[#allocation3 + $0x78] sm:$0xff] %vm749_vm3, %v1091_v24  ;;  %v1411_v19 = vld [vmem:[#allocation3 + $0x48] sm:$0xff]  ;;  %4556 = vmatmul.mubr.msk.bf16.gmra.mrb[136].mxu1 %vm411_vm1, %v2976_v49  ;;  %v4376_v21 = vpop.f32.mrb[30].mxu0  ;;  %v1070_v57 = vld [vmem:[#allocation3 + $0xd0] sm:$0xff] }
 0x139   : > { %1474 = vst.msk [vmem:[#allocation3 + $0x40] sm:$0xff] %vm749_vm3, %v1442_v46  ;;  %v1443_v62 = vadd.f32 %v1411_v19, %v1310_v55  ;;  %1121 = vst.msk [vmem:[#allocation3 + $0x68] sm:$0xff] %vm749_vm3, %v1089_v38  ;;  %v1326_v28 = vpop.f32.mrb[31].mxu0  ;;  %4559 = vmatprep.mubr.msk.bf16.mxu1 %vm411_vm1, %v5152_v5 }
 0x13a   : > { %1477 = vst.msk [vmem:[#allocation3 + $0x58] sm:$0xff] %vm749_vm3, %v1445_v45 }
 0x13b   : > { %1475 = vst.msk [vmem:[#allocation3 + $0x48] sm:$0xff] %vm749_vm3, %v1443_v62  ;;  %v4345_v48 = vpop.f32.mrb[32].mxu1  ;;  %4590 = vmatmul.mubr.msk.bf16.gmra.mrb[136].mxu0 %vm411_vm1, %v3334_v15  ;;  %v1068_v15 = vld [vmem:[#allocation3 + $0xc0] sm:$0xff]  ;;  %v1071_v62 = vld [vmem:[#allocation3 + $0xd8] sm:$0xff] }
 0x13c   : > { %v1094_v39 = vadd.f32 %v4345_v48, %v1062_v33  ;;  %v981_v40 = vpop.f32.mrb[33].mxu1  ;;  %4593 = vmatprep.mubr.msk.bf16.mxu0 %vm411_vm1, %v5216_v61  ;;  %v1069_v33 = vld [vmem:[#allocation3 + $0xc8] sm:$0xff] }
 0x13d   : > { %v1416_v5 = vld [vmem:[#allocation3 + $0x70] sm:$0xff]  ;;  %v1092_v31 = vadd.f32 %v1060_v10, %v981_v40  ;;  %v4346_v50 = vpop.f32.mrb[34].mxu1 }
 0x13e   : > { %v1448_v29 = vadd.f32 %v4375_v7, %v1416_v5  ;;  %1126 = vst.msk [vmem:[#allocation3 + $0x90] sm:$0xff] %vm749_vm3, %v1094_v39  ;;  %v1414_v17 = vld [vmem:[#allocation3 + $0x60] sm:$0xff]  ;;  %v1095_v32 = vadd.f32 %v4346_v50, %v1063_v11  ;;  %v984_v53 = vpop.f32.mrb[35].mxu1  ;;  %v4379_v37 = vpop.f32.mrb[32].mxu0 }
 0x13f   : > { %v1446_v42 = vadd.f32 %v1414_v17, %v1323_v12  ;;  %1124 = vst.msk [vmem:[#allocation3 + $0x80] sm:$0xff] %vm749_vm3, %v1092_v31  ;;  %v1417_v58 = vld [vmem:[#allocation3 + $0x78] sm:$0xff]  ;;  %v1093_v43 = vadd.f32 %v1061_v35, %v984_v53  ;;  %v1339_v61 = vpop.f32.mrb[33].mxu0  ;;  %v1074_v17 = vld [vmem:[#allocation3 + $0xf0] sm:$0xff]  ;;  %v1072_v35 = vld [vmem:[#allocation3 + $0xe0] sm:$0xff] }
 0x140   : > { %1480 = vst.msk [vmem:[#allocation3 + $0x70] sm:$0xff] %vm749_vm3, %v1448_v29  ;;  %v1449_v44 = vadd.f32 %v4376_v21, %v1417_v58  ;;  %1127 = vst.msk [vmem:[#allocation3 + $0x98] sm:$0xff] %vm749_vm3, %v1095_v32  ;;  %v1415_v47 = vld [vmem:[#allocation3 + $0x68] sm:$0xff]  ;;  %4560 = vmatmul.mubr.msk.bf16.gmra.mrb[140].mxu1 %vm411_vm1, %v2978_v27  ;;  %v4380_v51 = vpop.f32.mrb[34].mxu0 }
 0x141   : > { %1478 = vst.msk [vmem:[#allocation3 + $0x60] sm:$0xff] %vm749_vm3, %v1446_v42  ;;  %v1447_v52 = vadd.f32 %v1415_v47, %v1326_v28  ;;  %1125 = vst.msk [vmem:[#allocation3 + $0x88] sm:$0xff] %vm749_vm3, %v1093_v43  ;;  %v1342_v56 = vpop.f32.mrb[35].mxu0  ;;  %v1075_v43 = vld [vmem:[#allocation3 + $0xf8] sm:$0xff] }
 0x142   : > { %1481 = vst.msk [vmem:[#allocation3 + $0x78] sm:$0xff] %vm749_vm3, %v1449_v44 }
 0x143   : > { %1479 = vst.msk [vmem:[#allocation3 + $0x68] sm:$0xff] %vm749_vm3, %v1447_v52  ;;  %v4349_v36 = vpop.f32.mrb[36].mxu1  ;;  %4594 = vmatmul.mubr.msk.bf16.gmra.mrb[140].mxu0 %vm411_vm1, %v3336_v59 }
 0x144   : > { %v1098_v41 = vadd.f32 %v4349_v36, %v1066_v54  ;;  %v997_v55 = vpop.f32.mrb[37].mxu1 }
 0x145   : > { %v1420_v4 = vld [vmem:[#allocation3 + $0x90] sm:$0xff]  ;;  %v1096_v20 = vadd.f32 %v1064_v3, %v997_v55  ;;  %v4350_v63 = vpop.f32.mrb[38].mxu1 }
 0x146   : > { %v1452_v1 = vadd.f32 %v4379_v37, %v1420_v4  ;;  %1130 = vst.msk [vmem:[#allocation3 + $0xb0] sm:$0xff] %vm749_vm3, %v1098_v41  ;;  %v1418_v6 = vld [vmem:[#allocation3 + $0x80] sm:$0xff]  ;;  %v1099_v49 = vadd.f32 %v4350_v63, %v1067_v0  ;;  %v1000_v34 = vpop.f32.mrb[39].mxu1  ;;  %v4383_v22 = vpop.f32.mrb[36].mxu0 }
 0x147   : > { %v1450_v8 = vadd.f32 %v1418_v6, %v1339_v61  ;;  %1128 = vst.msk [vmem:[#allocation3 + $0xa0] sm:$0xff] %vm749_vm3, %v1096_v20  ;;  %v1421_v9 = vld [vmem:[#allocation3 + $0x98] sm:$0xff]  ;;  %v1097_v13 = vadd.f32 %v1065_v14, %v1000_v34  ;;  %v1355_v16 = vpop.f32.mrb[37].mxu0  ;;  %v1760_v34 = vld [vmem:[#allocation3] sm:$0xff] }
 0x148   : > { %1484 = vst.msk [vmem:[#allocation3 + $0x90] sm:$0xff] %vm749_vm3, %v1452_v1  ;;  %v1453_v18 = vadd.f32 %v4380_v51, %v1421_v9  ;;  %1131 = vst.msk [vmem:[#allocation3 + $0xb8] sm:$0xff] %vm749_vm3, %v1099_v49  ;;  %v1419_v24 = vld [vmem:[#allocation3 + $0x88] sm:$0xff]  ;;  %v4384_v60 = vpop.f32.mrb[38].mxu0  ;;  %v1762_v1 = vld [vmem:[#allocation3 + $0x10] sm:$0xff] }
 0x149   : > { %1482 = vst.msk [vmem:[#allocation3 + $0x80] sm:$0xff] %vm749_vm3, %v1450_v8  ;;  %v1451_v26 = vadd.f32 %v1419_v24, %v1342_v56  ;;  %1129 = vst.msk [vmem:[#allocation3 + $0xa8] sm:$0xff] %vm749_vm3, %v1097_v13  ;;  %v1358_v7 = vpop.f32.mrb[39].mxu0  ;;  %v1073_v51 = vld [vmem:[#allocation3 + $0xe8] sm:$0xff]  ;;  %v1763_v9 = vld [vmem:[#allocation3 + $0x18] sm:$0xff] }
 0x14a   : > { %1485 = vst.msk [vmem:[#allocation3 + $0x98] sm:$0xff] %vm749_vm3, %v1453_v18 }
 0x14b   : > { %1483 = vst.msk [vmem:[#allocation3 + $0x88] sm:$0xff] %vm749_vm3, %v1451_v26  ;;  %v4353_v46 = vpop.f32.mrb[40].mxu1 }
 0x14c   : > { %v1102_v38 = vadd.f32 %v4353_v46, %v1070_v57  ;;  %v1013_v12 = vpop.f32.mrb[41].mxu1 }
 0x14d   : > { %v1424_v45 = vld [vmem:[#allocation3 + $0xb0] sm:$0xff]  ;;  %v1100_v19 = vadd.f32 %v1068_v15, %v1013_v12  ;;  %v4354_v21 = vpop.f32.mrb[42].mxu1 }
 0x14e   : > { %v1456_v28 = vadd.f32 %v4383_v22, %v1424_v45  ;;  %1134 = vst.msk [vmem:[#allocation3 + $0xd0] sm:$0xff] %vm749_vm3, %v1102_v38  ;;  %v1422_v23 = vld [vmem:[#allocation3 + $0xa0] sm:$0xff]  ;;  %v1103_v25 = vadd.f32 %v4354_v21, %v1071_v62  ;;  %v1016_v48 = vpop.f32.mrb[43].mxu1  ;;  %v4387_v39 = vpop.f32.mrb[40].mxu0 }
 0x14f   : > { %v1454_v40 = vadd.f32 %v1422_v23, %v1355_v16  ;;  %1132 = vst.msk [vmem:[#allocation3 + $0xc0] sm:$0xff] %vm749_vm3, %v1100_v19  ;;  %v1425_v10 = vld [vmem:[#allocation3 + $0xb8] sm:$0xff]  ;;  %v1101_v27 = vadd.f32 %v1069_v33, %v1016_v48  ;;  %v1371_v30 = vpop.f32.mrb[41].mxu0  ;;  %v1764_v48 = vld [vmem:[#allocation3 + $0x20] sm:$0xff] }
 0x150   : > { %1488 = vst.msk [vmem:[#allocation3 + $0xb0] sm:$0xff] %vm749_vm3, %v1456_v28  ;;  %v1457_v2 = vadd.f32 %v4384_v60, %v1425_v10  ;;  %1135 = vst.msk [vmem:[#allocation3 + $0xd8] sm:$0xff] %vm749_vm3, %v1103_v25  ;;  %v1423_v5 = vld [vmem:[#allocation3 + $0xa8] sm:$0xff]  ;;  %v4388_v31 = vpop.f32.mrb[42].mxu0  ;;  %v1766_v28 = vld [vmem:[#allocation3 + $0x30] sm:$0xff] }
 0x151   : > { %1486 = vst.msk [vmem:[#allocation3 + $0xa0] sm:$0xff] %vm749_vm3, %v1454_v40  ;;  %v1455_v50 = vadd.f32 %v1423_v5, %v1358_v7  ;;  %1133 = vst.msk [vmem:[#allocation3 + $0xc8] sm:$0xff] %vm749_vm3, %v1101_v27  ;;  %v1374_v11 = vpop.f32.mrb[43].mxu0  ;;  %v1761_v60 = vld [vmem:[#allocation3 + $0x8] sm:$0xff]  ;;  %v1767_v10 = vld [vmem:[#allocation3 + $0x38] sm:$0xff] }
 0x152   : > { %1489 = vst.msk [vmem:[#allocation3 + $0xb8] sm:$0xff] %vm749_vm3, %v1457_v2 }
 0x153   : > { %1487 = vst.msk [vmem:[#allocation3 + $0xa8] sm:$0xff] %vm749_vm3, %v1455_v50  ;;  %v4357_v29 = vpop.f32.mrb[44].mxu1 }
 0x154   : > { %v1106_v32 = vadd.f32 %v4357_v29, %v1074_v17  ;;  %v1029_v53 = vpop.f32.mrb[45].mxu1 }
 0x155   : > { %v1428_v37 = vld [vmem:[#allocation3 + $0xd0] sm:$0xff]  ;;  %v1104_v42 = vadd.f32 %v1072_v35, %v1029_v53  ;;  %v4358_v58 = vpop.f32.mrb[46].mxu1 }
 0x156   : > { %v1460_v61 = vadd.f32 %v4387_v39, %v1428_v37  ;;  %1138 = vst.msk [vmem:[#allocation3 + $0xf0] sm:$0xff] %vm749_vm3, %v1106_v32  ;;  %v1426_v59 = vld [vmem:[#allocation3 + $0xc0] sm:$0xff]  ;;  %v1107_v44 = vadd.f32 %v4358_v58, %v1075_v43  ;;  %v1032_v47 = vpop.f32.mrb[47].mxu1  ;;  %v4391_v52 = vpop.f32.mrb[44].mxu0 }
 0x157   : > { %v1458_v56 = vadd.f32 %v1426_v59, %v1371_v30  ;;  %1136 = vst.msk [vmem:[#allocation3 + $0xe0] sm:$0xff] %vm749_vm3, %v1104_v42  ;;  %v1429_v36 = vld [vmem:[#allocation3 + $0xd8] sm:$0xff]  ;;  %v1105_v54 = vadd.f32 %v1073_v51, %v1032_v47  ;;  %v1387_v41 = vpop.f32.mrb[45].mxu0  ;;  %v1768_v47 = vld [vmem:[#allocation3 + $0x40] sm:$0xff] }
 0x158   : > { %1492 = vst.msk [vmem:[#allocation3 + $0xd0] sm:$0xff] %vm749_vm3, %v1460_v61  ;;  %v1461_v55 = vadd.f32 %v4388_v31, %v1429_v36  ;;  %1139 = vst.msk [vmem:[#allocation3 + $0xf8] sm:$0xff] %vm749_vm3, %v1107_v44  ;;  %v1427_v3 = vld [vmem:[#allocation3 + $0xc8] sm:$0xff]  ;;  %v4392_v4 = vpop.f32.mrb[46].mxu0  ;;  %v1770_v61 = vld [vmem:[#allocation3 + $0x50] sm:$0xff] }
 0x159   : > { %1490 = vst.msk [vmem:[#allocation3 + $0xc0] sm:$0xff] %vm749_vm3, %v1458_v56  ;;  %v1459_v20 = vadd.f32 %v1427_v3, %v1374_v11  ;;  %1137 = vst.msk [vmem:[#allocation3 + $0xe8] sm:$0xff] %vm749_vm3, %v1105_v54  ;;  %v1390_v63 = vpop.f32.mrb[47].mxu0  ;;  %v1765_v31 = vld [vmem:[#allocation3 + $0x28] sm:$0xff]  ;;  %v1771_v36 = vld [vmem:[#allocation3 + $0x58] sm:$0xff] }
 0x15a   : > { %1493 = vst.msk [vmem:[#allocation3 + $0xd8] sm:$0xff] %vm749_vm3, %v1461_v55 }
 0x15b   : > { %1491 = vst.msk [vmem:[#allocation3 + $0xc8] sm:$0xff] %vm749_vm3, %v1459_v20  ;;  %v4397_v0 = vpop.f32.mrb[48].mxu1 }
 0x15c   : > { %v1794_v6 = vadd.f32 %v4397_v0, %v1762_v1  ;;  %v1633_v49 = vpop.f32.mrb[49].mxu1 }
 0x15d   : > { %v1432_v14 = vld [vmem:[#allocation3 + $0xf0] sm:$0xff]  ;;  %v1792_v22 = vadd.f32 %v1760_v34, %v1633_v49  ;;  %v4398_v8 = vpop.f32.mrb[50].mxu1 }
 0x15e   : > { %v1464_v13 = vadd.f32 %v4391_v52, %v1432_v14  ;;  %v1430_v16 = vld [vmem:[#allocation3 + $0xe0] sm:$0xff]  ;;  %1826 = vst.msk [vmem:[#allocation3 + $0x10] sm:$0xff] %vm749_vm3, %v1794_v6  ;;  %v1795_v18 = vadd.f32 %v4398_v8, %v1763_v9  ;;  %v1636_v24 = vpop.f32.mrb[51].mxu1  ;;  %v4431_v26 = vpop.f32.mrb[48].mxu0 }
 0x15f   : > { %v1462_v7 = vadd.f32 %v1430_v16, %v1387_v41  ;;  %v1433_v46 = vld [vmem:[#allocation3 + $0xf8] sm:$0xff]  ;;  %1824 = vst.msk [vmem:[#allocation3] sm:$0xff] %vm749_vm3, %v1792_v22  ;;  %v1793_v57 = vadd.f32 %v1761_v60, %v1636_v24  ;;  %v1991_v38 = vpop.f32.mrb[49].mxu0  ;;  %v1772_v24 = vld [vmem:[#allocation3 + $0x60] sm:$0xff] }
 0x160   : > { %1496 = vst.msk [vmem:[#allocation3 + $0xf0] sm:$0xff] %vm749_vm3, %v1464_v13  ;;  %v1465_v12 = vadd.f32 %v4392_v4, %v1433_v46  ;;  %v1431_v15 = vld [vmem:[#allocation3 + $0xe8] sm:$0xff]  ;;  %1827 = vst.msk [vmem:[#allocation3 + $0x18] sm:$0xff] %vm749_vm3, %v1795_v18  ;;  %v4432_v45 = vpop.f32.mrb[50].mxu0  ;;  %v1774_v13 = vld [vmem:[#allocation3 + $0x70] sm:$0xff] }
 0x161   : > { %1494 = vst.msk [vmem:[#allocation3 + $0xe0] sm:$0xff] %vm749_vm3, %v1462_v7  ;;  %v1463_v19 = vadd.f32 %v1431_v15, %v1390_v63  ;;  %1825 = vst.msk [vmem:[#allocation3 + $0x8] sm:$0xff] %vm749_vm3, %v1793_v57  ;;  %v1994_v21 = vpop.f32.mrb[51].mxu0  ;;  %v1769_v4 = vld [vmem:[#allocation3 + $0x48] sm:$0xff]  ;;  %v1775_v46 = vld [vmem:[#allocation3 + $0x78] sm:$0xff] }
 0x162   : > { %1497 = vst.msk [vmem:[#allocation3 + $0xf8] sm:$0xff] %vm749_vm3, %v1465_v12 }
 0x163   : > { %1495 = vst.msk [vmem:[#allocation3 + $0xe8] sm:$0xff] %vm749_vm3, %v1463_v19  ;;  %v4401_v62 = vpop.f32.mrb[52].mxu1 }
 0x164   : > { %v1798_v23 = vadd.f32 %v4401_v62, %v1766_v28  ;;  %v1649_v25 = vpop.f32.mrb[53].mxu1 }
 0x165   : > { %v2120_v33 = vld [vmem:[#allocation3 + $0x10] sm:$0xff]  ;;  %v1796_v39 = vadd.f32 %v1764_v48, %v1649_v25  ;;  %v4402_v40 = vpop.f32.mrb[54].mxu1 }
 0x166   : > { %v2152_v27 = vadd.f32 %v4431_v26, %v2120_v33  ;;  %1830 = vst.msk [vmem:[#allocation3 + $0x30] sm:$0xff] %vm749_vm3, %v1798_v23  ;;  %v2118_v30 = vld [vmem:[#allocation3] sm:$0xff]  ;;  %v1799_v2 = vadd.f32 %v4402_v40, %v1767_v10  ;;  %v1652_v5 = vpop.f32.mrb[55].mxu1  ;;  %v4435_v50 = vpop.f32.mrb[52].mxu0 }
 0x167   : > { %v2150_v11 = vadd.f32 %v2118_v30, %v1991_v38  ;;  %1828 = vst.msk [vmem:[#allocation3 + $0x20] sm:$0xff] %vm749_vm3, %v1796_v39  ;;  %v2121_v29 = vld [vmem:[#allocation3 + $0x18] sm:$0xff]  ;;  %v1797_v17 = vadd.f32 %v1765_v31, %v1652_v5  ;;  %v2007_v32 = vpop.f32.mrb[53].mxu0  ;;  %v1776_v5 = vld [vmem:[#allocation3 + $0x80] sm:$0xff] }
 0x168   : > { %2184 = vst.msk [vmem:[#allocation3 + $0x10] sm:$0xff] %vm749_vm3, %v2152_v27  ;;  %v2153_v53 = vadd.f32 %v4432_v45, %v2121_v29  ;;  %1831 = vst.msk [vmem:[#allocation3 + $0x38] sm:$0xff] %vm749_vm3, %v1799_v2  ;;  %v2119_v35 = vld [vmem:[#allocation3 + $0x8] sm:$0xff]  ;;  %v4436_v37 = vpop.f32.mrb[54].mxu0  ;;  %v1778_v27 = vld [vmem:[#allocation3 + $0x90] sm:$0xff] }
 0x169   : > { %2182 = vst.msk [vmem:[#allocation3] sm:$0xff] %vm749_vm3, %v2150_v11  ;;  %v2151_v42 = vadd.f32 %v2119_v35, %v1994_v21  ;;  %1829 = vst.msk [vmem:[#allocation3 + $0x28] sm:$0xff] %vm749_vm3, %v1797_v17  ;;  %v2010_v58 = vpop.f32.mrb[55].mxu0  ;;  %v1773_v45 = vld [vmem:[#allocation3 + $0x68] sm:$0xff]  ;;  %v1779_v29 = vld [vmem:[#allocation3 + $0x98] sm:$0xff] }
 0x16a   : > { %2185 = vst.msk [vmem:[#allocation3 + $0x18] sm:$0xff] %vm749_vm3, %v2153_v53 }
 0x16b   : > { %2183 = vst.msk [vmem:[#allocation3 + $0x8] sm:$0xff] %vm749_vm3, %v2151_v42  ;;  %v4405_v43 = vpop.f32.mrb[56].mxu1 }
 0x16c   : > { %v1802_v59 = vadd.f32 %v4405_v43, %v1770_v61  ;;  %v1665_v44 = vpop.f32.mrb[57].mxu1 }
 0x16d   : > { %v2124_v51 = vld [vmem:[#allocation3 + $0x30] sm:$0xff]  ;;  %v1800_v52 = vadd.f32 %v1768_v47, %v1665_v44  ;;  %v4406_v56 = vpop.f32.mrb[58].mxu1 }
 0x16e   : > { %v2156_v54 = vadd.f32 %v4435_v50, %v2124_v51  ;;  %1834 = vst.msk [vmem:[#allocation3 + $0x50] sm:$0xff] %vm749_vm3, %v1802_v59  ;;  %v2122_v41 = vld [vmem:[#allocation3 + $0x20] sm:$0xff]  ;;  %v1803_v55 = vadd.f32 %v4406_v56, %v1771_v36  ;;  %v1668_v3 = vpop.f32.mrb[59].mxu1  ;;  %v4439_v20 = vpop.f32.mrb[56].mxu0 }
 0x16f   : > { %v2154_v63 = vadd.f32 %v2122_v41, %v2007_v32  ;;  %1832 = vst.msk [vmem:[#allocation3 + $0x40] sm:$0xff] %vm749_vm3, %v1800_v52  ;;  %v2125_v0 = vld [vmem:[#allocation3 + $0x38] sm:$0xff]  ;;  %v1801_v1 = vadd.f32 %v1769_v4, %v1668_v3  ;;  %v2023_v6 = vpop.f32.mrb[57].mxu0  ;;  %v1780_v3 = vld [vmem:[#allocation3 + $0xa0] sm:$0xff] }
 0x170   : > { %2188 = vst.msk [vmem:[#allocation3 + $0x30] sm:$0xff] %vm749_vm3, %v2156_v54  ;;  %v2157_v49 = vadd.f32 %v4436_v37, %v2125_v0  ;;  %1835 = vst.msk [vmem:[#allocation3 + $0x58] sm:$0xff] %vm749_vm3, %v1803_v55  ;;  %v2123_v34 = vld [vmem:[#allocation3 + $0x28] sm:$0xff]  ;;  %v4440_v14 = vpop.f32.mrb[58].mxu0  ;;  %v1782_v54 = vld [vmem:[#allocation3 + $0xb0] sm:$0xff] }
 0x171   : > { %2186 = vst.msk [vmem:[#allocation3 + $0x20] sm:$0xff] %vm749_vm3, %v2154_v63  ;;  %v2155_v22 = vadd.f32 %v2123_v34, %v2010_v58  ;;  %1833 = vst.msk [vmem:[#allocation3 + $0x48] sm:$0xff] %vm749_vm3, %v1801_v1  ;;  %v2026_v8 = vpop.f32.mrb[59].mxu0  ;;  %v1777_v37 = vld [vmem:[#allocation3 + $0x88] sm:$0xff]  ;;  %v1783_v0 = vld [vmem:[#allocation3 + $0xb8] sm:$0xff] }
 0x172   : > { %2189 = vst.msk [vmem:[#allocation3 + $0x38] sm:$0xff] %vm749_vm3, %v2157_v49 }
 0x173   : > { %2187 = vst.msk [vmem:[#allocation3 + $0x28] sm:$0xff] %vm749_vm3, %v2155_v22  ;;  %v4409_v9 = vpop.f32.mrb[60].mxu1 }
 0x174   : > { %v1806_v16 = vadd.f32 %v4409_v9, %v1774_v13  ;;  %v1681_v18 = vpop.f32.mrb[61].mxu1 }
 0x175   : > { %v2128_v60 = vld [vmem:[#allocation3 + $0x50] sm:$0xff]  ;;  %v1804_v26 = vadd.f32 %v1772_v24, %v1681_v18  ;;  %v4410_v7 = vpop.f32.mrb[62].mxu1 }
 0x176   : > { %v2160_v57 = vadd.f32 %v4439_v20, %v2128_v60  ;;  %1838 = vst.msk [vmem:[#allocation3 + $0x70] sm:$0xff] %vm749_vm3, %v1806_v16  ;;  %v2126_v38 = vld [vmem:[#allocation3 + $0x40] sm:$0xff]  ;;  %v1807_v12 = vadd.f32 %v4410_v7, %v1775_v46  ;;  %v1684_v15 = vpop.f32.mrb[63].mxu1  ;;  %v4443_v19 = vpop.f32.mrb[60].mxu0 }
 0x177   : > { %v2158_v21 = vadd.f32 %v2126_v38, %v2023_v6  ;;  %1836 = vst.msk [vmem:[#allocation3 + $0x60] sm:$0xff] %vm749_vm3, %v1804_v26  ;;  %v2129_v62 = vld [vmem:[#allocation3 + $0x58] sm:$0xff]  ;;  %v1805_v28 = vadd.f32 %v1773_v45, %v1684_v15  ;;  %v2039_v23 = vpop.f32.mrb[61].mxu0  ;;  %v1784_v15 = vld [vmem:[#allocation3 + $0xc0] sm:$0xff] }
 0x178   : > { %2192 = vst.msk [vmem:[#allocation3 + $0x50] sm:$0xff] %vm749_vm3, %v2160_v57  ;;  %v2161_v25 = vadd.f32 %v4440_v14, %v2129_v62  ;;  %1839 = vst.msk [vmem:[#allocation3 + $0x78] sm:$0xff] %vm749_vm3, %v1807_v12  ;;  %v2127_v48 = vld [vmem:[#allocation3 + $0x48] sm:$0xff]  ;;  %v4444_v33 = vpop.f32.mrb[62].mxu0  ;;  %v1786_v57 = vld [vmem:[#allocation3 + $0xd0] sm:$0xff] }
 0x179   : > { %2190 = vst.msk [vmem:[#allocation3 + $0x40] sm:$0xff] %vm749_vm3, %v2158_v21  ;;  %v2159_v39 = vadd.f32 %v2127_v48, %v2026_v8  ;;  %1837 = vst.msk [vmem:[#allocation3 + $0x68] sm:$0xff] %vm749_vm3, %v1805_v28  ;;  %v2042_v40 = vpop.f32.mrb[63].mxu0  ;;  %v1781_v14 = vld [vmem:[#allocation3 + $0xa8] sm:$0xff]  ;;  %v1787_v62 = vld [vmem:[#allocation3 + $0xd8] sm:$0xff] }
 0x17a   : > { %2193 = vst.msk [vmem:[#allocation3 + $0x58] sm:$0xff] %vm749_vm3, %v2161_v25 }
 0x17b   : > { %2191 = vst.msk [vmem:[#allocation3 + $0x48] sm:$0xff] %vm749_vm3, %v2159_v39  ;;  %v4413_v10 = vpop.f32.mrb[64].mxu1 }
 0x17c   : > { %v1810_v30 = vadd.f32 %v4413_v10, %v1778_v27  ;;  %v1697_v2 = vpop.f32.mrb[65].mxu1 }
 0x17d   : > { %v2132_v31 = vld [vmem:[#allocation3 + $0x70] sm:$0xff]  ;;  %v1808_v50 = vadd.f32 %v1776_v5, %v1697_v2  ;;  %v4414_v11 = vpop.f32.mrb[66].mxu1 }
 0x17e   : > { %v2164_v17 = vadd.f32 %v4443_v19, %v2132_v31  ;;  %1842 = vst.msk [vmem:[#allocation3 + $0x90] sm:$0xff] %vm749_vm3, %v1810_v30  ;;  %v2130_v32 = vld [vmem:[#allocation3 + $0x60] sm:$0xff]  ;;  %v1811_v53 = vadd.f32 %v4414_v11, %v1779_v29  ;;  %v1700_v35 = vpop.f32.mrb[67].mxu1  ;;  %v4447_v42 = vpop.f32.mrb[64].mxu0 }
 0x17f   : > { %v2162_v58 = vadd.f32 %v2130_v32, %v2039_v23  ;;  %1840 = vst.msk [vmem:[#allocation3 + $0x80] sm:$0xff] %vm749_vm3, %v1808_v50  ;;  %v2133_v43 = vld [vmem:[#allocation3 + $0x78] sm:$0xff]  ;;  %v1809_v61 = vadd.f32 %v1777_v37, %v1700_v35  ;;  %v2055_v59 = vpop.f32.mrb[65].mxu0  ;;  %v1788_v35 = vld [vmem:[#allocation3 + $0xe0] sm:$0xff] }
 0x180   : > { %2196 = vst.msk [vmem:[#allocation3 + $0x70] sm:$0xff] %vm749_vm3, %v2164_v17  ;;  %v2165_v44 = vadd.f32 %v4444_v33, %v2133_v43  ;;  %1843 = vst.msk [vmem:[#allocation3 + $0x98] sm:$0xff] %vm749_vm3, %v1811_v53  ;;  %v2131_v47 = vld [vmem:[#allocation3 + $0x68] sm:$0xff]  ;;  %v4448_v51 = vpop.f32.mrb[66].mxu0  ;;  %v1790_v17 = vld [vmem:[#allocation3 + $0xf0] sm:$0xff] }
 0x181   : > { %2194 = vst.msk [vmem:[#allocation3 + $0x60] sm:$0xff] %vm749_vm3, %v2162_v58  ;;  %v2163_v52 = vadd.f32 %v2131_v47, %v2042_v40  ;;  %1841 = vst.msk [vmem:[#allocation3 + $0x88] sm:$0xff] %vm749_vm3, %v1809_v61  ;;  %v2058_v56 = vpop.f32.mrb[67].mxu0  ;;  %v1785_v33 = vld [vmem:[#allocation3 + $0xc8] sm:$0xff]  ;;  %v1791_v43 = vld [vmem:[#allocation3 + $0xf8] sm:$0xff] }
 0x182   : > { %2197 = vst.msk [vmem:[#allocation3 + $0x78] sm:$0xff] %vm749_vm3, %v2165_v44 }
 0x183   : > { %2195 = vst.msk [vmem:[#allocation3 + $0x68] sm:$0xff] %vm749_vm3, %v2163_v52  ;;  %v4417_v36 = vpop.f32.mrb[68].mxu1 }
 0x184   : > { %v1814_v41 = vadd.f32 %v4417_v36, %v1782_v54  ;;  %v1713_v55 = vpop.f32.mrb[69].mxu1 }
 0x185   : > { %v2136_v4 = vld [vmem:[#allocation3 + $0x90] sm:$0xff]  ;;  %v1812_v20 = vadd.f32 %v1780_v3, %v1713_v55  ;;  %v4418_v63 = vpop.f32.mrb[70].mxu1 }
 0x186   : > { %v2168_v1 = vadd.f32 %v4447_v42, %v2136_v4  ;;  %1846 = vst.msk [vmem:[#allocation3 + $0xb0] sm:$0xff] %vm749_vm3, %v1814_v41  ;;  %v2134_v6 = vld [vmem:[#allocation3 + $0x80] sm:$0xff]  ;;  %v1815_v49 = vadd.f32 %v4418_v63, %v1783_v0  ;;  %v1716_v34 = vpop.f32.mrb[71].mxu1  ;;  %v4451_v22 = vpop.f32.mrb[68].mxu0 }
 0x187   : > { %v2166_v8 = vadd.f32 %v2134_v6, %v2055_v59  ;;  %1844 = vst.msk [vmem:[#allocation3 + $0xa0] sm:$0xff] %vm749_vm3, %v1812_v20  ;;  %v2137_v9 = vld [vmem:[#allocation3 + $0x98] sm:$0xff]  ;;  %v1813_v13 = vadd.f32 %v1781_v14, %v1716_v34  ;;  %v2071_v16 = vpop.f32.mrb[69].mxu0  ;;  %v2476_v34 = vld [vmem:[#allocation3] sm:$0xff] }
 0x188   : > { %2200 = vst.msk [vmem:[#allocation3 + $0x90] sm:$0xff] %vm749_vm3, %v2168_v1  ;;  %v2169_v18 = vadd.f32 %v4448_v51, %v2137_v9  ;;  %1847 = vst.msk [vmem:[#allocation3 + $0xb8] sm:$0xff] %vm749_vm3, %v1815_v49  ;;  %v2135_v24 = vld [vmem:[#allocation3 + $0x88] sm:$0xff]  ;;  %v4452_v60 = vpop.f32.mrb[70].mxu0  ;;  %v2478_v1 = vld [vmem:[#allocation3 + $0x10] sm:$0xff] }
 0x189   : > { %2198 = vst.msk [vmem:[#allocation3 + $0x80] sm:$0xff] %vm749_vm3, %v2166_v8  ;;  %v2167_v26 = vadd.f32 %v2135_v24, %v2058_v56  ;;  %1845 = vst.msk [vmem:[#allocation3 + $0xa8] sm:$0xff] %vm749_vm3, %v1813_v13  ;;  %v2074_v7 = vpop.f32.mrb[71].mxu0  ;;  %v1789_v51 = vld [vmem:[#allocation3 + $0xe8] sm:$0xff]  ;;  %v2479_v9 = vld [vmem:[#allocation3 + $0x18] sm:$0xff] }
 0x18a   : > { %2201 = vst.msk [vmem:[#allocation3 + $0x98] sm:$0xff] %vm749_vm3, %v2169_v18 }
 0x18b   : > { %2199 = vst.msk [vmem:[#allocation3 + $0x88] sm:$0xff] %vm749_vm3, %v2167_v26  ;;  %v4421_v46 = vpop.f32.mrb[72].mxu1 }
 0x18c   : > { %v1818_v38 = vadd.f32 %v4421_v46, %v1786_v57  ;;  %v1729_v12 = vpop.f32.mrb[73].mxu1 }
 0x18d   : > { %v2140_v45 = vld [vmem:[#allocation3 + $0xb0] sm:$0xff]  ;;  %v1816_v19 = vadd.f32 %v1784_v15, %v1729_v12  ;;  %v4422_v21 = vpop.f32.mrb[74].mxu1 }
 0x18e   : > { %v2172_v28 = vadd.f32 %v4451_v22, %v2140_v45  ;;  %1850 = vst.msk [vmem:[#allocation3 + $0xd0] sm:$0xff] %vm749_vm3, %v1818_v38  ;;  %v2138_v23 = vld [vmem:[#allocation3 + $0xa0] sm:$0xff]  ;;  %v1819_v25 = vadd.f32 %v4422_v21, %v1787_v62  ;;  %v1732_v48 = vpop.f32.mrb[75].mxu1  ;;  %v4455_v39 = vpop.f32.mrb[72].mxu0 }
 0x18f   : > { %v2170_v40 = vadd.f32 %v2138_v23, %v2071_v16  ;;  %1848 = vst.msk [vmem:[#allocation3 + $0xc0] sm:$0xff] %vm749_vm3, %v1816_v19  ;;  %v2141_v10 = vld [vmem:[#allocation3 + $0xb8] sm:$0xff]  ;;  %v1817_v27 = vadd.f32 %v1785_v33, %v1732_v48  ;;  %v2087_v30 = vpop.f32.mrb[73].mxu0  ;;  %v2480_v48 = vld [vmem:[#allocation3 + $0x20] sm:$0xff] }
 0x190   : > { %2204 = vst.msk [vmem:[#allocation3 + $0xb0] sm:$0xff] %vm749_vm3, %v2172_v28  ;;  %v2173_v2 = vadd.f32 %v4452_v60, %v2141_v10  ;;  %1851 = vst.msk [vmem:[#allocation3 + $0xd8] sm:$0xff] %vm749_vm3, %v1819_v25  ;;  %v2139_v5 = vld [vmem:[#allocation3 + $0xa8] sm:$0xff]  ;;  %v4456_v31 = vpop.f32.mrb[74].mxu0  ;;  %v2482_v28 = vld [vmem:[#allocation3 + $0x30] sm:$0xff] }
 0x191   : > { %2202 = vst.msk [vmem:[#allocation3 + $0xa0] sm:$0xff] %vm749_vm3, %v2170_v40  ;;  %v2171_v50 = vadd.f32 %v2139_v5, %v2074_v7  ;;  %1849 = vst.msk [vmem:[#allocation3 + $0xc8] sm:$0xff] %vm749_vm3, %v1817_v27  ;;  %v2090_v11 = vpop.f32.mrb[75].mxu0  ;;  %v2477_v60 = vld [vmem:[#allocation3 + $0x8] sm:$0xff]  ;;  %v2483_v10 = vld [vmem:[#allocation3 + $0x38] sm:$0xff] }
 0x192   : > { %2205 = vst.msk [vmem:[#allocation3 + $0xb8] sm:$0xff] %vm749_vm3, %v2173_v2 }
 0x193   : > { %2203 = vst.msk [vmem:[#allocation3 + $0xa8] sm:$0xff] %vm749_vm3, %v2171_v50  ;;  %v4425_v29 = vpop.f32.mrb[76].mxu1 }
 0x194   : > { %v1822_v32 = vadd.f32 %v4425_v29, %v1790_v17  ;;  %v1745_v53 = vpop.f32.mrb[77].mxu1 }
 0x195   : > { %v2144_v37 = vld [vmem:[#allocation3 + $0xd0] sm:$0xff]  ;;  %v1820_v42 = vadd.f32 %v1788_v35, %v1745_v53  ;;  %v4426_v58 = vpop.f32.mrb[78].mxu1 }
 0x196   : > { %v2176_v61 = vadd.f32 %v4455_v39, %v2144_v37  ;;  %1854 = vst.msk [vmem:[#allocation3 + $0xf0] sm:$0xff] %vm749_vm3, %v1822_v32  ;;  %v2142_v59 = vld [vmem:[#allocation3 + $0xc0] sm:$0xff]  ;;  %v1823_v44 = vadd.f32 %v4426_v58, %v1791_v43  ;;  %v1748_v47 = vpop.f32.mrb[79].mxu1  ;;  %v4459_v52 = vpop.f32.mrb[76].mxu0 }
 0x197   : > { %v2174_v56 = vadd.f32 %v2142_v59, %v2087_v30  ;;  %1852 = vst.msk [vmem:[#allocation3 + $0xe0] sm:$0xff] %vm749_vm3, %v1820_v42  ;;  %v2145_v36 = vld [vmem:[#allocation3 + $0xd8] sm:$0xff]  ;;  %v1821_v54 = vadd.f32 %v1789_v51, %v1748_v47  ;;  %v2103_v41 = vpop.f32.mrb[77].mxu0  ;;  %v2484_v47 = vld [vmem:[#allocation3 + $0x40] sm:$0xff] }
 0x198   : > { %2208 = vst.msk [vmem:[#allocation3 + $0xd0] sm:$0xff] %vm749_vm3, %v2176_v61  ;;  %v2177_v55 = vadd.f32 %v4456_v31, %v2145_v36  ;;  %1855 = vst.msk [vmem:[#allocation3 + $0xf8] sm:$0xff] %vm749_vm3, %v1823_v44  ;;  %v2143_v3 = vld [vmem:[#allocation3 + $0xc8] sm:$0xff]  ;;  %v4460_v4 = vpop.f32.mrb[78].mxu0  ;;  %v2486_v61 = vld [vmem:[#allocation3 + $0x50] sm:$0xff] }
 0x199   : > { %2206 = vst.msk [vmem:[#allocation3 + $0xc0] sm:$0xff] %vm749_vm3, %v2174_v56  ;;  %v2175_v20 = vadd.f32 %v2143_v3, %v2090_v11  ;;  %1853 = vst.msk [vmem:[#allocation3 + $0xe8] sm:$0xff] %vm749_vm3, %v1821_v54  ;;  %v2106_v63 = vpop.f32.mrb[79].mxu0  ;;  %v2481_v31 = vld [vmem:[#allocation3 + $0x28] sm:$0xff]  ;;  %v2487_v36 = vld [vmem:[#allocation3 + $0x58] sm:$0xff] }
 0x19a   : > { %2209 = vst.msk [vmem:[#allocation3 + $0xd8] sm:$0xff] %vm749_vm3, %v2177_v55 }
 0x19b   : > { %2207 = vst.msk [vmem:[#allocation3 + $0xc8] sm:$0xff] %vm749_vm3, %v2175_v20  ;;  %v4465_v0 = vpop.f32.mrb[80].mxu1 }
 0x19c   : > { %v2510_v6 = vadd.f32 %v4465_v0, %v2478_v1  ;;  %v2349_v49 = vpop.f32.mrb[81].mxu1 }
 0x19d   : > { %v2148_v14 = vld [vmem:[#allocation3 + $0xf0] sm:$0xff]  ;;  %v2508_v22 = vadd.f32 %v2476_v34, %v2349_v49  ;;  %v4466_v8 = vpop.f32.mrb[82].mxu1 }
 0x19e   : > { %v2180_v13 = vadd.f32 %v4459_v52, %v2148_v14  ;;  %v2146_v16 = vld [vmem:[#allocation3 + $0xe0] sm:$0xff]  ;;  %2542 = vst.msk [vmem:[#allocation3 + $0x10] sm:$0xff] %vm749_vm3, %v2510_v6  ;;  %v2511_v18 = vadd.f32 %v4466_v8, %v2479_v9  ;;  %v2352_v24 = vpop.f32.mrb[83].mxu1  ;;  %v4499_v26 = vpop.f32.mrb[80].mxu0 }
 0x19f   : > { %v2178_v7 = vadd.f32 %v2146_v16, %v2103_v41  ;;  %v2149_v46 = vld [vmem:[#allocation3 + $0xf8] sm:$0xff]  ;;  %2540 = vst.msk [vmem:[#allocation3] sm:$0xff] %vm749_vm3, %v2508_v22  ;;  %v2509_v57 = vadd.f32 %v2477_v60, %v2352_v24  ;;  %v2708_v38 = vpop.f32.mrb[81].mxu0  ;;  %v2488_v24 = vld [vmem:[#allocation3 + $0x60] sm:$0xff] }
 0x1a0   : > { %2212 = vst.msk [vmem:[#allocation3 + $0xf0] sm:$0xff] %vm749_vm3, %v2180_v13  ;;  %v2181_v12 = vadd.f32 %v4460_v4, %v2149_v46  ;;  %v2147_v15 = vld [vmem:[#allocation3 + $0xe8] sm:$0xff]  ;;  %2543 = vst.msk [vmem:[#allocation3 + $0x18] sm:$0xff] %vm749_vm3, %v2511_v18  ;;  %v4500_v45 = vpop.f32.mrb[82].mxu0  ;;  %v2490_v13 = vld [vmem:[#allocation3 + $0x70] sm:$0xff] }
 0x1a1   : > { %2210 = vst.msk [vmem:[#allocation3 + $0xe0] sm:$0xff] %vm749_vm3, %v2178_v7  ;;  %v2179_v19 = vadd.f32 %v2147_v15, %v2106_v63  ;;  %2541 = vst.msk [vmem:[#allocation3 + $0x8] sm:$0xff] %vm749_vm3, %v2509_v57  ;;  %v2711_v21 = vpop.f32.mrb[83].mxu0  ;;  %v2485_v4 = vld [vmem:[#allocation3 + $0x48] sm:$0xff]  ;;  %v2491_v46 = vld [vmem:[#allocation3 + $0x78] sm:$0xff] }
 0x1a2   : > { %2213 = vst.msk [vmem:[#allocation3 + $0xf8] sm:$0xff] %vm749_vm3, %v2181_v12 }
 0x1a3   : > { %2211 = vst.msk [vmem:[#allocation3 + $0xe8] sm:$0xff] %vm749_vm3, %v2179_v19  ;;  %v4469_v62 = vpop.f32.mrb[84].mxu1 }
 0x1a4   : > { %v2514_v23 = vadd.f32 %v4469_v62, %v2482_v28  ;;  %v2365_v25 = vpop.f32.mrb[85].mxu1 }
 0x1a5   : > { %v2837_v33 = vld [vmem:[#allocation3 + $0x10] sm:$0xff]  ;;  %v2512_v39 = vadd.f32 %v2480_v48, %v2365_v25  ;;  %v4470_v40 = vpop.f32.mrb[86].mxu1 }
 0x1a6   : > { %v2869_v27 = vadd.f32 %v4499_v26, %v2837_v33  ;;  %2546 = vst.msk [vmem:[#allocation3 + $0x30] sm:$0xff] %vm749_vm3, %v2514_v23  ;;  %v2835_v30 = vld [vmem:[#allocation3] sm:$0xff]  ;;  %v2515_v2 = vadd.f32 %v4470_v40, %v2483_v10  ;;  %v2368_v5 = vpop.f32.mrb[87].mxu1  ;;  %v4503_v50 = vpop.f32.mrb[84].mxu0 }
 0x1a7   : > { %v2867_v11 = vadd.f32 %v2835_v30, %v2708_v38  ;;  %2544 = vst.msk [vmem:[#allocation3 + $0x20] sm:$0xff] %vm749_vm3, %v2512_v39  ;;  %v2838_v29 = vld [vmem:[#allocation3 + $0x18] sm:$0xff]  ;;  %v2513_v17 = vadd.f32 %v2481_v31, %v2368_v5  ;;  %v2724_v32 = vpop.f32.mrb[85].mxu0  ;;  %v2492_v5 = vld [vmem:[#allocation3 + $0x80] sm:$0xff] }
 0x1a8   : > { %2901 = vst.msk [vmem:[#allocation3 + $0x10] sm:$0xff] %vm749_vm3, %v2869_v27  ;;  %v2870_v53 = vadd.f32 %v4500_v45, %v2838_v29  ;;  %2547 = vst.msk [vmem:[#allocation3 + $0x38] sm:$0xff] %vm749_vm3, %v2515_v2  ;;  %v2836_v35 = vld [vmem:[#allocation3 + $0x8] sm:$0xff]  ;;  %v4504_v37 = vpop.f32.mrb[86].mxu0  ;;  %v2494_v27 = vld [vmem:[#allocation3 + $0x90] sm:$0xff] }
 0x1a9   : > { %2899 = vst.msk [vmem:[#allocation3] sm:$0xff] %vm749_vm3, %v2867_v11  ;;  %v2868_v42 = vadd.f32 %v2836_v35, %v2711_v21  ;;  %2545 = vst.msk [vmem:[#allocation3 + $0x28] sm:$0xff] %vm749_vm3, %v2513_v17  ;;  %v2727_v58 = vpop.f32.mrb[87].mxu0  ;;  %v2489_v45 = vld [vmem:[#allocation3 + $0x68] sm:$0xff]  ;;  %v2495_v29 = vld [vmem:[#allocation3 + $0x98] sm:$0xff] }
 0x1aa   : > { %2902 = vst.msk [vmem:[#allocation3 + $0x18] sm:$0xff] %vm749_vm3, %v2870_v53 }
 0x1ab   : > { %2900 = vst.msk [vmem:[#allocation3 + $0x8] sm:$0xff] %vm749_vm3, %v2868_v42  ;;  %v4473_v43 = vpop.f32.mrb[88].mxu1 }
 0x1ac   : > { %v2518_v59 = vadd.f32 %v4473_v43, %v2486_v61  ;;  %v2381_v44 = vpop.f32.mrb[89].mxu1 }
 0x1ad   : > { %v2841_v51 = vld [vmem:[#allocation3 + $0x30] sm:$0xff]  ;;  %v2516_v52 = vadd.f32 %v2484_v47, %v2381_v44  ;;  %v4474_v56 = vpop.f32.mrb[90].mxu1 }
 0x1ae   : > { %v2873_v54 = vadd.f32 %v4503_v50, %v2841_v51  ;;  %2550 = vst.msk [vmem:[#allocation3 + $0x50] sm:$0xff] %vm749_vm3, %v2518_v59  ;;  %v2839_v41 = vld [vmem:[#allocation3 + $0x20] sm:$0xff]  ;;  %v2519_v55 = vadd.f32 %v4474_v56, %v2487_v36  ;;  %v2384_v3 = vpop.f32.mrb[91].mxu1  ;;  %v4507_v20 = vpop.f32.mrb[88].mxu0 }
 0x1af   : > { %v2871_v63 = vadd.f32 %v2839_v41, %v2724_v32  ;;  %2548 = vst.msk [vmem:[#allocation3 + $0x40] sm:$0xff] %vm749_vm3, %v2516_v52  ;;  %v2842_v0 = vld [vmem:[#allocation3 + $0x38] sm:$0xff]  ;;  %v2517_v1 = vadd.f32 %v2485_v4, %v2384_v3  ;;  %v2740_v6 = vpop.f32.mrb[89].mxu0  ;;  %v2496_v3 = vld [vmem:[#allocation3 + $0xa0] sm:$0xff] }
 0x1b0   : > { %2905 = vst.msk [vmem:[#allocation3 + $0x30] sm:$0xff] %vm749_vm3, %v2873_v54  ;;  %v2874_v49 = vadd.f32 %v4504_v37, %v2842_v0  ;;  %2551 = vst.msk [vmem:[#allocation3 + $0x58] sm:$0xff] %vm749_vm3, %v2519_v55  ;;  %v2840_v34 = vld [vmem:[#allocation3 + $0x28] sm:$0xff]  ;;  %v4508_v14 = vpop.f32.mrb[90].mxu0  ;;  %v2498_v54 = vld [vmem:[#allocation3 + $0xb0] sm:$0xff] }
 0x1b1   : > { %2903 = vst.msk [vmem:[#allocation3 + $0x20] sm:$0xff] %vm749_vm3, %v2871_v63  ;;  %v2872_v22 = vadd.f32 %v2840_v34, %v2727_v58  ;;  %2549 = vst.msk [vmem:[#allocation3 + $0x48] sm:$0xff] %vm749_vm3, %v2517_v1  ;;  %v2743_v8 = vpop.f32.mrb[91].mxu0  ;;  %v2493_v37 = vld [vmem:[#allocation3 + $0x88] sm:$0xff]  ;;  %v2499_v0 = vld [vmem:[#allocation3 + $0xb8] sm:$0xff] }
 0x1b2   : > { %2906 = vst.msk [vmem:[#allocation3 + $0x38] sm:$0xff] %vm749_vm3, %v2874_v49 }
 0x1b3   : > { %2904 = vst.msk [vmem:[#allocation3 + $0x28] sm:$0xff] %vm749_vm3, %v2872_v22  ;;  %v4477_v9 = vpop.f32.mrb[92].mxu1 }
 0x1b4   : > { %v2522_v16 = vadd.f32 %v4477_v9, %v2490_v13  ;;  %v2397_v18 = vpop.f32.mrb[93].mxu1 }
 0x1b5   : > { %v2845_v60 = vld [vmem:[#allocation3 + $0x50] sm:$0xff]  ;;  %v2520_v26 = vadd.f32 %v2488_v24, %v2397_v18  ;;  %v4478_v7 = vpop.f32.mrb[94].mxu1 }
 0x1b6   : > { %v2877_v57 = vadd.f32 %v4507_v20, %v2845_v60  ;;  %2554 = vst.msk [vmem:[#allocation3 + $0x70] sm:$0xff] %vm749_vm3, %v2522_v16  ;;  %v2843_v38 = vld [vmem:[#allocation3 + $0x40] sm:$0xff]  ;;  %v2523_v12 = vadd.f32 %v4478_v7, %v2491_v46  ;;  %v2400_v15 = vpop.f32.mrb[95].mxu1  ;;  %v4511_v19 = vpop.f32.mrb[92].mxu0 }
 0x1b7   : > { %v2875_v21 = vadd.f32 %v2843_v38, %v2740_v6  ;;  %2552 = vst.msk [vmem:[#allocation3 + $0x60] sm:$0xff] %vm749_vm3, %v2520_v26  ;;  %v2846_v62 = vld [vmem:[#allocation3 + $0x58] sm:$0xff]  ;;  %v2521_v28 = vadd.f32 %v2489_v45, %v2400_v15  ;;  %v2756_v23 = vpop.f32.mrb[93].mxu0  ;;  %v2500_v15 = vld [vmem:[#allocation3 + $0xc0] sm:$0xff] }
 0x1b8   : > { %2909 = vst.msk [vmem:[#allocation3 + $0x50] sm:$0xff] %vm749_vm3, %v2877_v57  ;;  %v2878_v25 = vadd.f32 %v4508_v14, %v2846_v62  ;;  %2555 = vst.msk [vmem:[#allocation3 + $0x78] sm:$0xff] %vm749_vm3, %v2523_v12  ;;  %v2844_v48 = vld [vmem:[#allocation3 + $0x48] sm:$0xff]  ;;  %v4512_v33 = vpop.f32.mrb[94].mxu0  ;;  %v2502_v57 = vld [vmem:[#allocation3 + $0xd0] sm:$0xff] }
 0x1b9   : > { %2907 = vst.msk [vmem:[#allocation3 + $0x40] sm:$0xff] %vm749_vm3, %v2875_v21  ;;  %v2876_v39 = vadd.f32 %v2844_v48, %v2743_v8  ;;  %2553 = vst.msk [vmem:[#allocation3 + $0x68] sm:$0xff] %vm749_vm3, %v2521_v28  ;;  %v2759_v40 = vpop.f32.mrb[95].mxu0  ;;  %v2497_v14 = vld [vmem:[#allocation3 + $0xa8] sm:$0xff]  ;;  %v2503_v62 = vld [vmem:[#allocation3 + $0xd8] sm:$0xff] }
 0x1ba   : > { %2910 = vst.msk [vmem:[#allocation3 + $0x58] sm:$0xff] %vm749_vm3, %v2878_v25 }
 0x1bb   : > { %2908 = vst.msk [vmem:[#allocation3 + $0x48] sm:$0xff] %vm749_vm3, %v2876_v39  ;;  %v4481_v10 = vpop.f32.mrb[96].mxu1 }
 0x1bc   : > { %v2526_v30 = vadd.f32 %v4481_v10, %v2494_v27  ;;  %v2413_v2 = vpop.f32.mrb[97].mxu1 }
 0x1bd   : > { %v2849_v31 = vld [vmem:[#allocation3 + $0x70] sm:$0xff]  ;;  %v2524_v50 = vadd.f32 %v2492_v5, %v2413_v2  ;;  %v4482_v11 = vpop.f32.mrb[98].mxu1 }
 0x1be   : > { %v2881_v17 = vadd.f32 %v4511_v19, %v2849_v31  ;;  %2558 = vst.msk [vmem:[#allocation3 + $0x90] sm:$0xff] %vm749_vm3, %v2526_v30  ;;  %v2847_v32 = vld [vmem:[#allocation3 + $0x60] sm:$0xff]  ;;  %v2527_v53 = vadd.f32 %v4482_v11, %v2495_v29  ;;  %v2416_v35 = vpop.f32.mrb[99].mxu1  ;;  %v4515_v42 = vpop.f32.mrb[96].mxu0 }
 0x1bf   : > { %v2879_v58 = vadd.f32 %v2847_v32, %v2756_v23  ;;  %2556 = vst.msk [vmem:[#allocation3 + $0x80] sm:$0xff] %vm749_vm3, %v2524_v50  ;;  %v2850_v43 = vld [vmem:[#allocation3 + $0x78] sm:$0xff]  ;;  %v2525_v61 = vadd.f32 %v2493_v37, %v2416_v35  ;;  %v2772_v59 = vpop.f32.mrb[97].mxu0  ;;  %v2504_v35 = vld [vmem:[#allocation3 + $0xe0] sm:$0xff] }
 0x1c0   : > { %2913 = vst.msk [vmem:[#allocation3 + $0x70] sm:$0xff] %vm749_vm3, %v2881_v17  ;;  %v2882_v44 = vadd.f32 %v4512_v33, %v2850_v43  ;;  %2559 = vst.msk [vmem:[#allocation3 + $0x98] sm:$0xff] %vm749_vm3, %v2527_v53  ;;  %v2848_v47 = vld [vmem:[#allocation3 + $0x68] sm:$0xff]  ;;  %v4516_v51 = vpop.f32.mrb[98].mxu0  ;;  %v2506_v17 = vld [vmem:[#allocation3 + $0xf0] sm:$0xff] }
 0x1c1   : > { %2911 = vst.msk [vmem:[#allocation3 + $0x60] sm:$0xff] %vm749_vm3, %v2879_v58  ;;  %v2880_v52 = vadd.f32 %v2848_v47, %v2759_v40  ;;  %2557 = vst.msk [vmem:[#allocation3 + $0x88] sm:$0xff] %vm749_vm3, %v2525_v61  ;;  %v2775_v56 = vpop.f32.mrb[99].mxu0  ;;  %v2501_v33 = vld [vmem:[#allocation3 + $0xc8] sm:$0xff]  ;;  %v2507_v43 = vld [vmem:[#allocation3 + $0xf8] sm:$0xff] }
 0x1c2   : > { %2914 = vst.msk [vmem:[#allocation3 + $0x78] sm:$0xff] %vm749_vm3, %v2882_v44 }
 0x1c3   : > { %2912 = vst.msk [vmem:[#allocation3 + $0x68] sm:$0xff] %vm749_vm3, %v2880_v52  ;;  %v4485_v36 = vpop.f32.mrb[100].mxu1 }
 0x1c4   : > { %v2530_v41 = vadd.f32 %v4485_v36, %v2498_v54  ;;  %v2429_v55 = vpop.f32.mrb[101].mxu1 }
 0x1c5   : > { %v2853_v4 = vld [vmem:[#allocation3 + $0x90] sm:$0xff]  ;;  %v2528_v20 = vadd.f32 %v2496_v3, %v2429_v55  ;;  %v4486_v63 = vpop.f32.mrb[102].mxu1 }
 0x1c6   : > { %v2885_v1 = vadd.f32 %v4515_v42, %v2853_v4  ;;  %2562 = vst.msk [vmem:[#allocation3 + $0xb0] sm:$0xff] %vm749_vm3, %v2530_v41  ;;  %v2851_v6 = vld [vmem:[#allocation3 + $0x80] sm:$0xff]  ;;  %v2531_v49 = vadd.f32 %v4486_v63, %v2499_v0  ;;  %v2432_v34 = vpop.f32.mrb[103].mxu1  ;;  %v4519_v22 = vpop.f32.mrb[100].mxu0 }
 0x1c7   : > { %v2883_v8 = vadd.f32 %v2851_v6, %v2772_v59  ;;  %2560 = vst.msk [vmem:[#allocation3 + $0xa0] sm:$0xff] %vm749_vm3, %v2528_v20  ;;  %v2854_v9 = vld [vmem:[#allocation3 + $0x98] sm:$0xff]  ;;  %v2529_v13 = vadd.f32 %v2497_v14, %v2432_v34  ;;  %v2788_v16 = vpop.f32.mrb[101].mxu0  ;;  %v3193_v34 = vld [vmem:[#allocation3] sm:$0xff] }
 0x1c8   : > { %2917 = vst.msk [vmem:[#allocation3 + $0x90] sm:$0xff] %vm749_vm3, %v2885_v1  ;;  %v2886_v18 = vadd.f32 %v4516_v51, %v2854_v9  ;;  %2563 = vst.msk [vmem:[#allocation3 + $0xb8] sm:$0xff] %vm749_vm3, %v2531_v49  ;;  %v2852_v24 = vld [vmem:[#allocation3 + $0x88] sm:$0xff]  ;;  %v4520_v60 = vpop.f32.mrb[102].mxu0  ;;  %v3195_v1 = vld [vmem:[#allocation3 + $0x10] sm:$0xff] }
 0x1c9   : > { %2915 = vst.msk [vmem:[#allocation3 + $0x80] sm:$0xff] %vm749_vm3, %v2883_v8  ;;  %v2884_v26 = vadd.f32 %v2852_v24, %v2775_v56  ;;  %2561 = vst.msk [vmem:[#allocation3 + $0xa8] sm:$0xff] %vm749_vm3, %v2529_v13  ;;  %v2791_v7 = vpop.f32.mrb[103].mxu0  ;;  %v2505_v51 = vld [vmem:[#allocation3 + $0xe8] sm:$0xff]  ;;  %v3196_v9 = vld [vmem:[#allocation3 + $0x18] sm:$0xff] }
 0x1ca   : > { %2918 = vst.msk [vmem:[#allocation3 + $0x98] sm:$0xff] %vm749_vm3, %v2886_v18 }
 0x1cb   : > { %2916 = vst.msk [vmem:[#allocation3 + $0x88] sm:$0xff] %vm749_vm3, %v2884_v26  ;;  %v4489_v46 = vpop.f32.mrb[104].mxu1 }
 0x1cc   : > { %v2534_v38 = vadd.f32 %v4489_v46, %v2502_v57  ;;  %v2445_v12 = vpop.f32.mrb[105].mxu1 }
 0x1cd   : > { %v2857_v45 = vld [vmem:[#allocation3 + $0xb0] sm:$0xff]  ;;  %v2532_v19 = vadd.f32 %v2500_v15, %v2445_v12  ;;  %v4490_v21 = vpop.f32.mrb[106].mxu1 }
 0x1ce   : > { %v2889_v28 = vadd.f32 %v4519_v22, %v2857_v45  ;;  %2566 = vst.msk [vmem:[#allocation3 + $0xd0] sm:$0xff] %vm749_vm3, %v2534_v38  ;;  %v2855_v23 = vld [vmem:[#allocation3 + $0xa0] sm:$0xff]  ;;  %v2535_v25 = vadd.f32 %v4490_v21, %v2503_v62  ;;  %v2448_v48 = vpop.f32.mrb[107].mxu1  ;;  %v4523_v39 = vpop.f32.mrb[104].mxu0 }
 0x1cf   : > { %v2887_v40 = vadd.f32 %v2855_v23, %v2788_v16  ;;  %2564 = vst.msk [vmem:[#allocation3 + $0xc0] sm:$0xff] %vm749_vm3, %v2532_v19  ;;  %v2858_v10 = vld [vmem:[#allocation3 + $0xb8] sm:$0xff]  ;;  %v2533_v27 = vadd.f32 %v2501_v33, %v2448_v48  ;;  %v2804_v30 = vpop.f32.mrb[105].mxu0  ;;  %v3197_v48 = vld [vmem:[#allocation3 + $0x20] sm:$0xff] }
 0x1d0   : > { %2921 = vst.msk [vmem:[#allocation3 + $0xb0] sm:$0xff] %vm749_vm3, %v2889_v28  ;;  %v2890_v2 = vadd.f32 %v4520_v60, %v2858_v10  ;;  %2567 = vst.msk [vmem:[#allocation3 + $0xd8] sm:$0xff] %vm749_vm3, %v2535_v25  ;;  %v2856_v5 = vld [vmem:[#allocation3 + $0xa8] sm:$0xff]  ;;  %v4524_v31 = vpop.f32.mrb[106].mxu0  ;;  %v3199_v28 = vld [vmem:[#allocation3 + $0x30] sm:$0xff] }
 0x1d1   : > { %2919 = vst.msk [vmem:[#allocation3 + $0xa0] sm:$0xff] %vm749_vm3, %v2887_v40  ;;  %v2888_v50 = vadd.f32 %v2856_v5, %v2791_v7  ;;  %2565 = vst.msk [vmem:[#allocation3 + $0xc8] sm:$0xff] %vm749_vm3, %v2533_v27  ;;  %v2807_v11 = vpop.f32.mrb[107].mxu0  ;;  %v3194_v60 = vld [vmem:[#allocation3 + $0x8] sm:$0xff]  ;;  %v3200_v10 = vld [vmem:[#allocation3 + $0x38] sm:$0xff] }
 0x1d2   : > { %2922 = vst.msk [vmem:[#allocation3 + $0xb8] sm:$0xff] %vm749_vm3, %v2890_v2 }
 0x1d3   : > { %2920 = vst.msk [vmem:[#allocation3 + $0xa8] sm:$0xff] %vm749_vm3, %v2888_v50  ;;  %v4493_v29 = vpop.f32.mrb[108].mxu1 }
 0x1d4   : > { %v2538_v32 = vadd.f32 %v4493_v29, %v2506_v17  ;;  %v2461_v53 = vpop.f32.mrb[109].mxu1 }
 0x1d5   : > { %v2861_v37 = vld [vmem:[#allocation3 + $0xd0] sm:$0xff]  ;;  %v2536_v42 = vadd.f32 %v2504_v35, %v2461_v53  ;;  %v4494_v58 = vpop.f32.mrb[110].mxu1 }
 0x1d6   : > { %v2893_v61 = vadd.f32 %v4523_v39, %v2861_v37  ;;  %2570 = vst.msk [vmem:[#allocation3 + $0xf0] sm:$0xff] %vm749_vm3, %v2538_v32  ;;  %v2859_v59 = vld [vmem:[#allocation3 + $0xc0] sm:$0xff]  ;;  %v2539_v44 = vadd.f32 %v4494_v58, %v2507_v43  ;;  %v2464_v47 = vpop.f32.mrb[111].mxu1  ;;  %v4527_v52 = vpop.f32.mrb[108].mxu0 }
 0x1d7   : > { %v2891_v56 = vadd.f32 %v2859_v59, %v2804_v30  ;;  %2568 = vst.msk [vmem:[#allocation3 + $0xe0] sm:$0xff] %vm749_vm3, %v2536_v42  ;;  %v2862_v36 = vld [vmem:[#allocation3 + $0xd8] sm:$0xff]  ;;  %v2537_v54 = vadd.f32 %v2505_v51, %v2464_v47  ;;  %v2820_v41 = vpop.f32.mrb[109].mxu0  ;;  %v3201_v47 = vld [vmem:[#allocation3 + $0x40] sm:$0xff] }
 0x1d8   : > { %2925 = vst.msk [vmem:[#allocation3 + $0xd0] sm:$0xff] %vm749_vm3, %v2893_v61  ;;  %v2894_v55 = vadd.f32 %v4524_v31, %v2862_v36  ;;  %2571 = vst.msk [vmem:[#allocation3 + $0xf8] sm:$0xff] %vm749_vm3, %v2539_v44  ;;  %v2860_v3 = vld [vmem:[#allocation3 + $0xc8] sm:$0xff]  ;;  %v4528_v4 = vpop.f32.mrb[110].mxu0  ;;  %v3203_v61 = vld [vmem:[#allocation3 + $0x50] sm:$0xff] }
 0x1d9   : > { %2923 = vst.msk [vmem:[#allocation3 + $0xc0] sm:$0xff] %vm749_vm3, %v2891_v56  ;;  %v2892_v20 = vadd.f32 %v2860_v3, %v2807_v11  ;;  %2569 = vst.msk [vmem:[#allocation3 + $0xe8] sm:$0xff] %vm749_vm3, %v2537_v54  ;;  %v2823_v63 = vpop.f32.mrb[111].mxu0  ;;  %v3198_v31 = vld [vmem:[#allocation3 + $0x28] sm:$0xff]  ;;  %v3204_v36 = vld [vmem:[#allocation3 + $0x58] sm:$0xff] }
 0x1da   : > { %2926 = vst.msk [vmem:[#allocation3 + $0xd8] sm:$0xff] %vm749_vm3, %v2894_v55 }
 0x1db   : > { %2924 = vst.msk [vmem:[#allocation3 + $0xc8] sm:$0xff] %vm749_vm3, %v2892_v20  ;;  %v4533_v0 = vpop.f32.mrb[112].mxu1 }
 0x1dc   : > { %v3227_v6 = vadd.f32 %v4533_v0, %v3195_v1  ;;  %v3066_v49 = vpop.f32.mrb[113].mxu1 }
 0x1dd   : > { %v2865_v14 = vld [vmem:[#allocation3 + $0xf0] sm:$0xff]  ;;  %v3225_v22 = vadd.f32 %v3193_v34, %v3066_v49  ;;  %v4534_v8 = vpop.f32.mrb[114].mxu1 }
 0x1de   : > { %v2897_v13 = vadd.f32 %v4527_v52, %v2865_v14  ;;  %v2863_v16 = vld [vmem:[#allocation3 + $0xe0] sm:$0xff]  ;;  %3259 = vst.msk [vmem:[#allocation3 + $0x10] sm:$0xff] %vm749_vm3, %v3227_v6  ;;  %v3228_v18 = vadd.f32 %v4534_v8, %v3196_v9  ;;  %v3069_v24 = vpop.f32.mrb[115].mxu1  ;;  %v4567_v26 = vpop.f32.mrb[112].mxu0 }
 0x1df   : > { %v2895_v7 = vadd.f32 %v2863_v16, %v2820_v41  ;;  %v2866_v46 = vld [vmem:[#allocation3 + $0xf8] sm:$0xff]  ;;  %3257 = vst.msk [vmem:[#allocation3] sm:$0xff] %vm749_vm3, %v3225_v22  ;;  %v3226_v57 = vadd.f32 %v3194_v60, %v3069_v24  ;;  %v3424_v38 = vpop.f32.mrb[113].mxu0 }
 0x1e0   : > { %2929 = vst.msk [vmem:[#allocation3 + $0xf0] sm:$0xff] %vm749_vm3, %v2897_v13  ;;  %v2898_v12 = vadd.f32 %v4528_v4, %v2866_v46  ;;  %v2864_v15 = vld [vmem:[#allocation3 + $0xe8] sm:$0xff]  ;;  %3260 = vst.msk [vmem:[#allocation3 + $0x18] sm:$0xff] %vm749_vm3, %v3228_v18  ;;  %v4568_v45 = vpop.f32.mrb[114].mxu0 }
 0x1e1   : > { %2927 = vst.msk [vmem:[#allocation3 + $0xe0] sm:$0xff] %vm749_vm3, %v2895_v7  ;;  %v2896_v19 = vadd.f32 %v2864_v15, %v2823_v63  ;;  %3258 = vst.msk [vmem:[#allocation3 + $0x8] sm:$0xff] %vm749_vm3, %v3226_v57  ;;  %v3427_v21 = vpop.f32.mrb[115].mxu0  ;;  %v3202_v4 = vld [vmem:[#allocation3 + $0x48] sm:$0xff] }
 0x1e2   : > { %2930 = vst.msk [vmem:[#allocation3 + $0xf8] sm:$0xff] %vm749_vm3, %v2898_v12 }
 0x1e3   : > { %2928 = vst.msk [vmem:[#allocation3 + $0xe8] sm:$0xff] %vm749_vm3, %v2896_v19  ;;  %v4537_v62 = vpop.f32.mrb[116].mxu1 }
 0x1e4   : > { %v3231_v23 = vadd.f32 %v4537_v62, %v3199_v28  ;;  %v3082_v25 = vpop.f32.mrb[117].mxu1 }
 0x1e5   : > { %v3553_v33 = vld [vmem:[#allocation3 + $0x10] sm:$0xff]  ;;  %v3229_v39 = vadd.f32 %v3197_v48, %v3082_v25  ;;  %v4538_v40 = vpop.f32.mrb[118].mxu1 }
 0x1e6   : > { %v3585_v27 = vadd.f32 %v4567_v26, %v3553_v33  ;;  %3263 = vst.msk [vmem:[#allocation3 + $0x30] sm:$0xff] %vm749_vm3, %v3231_v23  ;;  %v3551_v30 = vld [vmem:[#allocation3] sm:$0xff]  ;;  %v3232_v2 = vadd.f32 %v4538_v40, %v3200_v10  ;;  %v3085_v5 = vpop.f32.mrb[119].mxu1  ;;  %v4571_v50 = vpop.f32.mrb[116].mxu0 }
 0x1e7   : > { %v3583_v11 = vadd.f32 %v3551_v30, %v3424_v38  ;;  %3261 = vst.msk [vmem:[#allocation3 + $0x20] sm:$0xff] %vm749_vm3, %v3229_v39  ;;  %v3554_v29 = vld [vmem:[#allocation3 + $0x18] sm:$0xff]  ;;  %v3230_v17 = vadd.f32 %v3198_v31, %v3085_v5  ;;  %v3440_v32 = vpop.f32.mrb[117].mxu0  ;;  %v3207_v38 = vld [vmem:[#allocation3 + $0x70] sm:$0xff]  ;;  %v3206_v31 = vld [vmem:[#allocation3 + $0x68] sm:$0xff] }
 0x1e8   : > { %3617 = vst.msk [vmem:[#allocation3 + $0x10] sm:$0xff] %vm749_vm3, %v3585_v27  ;;  %v3586_v53 = vadd.f32 %v4568_v45, %v3554_v29  ;;  %3264 = vst.msk [vmem:[#allocation3 + $0x38] sm:$0xff] %vm749_vm3, %v3232_v2  ;;  %v3552_v35 = vld [vmem:[#allocation3 + $0x8] sm:$0xff]  ;;  %v4572_v37 = vpop.f32.mrb[118].mxu0  ;;  %v3208_v39 = vld [vmem:[#allocation3 + $0x78] sm:$0xff] }
 0x1e9   : > { %3615 = vst.msk [vmem:[#allocation3] sm:$0xff] %vm749_vm3, %v3583_v11  ;;  %v3584_v42 = vadd.f32 %v3552_v35, %v3427_v21  ;;  %3262 = vst.msk [vmem:[#allocation3 + $0x28] sm:$0xff] %vm749_vm3, %v3230_v17  ;;  %v3443_v58 = vpop.f32.mrb[119].mxu0  ;;  %v3205_v21 = vld [vmem:[#allocation3 + $0x60] sm:$0xff] }
 0x1ea   : > { %3618 = vst.msk [vmem:[#allocation3 + $0x18] sm:$0xff] %vm749_vm3, %v3586_v53 }
 0x1eb   : > { %3616 = vst.msk [vmem:[#allocation3 + $0x8] sm:$0xff] %vm749_vm3, %v3584_v42  ;;  %v4541_v43 = vpop.f32.mrb[120].mxu1 }
 0x1ec   : > { %v3235_v59 = vadd.f32 %v4541_v43, %v3203_v61  ;;  %v3098_v44 = vpop.f32.mrb[121].mxu1 }
 0x1ed   : > { %v3557_v51 = vld [vmem:[#allocation3 + $0x30] sm:$0xff]  ;;  %v3233_v52 = vadd.f32 %v3201_v47, %v3098_v44  ;;  %v4542_v56 = vpop.f32.mrb[122].mxu1 }
 0x1ee   : > { %v3589_v54 = vadd.f32 %v4571_v50, %v3557_v51  ;;  %3267 = vst.msk [vmem:[#allocation3 + $0x50] sm:$0xff] %vm749_vm3, %v3235_v59  ;;  %v3555_v41 = vld [vmem:[#allocation3 + $0x20] sm:$0xff]  ;;  %v3236_v55 = vadd.f32 %v4542_v56, %v3204_v36  ;;  %v3101_v3 = vpop.f32.mrb[123].mxu1  ;;  %v4575_v20 = vpop.f32.mrb[120].mxu0 }
 0x1ef   : > { %v3649_v63 = vld [vmem:[#allocation3 + $0x10] sm:$0xff]  ;;  %v3587_v0 = vadd.f32 %v3555_v41, %v3440_v32  ;;  %3265 = vst.msk [vmem:[#allocation3 + $0x40] sm:$0xff] %vm749_vm3, %v3233_v52  ;;  %v3558_v1 = vld [vmem:[#allocation3 + $0x38] sm:$0xff]  ;;  %v3234_v6 = vadd.f32 %v3202_v4, %v3101_v3  ;;  %v3456_v49 = vpop.f32.mrb[121].mxu0 }
 0x1f0   : > { %3681 = vst.msk [vmem:[%s5513_s25 + $0x10] sm:$0xff] %vm749_vm3, %v3649_v63  ;;  %v3647_v34 = vld [vmem:[#allocation3] sm:$0xff]  ;;  %3621 = vst.msk [vmem:[#allocation3 + $0x30] sm:$0xff] %vm749_vm3, %v3589_v54  ;;  %v3590_v14 = vadd.f32 %v4572_v37, %v3558_v1  ;;  %v3556_v22 = vld [vmem:[#allocation3 + $0x28] sm:$0xff]  ;;  %v4576_v8 = vpop.f32.mrb[122].mxu0  ;;  %v3784_v60 = vmul.f32 %v3649_v63, %v3649_v63  ;;  %v3714_v62 = vsel %vm749_vm3, %v3649_v63, 0.0 }
 0x1f1   : > { %3268 = vst.msk [vmem:[#allocation3 + $0x58] sm:$0xff] %vm749_vm3, %v3236_v55  ;;  %3679 = vst.msk [vmem:[%s5513_s25] sm:$0xff] %vm749_vm3, %v3647_v34  ;;  %v3782_v9 = vmul.f32 %v3647_v34, %v3647_v34  ;;  %v3650_v13 = vld [vmem:[#allocation3 + $0x18] sm:$0xff]  ;;  %v3588_v16 = vadd.f32 %v3556_v22, %v3443_v58  ;;  %v3459_v18 = vpop.f32.mrb[123].mxu0  ;;  %v3711_v26 = vsel %vm749_vm3, %v3647_v34, 0.0 }
 0x1f2   : > { %3619 = vst.msk [vmem:[#allocation3 + $0x20] sm:$0xff] %vm749_vm3, %v3587_v0  ;;  %3266 = vst.msk [vmem:[#allocation3 + $0x48] sm:$0xff] %vm749_vm3, %v3234_v6  ;;  %v3648_v24 = vld [vmem:[#allocation3 + $0x8] sm:$0xff]  ;;  %v3785_v12 = vmul.f32 %v3650_v13, %v3650_v13  ;;  %v3817_v11 = vsel %vm749_vm3, %v3784_v60, 0.0  ;;  %v3716_v29 = vsel %vm749_vm3, %v3650_v13, 0.0  ;;  %v3211_v6 = vld [vmem:[#allocation3 + $0x90] sm:$0xff] }
 0x1f3   : > { %3682 = vst.msk [vmem:[%s5513_s25 + $0x18] sm:$0xff] %vm749_vm3, %v3650_v13  ;;  %3622 = vst.msk [vmem:[#allocation3 + $0x38] sm:$0xff] %vm749_vm3, %v3590_v14  ;;  %v3712_v7 = vsel %vm749_vm3, %v3648_v24, 0.0  ;;  %v3783_v46 = vmul.f32 %v3648_v24, %v3648_v24  ;;  %v4545_v57 = vpop.f32.mrb[124].mxu1  ;;  %v3814_v28 = vsel %vm749_vm3, %v3782_v9, 0.0  ;;  %v3209_v9 = vld [vmem:[#allocation3 + $0x80] sm:$0xff] }
 0x1f4   : > { %3680 = vst.msk [vmem:[%s5513_s25 + $0x8] sm:$0xff] %vm749_vm3, %v3648_v24  ;;  %3620 = vst.msk [vmem:[#allocation3 + $0x28] sm:$0xff] %vm749_vm3, %v3588_v16  ;;  %v3713_v15 = vadd.f32 %v3712_v7, %v3711_v26  ;;  %v3239_v45 = vadd.f32 %v4545_v57, %v3207_v38  ;;  %v3114_v19 = vpop.f32.mrb[125].mxu1  ;;  %v3819_v42 = vsel %vm749_vm3, %v3785_v12, 0.0  ;;  %v3212_v26 = vld [vmem:[#allocation3 + $0x98] sm:$0xff] }
 0x1f5   : > { %v3815_v23 = vsel %vm749_vm3, %v3783_v46, 0.0  ;;  %v3561_v25 = vld [vmem:[#allocation3 + $0x50] sm:$0xff]  ;;  %v3237_v48 = vadd.f32 %v3205_v21, %v3114_v19  ;;  %v4546_v33 = vpop.f32.mrb[126].mxu1 }
 0x1f6   : > { %v3715_v40 = vadd.f32 %v3714_v62, %v3713_v15  ;;  %v3816_v10 = vadd.f32 %v3815_v23, %v3814_v28  ;;  %v3593_v27 = vadd.f32 %v4575_v20, %v3561_v25  ;;  %3271 = vst.msk [vmem:[#allocation3 + $0x70] sm:$0xff] %vm749_vm3, %v3239_v45  ;;  %v3559_v30 = vld [vmem:[#allocation3 + $0x40] sm:$0xff]  ;;  %v3240_v2 = vadd.f32 %v4546_v33, %v3208_v39  ;;  %v3117_v5 = vpop.f32.mrb[127].mxu1  ;;  %v4579_v50 = vpop.f32.mrb[124].mxu0  ;;  %v3210_v45 = vld [vmem:[#allocation3 + $0x88] sm:$0xff] }
 0x1f7   : > { %v3653_v17 = vld [vmem:[#allocation3 + $0x30] sm:$0xff]  ;;  %v3591_v32 = vadd.f32 %v3559_v30, %v3456_v49  ;;  %3269 = vst.msk [vmem:[#allocation3 + $0x60] sm:$0xff] %vm749_vm3, %v3237_v48  ;;  %v3238_v35 = vadd.f32 %v3206_v31, %v3117_v5  ;;  %v3472_v37 = vpop.f32.mrb[125].mxu0 }
 0x1f8   : > { %v3562_v53 = vld [vmem:[#allocation3 + $0x58] sm:$0xff]  ;;  %v3818_v58 = vadd.f32 %v3817_v11, %v3816_v10  ;;  %3685 = vst.msk [vmem:[%s5513_s25 + $0x30] sm:$0xff] %vm749_vm3, %v3653_v17  ;;  %v3717_v61 = vadd.f32 %v3716_v29, %v3715_v40  ;;  %3625 = vst.msk [vmem:[#allocation3 + $0x50] sm:$0xff] %vm749_vm3, %v3593_v27  ;;  %v5545_v44 = vpop.f32.mrb[126].mxu0  ;;  %v3788_v4 = vmul.f32 %v3653_v17, %v3653_v17  ;;  %v3722_v13 = vsel %vm749_vm3, %v3653_v17, 0.0 }
 0x1f9   : > { %v3651_v43 = vld [vmem:[#allocation3 + $0x20] sm:$0xff]  ;;  %3272 = vst.msk [vmem:[#allocation3 + $0x78] sm:$0xff] %vm749_vm3, %v3240_v2  ;;  %v3560_v59 = vld [vmem:[#allocation3 + $0x48] sm:$0xff]  ;;  %3623 = vst.msk [vmem:[#allocation3 + $0x40] sm:$0xff] %vm749_vm3, %v3591_v32  ;;  %v3594_v56 = vadd.f32 %v4576_v8, %v3562_v53  ;;  %v3475_v54 = vpop.f32.mrb[127].mxu0 }
 0x1fa   : > { %3683 = vst.msk [vmem:[%s5513_s25 + $0x20] sm:$0xff] %vm749_vm3, %v3651_v43  ;;  %v3718_v47 = vsel %vm749_vm3, %v3651_v43, 0.0  ;;  %v3786_v51 = vmul.f32 %v3651_v43, %v3651_v43  ;;  %v3654_v52 = vld [vmem:[#allocation3 + $0x38] sm:$0xff]  ;;  %v3592_v36 = vadd.f32 %v3560_v59, %v3459_v18  ;;  %3270 = vst.msk [vmem:[#allocation3 + $0x68] sm:$0xff] %vm749_vm3, %v3238_v35  ;;  %v3820_v55 = vadd.f32 %v3819_v42, %v3818_v58 }
 0x1fb   : > { %v3719_v41 = vadd.f32 %v3718_v47, %v3717_v61  ;;  %3686 = vst.msk [vmem:[%s5513_s25 + $0x38] sm:$0xff] %vm749_vm3, %v3654_v52  ;;  %v3652_v3 = vld [vmem:[#allocation3 + $0x28] sm:$0xff]  ;;  %3626 = vst.msk [vmem:[#allocation3 + $0x58] sm:$0xff] %vm749_vm3, %v3594_v56  ;;  %v4549_v1 = vpop.f32.mrb[128].mxu1  ;;  %v3789_v34 = vmul.f32 %v3654_v52, %v3654_v52  ;;  %v3825_v21 = vsel %vm749_vm3, %v3788_v4, 0.0  ;;  %v3724_v62 = vsel %vm749_vm3, %v3654_v52, 0.0 }
 0x1fc   : > { %v3821_v20 = vsel %vm749_vm3, %v3786_v51, 0.0  ;;  %3684 = vst.msk [vmem:[%s5513_s25 + $0x28] sm:$0xff] %vm749_vm3, %v3652_v3  ;;  %v3720_v63 = vsel %vm749_vm3, %v3652_v3, 0.0  ;;  %v3787_v0 = vmul.f32 %v3652_v3, %v3652_v3  ;;  %3624 = vst.msk [vmem:[#allocation3 + $0x48] sm:$0xff] %vm749_vm3, %v3592_v36  ;;  %v3243_v22 = vadd.f32 %v4549_v1, %v3211_v6  ;;  %v3130_v8 = vpop.f32.mrb[129].mxu1  ;;  %v3215_v61 = vld [vmem:[#allocation3 + $0xb0] sm:$0xff] }
 0x1fd   : > { %v3822_v49 = vadd.f32 %v3821_v20, %v3820_v55  ;;  %v3721_v14 = vadd.f32 %v3720_v63, %v3719_v41  ;;  %v3565_v18 = vld [vmem:[#allocation3 + $0x70] sm:$0xff]  ;;  %v3241_v24 = vadd.f32 %v3209_v9, %v3130_v8  ;;  %v4550_v60 = vpop.f32.mrb[130].mxu1  ;;  %v3827_v39 = vsel %vm749_vm3, %v3789_v34, 0.0  ;;  %v3213_v56 = vld [vmem:[#allocation3 + $0xa0] sm:$0xff]  ;;  %v3216_v4 = vld [vmem:[#allocation3 + $0xb8] sm:$0xff] }
 0x1fe   : > { %v3823_v16 = vsel %vm749_vm3, %v3787_v0, 0.0  ;;  %v3597_v57 = vadd.f32 %v4579_v50, %v3565_v18  ;;  %3275 = vst.msk [vmem:[#allocation3 + $0x90] sm:$0xff] %vm749_vm3, %v3243_v22  ;;  %v3563_v38 = vld [vmem:[#allocation3 + $0x60] sm:$0xff]  ;;  %v3244_v12 = vadd.f32 %v4550_v60, %v3212_v26  ;;  %v3133_v15 = vpop.f32.mrb[131].mxu1  ;;  %v4583_v19 = vpop.f32.mrb[128].mxu0  ;;  %v3214_v34 = vld [vmem:[#allocation3 + $0xa8] sm:$0xff] }
 0x1ff   : > { %v3723_v7 = vadd.f32 %v3722_v13, %v3721_v14  ;;  %v3824_v46 = vadd.f32 %v3823_v16, %v3822_v49  ;;  %v3657_v28 = vld [vmem:[#allocation3 + $0x50] sm:$0xff]  ;;  %v3595_v23 = vadd.f32 %v3563_v38, %v3472_v37  ;;  %3273 = vst.msk [vmem:[#allocation3 + $0x80] sm:$0xff] %vm749_vm3, %v3241_v24  ;;  %v3242_v48 = vadd.f32 %v3210_v45, %v3133_v15  ;;  %v3488_v33 = vpop.f32.mrb[129].mxu0 }
 0x200   : > { %v3566_v25 = vld [vmem:[#allocation3 + $0x78] sm:$0xff]  ;;  %3689 = vst.msk [vmem:[%s5513_s25 + $0x50] sm:$0xff] %vm749_vm3, %v3657_v28  ;;  %v3655_v10 = vld [vmem:[#allocation3 + $0x40] sm:$0xff]  ;;  %3629 = vst.msk [vmem:[#allocation3 + $0x70] sm:$0xff] %vm749_vm3, %v3597_v57  ;;  %v4584_v2 = vpop.f32.mrb[130].mxu0  ;;  %v3792_v37 = vmul.f32 %v3657_v28, %v3657_v28  ;;  %v3730_v36 = vsel %vm749_vm3, %v3657_v28, 0.0 }
 0x201   : > { %v3826_v40 = vadd.f32 %v3825_v21, %v3824_v46  ;;  %v3725_v27 = vadd.f32 %v3724_v62, %v3723_v7  ;;  %3276 = vst.msk [vmem:[#allocation3 + $0x98] sm:$0xff] %vm749_vm3, %v3244_v12  ;;  %v3564_v30 = vld [vmem:[#allocation3 + $0x68] sm:$0xff]  ;;  %3687 = vst.msk [vmem:[%s5513_s25 + $0x40] sm:$0xff] %vm749_vm3, %v3655_v10  ;;  %v3726_v5 = vsel %vm749_vm3, %v3655_v10, 0.0  ;;  %v3790_v31 = vmul.f32 %v3655_v10, %v3655_v10  ;;  %v3491_v29 = vpop.f32.mrb[131].mxu0 }
 0x202   : > { %3627 = vst.msk [vmem:[#allocation3 + $0x60] sm:$0xff] %vm749_vm3, %v3595_v23  ;;  %v3598_v50 = vadd.f32 %v5545_v44, %v3566_v25  ;;  %v3596_v11 = vadd.f32 %v3564_v30, %v3475_v54  ;;  %3274 = vst.msk [vmem:[#allocation3 + $0x88] sm:$0xff] %vm749_vm3, %v3242_v48  ;;  %v3658_v53 = vld [vmem:[#allocation3 + $0x58] sm:$0xff]  ;;  %v3833_v60 = vsel %vm749_vm3, %v3792_v37, 0.0 }
 0x203   : > { %v3727_v17 = vadd.f32 %v3726_v5, %v3725_v27  ;;  %v3828_v32 = vadd.f32 %v3827_v39, %v3826_v40  ;;  %v3656_v35 = vld [vmem:[#allocation3 + $0x48] sm:$0xff]  ;;  %v3829_v42 = vsel %vm749_vm3, %v3790_v31, 0.0  ;;  %3690 = vst.msk [vmem:[%s5513_s25 + $0x58] sm:$0xff] %vm749_vm3, %v3658_v53  ;;  %v4553_v43 = vpop.f32.mrb[132].mxu1  ;;  %v3793_v54 = vmul.f32 %v3658_v53, %v3658_v53  ;;  %v3219_v40 = vld [vmem:[#allocation3 + $0xd0] sm:$0xff]  ;;  %v3217_v31 = vld [vmem:[#allocation3 + $0xc0] sm:$0xff] }
 0x204   : > { %3688 = vst.msk [vmem:[%s5513_s25 + $0x48] sm:$0xff] %vm749_vm3, %v3656_v35  ;;  %v3728_v58 = vsel %vm749_vm3, %v3656_v35, 0.0  ;;  %3630 = vst.msk [vmem:[#allocation3 + $0x78] sm:$0xff] %vm749_vm3, %v3598_v50  ;;  %v3791_v47 = vmul.f32 %v3656_v35, %v3656_v35  ;;  %v3247_v51 = vadd.f32 %v4553_v43, %v3215_v61  ;;  %v3146_v52 = vpop.f32.mrb[133].mxu1  ;;  %v3732_v22 = vsel %vm749_vm3, %v3658_v53, 0.0  ;;  %v3220_v35 = vld [vmem:[#allocation3 + $0xd8] sm:$0xff] }
 0x205   : > { %3628 = vst.msk [vmem:[#allocation3 + $0x68] sm:$0xff] %vm749_vm3, %v3596_v11  ;;  %v3830_v59 = vadd.f32 %v3829_v42, %v3828_v32  ;;  %v3729_v44 = vadd.f32 %v3728_v58, %v3727_v17  ;;  %v3569_v41 = vld [vmem:[#allocation3 + $0x90] sm:$0xff]  ;;  %v3245_v55 = vadd.f32 %v3213_v56, %v3146_v52  ;;  %v4554_v3 = vpop.f32.mrb[134].mxu1  ;;  %v3835_v62 = vsel %vm749_vm3, %v3793_v54, 0.0 }
 0x206   : > { %v3831_v63 = vsel %vm749_vm3, %v3791_v47, 0.0  ;;  %v3601_v0 = vadd.f32 %v4583_v19, %v3569_v41  ;;  %3279 = vst.msk [vmem:[#allocation3 + $0xb0] sm:$0xff] %vm749_vm3, %v3247_v51  ;;  %v3567_v1 = vld [vmem:[#allocation3 + $0x80] sm:$0xff]  ;;  %v3248_v6 = vadd.f32 %v4554_v3, %v3216_v4  ;;  %v3149_v49 = vpop.f32.mrb[135].mxu1  ;;  %v4587_v14 = vpop.f32.mrb[132].mxu0 }
 0x207   : > { %v3731_v20 = vadd.f32 %v3730_v36, %v3729_v44  ;;  %v3832_v8 = vadd.f32 %v3831_v63, %v3830_v59  ;;  %v3661_v9 = vld [vmem:[#allocation3 + $0x70] sm:$0xff]  ;;  %v3599_v13 = vadd.f32 %v3567_v1, %v3488_v33  ;;  %3277 = vst.msk [vmem:[#allocation3 + $0xa0] sm:$0xff] %vm749_vm3, %v3245_v55  ;;  %v3246_v18 = vadd.f32 %v3214_v34, %v3149_v49  ;;  %v3504_v24 = vpop.f32.mrb[133].mxu0  ;;  %v3218_v44 = vld [vmem:[#allocation3 + $0xc8] sm:$0xff] }
 0x208   : > { %v3570_v16 = vld [vmem:[#allocation3 + $0x98] sm:$0xff]  ;;  %3693 = vst.msk [vmem:[%s5513_s25 + $0x70] sm:$0xff] %vm749_vm3, %v3661_v9  ;;  %3633 = vst.msk [vmem:[#allocation3 + $0x90] sm:$0xff] %vm749_vm3, %v3601_v0  ;;  %v4588_v38 = vpop.f32.mrb[134].mxu0  ;;  %v3796_v10 = vmul.f32 %v3661_v9, %v3661_v9  ;;  %v3738_v50 = vsel %vm749_vm3, %v3661_v9, 0.0 }
 0x209   : > { %v3659_v26 = vld [vmem:[#allocation3 + $0x60] sm:$0xff]  ;;  %v3733_v7 = vadd.f32 %v3732_v22, %v3731_v20  ;;  %v3602_v46 = vadd.f32 %v4584_v2, %v3570_v16  ;;  %3280 = vst.msk [vmem:[#allocation3 + $0xb8] sm:$0xff] %vm749_vm3, %v3248_v6  ;;  %v3568_v57 = vld [vmem:[#allocation3 + $0x88] sm:$0xff]  ;;  %v3834_v12 = vadd.f32 %v3833_v60, %v3832_v8  ;;  %3631 = vst.msk [vmem:[#allocation3 + $0x80] sm:$0xff] %vm749_vm3, %v3599_v13  ;;  %v5600_v21 = vpop.f32.mrb[135].mxu0 }
 0x20a   : > { %3691 = vst.msk [vmem:[%s5513_s25 + $0x60] sm:$0xff] %vm749_vm3, %v3659_v26  ;;  %v3734_v15 = vsel %vm749_vm3, %v3659_v26, 0.0  ;;  %v3794_v45 = vmul.f32 %v3659_v26, %v3659_v26  ;;  %v3600_v19 = vadd.f32 %v3568_v57, %v3491_v29  ;;  %3278 = vst.msk [vmem:[#allocation3 + $0xa8] sm:$0xff] %vm749_vm3, %v3246_v18  ;;  %v3841_v3 = vsel %vm749_vm3, %v3796_v10, 0.0 }
 0x20b   : > { %v3735_v28 = vadd.f32 %v3734_v15, %v3733_v7  ;;  %v3662_v23 = vld [vmem:[#allocation3 + $0x78] sm:$0xff]  ;;  %3634 = vst.msk [vmem:[#allocation3 + $0x98] sm:$0xff] %vm749_vm3, %v3602_v46  ;;  %v3836_v48 = vadd.f32 %v3835_v62, %v3834_v12  ;;  %v4557_v39 = vpop.f32.mrb[136].mxu1  ;;  %v3223_v46 = vld [vmem:[#allocation3 + $0xf0] sm:$0xff] }
 0x20c   : > { %v3660_v25 = vld [vmem:[#allocation3 + $0x68] sm:$0xff]  ;;  %v3837_v33 = vsel %vm749_vm3, %v3794_v45, 0.0  ;;  %3694 = vst.msk [vmem:[%s5513_s25 + $0x78] sm:$0xff] %vm749_vm3, %v3662_v23  ;;  %3632 = vst.msk [vmem:[#allocation3 + $0x88] sm:$0xff] %vm749_vm3, %v3600_v19  ;;  %v3251_v2 = vadd.f32 %v4557_v39, %v3219_v40  ;;  %v3162_v5 = vpop.f32.mrb[137].mxu1  ;;  %v3797_v37 = vmul.f32 %v3662_v23, %v3662_v23  ;;  %v3740_v4 = vsel %vm749_vm3, %v3662_v23, 0.0 }
 0x20d   : > { %3692 = vst.msk [vmem:[%s5513_s25 + $0x68] sm:$0xff] %vm749_vm3, %v3660_v25  ;;  %v3736_v27 = vsel %vm749_vm3, %v3660_v25, 0.0  ;;  %v3795_v30 = vmul.f32 %v3660_v25, %v3660_v25  ;;  %v3838_v11 = vadd.f32 %v3837_v33, %v3836_v48  ;;  %v3573_v17 = vld [vmem:[#allocation3 + $0xb0] sm:$0xff]  ;;  %v3249_v32 = vadd.f32 %v3217_v31, %v3162_v5  ;;  %v4558_v53 = vpop.f32.mrb[138].mxu1  ;;  %v3221_v45 = vld [vmem:[#allocation3 + $0xe0] sm:$0xff]  ;;  %v3224_v48 = vld [vmem:[#allocation3 + $0xf8] sm:$0xff] }
 0x20e   : > { %v3737_v29 = vadd.f32 %v3736_v27, %v3735_v28  ;;  %v3605_v58 = vadd.f32 %v4587_v14, %v3573_v17  ;;  %3283 = vst.msk [vmem:[#allocation3 + $0xd0] sm:$0xff] %vm749_vm3, %v3251_v2  ;;  %v3571_v43 = vld [vmem:[#allocation3 + $0xa0] sm:$0xff]  ;;  %v3252_v61 = vadd.f32 %v4558_v53, %v3220_v35  ;;  %v3165_v59 = vpop.f32.mrb[139].mxu1  ;;  %v4591_v47 = vpop.f32.mrb[136].mxu0  ;;  %v3843_v9 = vsel %vm749_vm3, %v3797_v37, 0.0  ;;  %v3222_v2 = vld [vmem:[#allocation3 + $0xe8] sm:$0xff] }
 0x20f   : > { %v3839_v42 = vsel %vm749_vm3, %v3795_v30, 0.0  ;;  %v3665_v56 = vld [vmem:[#allocation3 + $0x90] sm:$0xff]  ;;  %v3603_v36 = vadd.f32 %v3571_v43, %v3504_v24  ;;  %3281 = vst.msk [vmem:[#allocation3 + $0xc0] sm:$0xff] %vm749_vm3, %v3249_v32  ;;  %v3250_v41 = vadd.f32 %v3218_v44, %v3165_v59  ;;  %v3520_v55 = vpop.f32.mrb[137].mxu0 }
 0x210   : > { %v3739_v51 = vadd.f32 %v3738_v50, %v3737_v29  ;;  %v3840_v52 = vadd.f32 %v3839_v42, %v3838_v11  ;;  %v3574_v54 = vld [vmem:[#allocation3 + $0xb8] sm:$0xff]  ;;  %3697 = vst.msk [vmem:[%s5513_s25 + $0x90] sm:$0xff] %vm749_vm3, %v3665_v56  ;;  %v3663_v20 = vld [vmem:[#allocation3 + $0x80] sm:$0xff]  ;;  %3637 = vst.msk [vmem:[#allocation3 + $0xb0] sm:$0xff] %vm749_vm3, %v3605_v58  ;;  %v4592_v1 = vpop.f32.mrb[138].mxu0  ;;  %v3800_v57 = vmul.f32 %v3665_v56, %v3665_v56  ;;  %v3746_v19 = vsel %vm749_vm3, %v3665_v56, 0.0 }
 0x211   : > { %v3606_v63 = vadd.f32 %v4588_v38, %v3574_v54  ;;  %3284 = vst.msk [vmem:[#allocation3 + $0xd8] sm:$0xff] %vm749_vm3, %v3252_v61  ;;  %v3572_v0 = vld [vmem:[#allocation3 + $0xa8] sm:$0xff]  ;;  %3695 = vst.msk [vmem:[%s5513_s25 + $0x80] sm:$0xff] %vm749_vm3, %v3663_v20  ;;  %v3742_v34 = vsel %vm749_vm3, %v3663_v20, 0.0  ;;  %v3798_v14 = vmul.f32 %v3663_v20, %v3663_v20  ;;  %v5626_v8 = vpop.f32.mrb[139].mxu0 }
 0x212   : > { %v3842_v6 = vadd.f32 %v3841_v3, %v3840_v52  ;;  %v3741_v49 = vadd.f32 %v3740_v4, %v3739_v51  ;;  %v3666_v22 = vld [vmem:[#allocation3 + $0x98] sm:$0xff]  ;;  %3635 = vst.msk [vmem:[#allocation3 + $0xa0] sm:$0xff] %vm749_vm3, %v3603_v36  ;;  %3282 = vst.msk [vmem:[#allocation3 + $0xc8] sm:$0xff] %vm749_vm3, %v3250_v41  ;;  %v3604_v16 = vadd.f32 %v3572_v0, %v5600_v21  ;;  %v3849_v35 = vsel %vm749_vm3, %v3800_v57, 0.0 }
 0x213   : > { %3698 = vst.msk [vmem:[%s5513_s25 + $0x98] sm:$0xff] %vm749_vm3, %v3666_v22  ;;  %v3664_v13 = vld [vmem:[#allocation3 + $0x88] sm:$0xff]  ;;  %3638 = vst.msk [vmem:[#allocation3 + $0xb8] sm:$0xff] %vm749_vm3, %v3606_v63  ;;  %v3845_v60 = vsel %vm749_vm3, %v3798_v14, 0.0  ;;  %v4561_v7 = vpop.f32.mrb[140].mxu1  ;;  %v3801_v33 = vmul.f32 %v3666_v22, %v3666_v22  ;;  %v3748_v37 = vsel %vm749_vm3, %v3666_v22, 0.0 }
 0x214   : > { %v3743_v18 = vadd.f32 %v3742_v34, %v3741_v49  ;;  %v3844_v24 = vadd.f32 %v3843_v9, %v3842_v6  ;;  %3696 = vst.msk [vmem:[%s5513_s25 + $0x88] sm:$0xff] %vm749_vm3, %v3664_v13  ;;  %v3744_v26 = vsel %vm749_vm3, %v3664_v13, 0.0  ;;  %v3799_v38 = vmul.f32 %v3664_v13, %v3664_v13  ;;  %3636 = vst.msk [vmem:[#allocation3 + $0xa8] sm:$0xff] %vm749_vm3, %v3604_v16  ;;  %v3178_v15 = vpop.f32.mrb[141].mxu1 }
 0x215   : > { %v3255_v12 = vadd.f32 %v4561_v7, %v3223_v46  ;;  %v3577_v28 = vld [vmem:[#allocation3 + $0xd0] sm:$0xff]  ;;  %v3253_v23 = vadd.f32 %v3221_v45, %v3178_v15  ;;  %v4562_v25 = vpop.f32.mrb[142].mxu1  ;;  %v3851_v36 = vsel %vm749_vm3, %v3801_v33, 0.0 }
 0x216   : > { %v3846_v21 = vadd.f32 %v3845_v60, %v3844_v24  ;;  %v3745_v62 = vadd.f32 %v3744_v26, %v3743_v18  ;;  %v3847_v39 = vsel %vm749_vm3, %v3799_v38, 0.0  ;;  %v3609_v40 = vadd.f32 %v4591_v47, %v3577_v28  ;;  %v3575_v10 = vld [vmem:[#allocation3 + $0xc0] sm:$0xff]  ;;  %v3181_v30 = vpop.f32.mrb[143].mxu1  ;;  %v4595_v5 = vpop.f32.mrb[140].mxu0 }
 0x217   : > { %3287 = vst.msk [vmem:[#allocation3 + $0xf0] sm:$0xff] %vm749_vm3, %v3255_v12  ;;  %v3256_v27 = vadd.f32 %v4562_v25, %v3224_v48  ;;  %v3669_v11 = vld [vmem:[#allocation3 + $0xb0] sm:$0xff]  ;;  %v3607_v29 = vadd.f32 %v3575_v10, %v3520_v55  ;;  %3285 = vst.msk [vmem:[#allocation3 + $0xe0] sm:$0xff] %vm749_vm3, %v3253_v23  ;;  %v3254_v32 = vadd.f32 %v3222_v2, %v3181_v30  ;;  %v3536_v53 = vpop.f32.mrb[141].mxu0 }
 0x218   : > { %v3747_v31 = vadd.f32 %v3746_v19, %v3745_v62  ;;  %v3848_v50 = vadd.f32 %v3847_v39, %v3846_v21  ;;  %v3578_v17 = vld [vmem:[#allocation3 + $0xd8] sm:$0xff]  ;;  %3701 = vst.msk [vmem:[%s5513_s25 + $0xb0] sm:$0xff] %vm749_vm3, %v3669_v11  ;;  %3641 = vst.msk [vmem:[#allocation3 + $0xd0] sm:$0xff] %vm749_vm3, %v3609_v40  ;;  %v4596_v61 = vpop.f32.mrb[142].mxu0  ;;  %v3804_v20 = vmul.f32 %v3669_v11, %v3669_v11  ;;  %v3754_v34 = vsel %vm749_vm3, %v3669_v11, 0.0 }
 0x219   : > { %v3667_v42 = vld [vmem:[#allocation3 + $0xa0] sm:$0xff]  ;;  %v3610_v58 = vadd.f32 %v4592_v1, %v3578_v17  ;;  %3288 = vst.msk [vmem:[#allocation3 + $0xf8] sm:$0xff] %vm749_vm3, %v3256_v27  ;;  %v3576_v43 = vld [vmem:[#allocation3 + $0xc8] sm:$0xff]  ;;  %3639 = vst.msk [vmem:[#allocation3 + $0xc0] sm:$0xff] %vm749_vm3, %v3607_v29  ;;  %v3539_v56 = vpop.f32.mrb[143].mxu0 }
 0x21a   : > { %v3850_v59 = vadd.f32 %v3849_v35, %v3848_v50  ;;  %3699 = vst.msk [vmem:[%s5513_s25 + $0xa0] sm:$0xff] %vm749_vm3, %v3667_v42  ;;  %v3749_v44 = vadd.f32 %v3748_v37, %v3747_v31  ;;  %v3750_v47 = vsel %vm749_vm3, %v3667_v42, 0.0  ;;  %v3802_v51 = vmul.f32 %v3667_v42, %v3667_v42  ;;  %v3670_v52 = vld [vmem:[#allocation3 + $0xb8] sm:$0xff]  ;;  %3286 = vst.msk [vmem:[#allocation3 + $0xe8] sm:$0xff] %vm749_vm3, %v3254_v32 }
 0x21b   : > { %3702 = vst.msk [vmem:[%s5513_s25 + $0xb8] sm:$0xff] %vm749_vm3, %v3670_v52  ;;  %3642 = vst.msk [vmem:[#allocation3 + $0xd8] sm:$0xff] %vm749_vm3, %v3610_v58  ;;  %v3608_v54 = vadd.f32 %v3576_v43, %v5626_v8  ;;  %v3668_v4 = vld [vmem:[#allocation3 + $0xa8] sm:$0xff]  ;;  %v3805_v14 = vmul.f32 %v3670_v52, %v3670_v52  ;;  %v3857_v26 = vsel %vm749_vm3, %v3804_v20, 0.0  ;;  %v3756_v7 = vsel %vm749_vm3, %v3670_v52, 0.0 }
 0x21c   : > { %v3751_v41 = vadd.f32 %v3750_v47, %v3749_v44  ;;  %v3852_v55 = vadd.f32 %v3851_v36, %v3850_v59  ;;  %v3853_v3 = vsel %vm749_vm3, %v3802_v51, 0.0  ;;  %3700 = vst.msk [vmem:[%s5513_s25 + $0xa8] sm:$0xff] %vm749_vm3, %v3668_v4  ;;  %v3752_v63 = vsel %vm749_vm3, %v3668_v4, 0.0 }
 0x21d   : > { %v3803_v0 = vmul.f32 %v3668_v4, %v3668_v4  ;;  %3640 = vst.msk [vmem:[#allocation3 + $0xc8] sm:$0xff] %vm749_vm3, %v3608_v54  ;;  %v3859_v62 = vsel %vm749_vm3, %v3805_v14, 0.0 }
 0x21e   : > { %v3854_v1 = vadd.f32 %v3853_v3, %v3852_v55  ;;  %v3753_v6 = vadd.f32 %v3752_v63, %v3751_v41  ;;  %v3581_v49 = vld [vmem:[#allocation3 + $0xf0] sm:$0xff]  ;;  %v3579_v9 = vld [vmem:[#allocation3 + $0xe0] sm:$0xff] }
 0x21f   : > { %v3855_v22 = vsel %vm749_vm3, %v3803_v0, 0.0  ;;  %v3613_v8 = vadd.f32 %v4595_v5, %v3581_v49  ;;  %v3673_v18 = vld [vmem:[#allocation3 + $0xd0] sm:$0xff]  ;;  %v3611_v24 = vadd.f32 %v3579_v9, %v3536_v53 }
 0x220   : > { %v3755_v13 = vadd.f32 %v3754_v34, %v3753_v6  ;;  %v3856_v16 = vadd.f32 %v3855_v22, %v3854_v1  ;;  %v3582_v60 = vld [vmem:[#allocation3 + $0xf8] sm:$0xff]  ;;  %3705 = vst.msk [vmem:[%s5513_s25 + $0xd0] sm:$0xff] %vm749_vm3, %v3673_v18  ;;  %v3671_v46 = vld [vmem:[#allocation3 + $0xc0] sm:$0xff]  ;;  %v3808_v39 = vmul.f32 %v3673_v18, %v3673_v18  ;;  %v3762_v2 = vsel %vm749_vm3, %v3673_v18, 0.0 }
 0x221   : > { %3645 = vst.msk [vmem:[#allocation3 + $0xf0] sm:$0xff] %vm749_vm3, %v3613_v8  ;;  %v3614_v57 = vadd.f32 %v4596_v61, %v3582_v60  ;;  %v3580_v38 = vld [vmem:[#allocation3 + $0xe8] sm:$0xff]  ;;  %3703 = vst.msk [vmem:[%s5513_s25 + $0xc0] sm:$0xff] %vm749_vm3, %v3671_v46  ;;  %v3758_v45 = vsel %vm749_vm3, %v3671_v46, 0.0  ;;  %v3806_v19 = vmul.f32 %v3671_v46, %v3671_v46 }
 0x222   : > { %v3858_v12 = vadd.f32 %v3857_v26, %v3856_v16  ;;  %v3757_v15 = vadd.f32 %v3756_v7, %v3755_v13  ;;  %v3674_v21 = vld [vmem:[#allocation3 + $0xd8] sm:$0xff]  ;;  %3643 = vst.msk [vmem:[#allocation3 + $0xe0] sm:$0xff] %vm749_vm3, %v3611_v24  ;;  %v3612_v28 = vadd.f32 %v3580_v38, %v3539_v56  ;;  %v3865_v17 = vsel %vm749_vm3, %v3808_v39, 0.0 }
 0x223   : > { %3706 = vst.msk [vmem:[%s5513_s25 + $0xd8] sm:$0xff] %vm749_vm3, %v3674_v21  ;;  %3646 = vst.msk [vmem:[#allocation3 + $0xf8] sm:$0xff] %vm749_vm3, %v3614_v57  ;;  %v3861_v48 = vsel %vm749_vm3, %v3806_v19, 0.0  ;;  %v3809_v5 = vmul.f32 %v3674_v21, %v3674_v21  ;;  %v3764_v32 = vsel %vm749_vm3, %v3674_v21, 0.0 }
 0x224   : > { %v3759_v23 = vadd.f32 %v3758_v45, %v3757_v15  ;;  %v3860_v25 = vadd.f32 %v3859_v62, %v3858_v12  ;;  %v3672_v33 = vld [vmem:[#allocation3 + $0xc8] sm:$0xff]  ;;  %3644 = vst.msk [vmem:[#allocation3 + $0xe8] sm:$0xff] %vm749_vm3, %v3612_v28 }
 0x225   : > { %3704 = vst.msk [vmem:[%s5513_s25 + $0xc8] sm:$0xff] %vm749_vm3, %v3672_v33  ;;  %v3760_v40 = vsel %vm749_vm3, %v3672_v33, 0.0  ;;  %v3807_v10 = vmul.f32 %v3672_v33, %v3672_v33  ;;  %v3867_v61 = vsel %vm749_vm3, %v3809_v5, 0.0 }
 0x226   : > { %v3862_v27 = vadd.f32 %v3861_v48, %v3860_v25  ;;  %v3761_v30 = vadd.f32 %v3760_v40, %v3759_v23 }
 0x227   : > { %v3863_v31 = vsel %vm749_vm3, %v3807_v10, 0.0 }
 0x228   : > { %v3763_v50 = vadd.f32 %v3762_v2, %v3761_v30  ;;  %v3864_v11 = vadd.f32 %v3863_v31, %v3862_v27  ;;  %v3677_v29 = vld [vmem:[#allocation3 + $0xf0] sm:$0xff] }
 0x229   : > { %3709 = vst.msk [vmem:[%s5513_s25 + $0xf0] sm:$0xff] %vm749_vm3, %v3677_v29  ;;  %v3675_v53 = vld [vmem:[#allocation3 + $0xe0] sm:$0xff]  ;;  %v3812_v52 = vmul.f32 %v3677_v29, %v3677_v29  ;;  %v3770_v55 = vsel %vm749_vm3, %v3677_v29, 0.0 }
 0x22a   : > { %v3866_v35 = vadd.f32 %v3865_v17, %v3864_v11  ;;  %3707 = vst.msk [vmem:[%s5513_s25 + $0xe0] sm:$0xff] %vm749_vm3, %v3675_v53  ;;  %v3765_v37 = vadd.f32 %v3764_v32, %v3763_v50  ;;  %v3766_v42 = vsel %vm749_vm3, %v3675_v53, 0.0  ;;  %v3810_v58 = vmul.f32 %v3675_v53, %v3675_v53  ;;  %v3678_v43 = vld [vmem:[#allocation3 + $0xf8] sm:$0xff] }
 0x22b   : > { %3710 = vst.msk [vmem:[%s5513_s25 + $0xf8] sm:$0xff] %vm749_vm3, %v3678_v43  ;;  %v3676_v51 = vld [vmem:[#allocation3 + $0xe8] sm:$0xff]  ;;  %v3813_v3 = vmul.f32 %v3678_v43, %v3678_v43  ;;  %v3873_v0 = vsel %vm749_vm3, %v3812_v52, 0.0  ;;  %v3772_v1 = vsel %vm749_vm3, %v3678_v43, 0.0 }
 0x22c   : > { %v3767_v59 = vadd.f32 %v3766_v42, %v3765_v37  ;;  %v3868_v44 = vadd.f32 %v3867_v61, %v3866_v35  ;;  %v3869_v47 = vsel %vm749_vm3, %v3810_v58, 0.0  ;;  %3708 = vst.msk [vmem:[%s5513_s25 + $0xe8] sm:$0xff] %vm749_vm3, %v3676_v51  ;;  %v3768_v56 = vsel %vm749_vm3, %v3676_v51, 0.0 }
 0x22d   : > { %v3811_v36 = vmul.f32 %v3676_v51, %v3676_v51  ;;  %v3875_v34 = vsel %vm749_vm3, %v3813_v3, 0.0 }
 0x22e   : > { %v3870_v54 = vadd.f32 %v3869_v47, %v3868_v44  ;;  %v3769_v41 = vadd.f32 %v3768_v56, %v3767_v59 }
 0x22f   : > { %v3871_v4 = vsel %vm749_vm3, %v3811_v36, 0.0 }
 0x230   : > { %v3771_v20 = vadd.f32 %v3770_v55, %v3769_v41  ;;  %v3872_v63 = vadd.f32 %v3871_v4, %v3870_v54 }
 0x232   : > { %v3773_v6 = vadd.f32 %v3772_v1, %v3771_v20  ;;  %v3874_v49 = vadd.f32 %v3873_v0, %v3872_v63 }
 0x234   : > { %v3774_v14 = vrot.slane %v3773_v6, 4  ;;  %v3876_v22 = vadd.f32 %v3875_v34, %v3874_v49 }
 0x236   : > { %v3775_v8 = vadd.f32 %v3774_v14, %v3773_v6  ;;  %v3877_v9 = vrot.slane %v3876_v22, 4 }
 0x238   : > { %v3776_v13 = vrot.slane %v3775_v8, 2  ;;  %v3878_v16 = vadd.f32 %v3877_v9, %v3876_v22 }
 0x23a   : > { %v3777_v18 = vadd.f32 %v3776_v13, %v3775_v8  ;;  %v3879_v24 = vrot.slane %v3878_v16, 2 }
 0x23c   : > { %v3778_v60 = vrot.slane %v3777_v18, 1  ;;  %v3880_v26 = vadd.f32 %v3879_v24, %v3878_v16 }
 0x23e   : > { %v3779_v7 = vadd.f32 %v3778_v60, %v3777_v18  ;;  %v3881_v46 = vrot.slane %v3880_v26, 1 }
 0x240   : > { %3781 = vst.msk [vmem:[%s235_s29] sm:$0x1] %vm3780_vm4, %v3779_v7  ;;  %v3882_v57 = vadd.f32 %v3881_v46, %v3880_v26 }
 0x242   : > { %3883 = vst.msk [vmem:[%s235_s29 + $0x1] sm:$0x1] %vm3780_vm4, %v3882_v57 }
 0x243 PF: > { %s16_s18 = sadd.s32 1, %s4624_s18  }
 0x244   : > { %p13_p4 = scmp.ge.s32.totalorder %s16_s18, 4  }
 0x246   :  { %15 = sbr.rel (!%p13_p4) target bundleno = 1 (0x1), region = 89 }

// kernel: spatial_pyramid_pooling.7
= control target key start
LH: loop header
LB: loop body
LE: loop exit
PB: predicated region body
PF: predicated region fallthrough
CT: control target
= control target key end

     0   :  { %8 = vsyncpa [#allocation5], 0  ;;  %s8900_s0 = inlined_call_operand.vmem [shape: f32[2,256,8], index: 0, kind: input, shape index: {}]   ;;  %s8901_s1 = inlined_call_operand.vmem [shape: f32[1,8], index: 1, kind: input, shape index: {}]   ;;  %s8902_s2 = inlined_call_operand.vmem [shape: f32[1,8], index: 2, kind: input, shape index: {}]   ;;  %s8903_s3 = inlined_call_operand.hbm [shape: f32[2,256,32], index: 3, kind: output, shape index: {}]  }
   0x1   :  { %10 = vsyncpa [#allocation5 + $0x1], 0  ;;  %s5351_s12 = smov 0   ;;  %s5353_s13 = smov 0  }
   0x2   :  { %s5355_s14 = smov 0   ;;  %s5357_s15 = smov 0  }
   0x3 LB: > { %s5372_s16 = sadd.s32 4294967295, %s5323_s15   ;;  %s5187_s17 = sadd.s32 4294967294, %s5323_s15   ;;  %s5323_s15 = sphi %s5357_s15, %s9238_s15   ;;  %s5319_s14 = sphi %s5355_s14, %s9237_s14   ;;  %s5315_s13 = sphi %s5353_s13, %s9236_s13   ;;  %s5311_s12 = sphi %s5351_s12, %s9235_s12  }
   0x4   : > { %s5376_s18 = sadd.s32 1, %s5323_s15   ;;  %s91_s19 = sadd.s32 1, %s5319_s14 }
   0x5   : > { %s88_s20 = ssub.s32 %s5323_s15, %s5376_s18  ;;  %p101_p0 = scmp.ne.s32.totalorder %s5319_s14, %s5315_s13 }
   0x6   : > { %p89_p1 = scmp.eq.s32.totalorder %s88_s20, 0  ;;  %p102_p2 = scmp.eq.s32.totalorder %s5372_s16, 1 }
   0x7   : > { %p107_p3 = scmp.ne.s32.totalorder %s5315_s13, %s5311_s12  ;;  %p108_p4 = scmp.eq.s32.totalorder %s5187_s17, 1 }
   0x8   : > { %s5387_s21 = scalar_select %p89_p1, %s5319_s14, %s91_s19  }
   0x9   : > { %p5389_p5 = por %p102_p2, %p101_p0  ;;  %p5393_p6 = por %p108_p4, %p107_p3 }
   0xa   : > { %p5190_p7 = scmp.ge.s32.totalorder %s5323_s15, 1  ;;  %p140_p8 = scmp.lt.s32.totalorder %s5323_s15, 3 }
   0xc   : > { %p141_p9 = pnand %p5190_p7, %p140_p8 }
   0xe   : > { %144 = sbr.rel (%p141_p9) target bundleno = 911 (0x38f), region = 32 }
  0x15   : > { %p164_p10 = scmp.lt.s32.totalorder %s5372_s16, 1  ;;  %vm343_vm0 = vcmask 64512   ;;  %v5325_v0 = vmov -inf   ;;  %vm734_vm1 = vcmask 62464   ;;  %v5463_v1 = vld [vmem:[%s8901_s1] ss:$0 sm:$0xff] }
  0x16   : > { %344 = vst.msk [vmem:[#allocation2] sm:$0xff] %vm343_vm0, %v5325_v0  ;;  %345 = vst.msk [vmem:[#allocation2 + $0x8] sm:$0xff] %vm343_vm0, %v5325_v0  ;;  %v5473_v2 = vld [vmem:[%s8902_s2] ss:$0 sm:$0xff]  ;;  %vm911_vm2 = vcmask 1046528   ;;  %vm1120_vm3 = vcmask 1045504  }
  0x17   : > { %s5401_s24 = scalar_select %p164_p10, %s5372_s16, 1  ;;  %346 = vst.msk [vmem:[#allocation2 + $0x10] sm:$0xff] %vm343_vm0, %v5325_v0  ;;  %347 = vst.msk [vmem:[#allocation2 + $0x18] sm:$0xff] %vm343_vm0, %v5325_v0  ;;  %vm1329_vm4 = vcmask 1044480   ;;  %vm1538_vm5 = vcmask 1043456   ;;  %vm1795_vm6 = vcmask 1041408  }
  0x18   : > { %348 = vst.msk [vmem:[#allocation2 + $0x20] sm:$0xff] %vm343_vm0, %v5325_v0  ;;  %349 = vst.msk [vmem:[#allocation2 + $0x28] sm:$0xff] %vm343_vm0, %v5325_v0  ;;  %s5326_s6 = smov 8   ;;  %s5327_s11 = smov 16   ;;  %vm5012_vm7 = vcmask 130048   ;;  %vm5045_vm8 = vcmask 195584  }
  0x19   : > { %350 = vst.msk [vmem:[#allocation2 + $0x30] sm:$0xff] %vm343_vm0, %v5325_v0  ;;  %351 = vst.msk [vmem:[#allocation2 + $0x38] sm:$0xff] %vm343_vm0, %v5325_v0  ;;  %s5201_s25 = sshll.u32 %s5401_s24, 8  ;;  %s5328_s17 = smov 24   ;;  %vm5078_vm9 = vcmask 261120  }
  0x1a   : > { %352 = vst.msk [vmem:[#allocation2 + $0x40] sm:$0xff] %vm343_vm0, %v5325_v0  ;;  %353 = vst.msk [vmem:[#allocation2 + $0x48] sm:$0xff] %vm343_vm0, %v5325_v0  ;;  %s5468_s30 = scalar_lea.vmem %s8900_s0, %s5201_s25  ;;  %s161_s19 = sand.u32 1, %s5315_s13  }
  0x1b   : > { %354 = vst.msk [vmem:[#allocation2 + $0x50] sm:$0xff] %vm343_vm0, %v5325_v0  ;;  %355 = vst.msk [vmem:[#allocation2 + $0x58] sm:$0xff] %vm343_vm0, %v5325_v0  ;;  %v169_v3 = vld [vmem:[%s5468_s30] sm:$0xff]  ;;  %v170_v4 = vld [vmem:[%s5468_s30 + $0x8] sm:$0xff]  ;;  %s5191_s20 = sshll.u32 %s161_s19, 8  ;;  %s5202_s25 = sshll.u32 %s5372_s16, 12 }
  0x1c   : > { %718 = vst.msk [vmem:[#allocation3] sm:$0xff] %vm343_vm0, %v5325_v0  ;;  %357 = vst.msk [vmem:[#allocation2 + $0x160] sm:$0xff] %vm343_vm0, %v5325_v0  ;;  %v171_v5 = vld [vmem:[%s5468_s30 + $0x10] sm:$0xff]  ;;  %v172_v6 = vld [vmem:[%s5468_s30 + $0x18] sm:$0xff]  ;;  %v208_v9 = vmul.f32 %v5463_v1, %v169_v3  ;;  %v209_v10 = vmul.f32 %v5463_v1, %v170_v4  ;;  %s8661_s24 = scalar_lea.vmem [#allocation4], %s5191_s20  ;;  %s8842_s29 = scalar_lea.hbm %s8903_s3, %s5202_s25 }
  0x1d   : > { %358 = vst.msk [vmem:[#allocation2 + $0x168] sm:$0xff] %vm343_vm0, %v5325_v0  ;;  %359 = vst.msk [vmem:[#allocation2 + $0x170] sm:$0xff] %vm343_vm0, %v5325_v0  ;;  %v173_v7 = vld [vmem:[%s5468_s30 + $0x20] sm:$0xff]  ;;  %v174_v8 = vld [vmem:[%s5468_s30 + $0x28] sm:$0xff]  ;;  %v210_v11 = vmul.f32 %v5463_v1, %v171_v5  ;;  %v211_v15 = vmul.f32 %v5463_v1, %v172_v6  ;;  %s5125_s26 = sshll.u32 %s8661_s24, 4  ;;  %s8858_s16 = scalar_lea.sflag [#allocation5], %s161_s19  ;;  %s8848_s26 = int_to_ptr.vmem [resolvable:$true] %s5125_s26 }
  0x1e   : > { %360 = vst.msk [vmem:[#allocation2 + $0x178] sm:$0xff] %vm343_vm0, %v5325_v0  ;;  %361 = vst.msk [vmem:[#allocation2 + $0x180] sm:$0xff] %vm343_vm0, %v5325_v0  ;;  %v175_v12 = vld [vmem:[%s5468_s30 + $0x30] sm:$0xff]  ;;  %v176_v13 = vld [vmem:[%s5468_s30 + $0x38] sm:$0xff]  ;;  %v212_v16 = vmul.f32 %v5463_v1, %v173_v7  ;;  %v213_v17 = vmul.f32 %v5463_v1, %v174_v8  ;;  %v247_v24 = vadd.f32 %v5473_v2, %v208_v9  ;;  %s5329_s4 = smov [#allocation4]  }
  0x1f   : > { %362 = vst.msk [vmem:[#allocation2 + $0x188] sm:$0xff] %vm343_vm0, %v5325_v0  ;;  %363 = vst.msk [vmem:[#allocation2 + $0x190] sm:$0xff] %vm343_vm0, %v5325_v0  ;;  %v177_v14 = vld [vmem:[%s5468_s30 + $0x40] sm:$0xff]  ;;  %v178_v18 = vld [vmem:[%s5468_s30 + $0x48] sm:$0xff]  ;;  %v214_v21 = vmul.f32 %v5463_v1, %v175_v12  ;;  %v215_v22 = vmul.f32 %v5463_v1, %v176_v13  ;;  %v248_v31 = vadd.f32 %v5473_v2, %v209_v10  ;;  %s5265_s5 = sshll.u32 %s5329_s4, 4  ;;  %s5266_s5 = int_to_ptr.vmem [resolvable:$false] %s5265_s5 }
  0x20   : > { %364 = vst.msk [vmem:[#allocation2 + $0x198] sm:$0xff] %vm343_vm0, %v5325_v0  ;;  %365 = vst.msk [vmem:[#allocation2 + $0x1a0] sm:$0xff] %vm343_vm0, %v5325_v0  ;;  %v179_v19 = vld [vmem:[%s5468_s30 + $0x50] sm:$0xff]  ;;  %v180_v20 = vld [vmem:[%s5468_s30 + $0x58] sm:$0xff]  ;;  %v216_v23 = vmul.f32 %v5463_v1, %v177_v14  ;;  %v217_v28 = vmul.f32 %v5463_v1, %v178_v18  ;;  %v249_v38 = vadd.f32 %v5473_v2, %v210_v11  ;;  %v279_v59 = vmul.f32 0.01, %v247_v24  ;;  %p5268_p0 = scmp.lt.s32.totalorder %s8848_s26, %s5266_s5 }
  0x21   : > { %366 = vst.msk [vmem:[#allocation2 + $0x1a8] sm:$0xff] %vm343_vm0, %v5325_v0  ;;  %367 = vst.msk [vmem:[#allocation2 + $0x1b0] sm:$0xff] %vm343_vm0, %v5325_v0  ;;  %v181_v25 = vld [vmem:[%s5468_s30 + $0x60] sm:$0xff]  ;;  %v182_v26 = vld [vmem:[%s5468_s30 + $0x68] sm:$0xff]  ;;  %v218_v29 = vmul.f32 %v5463_v1, %v179_v19  ;;  %v219_v30 = vmul.f32 %v5463_v1, %v180_v20  ;;  %v250_v42 = vadd.f32 %v5473_v2, %v211_v15  ;;  %v280_v60 = vmul.f32 0.01, %v248_v31 }
  0x22   : > { %368 = vst.msk [vmem:[#allocation2 + $0x1b8] sm:$0xff] %vm343_vm0, %v5325_v0  ;;  %719 = vst.msk [vmem:[#allocation3 + $0x20] sm:$0xff] %vm343_vm0, %v5325_v0  ;;  %v183_v27 = vld [vmem:[%s5468_s30 + $0x70] sm:$0xff]  ;;  %v184_v32 = vld [vmem:[%s5468_s30 + $0x78] sm:$0xff]  ;;  %v220_v35 = vmul.f32 %v5463_v1, %v181_v25  ;;  %v221_v36 = vmul.f32 %v5463_v1, %v182_v26  ;;  %v251_v43 = vadd.f32 %v5473_v2, %v212_v16  ;;  %v281_v61 = vmul.f32 0.01, %v249_v38 }
  0x23   : > { %720 = vst.msk [vmem:[#allocation3 + $0x40] sm:$0xff] %vm343_vm0, %v5325_v0  ;;  %721 = vst.msk [vmem:[#allocation3 + $0x60] sm:$0xff] %vm343_vm0, %v5325_v0  ;;  %v185_v33 = vld [vmem:[%s5468_s30 + $0x80] sm:$0xff]  ;;  %v186_v34 = vld [vmem:[%s5468_s30 + $0x88] sm:$0xff]  ;;  %v222_v37 = vmul.f32 %v5463_v1, %v183_v27  ;;  %v223_v39 = vmul.f32 %v5463_v1, %v184_v32  ;;  %v252_v44 = vadd.f32 %v5473_v2, %v213_v17  ;;  %v282_v62 = vmul.f32 0.01, %v250_v42 }
  0x24   : > { %722 = vst.msk [vmem:[#allocation3 + $0x80] sm:$0xff] %vm343_vm0, %v5325_v0  ;;  %723 = vst.msk [vmem:[#allocation3 + $0xa0] sm:$0xff] %vm343_vm0, %v5325_v0  ;;  %v224_v40 = vmul.f32 %v5463_v1, %v185_v33  ;;  %v225_v41 = vmul.f32 %v5463_v1, %v186_v34  ;;  %v253_v45 = vadd.f32 %v5473_v2, %v214_v21  ;;  %v5523_v51 = vld [vmem:[#allocation2] sm:$0xff]  ;;  %v5525_v52 = vld [vmem:[#allocation2 + $0x10] sm:$0xff]  ;;  %v283_v63 = vmul.f32 0.01, %v251_v43 }
  0x25   : > { %724 = vst.msk [vmem:[#allocation3 + $0xc0] sm:$0xff] %vm343_vm0, %v5325_v0  ;;  %725 = vst.msk [vmem:[#allocation3 + $0xe0] sm:$0xff] %vm343_vm0, %v5325_v0  ;;  %v254_v46 = vadd.f32 %v5473_v2, %v215_v22  ;;  %v255_v47 = vadd.f32 %v5473_v2, %v216_v23  ;;  %v256_v48 = vadd.f32 %v5473_v2, %v217_v28  ;;  %v284_v3 = vmul.f32 0.01, %v252_v44  ;;  %v403_v15 = vld [vmem:[#allocation2 + $0x8] sm:$0xff]  ;;  %v5557_v25 = vld [vmem:[#allocation2 + $0x20] sm:$0xff] }
  0x26   : > { %726 = vst.msk [vmem:[#allocation3 + $0x100] sm:$0xff] %vm343_vm0, %v5325_v0  ;;  %727 = vst.msk [vmem:[#allocation3 + $0x120] sm:$0xff] %vm343_vm0, %v5325_v0  ;;  %v257_v49 = vadd.f32 %v5473_v2, %v218_v29  ;;  %v258_v50 = vadd.f32 %v5473_v2, %v219_v30  ;;  %v259_v53 = vadd.f32 %v5473_v2, %v220_v35  ;;  %v285_v4 = vmul.f32 0.01, %v253_v45  ;;  %v5559_v26 = vld [vmem:[#allocation2 + $0x28] sm:$0xff]  ;;  %v5573_v32 = vld [vmem:[#allocation2 + $0x38] sm:$0xff] }
  0x27   : > { %728 = vst.msk [vmem:[#allocation3 + $0x140] sm:$0xff] %vm343_vm0, %v5325_v0  ;;  %729 = vst.msk [vmem:[#allocation3 + $0x160] sm:$0xff] %vm343_vm0, %v5325_v0  ;;  %v260_v54 = vadd.f32 %v5473_v2, %v221_v36  ;;  %v261_v55 = vadd.f32 %v5473_v2, %v222_v37  ;;  %v262_v56 = vadd.f32 %v5473_v2, %v223_v39  ;;  %v286_v5 = vmul.f32 0.01, %v254_v46  ;;  %v5575_v33 = vld [vmem:[#allocation2 + $0x40] sm:$0xff]  ;;  %v5593_v39 = vld [vmem:[#allocation2 + $0x50] sm:$0xff] }
  0x28   : > { %730 = vst.msk [vmem:[#allocation3 + $0x180] sm:$0xff] %vm343_vm0, %v5325_v0  ;;  %731 = vst.msk [vmem:[#allocation3 + $0x1a0] sm:$0xff] %vm343_vm0, %v5325_v0  ;;  %v263_v57 = vadd.f32 %v5473_v2, %v224_v40  ;;  %v264_v58 = vadd.f32 %v5473_v2, %v225_v41  ;;  %v5535_v6 = vmax.f32 %v247_v24, %v279_v59  ;;  %v287_v7 = vmul.f32 0.01, %v255_v47  ;;  %v5555_v24 = vld [vmem:[#allocation2 + $0x18] sm:$0xff]  ;;  %s5267_s7 = scalar_lea.vmem %s5266_s5, 8192 }
  0x29   : > { %732 = vst.msk [vmem:[#allocation3 + $0x1c0] sm:$0xff] %vm343_vm0, %v5325_v0  ;;  %733 = vst.msk [vmem:[#allocation3 + $0x1e0] sm:$0xff] %vm343_vm0, %v5325_v0  ;;  %v288_v8 = vmul.f32 0.01, %v256_v48  ;;  %v289_v9 = vmul.f32 0.01, %v257_v49  ;;  %v5537_v10 = vmax.f32 %v248_v31, %v280_v60  ;;  %v5539_v14 = vmax.f32 %v249_v38, %v281_v61 }
  0x2a   : > { %735 = vst.msk [vmem:[#allocation3 + $0x18] sm:$0x3f] %vm734_vm1, %v5325_v0  ;;  %736 = vst.msk [vmem:[#allocation3 + $0x38] sm:$0x3f] %vm734_vm1, %v5325_v0  ;;  %v290_v11 = vmul.f32 0.01, %v258_v50  ;;  %v5543_v19 = vmax.f32 %v250_v42, %v282_v62  ;;  %v5547_v21 = vmax.f32 %v251_v43, %v283_v63  ;;  %v5549_v22 = vmax.f32 %v252_v44, %v284_v3 }
  0x2b   : > { %737 = vst.msk [vmem:[#allocation3 + $0x58] sm:$0x3f] %vm734_vm1, %v5325_v0  ;;  %738 = vst.msk [vmem:[#allocation3 + $0x78] sm:$0x3f] %vm734_vm1, %v5325_v0  ;;  %v291_v12 = vmul.f32 0.01, %v259_v53  ;;  %v5551_v23 = vmax.f32 %v253_v45, %v285_v4  ;;  %v5561_v27 = vmax.f32 %v254_v46, %v286_v5  ;;  %v5563_v28 = vmax.f32 %v255_v47, %v287_v7 }
  0x2c   : > { %739 = vst.msk [vmem:[#allocation3 + $0x98] sm:$0x3f] %vm734_vm1, %v5325_v0  ;;  %740 = vst.msk [vmem:[#allocation3 + $0xb8] sm:$0x3f] %vm734_vm1, %v5325_v0  ;;  %v292_v13 = vmul.f32 0.01, %v260_v54  ;;  %v5565_v29 = vmax.f32 %v256_v48, %v288_v8  ;;  %v5567_v30 = vmax.f32 %v257_v49, %v289_v9  ;;  %v5577_v34 = vmax.f32 %v258_v50, %v290_v11 }
  0x2d   : > { %741 = vst.msk [vmem:[#allocation3 + $0xd8] sm:$0x3f] %vm734_vm1, %v5325_v0  ;;  %742 = vst.msk [vmem:[#allocation3 + $0xf8] sm:$0x3f] %vm734_vm1, %v5325_v0  ;;  %v293_v16 = vmul.f32 0.01, %v261_v55  ;;  %v5579_v35 = vmax.f32 %v259_v53, %v291_v12  ;;  %v459_v44 = vmax.f32 %v403_v15, %v5555_v24  ;;  %v463_v49 = vmax.f32 %v5559_v26, %v5573_v32 }
  0x2e   : > { %743 = vst.msk [vmem:[#allocation3 + $0x118] sm:$0x3f] %vm734_vm1, %v5325_v0  ;;  %744 = vst.msk [vmem:[#allocation3 + $0x138] sm:$0x3f] %vm734_vm1, %v5325_v0  ;;  %v294_v17 = vmul.f32 0.01, %v262_v56  ;;  %v5581_v36 = vmax.f32 %v260_v54, %v292_v13  ;;  %v466_v53 = vmax.f32 %v5575_v33, %v5593_v39 }
  0x2f   : > { %745 = vst.msk [vmem:[#allocation3 + $0x158] sm:$0x3f] %vm734_vm1, %v5325_v0  ;;  %746 = vst.msk [vmem:[#allocation3 + $0x178] sm:$0x3f] %vm734_vm1, %v5325_v0  ;;  %v295_v18 = vmul.f32 0.01, %v263_v57  ;;  %v5583_v37 = vmax.f32 %v261_v55, %v293_v16 }
  0x30   : > { %747 = vst.msk [vmem:[#allocation3 + $0x198] sm:$0x3f] %vm734_vm1, %v5325_v0  ;;  %748 = vst.msk [vmem:[#allocation3 + $0x1b8] sm:$0x3f] %vm734_vm1, %v5325_v0  ;;  %v296_v20 = vmul.f32 0.01, %v264_v58  ;;  %v5597_v41 = vmax.f32 %v262_v56, %v294_v17  ;;  %v507_v56 = vmax.f32 %v459_v44, %v5559_v26 }
  0x31   : > { %749 = vst.msk [vmem:[#allocation3 + $0x1d8] sm:$0x3f] %vm734_vm1, %v5325_v0  ;;  %750 = vst.msk [vmem:[#allocation3 + $0x1f8] sm:$0x3f] %vm734_vm1, %v5325_v0  ;;  %v458_v0 = vmax.f32 %v5523_v51, %v5525_v52  ;;  %v5571_v31 = vld [vmem:[#allocation2 + $0x30] sm:$0xff]  ;;  %v5591_v38 = vld [vmem:[#allocation2 + $0x48] sm:$0xff]  ;;  %v5599_v42 = vmax.f32 %v263_v57, %v295_v18 }
  0x32   : > { %8984 = vst [vmem:[#allocation7_spill] sm:$0xff] %v5535_v6  ;;  %8985 = vst [vmem:[#allocation8_spill] sm:$0xff] %v5537_v10  ;;  %v5595_v40 = vld [vmem:[#allocation2 + $0x58] sm:$0xff]  ;;  %v5601_v43 = vmax.f32 %v264_v58, %v296_v20  ;;  %v5612_v45 = vld [vmem:[#allocation3] sm:$0xff]  ;;  %v462_v48 = vmax.f32 %v5557_v25, %v5571_v31  ;;  %v511_v59 = vmax.f32 %v463_v49, %v5591_v38 }
  0x33   : > { %8986 = vst [vmem:[#allocation9_spill] sm:$0xff] %v5539_v14  ;;  %370 = vst.msk [vmem:[#allocation2 + $0x60] sm:$0xff] %vm343_vm0, %v5535_v6  ;;  %v467_v54 = vmax.f32 %v5591_v38, %v5595_v40  ;;  %v506_v55 = vmax.f32 %v458_v0, %v5557_v25  ;;  %v555_v3 = vmax.f32 %v507_v56, %v5573_v32  ;;  %v187_v11 = vld [vmem:[%s5468_s30 + $0x90] sm:$0xff]  ;;  %v188_v56 = vld [vmem:[%s5468_s30 + $0x98] sm:$0xff] }
  0x34   : > { %8987 = vst [vmem:[#allocation10_spill] sm:$0xff] %v5543_v19  ;;  %371 = vst.msk [vmem:[#allocation2 + $0x68] sm:$0xff] %vm343_vm0, %v5537_v10  ;;  %v510_v58 = vmax.f32 %v462_v48, %v5575_v33  ;;  %v559_v7 = vmax.f32 %v511_v59, %v5595_v40  ;;  %v9014_v10 = vrot.slane %v5612_v45, 3 }
  0x35   : > { %8988 = vst [vmem:[#allocation11_spill] sm:$0xff] %v5547_v21  ;;  %8989 = vst [vmem:[#allocation12_spill] sm:$0xff] %v5549_v22  ;;  %v554_v0 = vmax.f32 %v506_v55, %v5571_v31 }
  0x36   : > { %8990 = vst [vmem:[#allocation13_spill] sm:$0xff] %v5551_v23  ;;  %372 = vst.msk [vmem:[#allocation2 + $0x70] sm:$0xff] %vm343_vm0, %v5539_v14  ;;  %v558_v5 = vmax.f32 %v510_v58, %v5593_v39 }
  0x37   : > { %8991 = vst [vmem:[#allocation14_spill] sm:$0xff] %v5561_v27  ;;  %8992 = vst [vmem:[#allocation15_spill] sm:$0xff] %v5563_v28  ;;  %v5677_v20 = vmax.f32 %v554_v0, %v5575_v33 }
  0x38   : > { %8993 = vst [vmem:[#allocation16_spill] sm:$0xff] %v5565_v29  ;;  %8994 = vst [vmem:[#allocation17_spill] sm:$0xff] %v5567_v30 }
  0x39   : > { %373 = vst.msk [vmem:[#allocation2 + $0x78] sm:$0xff] %vm343_vm0, %v5543_v19  ;;  %8995 = vst [vmem:[#allocation18_spill] sm:$0xff] %v5577_v34 }
  0x3a   : > { %8996 = vst [vmem:[#allocation19_spill] sm:$0xff] %v5579_v35  ;;  %8997 = vst [vmem:[#allocation20_spill] sm:$0xff] %v5581_v36  ;;  %v5636_v50 = vld [vmem:[#allocation2 + $0x60] sm:$0xff] }
  0x3b   : > { %8998 = vst [vmem:[#allocation21_spill] sm:$0xff] %v5583_v37  ;;  %374 = vst.msk [vmem:[#allocation2 + $0x80] sm:$0xff] %vm343_vm0, %v5547_v21  ;;  %v5647_v57 = vld [vmem:[#allocation2 + $0x68] sm:$0xff]  ;;  %v514_v63 = vmax.f32 %v466_v53, %v5636_v50  ;;  %v5686_v53 = vmax.f32 %v555_v3, %v5591_v38 }
  0x3c   : > { %375 = vst.msk [vmem:[#allocation2 + $0x88] sm:$0xff] %vm343_vm0, %v5549_v22  ;;  %376 = vst.msk [vmem:[#allocation2 + $0x90] sm:$0xff] %vm343_vm0, %v5551_v23  ;;  %v515_v51 = vmax.f32 %v467_v54, %v5647_v57  ;;  %v606_v54 = vmax.f32 %v558_v5, %v5636_v50  ;;  %v607_v55 = vmax.f32 %v559_v7, %v5647_v57 }
  0x3d   : > { %8999 = vst [vmem:[#allocation22_spill] sm:$0xff] %v5597_v41  ;;  %9000 = vst [vmem:[#allocation23_spill] sm:$0xff] %v5599_v42  ;;  %v5653_v62 = vld [vmem:[#allocation2 + $0x70] sm:$0xff] }
  0x3e   : > { %9001 = vst [vmem:[#allocation24_spill] sm:$0xff] %v5601_v43  ;;  %377 = vst.msk [vmem:[#allocation2 + $0x98] sm:$0xff] %vm343_vm0, %v5561_v27  ;;  %v562_v17 = vmax.f32 %v514_v63, %v5653_v62  ;;  %v470_v47 = vmax.f32 %v5636_v50, %v5653_v62 }
  0x3f   : > { %378 = vst.msk [vmem:[#allocation2 + $0xa0] sm:$0xff] %vm343_vm0, %v5563_v28  ;;  %379 = vst.msk [vmem:[#allocation2 + $0xa8] sm:$0xff] %vm343_vm0, %v5565_v29 }
  0x40   : > { %380 = vst.msk [vmem:[#allocation2 + $0xb0] sm:$0xff] %vm343_vm0, %v5567_v30  ;;  %381 = vst.msk [vmem:[#allocation2 + $0xb8] sm:$0xff] %vm343_vm0, %v5577_v34  ;;  %v5659_v4 = vld [vmem:[#allocation2 + $0x78] sm:$0xff] }
  0x41   : > { %382 = vst.msk [vmem:[#allocation2 + $0xc0] sm:$0xff] %vm343_vm0, %v5579_v35  ;;  %383 = vst.msk [vmem:[#allocation2 + $0xc8] sm:$0xff] %vm343_vm0, %v5581_v36  ;;  %v471_v16 = vmax.f32 %v5647_v57, %v5659_v4  ;;  %v563_v18 = vmax.f32 %v515_v51, %v5659_v4  ;;  %v226_v51 = vmul.f32 %v5463_v1, %v187_v11 }
  0x42   : > { %384 = vst.msk [vmem:[#allocation2 + $0xd0] sm:$0xff] %vm343_vm0, %v5583_v37  ;;  %385 = vst.msk [vmem:[#allocation2 + $0xd8] sm:$0xff] %vm343_vm0, %v5597_v41  ;;  %v5666_v12 = vld [vmem:[#allocation2 + $0x80] sm:$0xff]  ;;  %v227_v11 = vmul.f32 %v5463_v1, %v188_v56  ;;  %v464_v56 = vmax.f32 %v5571_v31, %v5575_v33 }
  0x43   : > { %386 = vst.msk [vmem:[#allocation2 + $0xe0] sm:$0xff] %vm343_vm0, %v5599_v42  ;;  %387 = vst.msk [vmem:[#allocation2 + $0xe8] sm:$0xff] %vm343_vm0, %v5601_v43  ;;  %v5668_v13 = vld [vmem:[#allocation2 + $0x88] sm:$0xff]  ;;  %v5670_v15 = vld [vmem:[#allocation2 + $0x90] sm:$0xff]  ;;  %v5701_v49 = vmax.f32 %v562_v17, %v5666_v12  ;;  %v518_v9 = vmax.f32 %v470_v47, %v5666_v12  ;;  %v265_v46 = vadd.f32 %v5473_v2, %v226_v51 }
  0x44   : > { %9002 = vst [vmem:[#allocation25_spill] sm:$0xff] %v5677_v20  ;;  %9003 = vst [vmem:[#allocation26_spill] sm:$0xff] %v5686_v53  ;;  %v519_v0 = vmax.f32 %v471_v16, %v5668_v13  ;;  %v5704_v3 = vmax.f32 %v563_v18, %v5668_v13  ;;  %v266_v1 = vadd.f32 %v5473_v2, %v227_v11 }
  0x45   : > { %v5679_v44 = vld [vmem:[#allocation2 + $0x98] sm:$0xff]  ;;  %751 = vst.msk [vmem:[#allocation3 + $0x8] sm:$0xff] %vm343_vm0, %v5701_v49  ;;  %v297_v37 = vmul.f32 0.01, %v265_v46  ;;  %v469_v11 = vmax.f32 %v5595_v40, %v5647_v57  ;;  %v472_v34 = vmax.f32 %v5653_v62, %v5666_v12  ;;  %v473_v30 = vmax.f32 %v5659_v4, %v5668_v13 }
  0x46   : > { %v5681_v48 = vld [vmem:[#allocation2 + $0xa0] sm:$0xff]  ;;  %v5691_v58 = vld [vmem:[#allocation2 + $0xa8] sm:$0xff]  ;;  %v567_v18 = vmax.f32 %v519_v0, %v5679_v44  ;;  %752 = vst.msk [vmem:[#allocation3 + $0x10] sm:$0xff] %vm343_vm0, %v5704_v3  ;;  %v298_v2 = vmul.f32 0.01, %v266_v1 }
  0x47   : > { %v5693_v59 = vld [vmem:[#allocation2 + $0xb0] sm:$0xff]  ;;  %v5695_v63 = vld [vmem:[#allocation2 + $0xb8] sm:$0xff] }
  0x48   : > { %v478_v5 = vmax.f32 %v5681_v48, %v5693_v59  ;;  %v479_v7 = vmax.f32 %v5691_v58, %v5695_v63  ;;  %v5713_v16 = vld [vmem:[#allocation2 + $0xc0] sm:$0xff]  ;;  %v5715_v17 = vld [vmem:[#allocation2 + $0xc8] sm:$0xff]  ;;  %v5740_v8 = vmax.f32 %v567_v18, %v5691_v58  ;;  %v468_v18 = vmax.f32 %v5593_v39, %v5636_v50 }
  0x49   : > { %v5727_v61 = vld [vmem:[#allocation2 + $0xd0] sm:$0xff]  ;;  %v5733_v43 = vld [vmem:[#allocation2 + $0xd8] sm:$0xff]  ;;  %v5770_v35 = vmax.f32 %v266_v1, %v298_v2 }
  0x4a   : > { %v526_v60 = vmax.f32 %v478_v5, %v5713_v16  ;;  %v527_v0 = vmax.f32 %v479_v7, %v5715_v17  ;;  %v5735_v42 = vld [vmem:[#allocation2 + $0xe0] sm:$0xff]  ;;  %v5737_v41 = vld [vmem:[#allocation2 + $0xe8] sm:$0xff]  ;;  %v465_v5 = vmax.f32 %v5573_v32, %v5591_v38  ;;  %v566_v7 = vmax.f32 %v518_v9, %v5670_v15  ;;  %756 = vst.msk [vmem:[#allocation3 + $0x50] sm:$0xff] %vm343_vm0, %v5740_v8 }
  0x4b   : > { %9004 = vst [vmem:[#allocation27_spill] sm:$0xff] %v5735_v42  ;;  %9005 = vst [vmem:[#allocation28_spill] sm:$0xff] %v5737_v41  ;;  %v5751_v36 = vmax.f32 %v607_v55, %v5740_v8  ;;  %v5768_v55 = vmax.f32 %v265_v46, %v297_v37  ;;  %v481_v46 = vmax.f32 %v5695_v63, %v5715_v17 }
  0x4c   : > { %v574_v47 = vmax.f32 %v526_v60, %v5727_v61  ;;  %v575_v51 = vmax.f32 %v527_v0, %v5733_v43  ;;  %v5766_v9 = vmax.f32 %v566_v7, %v5681_v48  ;;  %9008 = vst [vmem:[#allocation31_spill] sm:$0xff] %v5770_v35  ;;  %v784_v29 = vld [vmem:[#allocation3 + $0x8] sm:$0xff]  ;;  %389 = vst.msk [vmem:[#allocation2 + $0xf8] sm:$0xff] %vm343_vm0, %v5770_v35 }
  0x4d   : > { %9006 = vst [vmem:[#allocation29_spill] sm:$0xff] %v5751_v36  ;;  %9007 = vst [vmem:[#allocation30_spill] sm:$0xff] %v5768_v55  ;;  %v5780_v28 = vld [vmem:[#allocation3 + $0x10] sm:$0xff]  ;;  %v913_v7 = vrot.slane %v784_v29, 1  ;;  %v1540_v22 = vrot.slane %v784_v29, 4 }
  0x4e   : > { %v5760_v60 = vmax.f32 %v574_v47, %v5735_v42  ;;  %v5763_v0 = vmax.f32 %v575_v51, %v5737_v41  ;;  %v480_v47 = vmax.f32 %v5693_v59, %v5713_v16  ;;  %v5783_v37 = vmax.f32 %v606_v54, %v5766_v9  ;;  %755 = vst.msk [vmem:[#allocation3 + $0x48] sm:$0xff] %vm343_vm0, %v5766_v9 }
  0x4f   : > { %388 = vst.msk [vmem:[#allocation2 + $0xf0] sm:$0xff] %vm343_vm0, %v5768_v55  ;;  %v9010_v54 = vmax.f32 %v5525_v52, %v5557_v25  ;;  %v8923_v2 = vrot.slane %v5780_v28, 1  ;;  %v1122_v51 = vrot.slane %v784_v29, 2  ;;  %1877 = vst.msk [vmem:[#allocation3 + $0x10] sm:$0xff] %vm343_vm0, %v5751_v36  ;;  %v1331_v55 = vrot.slane %v784_v29, 3 }
  0x50   : > { %9009 = vst [vmem:[#allocation32_spill] sm:$0xff] %v5783_v37  ;;  %763 = vst.msk [vmem:[#allocation3 + $0xc8] sm:$0xff] %vm343_vm0, %v5760_v60  ;;  %v9011_v52 = vrot.slane %v5612_v45, 1  ;;  %v9013_v23 = vrot.slane %v5780_v28, 2  ;;  %v9015_v14 = vrot.slane %v5780_v28, 3  ;;  %v9017_v6 = vrot.slane %v5780_v28, 4 }
  0x51   : > { %764 = vst.msk [vmem:[#allocation3 + $0xd0] sm:$0xff] %vm343_vm0, %v5763_v0  ;;  %v508_v1 = vmax.f32 %v9010_v54, %v5571_v31  ;;  %1876 = vst.msk [vmem:[#allocation3 + $0x8] sm:$0xff] %vm343_vm0, %v5783_v37  ;;  %v916_v31 = vsel %vm911_vm2, %v913_v7, %v8923_v2  ;;  %v9012_v54 = vrot.slane %v5612_v45, 2  ;;  %v9016_v2 = vrot.slane %v5612_v45, 4 }
  0x52   : > { %v914_v25 = vsel %vm911_vm2, %v9011_v52, %v913_v7  ;;  %v1125_v35 = vsel %vm1120_vm3, %v1122_v51, %v9013_v23  ;;  %v1073_v19 = vmax.f32 %v784_v29, %v916_v31  ;;  %v1332_v52 = vsel %vm1329_vm4, %v9014_v10, %v1331_v55 }
  0x53   : > { %v1123_v27 = vsel %vm1120_vm3, %v9012_v54, %v1122_v51  ;;  %v1072_v21 = vmax.f32 %v5612_v45, %v914_v25  ;;  %v1334_v7 = vsel %vm1329_vm4, %v1331_v55, %v9015_v14  ;;  %v1541_v54 = vsel %vm1538_vm5, %v9016_v2, %v1540_v22 }
  0x54   : > { %v1543_v23 = vsel %vm1538_vm5, %v1540_v22, %v9017_v6  ;;  %v9018_v29 = vmax.f32 %v5555_v24, %v5559_v26  ;;  %v1282_v31 = vmax.f32 %v1073_v19, %v1125_v35  ;;  %v512_v14 = vmax.f32 %v464_v56, %v5593_v39 }
  0x55   : > { %v1281_v25 = vmax.f32 %v1072_v21, %v1123_v27  ;;  %v513_v45 = vmax.f32 %v465_v5, %v5595_v40  ;;  %v516_v55 = vmax.f32 %v468_v18, %v5653_v62  ;;  %v517_v2 = vmax.f32 %v469_v11, %v5659_v4  ;;  %v5863_v11 = vld [vmem:[#allocation2 + $0xf8] sm:$0xff] }
  0x56   : > { %v509_v10 = vmax.f32 %v9018_v29, %v5573_v32  ;;  %v520_v6 = vmax.f32 %v472_v34, %v5670_v15  ;;  %v521_v22 = vmax.f32 %v473_v30, %v5679_v44  ;;  %v1491_v53 = vmax.f32 %v1282_v31, %v1334_v7  ;;  %v5856_v56 = vld [vmem:[#allocation2 + $0xf0] sm:$0xff]  ;;  %9020 = vst [vmem:[#allocation34_spill] sm:$0xff] %v5863_v11 }
  0x57   : > { %v1490_v51 = vmax.f32 %v1281_v25, %v1332_v52  ;;  %v528_v20 = vmax.f32 %v480_v47, %v5727_v61  ;;  %v529_v24 = vmax.f32 %v481_v46, %v5733_v43  ;;  %v556_v19 = vmax.f32 %v508_v1, %v5575_v33  ;;  %9019 = vst [vmem:[#allocation33_spill] sm:$0xff] %v5856_v56  ;;  %v5871_v46 = vld [vmem:[#allocation3 + $0x20] sm:$0xff]  ;;  %v5905_v25 = vld [vmem:[#allocation3 + $0x38] sm:$0x3f] }
  0x58   : > { %v557_v21 = vmax.f32 %v509_v10, %v5591_v38  ;;  %v560_v26 = vmax.f32 %v512_v14, %v5636_v50  ;;  %v561_v27 = vmax.f32 %v513_v45, %v5647_v57  ;;  %v5852_v35 = vmax.f32 %v1491_v53, %v1543_v23 }
  0x59   : > { %v1699_v32 = vmax.f32 %v1490_v51, %v1541_v54  ;;  %v564_v34 = vmax.f32 %v516_v55, %v5666_v12  ;;  %v565_v30 = vmax.f32 %v517_v2, %v5668_v13  ;;  %v568_v5 = vmax.f32 %v520_v6, %v5681_v48 }
  0x5a   : > { %v569_v18 = vmax.f32 %v521_v22, %v5691_v58  ;;  %v576_v33 = vmax.f32 %v528_v20, %v5735_v42  ;;  %v577_v38 = vmax.f32 %v529_v24, %v5737_v41  ;;  %v8927_v57 = vrot.slane %v5852_v35, 6 }
  0x5b   : > { %v1796_v50 = vrot.slane %v1699_v32, 6  ;;  %v5866_v53 = vmax.f32 %v556_v19, %v5593_v39  ;;  %v5869_v47 = vmax.f32 %v557_v21, %v5595_v40  ;;  %v608_v1 = vmax.f32 %v560_v26, %v5653_v62  ;;  %v5930_v32 = vld [vmem:[#allocation3 + $0x40] sm:$0xff] }
  0x5c   : > { %v609_v52 = vmax.f32 %v561_v27, %v5659_v4  ;;  %v5876_v20 = vmax.f32 %v564_v34, %v5670_v15  ;;  %v5879_v7 = vmax.f32 %v565_v30, %v5679_v44  ;;  %v5885_v54 = vmax.f32 %v568_v5, %v5693_v59  ;;  %v786_v4 = vld [vmem:[#allocation3 + $0x18] sm:$0x3f]  ;;  %v5932_v34 = vld [vmem:[#allocation3 + $0x48] sm:$0xff] }
  0x5d   : > { %9021 = vst [vmem:[#allocation35_spill] sm:$0xff] %v5866_v53  ;;  %9022 = vst [vmem:[#allocation36_spill] sm:$0xff] %v5869_v47  ;;  %v1798_v39 = vsel %vm1795_vm6, %v1796_v50, %v8927_v57  ;;  %v5888_v40 = vmax.f32 %v569_v18, %v5695_v63  ;;  %v5891_v62 = vmax.f32 %v576_v33, %v5856_v56  ;;  %v919_v29 = vrot.slane %v5871_v46, 1 }
  0x5e   : > { %4692 = vrot.lane.b32.xlu0 %v1798_v39, %s5326_s6  ;;  %v5895_v23 = vmax.f32 %v577_v38, %v5863_v11  ;;  %753 = vst.msk [vmem:[#allocation3 + $0x28] sm:$0xff] %vm343_vm0, %v5876_v20  ;;  %754 = vst.msk [vmem:[#allocation3 + $0x30] sm:$0xff] %vm343_vm0, %v5879_v7  ;;  %v1128_v10 = vrot.slane %v5871_v46, 2  ;;  %v5908_v31 = vmax.f32 %v608_v1, %v5885_v54  ;;  %v1337_v45 = vrot.slane %v5871_v46, 3 }
  0x5f   : > { %9023 = vst [vmem:[#allocation37_spill] sm:$0xff] %v5888_v40  ;;  %v5911_v14 = vmax.f32 %v609_v52, %v5888_v40  ;;  %v1546_v55 = vrot.slane %v5871_v46, 4  ;;  %757 = vst.msk [vmem:[#allocation3 + $0x68] sm:$0xff] %vm343_vm0, %v5885_v54  ;;  %v917_v6 = vrot.slane %v786_v4, 1  ;;  %v1126_v22 = vrot.slane %v786_v4, 2  ;;  %v5944_v52 = vld [vmem:[#allocation3 + $0x50] sm:$0xff] }
  0x60   : > { %9024 = vst [vmem:[#allocation38_spill] sm:$0xff] %v5895_v23  ;;  %9025 = vst [vmem:[#allocation39_spill] sm:$0xff] %v5908_v31  ;;  %v1335_v24 = vrot.slane %v786_v4, 3  ;;  %v1544_v26 = vrot.slane %v786_v4, 4  ;;  %v924_v27 = vrot.slane %v5905_v25, 1  ;;  %v9027_v30 = vrot.slane %v5780_v28, 1 }
  0x61   : > { %9026 = vst [vmem:[#allocation40_spill] sm:$0xff] %v5911_v14  ;;  %758 = vst.msk [vmem:[#allocation3 + $0x70] sm:$0xff] %vm343_vm0, %v5888_v40  ;;  %v9028_v18 = vrot.slane %v5780_v28, 2  ;;  %v9029_v38 = vrot.slane %v5780_v28, 3  ;;  %v1133_v1 = vrot.slane %v5905_v25, 2  ;;  %v9030_v4 = vrot.slane %v5780_v28, 4 }
  0x62   : > { %765 = vst.msk [vmem:[#allocation3 + $0xe8] sm:$0xff] %vm343_vm0, %v5891_v62  ;;  %766 = vst.msk [vmem:[#allocation3 + $0xf0] sm:$0xff] %vm343_vm0, %v5895_v23  ;;  %v918_v5 = vsel %vm911_vm2, %v9027_v30, %v917_v6  ;;  %v1342_v6 = vrot.slane %v5905_v25, 3  ;;  %v1551_v30 = vrot.slane %v5905_v25, 4  ;;  %v1135_v25 = vrot.slane %v5930_v32, 2 }
  0x63   : > { %v1127_v33 = vsel %vm1120_vm3, %v9028_v18, %v1126_v22  ;;  %v1336_v50 = vsel %vm1329_vm4, %v9029_v38, %v1335_v24  ;;  %v1074_v39 = vmax.f32 %v5780_v28, %v918_v5  ;;  %v1545_v2 = vsel %vm1538_vm5, %v9030_v4, %v1544_v26 }
  0x64   : > { %v9031_v22 = vmax.f32 %v5666_v12, %v5670_v15  ;;  %v9032_v24 = vmax.f32 %v5668_v13, %v5679_v44  ;;  %v926_v5 = vrot.slane %v5930_v32, 1  ;;  %v927_v28 = vrot.slane %v5932_v34, 1 }
  0x65   : > { %v788_v51 = vld [vmem:[#allocation3 + $0x28] sm:$0xff]  ;;  %v789_v26 = vld [vmem:[#allocation3 + $0x30] sm:$0xff]  ;;  %v1283_v4 = vmax.f32 %v1074_v39, %v1127_v33 }
  0x66   : > { %v522_v18 = vmax.f32 %v9031_v22, %v5681_v48  ;;  %v523_v38 = vmax.f32 %v9032_v24, %v5691_v58  ;;  %v920_v12 = vrot.slane %v788_v51, 1  ;;  %v922_v22 = vrot.slane %v789_v26, 1  ;;  %1878 = vst.msk [vmem:[#allocation3 + $0x28] sm:$0xff] %vm343_vm0, %v5908_v31  ;;  %1879 = vst.msk [vmem:[#allocation3 + $0x30] sm:$0xff] %vm343_vm0, %v5911_v14 }
  0x67   : > { %v1129_v57 = vrot.slane %v788_v51, 2  ;;  %v1131_v53 = vrot.slane %v789_v26, 2  ;;  %v1338_v13 = vrot.slane %v788_v51, 3  ;;  %v1340_v24 = vrot.slane %v789_v26, 3 }
  0x68   : > { %v1547_v47 = vrot.slane %v788_v51, 4  ;;  %v1549_v33 = vrot.slane %v789_v26, 4  ;;  %v921_v39 = vsel %vm911_vm2, %v919_v29, %v920_v12  ;;  %v923_v21 = vsel %vm911_vm2, %v920_v12, %v922_v22 }
  0x69   : > { %v1130_v19 = vsel %vm1120_vm3, %v1128_v10, %v1129_v57  ;;  %v1132_v36 = vsel %vm1120_vm3, %v1129_v57, %v1131_v53  ;;  %v1075_v37 = vmax.f32 %v5871_v46, %v921_v39  ;;  %v1076_v11 = vmax.f32 %v788_v51, %v923_v21 }
  0x6a   : > { %v1339_v31 = vsel %vm1329_vm4, %v1337_v45, %v1338_v13  ;;  %v1341_v56 = vsel %vm1329_vm4, %v1338_v13, %v1340_v24  ;;  %v1548_v14 = vsel %vm1538_vm5, %v1546_v55, %v1547_v47  ;;  %v1550_v41 = vsel %vm1538_vm5, %v1547_v47, %v1549_v33 }
  0x6b   : > { %v1492_v42 = vmax.f32 %v1283_v4, %v1336_v50  ;;  %v925_v29 = vsel %vm911_vm2, %v922_v22, %v924_v27  ;;  %v1284_v40 = vmax.f32 %v1075_v37, %v1130_v19  ;;  %v1285_v12 = vmax.f32 %v1076_v11, %v1132_v36 }
  0x6c   : > { %v1077_v23 = vmax.f32 %v789_v26, %v925_v29  ;;  %v1134_v10 = vsel %vm1120_vm3, %v1131_v53, %v1133_v1  ;;  %v1343_v46 = vsel %vm1329_vm4, %v1340_v24, %v1342_v6  ;;  %v1552_v51 = vsel %vm1538_vm5, %v1549_v33, %v1551_v30  ;;  %v794_v33 = vld [vmem:[#allocation3 + $0x58] sm:$0x3f] }
  0x6d   : > { %v1701_v57 = vmax.f32 %v1492_v42, %v1545_v2  ;;  %v570_v45 = vmax.f32 %v522_v18, %v5693_v59  ;;  %v1493_v21 = vmax.f32 %v1284_v40, %v1339_v31  ;;  %v1494_v13 = vmax.f32 %v1285_v12, %v1341_v56 }
  0x6e   : > { %v1286_v55 = vmax.f32 %v1077_v23, %v1134_v10  ;;  %v571_v47 = vmax.f32 %v523_v38, %v5695_v63  ;;  %v928_v36 = vsel %vm911_vm2, %v926_v5, %v927_v28  ;;  %v9033_v37 = vrot.slane %v5944_v52, 1 }
  0x6f   : > { %v1799_v50 = vrot.slane %v1701_v57, 6  ;;  %v5985_v27 = vmax.f32 %v570_v45, %v5713_v16  ;;  %v1702_v11 = vmax.f32 %v1493_v21, %v1548_v14  ;;  %v1703_v53 = vmax.f32 %v1494_v13, %v1550_v41 }
  0x70   : > { %v930_v42 = vsel %vm911_vm2, %v927_v28, %v9033_v37  ;;  %v1495_v2 = vmax.f32 %v1286_v55, %v1343_v46  ;;  %v5992_v19 = vmax.f32 %v571_v47, %v5715_v17  ;;  %v9034_v56 = vrot.slane %v5852_v35, 6 }
  0x71   : > { %v5999_v23 = vmax.f32 %v5701_v49, %v5985_v27  ;;  %v1078_v31 = vmax.f32 %v5930_v32, %v928_v36  ;;  %v1079_v1 = vmax.f32 %v5932_v34, %v930_v42  ;;  %759 = vst.msk [vmem:[#allocation3 + $0x88] sm:$0xff] %vm343_vm0, %v5985_v27  ;;  %v1801_v41 = vrot.slane %v1702_v11, 6  ;;  %v795_v11 = vld [vmem:[#allocation3 + $0x60] sm:$0xff] }
  0x72   : > { %v1800_v40 = vsel %vm1795_vm6, %v9034_v56, %v1799_v50  ;;  %v1802_v14 = vrot.slane %v1703_v53, 6  ;;  %v1704_v6 = vmax.f32 %v1495_v2, %v1552_v51  ;;  %v6008_v35 = vmax.f32 %v5704_v3, %v5992_v19  ;;  %760 = vst.msk [vmem:[#allocation3 + $0x90] sm:$0xff] %vm343_vm0, %v5992_v19 }
  0x73   : > { %4694 = vrot.lane.b32.xlu0 %v1800_v40, %s5326_s6  ;;  %v9035_v30 = vrot.slane %v5932_v34, 2  ;;  %v1138_v38 = vrot.slane %v5944_v52, 2  ;;  %v1344_v5 = vrot.slane %v5930_v32, 3  ;;  %v1345_v28 = vrot.slane %v5932_v34, 3  ;;  %1880 = vst.msk [vmem:[#allocation3 + $0x48] sm:$0xff] %vm343_vm0, %v5999_v23  ;;  %v796_v40 = vld [vmem:[#allocation3 + $0x68] sm:$0xff] }
  0x74   : > { %v1803_v26 = vsel %vm1795_vm6, %v1801_v41, %v1802_v14  ;;  %v1804_v4 = vrot.slane %v1704_v6, 6  ;;  %v1347_v24 = vrot.slane %v5944_v52, 3  ;;  %1881 = vst.msk [vmem:[#allocation3 + $0x50] sm:$0xff] %vm343_vm0, %v6008_v35  ;;  %v1553_v12 = vrot.slane %v5930_v32, 4 }
  0x75   : > { %v1137_v18 = vsel %vm1120_vm3, %v1135_v25, %v9035_v30  ;;  %4696 = vrot.lane.b32.xlu1 %v1803_v26, %s5326_s6  ;;  %v9036_v25 = vmov %v9035_v30  ;;  %v1346_v29 = vsel %vm1329_vm4, %v1344_v5, %v1345_v28  ;;  %v1554_v10 = vrot.slane %v5932_v34, 4 }
  0x76   : > { %v1287_v22 = vmax.f32 %v1078_v31, %v1137_v18  ;;  %v1139_v39 = vsel %vm1120_vm3, %v9036_v25, %v1138_v38  ;;  %v1805_v57 = vsel %vm1795_vm6, %v1802_v14, %v1804_v4  ;;  %v1348_v51 = vsel %vm1329_vm4, %v1345_v28, %v1347_v24  ;;  %v6043_v31 = vld [vmem:[#allocation3 + $0x70] sm:$0xff] }
  0x77   : > { %v1288_v46 = vmax.f32 %v1079_v1, %v1139_v39  ;;  %v1555_v21 = vsel %vm1538_vm5, %v1553_v12, %v1554_v10  ;;  %v1556_v13 = vrot.slane %v5944_v52, 4  ;;  %v931_v55 = vrot.slane %v794_v33, 1 }
  0x78   : > { %v1496_v45 = vmax.f32 %v1287_v22, %v1346_v29  ;;  %v1140_v47 = vrot.slane %v794_v33, 2  ;;  %v1349_v37 = vrot.slane %v794_v33, 3  ;;  %v1558_v42 = vrot.slane %v794_v33, 4 }
  0x79   : > { %v1497_v50 = vmax.f32 %v1288_v46, %v1348_v51  ;;  %4698 = vrot.lane.b32.xlu1 %v1805_v57, %s5326_s6  ;;  %v1557_v32 = vsel %vm1538_vm5, %v1554_v10, %v1556_v13  ;;  %v9037_v34 = vrot.slane %v5944_v52, 1  ;;  %v476_v56 = vmax.f32 %v5670_v15, %v5681_v48 }
  0x7a   : > { %v1705_v36 = vmax.f32 %v1496_v45, %v1555_v21  ;;  %v1141_v2 = vsel %vm1120_vm3, %v1138_v38, %v1140_v47  ;;  %v1350_v6 = vsel %vm1329_vm4, %v1347_v24, %v1349_v37  ;;  %v1559_v30 = vsel %vm1538_vm5, %v1556_v13, %v1558_v42  ;;  %v798_v37 = vld [vmem:[#allocation3 + $0x78] sm:$0x3f] }
  0x7b   : > { %v932_v53 = vsel %vm911_vm2, %v9037_v34, %v931_v55  ;;  %v1706_v1 = vmax.f32 %v1497_v50, %v1557_v32  ;;  %v477_v18 = vmax.f32 %v5679_v44, %v5691_v58  ;;  %v524_v5 = vmax.f32 %v476_v56, %v5693_v59 }
  0x7c   : > { %v1806_v41 = vrot.slane %v1705_v36, 6  ;;  %v1080_v14 = vmax.f32 %v5944_v52, %v932_v53  ;;  %v933_v38 = vrot.slane %v795_v11, 1  ;;  %v934_v15 = vrot.slane %v796_v40, 1 }
  0x7d   : > { %v1807_v28 = vrot.slane %v1706_v1, 6  ;;  %v936_v48 = vrot.slane %v6043_v31, 1  ;;  %v525_v4 = vmax.f32 %v477_v18, %v5695_v63  ;;  %v572_v22 = vmax.f32 %v524_v5, %v5713_v16 }
  0x7e   : > { %v1289_v26 = vmax.f32 %v1080_v14, %v1141_v2  ;;  %v1142_v52 = vrot.slane %v795_v11, 2  ;;  %v1143_v33 = vrot.slane %v796_v40, 2  ;;  %v935_v39 = vsel %vm911_vm2, %v933_v38, %v934_v15 }
  0x7f   : > { %v1808_v24 = vsel %vm1795_vm6, %v1806_v41, %v1807_v28  ;;  %v937_v44 = vsel %vm911_vm2, %v934_v15, %v936_v48  ;;  %v573_v58 = vmax.f32 %v525_v4, %v5715_v17  ;;  %v6060_v59 = vmax.f32 %v572_v22, %v5727_v61  ;;  %v6090_v15 = vld [vmem:[#allocation3 + $0x90] sm:$0xff] }
  0x80   : > { %v1498_v25 = vmax.f32 %v1289_v26, %v1350_v6  ;;  %4700 = vrot.lane.b32.xlu0 %v1808_v24, %s5326_s6  ;;  %v1081_v29 = vmax.f32 %v795_v11, %v935_v39  ;;  %v1082_v63 = vmax.f32 %v796_v40, %v937_v44  ;;  %v1144_v10 = vsel %vm1120_vm3, %v1142_v52, %v1143_v33  ;;  %v800_v26 = vld [vmem:[#allocation3 + $0x88] sm:$0xff] }
  0x81   : > { %v1145_v57 = vrot.slane %v6043_v31, 2  ;;  %v1351_v46 = vrot.slane %v795_v11, 3  ;;  %v6065_v51 = vmax.f32 %v573_v58, %v5733_v43  ;;  %v1352_v21 = vrot.slane %v796_v40, 3  ;;  %761 = vst.msk [vmem:[#allocation3 + $0xa8] sm:$0xff] %vm343_vm0, %v6060_v59 }
  0x82   : > { %v1707_v12 = vmax.f32 %v1498_v25, %v1559_v30  ;;  %v1290_v45 = vmax.f32 %v1081_v29, %v1144_v10  ;;  %v1354_v13 = vrot.slane %v6043_v31, 3  ;;  %v1560_v50 = vrot.slane %v795_v11, 4 }
  0x83   : > { %v1146_v47 = vsel %vm1120_vm3, %v1143_v33, %v1145_v57  ;;  %v1561_v36 = vrot.slane %v796_v40, 4  ;;  %v6073_v42 = vmax.f32 %v5879_v7, %v6065_v51  ;;  %v1353_v34 = vsel %vm1329_vm4, %v1351_v46, %v1352_v21  ;;  %762 = vst.msk [vmem:[#allocation3 + $0xb0] sm:$0xff] %vm343_vm0, %v6065_v51 }
  0x84   : > { %v1809_v55 = vrot.slane %v1707_v12, 6  ;;  %v1291_v32 = vmax.f32 %v1082_v63, %v1146_v47  ;;  %v1355_v53 = vsel %vm1329_vm4, %v1352_v21, %v1354_v13  ;;  %v1499_v56 = vmax.f32 %v1290_v45, %v1353_v34 }
  0x85   : > { %v1562_v1 = vsel %vm1538_vm5, %v1560_v50, %v1561_v36  ;;  %v1563_v11 = vrot.slane %v6043_v31, 4  ;;  %1883 = vst.msk [vmem:[#allocation3 + $0x70] sm:$0xff] %vm343_vm0, %v6073_v42  ;;  %v6087_v41 = vmax.f32 %v5876_v20, %v6060_v59  ;;  %v938_v14 = vrot.slane %v798_v37, 1 }
  0x86   : > { %v1810_v2 = vsel %vm1795_vm6, %v1807_v28, %v1809_v55  ;;  %v1500_v40 = vmax.f32 %v1291_v32, %v1355_v53  ;;  %v1147_v6 = vrot.slane %v798_v37, 2  ;;  %v1708_v18 = vmax.f32 %v1499_v56, %v1562_v1  ;;  %v799_v28 = vld [vmem:[#allocation3 + $0x80] sm:$0xff] }
  0x87   : > { %4702 = vrot.lane.b32.xlu1 %v1810_v2, %s5326_s6  ;;  %v1564_v30 = vsel %vm1538_vm5, %v1561_v36, %v1563_v11  ;;  %v1356_v5 = vrot.slane %v798_v37, 3  ;;  %v1565_v38 = vrot.slane %v798_v37, 4  ;;  %1882 = vst.msk [vmem:[#allocation3 + $0x68] sm:$0xff] %vm343_vm0, %v6087_v41  ;;  %v939_v22 = vsel %vm911_vm2, %v936_v48, %v938_v14 }
  0x88   : > { %v1709_v4 = vmax.f32 %v1500_v40, %v1564_v30  ;;  %v1148_v52 = vsel %vm1120_vm3, %v1145_v57, %v1147_v6  ;;  %v6098_v33 = vmax.f32 %v5740_v8, %v5763_v0  ;;  %v1811_v24 = vrot.slane %v1708_v18, 6 }
  0x89   : > { %v1083_v25 = vmax.f32 %v6043_v31, %v939_v22  ;;  %v1357_v39 = vsel %vm1329_vm4, %v1354_v13, %v1356_v5  ;;  %v1566_v44 = vsel %vm1538_vm5, %v1563_v11, %v1565_v38  ;;  %v940_v29 = vrot.slane %v799_v28, 1  ;;  %v802_v11 = vld [vmem:[#allocation3 + $0x98] sm:$0x3f] }
  0x8a   : > { %9038 = vst [vmem:[#allocation41_spill] sm:$0xff] %v6098_v33  ;;  %v1812_v58 = vrot.slane %v1709_v4, 6  ;;  %v941_v63 = vrot.slane %v800_v26, 1  ;;  %v943_v12 = vrot.slane %v6090_v15, 1  ;;  %1885 = vst.msk [vmem:[#allocation3 + $0x90] sm:$0xff] %vm343_vm0, %v6098_v33  ;;  %v1149_v10 = vrot.slane %v799_v28, 2 }
  0x8b   : > { %v1292_v48 = vmax.f32 %v1083_v25, %v1148_v52  ;;  %v1150_v57 = vrot.slane %v800_v26, 2  ;;  %v1152_v8 = vrot.slane %v6090_v15, 2  ;;  %v1358_v21 = vrot.slane %v799_v28, 3 }
  0x8c   : > { %v1813_v46 = vsel %vm1795_vm6, %v1811_v24, %v1812_v58  ;;  %v942_v31 = vsel %vm911_vm2, %v940_v29, %v941_v63  ;;  %v944_v45 = vsel %vm911_vm2, %v941_v63, %v943_v12  ;;  %v1359_v37 = vrot.slane %v800_v26, 3  ;;  %v804_v29 = vld [vmem:[#allocation3 + $0xa8] sm:$0xff]  ;;  %v6126_v63 = vld [vmem:[#allocation3 + $0xb0] sm:$0xff] }
  0x8d   : > { %4704 = vrot.lane.b32.xlu0 %v1813_v46, %s5326_s6  ;;  %v1501_v13 = vmax.f32 %v1292_v48, %v1357_v39  ;;  %v1084_v55 = vmax.f32 %v799_v28, %v942_v31  ;;  %v1085_v47 = vmax.f32 %v800_v26, %v944_v45  ;;  %v1151_v50 = vsel %vm1120_vm3, %v1149_v10, %v1150_v57 }
  0x8e   : > { %v1153_v36 = vsel %vm1120_vm3, %v1150_v57, %v1152_v8  ;;  %v1361_v32 = vrot.slane %v6090_v15, 3  ;;  %v1567_v34 = vrot.slane %v799_v28, 4  ;;  %v1568_v1 = vrot.slane %v800_v26, 4 }
  0x8f   : > { %v1710_v53 = vmax.f32 %v1501_v13, %v1566_v44  ;;  %v1293_v2 = vmax.f32 %v1084_v55, %v1151_v50  ;;  %v1294_v56 = vmax.f32 %v1085_v47, %v1153_v36  ;;  %v1360_v40 = vsel %vm1329_vm4, %v1358_v21, %v1359_v37  ;;  %v9040_v13 = vld [vmem:[#allocation38_spill] sm:$0xff]  ;;  %v9041_v55 = vld [vmem:[#allocation37_spill] sm:$0xff] }
  0x90   : > { %v1362_v14 = vsel %vm1329_vm4, %v1359_v37, %v1361_v32  ;;  %v1570_v6 = vrot.slane %v6090_v15, 4  ;;  %v6119_v30 = vmax.f32 %v5766_v9, %v5760_v60  ;;  %v1569_v28 = vsel %vm1538_vm5, %v1567_v34, %v1568_v1  ;;  %v803_v9 = vld [vmem:[#allocation3 + $0xa0] sm:$0xff] }
  0x91   : > { %v1814_v18 = vrot.slane %v1710_v53, 6  ;;  %v1502_v5 = vmax.f32 %v1293_v2, %v1360_v40  ;;  %v1503_v38 = vmax.f32 %v1294_v56, %v1362_v14  ;;  %v945_v26 = vrot.slane %v802_v11, 1  ;;  %v806_v14 = vld [vmem:[#allocation3 + $0xb8] sm:$0x3f] }
  0x92   : > { %v1571_v4 = vsel %vm1538_vm5, %v1568_v1, %v1570_v6  ;;  %1884 = vst.msk [vmem:[#allocation3 + $0x88] sm:$0xff] %vm343_vm0, %v6119_v30  ;;  %v1154_v22 = vrot.slane %v802_v11, 2  ;;  %v1363_v52 = vrot.slane %v802_v11, 3  ;;  %v1572_v44 = vrot.slane %v802_v11, 4 }
  0x93   : > { %v1815_v24 = vsel %vm1795_vm6, %v1812_v58, %v1814_v18  ;;  %v1711_v25 = vmax.f32 %v1502_v5, %v1569_v28  ;;  %v1712_v39 = vmax.f32 %v1503_v38, %v1571_v4  ;;  %v946_v48 = vsel %vm911_vm2, %v943_v12, %v945_v26 }
  0x94   : > { %4706 = vrot.lane.b32.xlu1 %v1815_v24, %s5326_s6  ;;  %v1155_v10 = vsel %vm1120_vm3, %v1152_v8, %v1154_v22  ;;  %v1364_v57 = vsel %vm1329_vm4, %v1361_v32, %v1363_v52  ;;  %v6134_v46 = vmax.f32 %v5885_v54, %v5891_v62  ;;  %v1086_v45 = vmax.f32 %v6090_v15, %v946_v48 }
  0x95   : > { %v1816_v58 = vrot.slane %v1711_v25, 6  ;;  %v1817_v31 = vrot.slane %v1712_v39, 6  ;;  %v1573_v21 = vsel %vm1538_vm5, %v1570_v6, %v1572_v44  ;;  %v6140_v47 = vmax.f32 %v9041_v55, %v9040_v13 }
  0x96   : > { %9039 = vst [vmem:[#allocation42_spill] sm:$0xff] %v6134_v46  ;;  %v947_v50 = vrot.slane %v803_v9, 1  ;;  %v948_v12 = vrot.slane %v804_v29, 1  ;;  %v950_v8 = vrot.slane %v6126_v63, 1  ;;  %1886 = vst.msk [vmem:[#allocation3 + $0xa8] sm:$0xff] %vm343_vm0, %v6134_v46  ;;  %v1295_v36 = vmax.f32 %v1086_v45, %v1155_v10  ;;  %v197_v46 = vld [vmem:[%s5468_s30 + $0xe0] sm:$0xff] }
  0x97   : > { %9042 = vst [vmem:[#allocation38_spill] sm:$0xff] %v6140_v47  ;;  %v1818_v54 = vsel %vm1795_vm6, %v1816_v58, %v1817_v31  ;;  %v1156_v37 = vrot.slane %v803_v9, 2  ;;  %v1157_v32 = vrot.slane %v804_v29, 2  ;;  %v1159_v53 = vrot.slane %v6126_v63, 2  ;;  %1887 = vst.msk [vmem:[#allocation3 + $0xb0] sm:$0xff] %vm343_vm0, %v6140_v47  ;;  %v189_v58 = vld [vmem:[%s5468_s30 + $0xa0] sm:$0xff] }
  0x98   : > { %4708 = vrot.lane.b32.xlu0 %v1818_v54, %s5326_s6  ;;  %v949_v15 = vsel %vm911_vm2, %v947_v50, %v948_v12  ;;  %v951_v34 = vsel %vm911_vm2, %v948_v12, %v950_v8  ;;  %v1365_v2 = vrot.slane %v803_v9, 3  ;;  %v1504_v56 = vmax.f32 %v1295_v36, %v1364_v57 }
  0x99   : > { %v1087_v1 = vmax.f32 %v803_v9, %v949_v15  ;;  %v1088_v11 = vmax.f32 %v804_v29, %v951_v34  ;;  %v1158_v40 = vsel %vm1120_vm3, %v1156_v37, %v1157_v32  ;;  %v1160_v6 = vsel %vm1120_vm3, %v1157_v32, %v1159_v53 }
  0x9a   : > { %v1366_v18 = vrot.slane %v804_v29, 3  ;;  %v1368_v5 = vrot.slane %v6126_v63, 3  ;;  %v1574_v38 = vrot.slane %v803_v9, 4  ;;  %v1713_v28 = vmax.f32 %v1504_v56, %v1573_v21 }
  0x9b   : > { %v1296_v4 = vmax.f32 %v1087_v1, %v1158_v40  ;;  %v1297_v26 = vmax.f32 %v1088_v11, %v1160_v6  ;;  %v1575_v22 = vrot.slane %v804_v29, 4  ;;  %v1577_v25 = vrot.slane %v6126_v63, 4  ;;  %v190_v29 = vld [vmem:[%s5468_s30 + $0xa8] sm:$0xff] }
  0x9c   : > { %v1367_v52 = vsel %vm1329_vm4, %v1365_v2, %v1366_v18  ;;  %v1369_v24 = vsel %vm1329_vm4, %v1366_v18, %v1368_v5  ;;  %v952_v39 = vrot.slane %v806_v14, 1  ;;  %v1819_v44 = vrot.slane %v1713_v28, 6  ;;  %v807_v2 = vld [vmem:[#allocation3 + $0xc0] sm:$0xff]  ;;  %v808_v11 = vld [vmem:[#allocation3 + $0xc8] sm:$0xff] }
  0x9d   : > { %v1505_v48 = vmax.f32 %v1296_v4, %v1367_v52  ;;  %v1506_v10 = vmax.f32 %v1297_v26, %v1369_v24  ;;  %v1576_v57 = vsel %vm1538_vm5, %v1574_v38, %v1575_v22  ;;  %v1578_v9 = vsel %vm1538_vm5, %v1575_v22, %v1577_v25  ;;  %v9043_v52 = vld [vmem:[#allocation27_spill] sm:$0xff] }
  0x9e   : > { %v953_v45 = vsel %vm911_vm2, %v950_v8, %v952_v39  ;;  %v1161_v21 = vrot.slane %v806_v14, 2  ;;  %v1370_v55 = vrot.slane %v806_v14, 3  ;;  %v1820_v50 = vsel %vm1795_vm6, %v1817_v31, %v1819_v44  ;;  %v6171_v8 = vld [vmem:[%s8901_s1] ss:$0 sm:$0xff] }
  0x9f   : > { %v1714_v12 = vmax.f32 %v1505_v48, %v1576_v57  ;;  %v1715_v54 = vmax.f32 %v1506_v10, %v1578_v9  ;;  %v1089_v36 = vmax.f32 %v6126_v63, %v953_v45  ;;  %4710 = vrot.lane.b32.xlu1 %v1820_v50, %s5326_s6  ;;  %v1579_v15 = vrot.slane %v806_v14, 4  ;;  %v9047_v45 = vld [vmem:[#allocation34_spill] sm:$0xff] }
  0xa0   : > { %v1162_v37 = vsel %vm1120_vm3, %v1159_v53, %v1161_v21  ;;  %v1371_v32 = vsel %vm1329_vm4, %v1368_v5, %v1370_v55  ;;  %v228_v34 = vmul.f32 %v6171_v8, %v189_v58  ;;  %v229_v63 = vmul.f32 %v6171_v8, %v190_v29  ;;  %v6179_v53 = vld [vmem:[%s8902_s2] ss:$0 sm:$0xff]  ;;  %v6186_v5 = vld [vmem:[#allocation3 + $0xd0] sm:$0xff] }
  0xa1   : > { %v1821_v31 = vrot.slane %v1714_v12, 6  ;;  %v1822_v56 = vrot.slane %v1715_v54, 6  ;;  %v1298_v1 = vmax.f32 %v1089_v36, %v1162_v37  ;;  %v1580_v40 = vsel %vm1538_vm5, %v1577_v25, %v1579_v15  ;;  %v9044_v25 = vld [vmem:[#allocation28_spill] sm:$0xff]  ;;  %v9046_v58 = vld [vmem:[#allocation33_spill] sm:$0xff] }
  0xa2   : > { %v267_v14 = vadd.f32 %v6179_v53, %v228_v34  ;;  %v482_v6 = vmax.f32 %v5713_v16, %v5727_v61  ;;  %v483_v18 = vmax.f32 %v5715_v17, %v5733_v43  ;;  %v268_v4 = vadd.f32 %v6179_v53, %v229_v63 }
  0xa3   : > { %v1823_v38 = vsel %vm1795_vm6, %v1821_v31, %v1822_v56  ;;  %v1507_v28 = vmax.f32 %v1298_v1, %v1371_v32  ;;  %v954_v26 = vrot.slane %v807_v2, 1  ;;  %v955_v44 = vrot.slane %v808_v11, 1 }
  0xa4   : > { %4712 = vrot.lane.b32.xlu0 %v1823_v38, %s5326_s6  ;;  %v299_v22 = vmul.f32 0.01, %v267_v14  ;;  %v530_v24 = vmax.f32 %v482_v6, %v9043_v52  ;;  %v531_v39 = vmax.f32 %v483_v18, %v9044_v25  ;;  %v300_v48 = vmul.f32 0.01, %v268_v4 }
  0xa5   : > { %v1716_v16 = vmax.f32 %v1507_v28, %v1580_v40  ;;  %v957_v17 = vrot.slane %v6186_v5, 1  ;;  %v1163_v10 = vrot.slane %v807_v2, 2  ;;  %v956_v55 = vsel %vm911_vm2, %v954_v26, %v955_v44  ;;  %v810_v40 = vld [vmem:[#allocation3 + $0xd8] sm:$0x3f] }
  0xa6   : > { %v6194_v57 = vmax.f32 %v267_v14, %v299_v22  ;;  %v578_v9 = vmax.f32 %v530_v24, %v9046_v58  ;;  %v579_v21 = vmax.f32 %v531_v39, %v9047_v45  ;;  %v6199_v50 = vmax.f32 %v268_v4, %v300_v48  ;;  %v191_v22 = vld [vmem:[%s5468_s30 + $0xb0] sm:$0xff]  ;;  %v192_v24 = vld [vmem:[%s5468_s30 + $0xb8] sm:$0xff] }
  0xa7   : > { %v1824_v29 = vrot.slane %v1716_v16, 6  ;;  %v958_v12 = vsel %vm911_vm2, %v955_v44, %v957_v17  ;;  %v1090_v54 = vmax.f32 %v807_v2, %v956_v55  ;;  %v1164_v37 = vrot.slane %v808_v11, 2 }
  0xa8   : > { %9045 = vst [vmem:[#allocation37_spill] sm:$0xff] %v6194_v57  ;;  %9048 = vst [vmem:[#allocation27_spill] sm:$0xff] %v6199_v50  ;;  %v1091_v36 = vmax.f32 %v808_v11, %v958_v12  ;;  %v1166_v32 = vrot.slane %v6186_v5, 2  ;;  %v1372_v15 = vrot.slane %v807_v2, 3  ;;  %v1373_v31 = vrot.slane %v808_v11, 3 }
  0xa9   : > { %390 = vst.msk [vmem:[#allocation2 + $0x100] sm:$0xff] %vm343_vm0, %v6194_v57  ;;  %v1825_v34 = vsel %vm1795_vm6, %v1822_v56, %v1824_v29  ;;  %391 = vst.msk [vmem:[#allocation2 + $0x108] sm:$0xff] %vm343_vm0, %v6199_v50  ;;  %v1375_v1 = vrot.slane %v6186_v5, 3  ;;  %v1581_v63 = vrot.slane %v807_v2, 4  ;;  %v1165_v14 = vsel %vm1120_vm3, %v1163_v10, %v1164_v37 }
  0xaa   : > { %4714 = vrot.lane.b32.xlu1 %v1825_v34, %s5326_s6  ;;  %v1167_v6 = vsel %vm1120_vm3, %v1164_v37, %v1166_v32  ;;  %v1582_v18 = vrot.slane %v808_v11, 4  ;;  %v1584_v38 = vrot.slane %v6186_v5, 4  ;;  %v1299_v28 = vmax.f32 %v1090_v54, %v1165_v14 }
  0xab   : > { %v1300_v56 = vmax.f32 %v1091_v36, %v1167_v6  ;;  %v1374_v4 = vsel %vm1329_vm4, %v1372_v15, %v1373_v31  ;;  %v1376_v26 = vsel %vm1329_vm4, %v1373_v31, %v1375_v1  ;;  %v959_v44 = vrot.slane %v810_v40, 1 }
  0xac   : > { %v1583_v2 = vsel %vm1538_vm5, %v1581_v63, %v1582_v18  ;;  %v1585_v39 = vsel %vm1538_vm5, %v1582_v18, %v1584_v38  ;;  %v1168_v16 = vrot.slane %v810_v40, 2  ;;  %v1508_v48 = vmax.f32 %v1299_v28, %v1374_v4 }
  0xad   : > { %v1509_v10 = vmax.f32 %v1300_v56, %v1376_v26  ;;  %v1377_v55 = vrot.slane %v810_v40, 3  ;;  %v1586_v11 = vrot.slane %v810_v40, 4  ;;  %v960_v29 = vsel %vm911_vm2, %v957_v17, %v959_v44 }
  0xae   : > { %v1169_v12 = vsel %vm1120_vm3, %v1166_v32, %v1168_v16  ;;  %v230_v54 = vmul.f32 %v6171_v8, %v191_v22  ;;  %v231_v36 = vmul.f32 %v6171_v8, %v192_v24  ;;  %v1717_v15 = vmax.f32 %v1508_v48, %v1583_v2  ;;  %v812_v22 = vld [vmem:[#allocation3 + $0xe8] sm:$0xff]  ;;  %v6246_v24 = vld [vmem:[#allocation3 + $0xf0] sm:$0xff] }
  0xaf   : > { %v1718_v34 = vmax.f32 %v1509_v10, %v1585_v39  ;;  %v1092_v31 = vmax.f32 %v6186_v5, %v960_v29  ;;  %v1378_v63 = vsel %vm1329_vm4, %v1375_v1, %v1377_v55  ;;  %v1587_v17 = vsel %vm1538_vm5, %v1584_v38, %v1586_v11  ;;  %v811_v5 = vld [vmem:[#allocation3 + $0xe0] sm:$0xff] }
  0xb0   : > { %v6223_v37 = vld [vmem:[#allocation2 + $0x100] sm:$0xff]  ;;  %v6227_v14 = vld [vmem:[#allocation2 + $0x108] sm:$0xff]  ;;  %v269_v32 = vadd.f32 %v6179_v53, %v230_v54  ;;  %v270_v6 = vadd.f32 %v6179_v53, %v231_v36  ;;  %v1826_v28 = vrot.slane %v1717_v15, 6  ;;  %v484_v26 = vmax.f32 %v5727_v61, %v9043_v52 }
  0xb1   : > { %v6230_v40 = vmax.f32 %v578_v9, %v6223_v37  ;;  %v6236_v18 = vmax.f32 %v579_v21, %v6227_v14  ;;  %v1827_v56 = vrot.slane %v1718_v34, 6  ;;  %v1301_v4 = vmax.f32 %v1092_v31, %v1169_v12 }
  0xb2   : > { %v301_v9 = vmul.f32 0.01, %v269_v32  ;;  %v302_v38 = vmul.f32 0.01, %v270_v6  ;;  %v485_v44 = vmax.f32 %v5733_v43, %v9044_v25  ;;  %v532_v16 = vmax.f32 %v484_v26, %v9046_v58 }
  0xb3   : > { %v6240_v1 = vmax.f32 %v5985_v27, %v6230_v40  ;;  %767 = vst.msk [vmem:[#allocation3 + $0x108] sm:$0xff] %vm343_vm0, %v6230_v40  ;;  %v6250_v21 = vmax.f32 %v5992_v19, %v6236_v18  ;;  %v1828_v2 = vsel %vm1795_vm6, %v1826_v28, %v1827_v56  ;;  %768 = vst.msk [vmem:[#allocation3 + $0x110] sm:$0xff] %vm343_vm0, %v6236_v18  ;;  %v961_v48 = vrot.slane %v811_v5, 1  ;;  %v814_v28 = vld [vmem:[#allocation3 + $0xf8] sm:$0x3f] }
  0xb4   : > { %v1510_v39 = vmax.f32 %v1301_v4, %v1378_v63  ;;  %4716 = vrot.lane.b32.xlu0 %v1828_v2, %s5326_s6  ;;  %v6260_v61 = vmax.f32 %v269_v32, %v301_v9  ;;  %v6262_v52 = vmax.f32 %v270_v6, %v302_v38  ;;  %v533_v55 = vmax.f32 %v485_v44, %v9047_v45 }
  0xb5   : > { %9049 = vst [vmem:[#allocation28_spill] sm:$0xff] %v6240_v1  ;;  %9050 = vst [vmem:[#allocation33_spill] sm:$0xff] %v6250_v21  ;;  %v962_v11 = vrot.slane %v812_v22, 1  ;;  %v964_v43 = vrot.slane %v6246_v24, 1  ;;  %v580_v25 = vmax.f32 %v532_v16, %v6223_v37  ;;  %v1170_v29 = vrot.slane %v811_v5, 2 }
  0xb6   : > { %1888 = vst.msk [vmem:[#allocation3 + $0xc8] sm:$0xff] %vm343_vm0, %v6240_v1  ;;  %9051 = vst [vmem:[#allocation34_spill] sm:$0xff] %v6260_v61  ;;  %v1719_v10 = vmax.f32 %v1510_v39, %v1587_v17  ;;  %v1171_v12 = vrot.slane %v812_v22, 2  ;;  %v1173_v54 = vrot.slane %v6246_v24, 2  ;;  %v581_v15 = vmax.f32 %v533_v55, %v6227_v14 }
  0xb7   : > { %9052 = vst [vmem:[#allocation43_spill] sm:$0xff] %v6262_v52  ;;  %1889 = vst.msk [vmem:[#allocation3 + $0xd0] sm:$0xff] %vm343_vm0, %v6250_v21  ;;  %v963_v34 = vsel %vm911_vm2, %v961_v48, %v962_v11  ;;  %v965_v31 = vsel %vm911_vm2, %v962_v11, %v964_v43  ;;  %v1379_v9 = vrot.slane %v811_v5, 3  ;;  %v1380_v38 = vrot.slane %v812_v22, 3 }
  0xb8   : > { %392 = vst.msk [vmem:[#allocation2 + $0x110] sm:$0xff] %vm343_vm0, %v6260_v61  ;;  %393 = vst.msk [vmem:[#allocation2 + $0x118] sm:$0xff] %vm343_vm0, %v6262_v52  ;;  %v1829_v36 = vrot.slane %v1719_v10, 6  ;;  %v1093_v63 = vmax.f32 %v811_v5, %v963_v34  ;;  %v1094_v17 = vmax.f32 %v812_v22, %v965_v31  ;;  %v1172_v32 = vsel %vm1120_vm3, %v1170_v29, %v1171_v12  ;;  %v196_v61 = vld [vmem:[%s5468_s30 + $0xd8] sm:$0xff] }
  0xb9   : > { %v1174_v6 = vsel %vm1120_vm3, %v1171_v12, %v1173_v54  ;;  %v1382_v26 = vrot.slane %v6246_v24, 3  ;;  %v1588_v44 = vrot.slane %v811_v5, 4  ;;  %v1589_v16 = vrot.slane %v812_v22, 4 }
  0xba   : > { %v1830_v4 = vsel %vm1795_vm6, %v1827_v56, %v1829_v36  ;;  %v1302_v2 = vmax.f32 %v1093_v63, %v1172_v32  ;;  %v1303_v39 = vmax.f32 %v1094_v17, %v1174_v6  ;;  %v1381_v48 = vsel %vm1329_vm4, %v1379_v9, %v1380_v38 }
  0xbb   : > { %4718 = vrot.lane.b32.xlu1 %v1830_v4, %s5326_s6  ;;  %v1383_v10 = vsel %vm1329_vm4, %v1380_v38, %v1382_v26  ;;  %v1591_v55 = vrot.slane %v6246_v24, 4  ;;  %v966_v11 = vrot.slane %v814_v28, 1  ;;  %v1590_v12 = vsel %vm1538_vm5, %v1588_v44, %v1589_v16  ;;  %v193_v38 = vld [vmem:[%s5468_s30 + $0xc0] sm:$0xff] }
  0xbc   : > { %v1511_v56 = vmax.f32 %v1302_v2, %v1381_v48  ;;  %v1512_v29 = vmax.f32 %v1303_v39, %v1383_v10  ;;  %v1175_v36 = vrot.slane %v814_v28, 2  ;;  %v1384_v63 = vrot.slane %v814_v28, 3  ;;  %v194_v2 = vld [vmem:[%s5468_s30 + $0xc8] sm:$0xff]  ;;  %v6305_v48 = vld [vmem:[#allocation3 + $0x100] sm:$0xff] }
  0xbd   : > { %v1592_v5 = vsel %vm1538_vm5, %v1589_v16, %v1591_v55  ;;  %v967_v22 = vsel %vm911_vm2, %v964_v43, %v966_v11  ;;  %v1593_v17 = vrot.slane %v814_v28, 4  ;;  %v6307_v28 = vld [vmem:[#allocation3 + $0x108] sm:$0xff]  ;;  %v5249_v11 = vld [vmem:[#allocation2 + $0xe0] sm:$0xff] }
  0xbe   : > { %v1720_v4 = vmax.f32 %v1511_v56, %v1590_v12  ;;  %v1721_v9 = vmax.f32 %v1512_v29, %v1592_v5  ;;  %v1095_v39 = vmax.f32 %v6246_v24, %v967_v22  ;;  %v1176_v44 = vsel %vm1120_vm3, %v1173_v54, %v1175_v36  ;;  %v6324_v29 = vld [vmem:[#allocation3 + $0x110] sm:$0xff]  ;;  %v5250_v36 = vld [vmem:[#allocation2 + $0xe8] sm:$0xff] }
  0xbf   : > { %v6287_v34 = vld [vmem:[#allocation2 + $0x110] sm:$0xff]  ;;  %v6289_v31 = vld [vmem:[#allocation2 + $0x118] sm:$0xff]  ;;  %v1385_v16 = vsel %vm1329_vm4, %v1382_v26, %v1384_v63  ;;  %v1594_v43 = vsel %vm1538_vm5, %v1591_v55, %v1593_v17  ;;  %v232_v26 = vmul.f32 %v6171_v8, %v193_v38  ;;  %v233_v55 = vmul.f32 %v6171_v8, %v194_v2 }
  0xc0   : > { %v6294_v32 = vmax.f32 %v580_v25, %v6287_v34  ;;  %v6297_v6 = vmax.f32 %v581_v15, %v6289_v31  ;;  %v1831_v10 = vrot.slane %v1720_v4, 6  ;;  %v1832_v24 = vrot.slane %v1721_v9, 6 }
  0xc1   : > { %v1304_v54 = vmax.f32 %v1095_v39, %v1176_v44  ;;  %v486_v56 = vmax.f32 %v5249_v11, %v9046_v58  ;;  %v487_v5 = vmax.f32 %v5250_v36, %v9047_v45  ;;  %v968_v22 = vrot.slane %v6305_v48, 1 }
  0xc2   : > { %v6311_v25 = vmax.f32 %v6060_v59, %v6294_v32  ;;  %v6315_v15 = vmax.f32 %v6065_v51, %v6297_v6  ;;  %769 = vst.msk [vmem:[#allocation3 + $0x128] sm:$0xff] %vm343_vm0, %v6294_v32  ;;  %770 = vst.msk [vmem:[#allocation3 + $0x130] sm:$0xff] %vm343_vm0, %v6297_v6  ;;  %v1833_v12 = vsel %vm1795_vm6, %v1831_v10, %v1832_v24  ;;  %v969_v63 = vrot.slane %v6307_v28, 1 }
  0xc3   : > { %4720 = vrot.lane.b32.xlu0 %v1833_v12, %s5326_s6  ;;  %v1513_v58 = vmax.f32 %v1304_v54, %v1385_v16  ;;  %v271_v17 = vadd.f32 %v6179_v53, %v232_v26  ;;  %v272_v4 = vadd.f32 %v6179_v53, %v233_v55  ;;  %v6338_v9 = vmax.f32 %v486_v56, %v6223_v37 }
  0xc4   : > { %9053 = vst [vmem:[#allocation44_spill] sm:$0xff] %v6311_v25  ;;  %9054 = vst [vmem:[#allocation45_spill] sm:$0xff] %v6315_v15  ;;  %v6341_v38 = vmax.f32 %v487_v5, %v6227_v14  ;;  %v970_v2 = vsel %vm911_vm2, %v968_v22, %v969_v63  ;;  %v971_v45 = vrot.slane %v6324_v29, 1  ;;  %v1177_v39 = vrot.slane %v6305_v48, 2 }
  0xc5   : > { %1890 = vst.msk [vmem:[#allocation3 + $0xe8] sm:$0xff] %vm343_vm0, %v6311_v25  ;;  %1891 = vst.msk [vmem:[#allocation3 + $0xf0] sm:$0xff] %vm343_vm0, %v6315_v15  ;;  %v1722_v44 = vmax.f32 %v1513_v58, %v1594_v43  ;;  %v303_v10 = vmul.f32 0.01, %v271_v17  ;;  %v304_v11 = vmul.f32 0.01, %v272_v4  ;;  %v582_v16 = vmax.f32 %v6338_v9, %v6287_v34 }
  0xc6   : > { %v583_v54 = vmax.f32 %v6341_v38, %v6289_v31  ;;  %v972_v26 = vsel %vm911_vm2, %v969_v63, %v971_v45  ;;  %v1096_v55 = vmax.f32 %v6305_v48, %v970_v2  ;;  %v1178_v56 = vrot.slane %v6307_v28, 2  ;;  %v818_v63 = vld [vmem:[#allocation3 + $0x118] sm:$0x3f] }
  0xc7   : > { %v1834_v12 = vrot.slane %v1722_v44, 6  ;;  %v6353_v36 = vmax.f32 %v271_v17, %v303_v10  ;;  %v6355_v5 = vmax.f32 %v272_v4, %v304_v11  ;;  %v1097_v43 = vmax.f32 %v6307_v28, %v972_v26 }
  0xc8   : > { %v1179_v22 = vsel %vm1120_vm3, %v1177_v39, %v1178_v56  ;;  %v1180_v58 = vrot.slane %v6324_v29, 2  ;;  %v1386_v9 = vrot.slane %v6305_v48, 3  ;;  %v1387_v38 = vrot.slane %v6307_v28, 3 }
  0xc9   : > { %9055 = vst [vmem:[#allocation46_spill] sm:$0xff] %v6353_v36  ;;  %9056 = vst [vmem:[#allocation47_spill] sm:$0xff] %v6355_v5  ;;  %v1835_v2 = vsel %vm1795_vm6, %v1832_v24, %v1834_v12  ;;  %v1305_v17 = vmax.f32 %v1096_v55, %v1179_v22  ;;  %v1389_v4 = vrot.slane %v6324_v29, 3  ;;  %v1595_v39 = vrot.slane %v6305_v48, 4  ;;  %v195_v22 = vld [vmem:[%s5468_s30 + $0xd0] sm:$0xff] }
  0xca   : > { %394 = vst.msk [vmem:[#allocation2 + $0x120] sm:$0xff] %vm343_vm0, %v6353_v36  ;;  %395 = vst.msk [vmem:[#allocation2 + $0x128] sm:$0xff] %vm343_vm0, %v6355_v5  ;;  %4722 = vrot.lane.b32.xlu1 %v1835_v2, %s5326_s6  ;;  %v1181_v44 = vsel %vm1120_vm3, %v1178_v56, %v1180_v58  ;;  %v1388_v10 = vsel %vm1329_vm4, %v1386_v9, %v1387_v38  ;;  %v1596_v24 = vrot.slane %v6307_v28, 4  ;;  %v1598_v11 = vrot.slane %v6324_v29, 4  ;;  %v6379_v56 = vld [vmem:[#allocation3 + $0x48] sm:$0xff]  ;;  %v6381_v9 = vld [vmem:[#allocation3 + $0x50] sm:$0xff] }
  0xcb   : > { %v1306_v26 = vmax.f32 %v1097_v43, %v1181_v44  ;;  %v1390_v12 = vsel %vm1329_vm4, %v1387_v38, %v1389_v4  ;;  %v1514_v5 = vmax.f32 %v1305_v17, %v1388_v10  ;;  %v973_v55 = vrot.slane %v818_v63, 1  ;;  %v9057_v38 = vld [vmem:[#allocation32_spill] sm:$0xff] }
  0xcc   : > { %v1597_v36 = vsel %vm1538_vm5, %v1595_v39, %v1596_v24  ;;  %v1599_v48 = vsel %vm1538_vm5, %v1596_v24, %v1598_v11  ;;  %v1182_v52 = vrot.slane %v818_v63, 2  ;;  %v1391_v2 = vrot.slane %v818_v63, 3  ;;  %v9059_v39 = vld [vmem:[#allocation29_spill] sm:$0xff] }
  0xcd   : > { %v1515_v28 = vmax.f32 %v1306_v26, %v1390_v12  ;;  %v1723_v50 = vmax.f32 %v1514_v5, %v1597_v36  ;;  %v974_v43 = vsel %vm911_vm2, %v971_v45, %v973_v55  ;;  %v1600_v44 = vrot.slane %v818_v63, 4 }
  0xce   : > { %v9058_v17 = vmax.f32 %v9057_v38, %v5760_v60  ;;  %v9060_v10 = vmax.f32 %v9059_v39, %v5763_v0  ;;  %v1098_v24 = vmax.f32 %v6324_v29, %v974_v43  ;;  %v1183_v57 = vsel %vm1120_vm3, %v1180_v58, %v1182_v52  ;;  %v5251_v29 = vld [vmem:[#allocation2 + $0xf0] sm:$0xff]  ;;  %v5252_v58 = vld [vmem:[#allocation2 + $0xf8] sm:$0xff]  ;;  %v819_v43 = vld [vmem:[#allocation3 + $0x120] sm:$0xff] }
  0xcf   : > { %v1392_v26 = vsel %vm1329_vm4, %v1389_v4, %v1391_v2  ;;  %v234_v36 = vmul.f32 %v6171_v8, %v195_v22  ;;  %v1724_v45 = vmax.f32 %v1515_v28, %v1599_v48  ;;  %v1836_v5 = vrot.slane %v1723_v50, 6 }
  0xd0   : > { %3176 = vst.msk [vmem:[#allocation3 + $0x48] sm:$0xff] %vm343_vm0, %v9058_v17  ;;  %3177 = vst.msk [vmem:[#allocation3 + $0x50] sm:$0xff] %vm343_vm0, %v9060_v10  ;;  %v1601_v63 = vsel %vm1538_vm5, %v1598_v11, %v1600_v44  ;;  %v235_v12 = vmul.f32 %v6171_v8, %v196_v61  ;;  %v1307_v17 = vmax.f32 %v1098_v24, %v1183_v57  ;;  %v820_v44 = vld [vmem:[#allocation3 + $0x128] sm:$0xff]  ;;  %v6418_v10 = vld [vmem:[#allocation3 + $0x130] sm:$0xff] }
  0xd1   : > { %v6398_v55 = vld [vmem:[#allocation2 + $0x120] sm:$0xff]  ;;  %v6400_v38 = vld [vmem:[#allocation2 + $0x128] sm:$0xff]  ;;  %v273_v39 = vadd.f32 %v6179_v53, %v234_v36  ;;  %v488_v52 = vmax.f32 %v5251_v29, %v6223_v37  ;;  %v489_v4 = vmax.f32 %v5252_v58, %v6227_v14  ;;  %v1837_v61 = vrot.slane %v1724_v45, 6 }
  0xd2   : > { %v6406_v22 = vmax.f32 %v582_v16, %v6398_v55  ;;  %v6409_v50 = vmax.f32 %v583_v54, %v6400_v38  ;;  %v274_v11 = vadd.f32 %v6179_v53, %v235_v12  ;;  %v1516_v48 = vmax.f32 %v1307_v17, %v1392_v26 }
  0xd3   : > { %v305_v2 = vmul.f32 0.01, %v273_v39  ;;  %v6413_v57 = vmax.f32 %v488_v52, %v6287_v34  ;;  %v6416_v28 = vmax.f32 %v489_v4, %v6289_v31  ;;  %v1838_v24 = vsel %vm1795_vm6, %v1836_v5, %v1837_v61 }
  0xd4   : > { %v6422_v16 = vmax.f32 %v5760_v60, %v6406_v22  ;;  %v6426_v54 = vmax.f32 %v5763_v0, %v6409_v50  ;;  %771 = vst.msk [vmem:[#allocation3 + $0x148] sm:$0xff] %vm343_vm0, %v6406_v22  ;;  %772 = vst.msk [vmem:[#allocation3 + $0x150] sm:$0xff] %vm343_vm0, %v6409_v50  ;;  %v306_v26 = vmul.f32 0.01, %v274_v11  ;;  %4724 = vrot.lane.b32.xlu0 %v1838_v24, %s5326_s6  ;;  %v975_v12 = vrot.slane %v819_v43, 1 }
  0xd5   : > { %v1725_v36 = vmax.f32 %v1516_v48, %v1601_v63  ;;  %v6434_v45 = vmax.f32 %v273_v39, %v305_v2  ;;  %v584_v60 = vmax.f32 %v6413_v57, %v6398_v55  ;;  %v585_v0 = vmax.f32 %v6416_v28, %v6400_v38 }
  0xd6   : > { %9061 = vst [vmem:[#allocation32_spill] sm:$0xff] %v6422_v16  ;;  %9062 = vst [vmem:[#allocation29_spill] sm:$0xff] %v6426_v54  ;;  %v6444_v5 = vmax.f32 %v274_v11, %v306_v26  ;;  %v976_v17 = vrot.slane %v820_v44, 1  ;;  %v978_v63 = vrot.slane %v6418_v10, 1  ;;  %v1184_v29 = vrot.slane %v819_v43, 2 }
  0xd7   : > { %9063 = vst [vmem:[#allocation48_spill] sm:$0xff] %v6434_v45  ;;  %1892 = vst.msk [vmem:[#allocation3 + $0x108] sm:$0xff] %vm343_vm0, %v6422_v16  ;;  %v1839_v39 = vrot.slane %v1725_v36, 6  ;;  %v1185_v52 = vrot.slane %v820_v44, 2  ;;  %v1187_v58 = vrot.slane %v6418_v10, 2  ;;  %v1393_v48 = vrot.slane %v819_v43, 3 }
  0xd8   : > { %1893 = vst.msk [vmem:[#allocation3 + $0x110] sm:$0xff] %vm343_vm0, %v6426_v54  ;;  %9064 = vst [vmem:[#allocation49_spill] sm:$0xff] %v6444_v5  ;;  %v977_v4 = vsel %vm911_vm2, %v975_v12, %v976_v17  ;;  %v979_v11 = vsel %vm911_vm2, %v976_v17, %v978_v63  ;;  %v1394_v2 = vrot.slane %v820_v44, 3  ;;  %v822_v36 = vld [vmem:[#allocation3 + $0x138] sm:$0x3f]  ;;  %v6458_v54 = vld [vmem:[#allocation3 + $0x70] sm:$0xff] }
  0xd9   : > { %396 = vst.msk [vmem:[#allocation2 + $0x130] sm:$0xff] %vm343_vm0, %v6434_v45  ;;  %397 = vst.msk [vmem:[#allocation2 + $0x138] sm:$0xff] %vm343_vm0, %v6444_v5  ;;  %v1840_v57 = vsel %vm1795_vm6, %v1837_v61, %v1839_v39  ;;  %v1099_v28 = vmax.f32 %v819_v43, %v977_v4  ;;  %v1100_v24 = vmax.f32 %v820_v44, %v979_v11  ;;  %v6456_v45 = vld [vmem:[#allocation3 + $0x68] sm:$0xff]  ;;  %v1396_v17 = vrot.slane %v6418_v10, 3  ;;  %v9065_v61 = vld [vmem:[#allocation39_spill] sm:$0xff] }
  0xda   : > { %v1186_v26 = vsel %vm1120_vm3, %v1184_v29, %v1185_v52  ;;  %4726 = vrot.lane.b32.xlu1 %v1840_v57, %s5326_s6  ;;  %v1188_v5 = vsel %vm1120_vm3, %v1185_v52, %v1187_v58  ;;  %v1395_v12 = vsel %vm1329_vm4, %v1393_v48, %v1394_v2  ;;  %v1602_v16 = vrot.slane %v819_v43, 4  ;;  %v9067_v29 = vld [vmem:[#allocation40_spill] sm:$0xff] }
  0xdb   : > { %v9066_v39 = vmax.f32 %v9065_v61, %v5891_v62  ;;  %v9068_v4 = vmax.f32 %v9067_v29, %v9040_v13  ;;  %v1308_v11 = vmax.f32 %v1099_v28, %v1186_v26  ;;  %v1309_v57 = vmax.f32 %v1100_v24, %v1188_v5  ;;  %v198_v29 = vld [vmem:[%s5468_s30 + $0xe8] sm:$0xff] }
  0xdc   : > { %v1603_v52 = vrot.slane %v820_v44, 4  ;;  %v1605_v48 = vrot.slane %v6418_v10, 4  ;;  %v1397_v15 = vsel %vm1329_vm4, %v1394_v2, %v1396_v17  ;;  %v980_v25 = vrot.slane %v822_v36, 1 }
  0xdd   : > { %3178 = vst.msk [vmem:[#allocation3 + $0x68] sm:$0xff] %vm343_vm0, %v9066_v39  ;;  %3179 = vst.msk [vmem:[#allocation3 + $0x70] sm:$0xff] %vm343_vm0, %v9068_v4  ;;  %v1189_v43 = vrot.slane %v822_v36, 2  ;;  %v1398_v21 = vrot.slane %v822_v36, 3  ;;  %v1517_v1 = vmax.f32 %v1308_v11, %v1395_v12  ;;  %v1518_v61 = vmax.f32 %v1309_v57, %v1397_v15 }
  0xde   : > { %v1604_v47 = vsel %vm1538_vm5, %v1602_v16, %v1603_v52  ;;  %v1606_v39 = vsel %vm1538_vm5, %v1603_v52, %v1605_v48  ;;  %v981_v5 = vsel %vm911_vm2, %v978_v63, %v980_v25  ;;  %v1607_v2 = vrot.slane %v822_v36, 4 }
  0xdf   : > { %v1190_v44 = vsel %vm1120_vm3, %v1187_v58, %v1189_v43  ;;  %v1399_v28 = vsel %vm1329_vm4, %v1396_v17, %v1398_v21  ;;  %v1726_v15 = vmax.f32 %v1517_v1, %v1604_v47  ;;  %v1727_v16 = vmax.f32 %v1518_v61, %v1606_v39  ;;  %v823_v21 = vld [vmem:[#allocation3 + $0x140] sm:$0xff]  ;;  %v824_v1 = vld [vmem:[#allocation3 + $0x148] sm:$0xff]  ;;  %v6511_v17 = vld [vmem:[#allocation3 + $0x150] sm:$0xff] }
  0xe0   : > { %v6478_v33 = vld [vmem:[#allocation2 + $0x130] sm:$0xff]  ;;  %v6483_v24 = vld [vmem:[#allocation2 + $0x138] sm:$0xff]  ;;  %v1101_v12 = vmax.f32 %v6418_v10, %v981_v5  ;;  %v1608_v11 = vsel %vm1538_vm5, %v1605_v48, %v1607_v2  ;;  %v236_v25 = vmul.f32 %v6171_v8, %v197_v46  ;;  %v237_v63 = vmul.f32 %v6171_v8, %v198_v29 }
  0xe1   : > { %v6486_v26 = vmax.f32 %v584_v60, %v6478_v33  ;;  %v6490_v4 = vmax.f32 %v585_v0, %v6483_v24  ;;  %v1841_v60 = vrot.slane %v1726_v15, 6  ;;  %v1842_v36 = vrot.slane %v1727_v16, 6 }
  0xe2   : > { %v1310_v47 = vmax.f32 %v1101_v12, %v1190_v44  ;;  %v275_v46 = vadd.f32 %v6179_v53, %v236_v25  ;;  %v276_v0 = vadd.f32 %v6179_v53, %v237_v63  ;;  %v982_v48 = vrot.slane %v823_v21, 1 }
  0xe3   : > { %v6497_v58 = vmax.f32 %v5891_v62, %v6486_v26  ;;  %773 = vst.msk [vmem:[#allocation3 + $0x168] sm:$0xff] %vm343_vm0, %v6486_v26  ;;  %v6503_v10 = vmax.f32 %v9040_v13, %v6490_v4  ;;  %774 = vst.msk [vmem:[#allocation3 + $0x170] sm:$0xff] %vm343_vm0, %v6490_v4  ;;  %v490_v62 = vmax.f32 %v6223_v37, %v6287_v34  ;;  %v983_v39 = vrot.slane %v824_v1, 1 }
  0xe4   : > { %v1843_v57 = vsel %vm1795_vm6, %v1841_v60, %v1842_v36  ;;  %v1519_v52 = vmax.f32 %v1310_v47, %v1399_v28  ;;  %v491_v13 = vmax.f32 %v6227_v14, %v6289_v31  ;;  %v307_v43 = vmul.f32 0.01, %v275_v46 }
  0xe5   : > { %9069 = vst [vmem:[#allocation39_spill] sm:$0xff] %v6497_v58  ;;  %9070 = vst [vmem:[#allocation40_spill] sm:$0xff] %v6503_v10  ;;  %4728 = vrot.lane.b32.xlu0 %v1843_v57, %s5326_s6  ;;  %v308_v61 = vmul.f32 0.01, %v276_v0  ;;  %v538_v37 = vmax.f32 %v490_v62, %v6398_v55  ;;  %v985_v44 = vrot.slane %v6511_v17, 1  ;;  %v1191_v28 = vrot.slane %v823_v21, 2 }
  0xe6   : > { %1894 = vst.msk [vmem:[#allocation3 + $0x128] sm:$0xff] %vm343_vm0, %v6497_v58  ;;  %1895 = vst.msk [vmem:[#allocation3 + $0x130] sm:$0xff] %vm343_vm0, %v6503_v10  ;;  %v1728_v29 = vmax.f32 %v1519_v52, %v1608_v11  ;;  %v539_v5 = vmax.f32 %v491_v13, %v6400_v38  ;;  %v6524_v2 = vmax.f32 %v275_v46, %v307_v43  ;;  %v1192_v47 = vrot.slane %v824_v1, 2 }
  0xe7   : > { %v6526_v14 = vmax.f32 %v276_v0, %v308_v61  ;;  %v586_v15 = vmax.f32 %v538_v37, %v6478_v33  ;;  %v984_v16 = vsel %vm911_vm2, %v982_v48, %v983_v39  ;;  %v986_v63 = vsel %vm911_vm2, %v983_v39, %v985_v44  ;;  %v826_v48 = vld [vmem:[#allocation3 + $0x158] sm:$0x3f] }
  0xe8   : > { %9071 = vst [vmem:[#allocation50_spill] sm:$0xff] %v6524_v2  ;;  %v1844_v12 = vrot.slane %v1728_v29, 6  ;;  %v587_v25 = vmax.f32 %v539_v5, %v6483_v24  ;;  %v1102_v60 = vmax.f32 %v823_v21, %v984_v16  ;;  %398 = vst.msk [vmem:[#allocation2 + $0x140] sm:$0xff] %vm343_vm0, %v6524_v2  ;;  %v1103_v11 = vmax.f32 %v824_v1, %v986_v63  ;;  %v200_v63 = vld [vmem:[%s5468_s30 + $0xf8] sm:$0xff] }
  0xe9   : > { %9072 = vst [vmem:[#allocation51_spill] sm:$0xff] %v6526_v14  ;;  %399 = vst.msk [vmem:[#allocation2 + $0x148] sm:$0xff] %vm343_vm0, %v6526_v14  ;;  %v1194_v46 = vrot.slane %v6511_v17, 2  ;;  %v1400_v0 = vrot.slane %v823_v21, 3  ;;  %v1401_v57 = vrot.slane %v824_v1, 3  ;;  %v1403_v52 = vrot.slane %v6511_v17, 3 }
  0xea   : > { %v1845_v62 = vsel %vm1795_vm6, %v1842_v36, %v1844_v12  ;;  %v1609_v13 = vrot.slane %v823_v21, 4  ;;  %v1193_v43 = vsel %vm1120_vm3, %v1191_v28, %v1192_v47  ;;  %v1610_v37 = vrot.slane %v824_v1, 4  ;;  %v199_v12 = vld [vmem:[%s5468_s30 + $0xf0] sm:$0xff]  ;;  %s5261_s30 = scalar_lea.vmem %s8848_s26, 4096 }
  0xeb   : > { %4730 = vrot.lane.b32.xlu1 %v1845_v62, %s5326_s6  ;;  %v1195_v61 = vsel %vm1120_vm3, %v1192_v47, %v1194_v46  ;;  %v1612_v39 = vrot.slane %v6511_v17, 4  ;;  %v1311_v29 = vmax.f32 %v1102_v60, %v1193_v43  ;;  %v1402_v16 = vsel %vm1329_vm4, %v1400_v0, %v1401_v57  ;;  %p5262_p11 = scmp.ne.s32.totalorder %s8848_s26, %s5261_s30  ;;  %p5269_p1 = scmp.lt.s32.totalorder %s5267_s7, %s5261_s30 }
  0xec   : > { %v1312_v5 = vmax.f32 %v1103_v11, %v1195_v61  ;;  %v1404_v36 = vsel %vm1329_vm4, %v1401_v57, %v1403_v52  ;;  %v1611_v21 = vsel %vm1538_vm5, %v1609_v13, %v1610_v37  ;;  %v987_v62 = vrot.slane %v826_v48, 1 }
  0xed   : > { %v1613_v14 = vsel %vm1538_vm5, %v1610_v37, %v1612_v39  ;;  %v1196_v2 = vrot.slane %v826_v48, 2  ;;  %v1520_v28 = vmax.f32 %v1311_v29, %v1402_v16  ;;  %v1405_v47 = vrot.slane %v826_v48, 3  ;;  %p5263_p12 = pnand %p5262_p11, %p5389_p5  ;;  %p5270_p2 = por %p5269_p1, %p5268_p0 }
  0xee   : > { %v1521_v10 = vmax.f32 %v1312_v5, %v1404_v36  ;;  %v1614_v1 = vrot.slane %v826_v48, 4  ;;  %v988_v58 = vsel %vm911_vm2, %v985_v44, %v987_v62  ;;  %v238_v11 = vmul.f32 %v6171_v8, %v199_v12 }
  0xef   : > { %v1197_v60 = vsel %vm1120_vm3, %v1194_v46, %v1196_v2  ;;  %v239_v0 = vmul.f32 %v6171_v8, %v200_v63  ;;  %v6553_v57 = vld [vmem:[#allocation2 + $0x140] sm:$0xff]  ;;  %v1729_v13 = vmax.f32 %v1520_v28, %v1611_v21  ;;  %v1104_v37 = vmax.f32 %v6511_v17, %v988_v58  ;;  %p5264_p13 = pneg %p5263_p12 }
  0xf0   : > { %v6555_v43 = vld [vmem:[#allocation2 + $0x148] sm:$0xff]  ;;  %v1730_v61 = vmax.f32 %v1521_v10, %v1613_v14  ;;  %v1406_v29 = vsel %vm1329_vm4, %v1403_v52, %v1405_v47  ;;  %v6560_v48 = vmax.f32 %v586_v15, %v6553_v57  ;;  %v1615_v2 = vsel %vm1538_vm5, %v1612_v39, %v1614_v1  ;;  %v827_v10 = vld [vmem:[#allocation3 + $0x160] sm:$0xff] }
  0xf1   : > { %v6563_v44 = vmax.f32 %v587_v25, %v6555_v43  ;;  %v277_v8 = vadd.f32 %v6179_v53, %v238_v11  ;;  %v1846_v46 = vrot.slane %v1729_v13, 6  ;;  %v1313_v16 = vmax.f32 %v1104_v37, %v1197_v60  ;;  %v828_v14 = vld [vmem:[#allocation3 + $0x168] sm:$0xff]  ;;  %v6582_v25 = vld [vmem:[#allocation3 + $0x170] sm:$0xff]  ;;  %p5271_p3 = pnand %p5270_p2, %p5264_p13 }
  0xf2   : > { %v1847_v5 = vrot.slane %v1730_v61, 6  ;;  %v278_v36 = vadd.f32 %v6179_v53, %v239_v0  ;;  %v6570_v58 = vmax.f32 %v6230_v40, %v6560_v48  ;;  %775 = vst.msk [vmem:[#allocation3 + $0x188] sm:$0xff] %vm343_vm0, %v6560_v48  ;;  %v492_v53 = vmax.f32 %v6287_v34, %v6398_v55 }
  0xf3   : > { %v6574_v17 = vmax.f32 %v6236_v18, %v6563_v44  ;;  %776 = vst.msk [vmem:[#allocation3 + $0x190] sm:$0xff] %vm343_vm0, %v6563_v44  ;;  %v309_v15 = vmul.f32 0.01, %v277_v8  ;;  %v1522_v39 = vmax.f32 %v1313_v16, %v1406_v29  ;;  %v493_v63 = vmax.f32 %v6289_v31, %v6400_v38 }
  0xf4   : > { %9073 = vst [vmem:[#allocation52_spill] sm:$0xff] %v6570_v58  ;;  %v1848_v52 = vsel %vm1795_vm6, %v1846_v46, %v1847_v5  ;;  %v310_v12 = vmul.f32 0.01, %v278_v36  ;;  %1896 = vst.msk [vmem:[#allocation3 + $0x148] sm:$0xff] %vm343_vm0, %v6570_v58  ;;  %v540_v34 = vmax.f32 %v492_v53, %v6478_v33  ;;  %v989_v62 = vrot.slane %v827_v10, 1 }
  0xf5   : > { %9074 = vst [vmem:[#allocation53_spill] sm:$0xff] %v6574_v17  ;;  %1897 = vst.msk [vmem:[#allocation3 + $0x150] sm:$0xff] %vm343_vm0, %v6574_v17  ;;  %4732 = vrot.lane.b32.xlu0 %v1848_v52, %s5326_s6  ;;  %v6592_v21 = vmax.f32 %v277_v8, %v309_v15  ;;  %v990_v28 = vrot.slane %v828_v14, 1  ;;  %v1731_v47 = vmax.f32 %v1522_v39, %v1615_v2  ;;  %v992_v31 = vrot.slane %v6582_v25, 1  ;;  %v830_v53 = vld [vmem:[#allocation3 + $0x178] sm:$0x3f] }
  0xf6   : > { %v6595_v1 = vmax.f32 %v278_v36, %v310_v12  ;;  %v541_v60 = vmax.f32 %v493_v63, %v6483_v24  ;;  %v588_v11 = vmax.f32 %v540_v34, %v6553_v57  ;;  %v1198_v13 = vrot.slane %v827_v10, 2 }
  0xf7   : > { %9075 = vst [vmem:[#allocation54_spill] sm:$0xff] %v6592_v21  ;;  %400 = vst.msk [vmem:[#allocation2 + $0x150] sm:$0xff] %vm343_vm0, %v6592_v21  ;;  %v991_v0 = vsel %vm911_vm2, %v989_v62, %v990_v28  ;;  %v1199_v61 = vrot.slane %v828_v14, 2  ;;  %v1849_v37 = vrot.slane %v1731_v47, 6  ;;  %v993_v2 = vsel %vm911_vm2, %v990_v28, %v992_v31 }
  0xf8   : > { %9076 = vst [vmem:[#allocation55_spill] sm:$0xff] %v6595_v1  ;;  %401 = vst.msk [vmem:[#allocation2 + $0x158] sm:$0xff] %vm343_vm0, %v6595_v1  ;;  %v589_v29 = vmax.f32 %v541_v60, %v6555_v43  ;;  %v1105_v8 = vmax.f32 %v827_v10, %v991_v0  ;;  %v1106_v46 = vmax.f32 %v828_v14, %v993_v2  ;;  %v1201_v36 = vrot.slane %v6582_v25, 2 }
  0xf9   : > { %v1200_v16 = vsel %vm1120_vm3, %v1198_v13, %v1199_v61  ;;  %v1407_v15 = vrot.slane %v827_v10, 3  ;;  %v1850_v52 = vsel %vm1795_vm6, %v1847_v5, %v1849_v37  ;;  %v1408_v12 = vrot.slane %v828_v14, 3 }
  0xfa   : > { %v1314_v39 = vmax.f32 %v1105_v8, %v1200_v16  ;;  %v1410_v63 = vrot.slane %v6582_v25, 3  ;;  %4734 = vrot.lane.b32.xlu1 %v1850_v52, %s5326_s6  ;;  %v1202_v34 = vsel %vm1120_vm3, %v1199_v61, %v1201_v36  ;;  %v1616_v62 = vrot.slane %v827_v10, 4 }
  0xfb   : > { %v1617_v28 = vrot.slane %v828_v14, 4  ;;  %v1619_v47 = vrot.slane %v6582_v25, 4  ;;  %v1315_v60 = vmax.f32 %v1106_v46, %v1202_v34  ;;  %v1409_v0 = vsel %vm1329_vm4, %v1407_v15, %v1408_v12  ;;  %v6628_v34 = vld [vmem:[#allocation3 + $0x180] sm:$0xff] }
  0xfc   : > { %v1411_v13 = vsel %vm1329_vm4, %v1408_v12, %v1410_v63  ;;  %v994_v2 = vrot.slane %v830_v53, 1  ;;  %v1523_v1 = vmax.f32 %v1314_v39, %v1409_v0  ;;  %v1203_v8 = vrot.slane %v830_v53, 2  ;;  %v6637_v0 = vld [vmem:[#allocation3 + $0x190] sm:$0xff] }
  0xfd   : > { %v1618_v5 = vsel %vm1538_vm5, %v1616_v62, %v1617_v28  ;;  %v1620_v37 = vsel %vm1538_vm5, %v1617_v28, %v1619_v47  ;;  %v1524_v52 = vmax.f32 %v1315_v60, %v1411_v13  ;;  %v1412_v14 = vrot.slane %v830_v53, 3  ;;  %v6635_v60 = vld [vmem:[#allocation3 + $0x188] sm:$0xff] }
  0xfe   : > { %v6618_v16 = vld [vmem:[#allocation2 + $0x150] sm:$0xff]  ;;  %v995_v10 = vsel %vm911_vm2, %v992_v31, %v994_v2  ;;  %v1621_v61 = vrot.slane %v830_v53, 4  ;;  %v1732_v15 = vmax.f32 %v1523_v1, %v1618_v5  ;;  %v1204_v12 = vsel %vm1120_vm3, %v1201_v36, %v1203_v8 }
  0xff   : > { %v6621_v21 = vld [vmem:[#allocation2 + $0x158] sm:$0xff]  ;;  %v6624_v46 = vmax.f32 %v588_v11, %v6618_v16  ;;  %v1107_v39 = vmax.f32 %v6582_v25, %v995_v10  ;;  %v1733_v28 = vmax.f32 %v1524_v52, %v1620_v37  ;;  %v1413_v31 = vsel %vm1329_vm4, %v1410_v63, %v1412_v14  ;;  %v6664_v52 = vld [vmem:[#allocation2 + $0x160] sm:$0xff] }
 0x100   : > { %v6631_v62 = vmax.f32 %v589_v29, %v6621_v21  ;;  %v1622_v53 = vsel %vm1538_vm5, %v1619_v47, %v1621_v61  ;;  %v1851_v25 = vrot.slane %v1732_v15, 6  ;;  %v494_v29 = vmax.f32 %v6398_v55, %v6478_v33  ;;  %v6670_v15 = vld [vmem:[#allocation2 + $0x168] sm:$0xff] }
 0x101   : > { %v6641_v1 = vmax.f32 %v6294_v32, %v6624_v46  ;;  %777 = vst.msk [vmem:[#allocation3 + $0x1a8] sm:$0xff] %vm343_vm0, %v6624_v46  ;;  %v1316_v11 = vmax.f32 %v1107_v39, %v1204_v12  ;;  %v1852_v63 = vrot.slane %v1733_v28, 6  ;;  %v495_v47 = vmax.f32 %v6400_v38, %v6483_v24 }
 0x102   : > { %v6649_v36 = vmax.f32 %v6297_v6, %v6631_v62  ;;  %778 = vst.msk [vmem:[#allocation3 + $0x1b0] sm:$0xff] %vm343_vm0, %v6631_v62  ;;  %v996_v13 = vrot.slane %v6628_v34, 1  ;;  %v542_v5 = vmax.f32 %v494_v29, %v6553_v57  ;;  %v997_v55 = vrot.slane %v6635_v60, 1 }
 0x103   : > { %9077 = vst [vmem:[#allocation56_spill] sm:$0xff] %v6641_v1  ;;  %1898 = vst.msk [vmem:[#allocation3 + $0x168] sm:$0xff] %vm343_vm0, %v6641_v1  ;;  %v1525_v2 = vmax.f32 %v1316_v11, %v1413_v31  ;;  %v999_v37 = vrot.slane %v6637_v0, 1  ;;  %v1853_v8 = vsel %vm1795_vm6, %v1851_v25, %v1852_v63  ;;  %v543_v38 = vmax.f32 %v495_v47, %v6555_v43 }
 0x104   : > { %9078 = vst [vmem:[#allocation57_spill] sm:$0xff] %v6649_v36  ;;  %1899 = vst.msk [vmem:[#allocation3 + $0x170] sm:$0xff] %vm343_vm0, %v6649_v36  ;;  %v1205_v10 = vrot.slane %v6628_v34, 2  ;;  %v1206_v14 = vrot.slane %v6635_v60, 2  ;;  %4736 = vrot.lane.b32.xlu0 %v1853_v8, %s5326_s6  ;;  %v590_v39 = vmax.f32 %v542_v5, %v6618_v16  ;;  %v998_v12 = vsel %vm911_vm2, %v996_v13, %v997_v55 }
 0x105   : > { %v1734_v61 = vmax.f32 %v1525_v2, %v1622_v53  ;;  %v1000_v28 = vsel %vm911_vm2, %v997_v55, %v999_v37  ;;  %v591_v31 = vmax.f32 %v543_v38, %v6621_v21  ;;  %v1108_v25 = vmax.f32 %v6628_v34, %v998_v12  ;;  %v834_v12 = vld [vmem:[#allocation3 + $0x198] sm:$0x3f] }
 0x106   : > { %v1109_v11 = vmax.f32 %v6635_v60, %v1000_v28  ;;  %v1207_v29 = vsel %vm1120_vm3, %v1205_v10, %v1206_v14  ;;  %v6680_v8 = vmax.f32 %v590_v39, %v6664_v52  ;;  %v1208_v53 = vrot.slane %v6637_v0, 2 }
 0x107   : > { %v1854_v47 = vrot.slane %v1734_v61, 6  ;;  %v1414_v2 = vrot.slane %v6628_v34, 3  ;;  %v6685_v13 = vmax.f32 %v591_v31, %v6670_v15  ;;  %v1317_v5 = vmax.f32 %v1108_v25, %v1207_v29 }
 0x108   : > { %9079 = vst [vmem:[#allocation58_spill] sm:$0xff] %v6680_v8  ;;  %v1415_v55 = vrot.slane %v6635_v60, 3  ;;  %v1417_v38 = vrot.slane %v6637_v0, 3  ;;  %v6692_v10 = vmax.f32 %v6406_v22, %v6680_v8  ;;  %v1209_v61 = vsel %vm1120_vm3, %v1206_v14, %v1208_v53  ;;  %779 = vst.msk [vmem:[#allocation3 + $0x1c8] sm:$0xff] %vm343_vm0, %v6680_v8 }
 0x109   : > { %9080 = vst [vmem:[#allocation59_spill] sm:$0xff] %v6685_v13  ;;  %v1855_v28 = vsel %vm1795_vm6, %v1852_v63, %v1854_v47  ;;  %v1623_v39 = vrot.slane %v6628_v34, 4  ;;  %v6701_v31 = vmax.f32 %v6409_v50, %v6685_v13  ;;  %v1318_v25 = vmax.f32 %v1109_v11, %v1209_v61  ;;  %780 = vst.msk [vmem:[#allocation3 + $0x1d0] sm:$0xff] %vm343_vm0, %v6685_v13  ;;  %v6720_v58 = vld [vmem:[#allocation3 + $0x1b0] sm:$0xff] }
 0x10a   : > { %9081 = vst [vmem:[#allocation60_spill] sm:$0xff] %v6692_v10  ;;  %4738 = vrot.lane.b32.xlu1 %v1855_v28, %s5326_s6  ;;  %v1416_v63 = vsel %vm1329_vm4, %v1414_v2, %v1415_v55  ;;  %v1418_v29 = vsel %vm1329_vm4, %v1415_v55, %v1417_v38  ;;  %v1624_v34 = vrot.slane %v6635_v60, 4  ;;  %v1626_v47 = vrot.slane %v6637_v0, 4  ;;  %1900 = vst.msk [vmem:[#allocation3 + $0x188] sm:$0xff] %vm343_vm0, %v6692_v10 }
 0x10b   : > { %9082 = vst [vmem:[#allocation61_spill] sm:$0xff] %v6701_v31  ;;  %v1526_v14 = vmax.f32 %v1317_v5, %v1416_v63  ;;  %v1001_v28 = vrot.slane %v834_v12, 1  ;;  %v1527_v36 = vmax.f32 %v1318_v25, %v1418_v29  ;;  %1901 = vst.msk [vmem:[#allocation3 + $0x190] sm:$0xff] %vm343_vm0, %v6701_v31  ;;  %v1210_v11 = vrot.slane %v834_v12, 2  ;;  %v835_v63 = vld [vmem:[#allocation3 + $0x1a0] sm:$0xff]  ;;  %v836_v31 = vld [vmem:[#allocation3 + $0x1a8] sm:$0xff] }
 0x10c   : > { %v1419_v2 = vrot.slane %v834_v12, 3  ;;  %v1628_v61 = vrot.slane %v834_v12, 4  ;;  %v1625_v55 = vsel %vm1538_vm5, %v1623_v39, %v1624_v34  ;;  %v1627_v1 = vsel %vm1538_vm5, %v1624_v34, %v1626_v47 }
 0x10d   : > { %v1002_v5 = vsel %vm911_vm2, %v999_v37, %v1001_v28  ;;  %v496_v60 = vmax.f32 %v6478_v33, %v6553_v57  ;;  %v1735_v17 = vmax.f32 %v1526_v14, %v1625_v55  ;;  %v1736_v10 = vmax.f32 %v1527_v36, %v1627_v1  ;;  %v6727_v1 = vld [vmem:[#allocation2 + $0x170] sm:$0xff] }
 0x10e   : > { %v1110_v25 = vmax.f32 %v6637_v0, %v1002_v5  ;;  %v1211_v29 = vsel %vm1120_vm3, %v1208_v53, %v1210_v11  ;;  %v1420_v12 = vsel %vm1329_vm4, %v1417_v38, %v1419_v2  ;;  %v1629_v39 = vsel %vm1538_vm5, %v1626_v47, %v1628_v61  ;;  %v6733_v61 = vld [vmem:[#allocation2 + $0x178] sm:$0xff] }
 0x10f   : > { %v497_v37 = vmax.f32 %v6483_v24, %v6555_v43  ;;  %v544_v34 = vmax.f32 %v496_v60, %v6618_v16  ;;  %v1856_v33 = vrot.slane %v1735_v17, 6  ;;  %v1857_v28 = vrot.slane %v1736_v10, 6 }
 0x110   : > { %v1319_v14 = vmax.f32 %v1110_v25, %v1211_v29  ;;  %v1003_v0 = vrot.slane %v835_v63, 1  ;;  %v1004_v11 = vrot.slane %v836_v31, 1  ;;  %v1006_v38 = vrot.slane %v6720_v58, 1 }
 0x111   : > { %v545_v36 = vmax.f32 %v497_v37, %v6621_v21  ;;  %v592_v53 = vmax.f32 %v544_v34, %v6664_v52  ;;  %v1858_v47 = vsel %vm1795_vm6, %v1856_v33, %v1857_v28  ;;  %v1212_v24 = vrot.slane %v835_v63, 2 }
 0x112   : > { %v1528_v2 = vmax.f32 %v1319_v14, %v1420_v12  ;;  %v1213_v55 = vrot.slane %v836_v31, 2  ;;  %4740 = vrot.lane.b32.xlu0 %v1858_v47, %s5326_s6  ;;  %v1005_v5 = vsel %vm911_vm2, %v1003_v0, %v1004_v11  ;;  %v1007_v60 = vsel %vm911_vm2, %v1004_v11, %v1006_v38  ;;  %v838_v47 = vld [vmem:[#allocation3 + $0x1b8] sm:$0x3f] }
 0x113   : > { %v593_v17 = vmax.f32 %v545_v36, %v6670_v15  ;;  %v6738_v10 = vmax.f32 %v592_v53, %v6727_v1  ;;  %v1111_v29 = vmax.f32 %v835_v63, %v1005_v5  ;;  %v1112_v37 = vmax.f32 %v836_v31, %v1007_v60 }
 0x114   : > { %v1737_v25 = vmax.f32 %v1528_v2, %v1629_v39  ;;  %v1214_v12 = vsel %vm1120_vm3, %v1212_v24, %v1213_v55  ;;  %v1215_v14 = vrot.slane %v6720_v58, 2  ;;  %v1421_v36 = vrot.slane %v835_v63, 3 }
 0x115   : > { %9083 = vst [vmem:[#allocation62_spill] sm:$0xff] %v6738_v10  ;;  %v6744_v34 = vmax.f32 %v593_v17, %v6733_v61  ;;  %v6748_v33 = vmax.f32 %v6486_v26, %v6738_v10  ;;  %781 = vst.msk [vmem:[#allocation3 + $0x1e8] sm:$0xff] %vm343_vm0, %v6738_v10  ;;  %v1320_v53 = vmax.f32 %v1111_v29, %v1214_v12  ;;  %v1422_v39 = vrot.slane %v836_v31, 3 }
 0x116   : > { %v1859_v0 = vrot.slane %v1737_v25, 6  ;;  %v1424_v11 = vrot.slane %v6720_v58, 3  ;;  %v1216_v24 = vsel %vm1120_vm3, %v1213_v55, %v1215_v14  ;;  %v1630_v17 = vrot.slane %v835_v63, 4 }
 0x117   : > { %9084 = vst [vmem:[#allocation63_spill] sm:$0xff] %v6744_v34  ;;  %9085 = vst [vmem:[#allocation64_spill] sm:$0xff] %v6748_v33  ;;  %v6756_v2 = vmax.f32 %v6490_v4, %v6744_v34  ;;  %v1631_v5 = vrot.slane %v836_v31, 4  ;;  %v1321_v25 = vmax.f32 %v1112_v37, %v1216_v24  ;;  %v1423_v29 = vsel %vm1329_vm4, %v1421_v36, %v1422_v39  ;;  %v840_v24 = vld [vmem:[#allocation3 + $0x1c8] sm:$0xff] }
 0x118   : > { %1902 = vst.msk [vmem:[#allocation3 + $0x1a8] sm:$0xff] %vm343_vm0, %v6748_v33  ;;  %782 = vst.msk [vmem:[#allocation3 + $0x1f0] sm:$0xff] %vm343_vm0, %v6744_v34  ;;  %v1860_v60 = vsel %vm1795_vm6, %v1857_v28, %v1859_v0  ;;  %v1425_v12 = vsel %vm1329_vm4, %v1422_v39, %v1424_v11  ;;  %v1529_v10 = vmax.f32 %v1320_v53, %v1423_v29  ;;  %v1633_v31 = vrot.slane %v6720_v58, 4  ;;  %v839_v39 = vld [vmem:[#allocation3 + $0x1c0] sm:$0xff] }
 0x119   : > { %9086 = vst [vmem:[#allocation65_spill] sm:$0xff] %v6756_v2  ;;  %4742 = vrot.lane.b32.xlu1 %v1860_v60, %s5326_s6  ;;  %v1632_v55 = vsel %vm1538_vm5, %v1630_v17, %v1631_v5  ;;  %1903 = vst.msk [vmem:[#allocation3 + $0x1b0] sm:$0xff] %vm343_vm0, %v6756_v2  ;;  %v1008_v63 = vrot.slane %v838_v47, 1  ;;  %v1530_v33 = vmax.f32 %v1321_v25, %v1425_v12  ;;  %v1217_v34 = vrot.slane %v838_v47, 2  ;;  %v6778_v12 = vld [vmem:[#allocation3 + $0x1d0] sm:$0xff] }
 0x11a   : > { %v1426_v13 = vrot.slane %v838_v47, 3  ;;  %v1635_v28 = vrot.slane %v838_v47, 4  ;;  %v1634_v37 = vsel %vm1538_vm5, %v1631_v5, %v1633_v31  ;;  %v1738_v36 = vmax.f32 %v1529_v10, %v1632_v55 }
 0x11b   : > { %v1009_v0 = vsel %vm911_vm2, %v1006_v38, %v1008_v63  ;;  %v498_v53 = vmax.f32 %v6553_v57, %v6618_v16  ;;  %v1739_v17 = vmax.f32 %v1530_v33, %v1634_v37  ;;  %v1218_v29 = vsel %vm1120_vm3, %v1215_v14, %v1217_v34  ;;  %v6784_v63 = vld [vmem:[#allocation2 + $0x180] sm:$0xff]  ;;  %v6790_v37 = vld [vmem:[#allocation2 + $0x188] sm:$0xff] }
 0x11c   : > { %v1113_v60 = vmax.f32 %v6720_v58, %v1009_v0  ;;  %v1427_v25 = vsel %vm1329_vm4, %v1424_v11, %v1426_v13  ;;  %v1861_v47 = vrot.slane %v1738_v36, 6  ;;  %v1636_v5 = vsel %vm1538_vm5, %v1633_v31, %v1635_v28 }
 0x11d   : > { %v499_v38 = vmax.f32 %v6555_v43, %v6621_v21  ;;  %v546_v10 = vmax.f32 %v498_v53, %v6664_v52  ;;  %v1862_v57 = vrot.slane %v1739_v17, 6  ;;  %v1010_v33 = vrot.slane %v839_v39, 1 }
 0x11e   : > { %v1322_v55 = vmax.f32 %v1113_v60, %v1218_v29  ;;  %v1011_v58 = vrot.slane %v840_v24, 1  ;;  %v1013_v14 = vrot.slane %v6778_v12, 1  ;;  %v1219_v11 = vrot.slane %v839_v39, 2 }
 0x11f   : > { %v547_v34 = vmax.f32 %v499_v38, %v6670_v15  ;;  %v594_v13 = vmax.f32 %v546_v10, %v6727_v1  ;;  %v1863_v31 = vsel %vm1795_vm6, %v1861_v47, %v1862_v57  ;;  %v1220_v36 = vrot.slane %v840_v24, 2 }
 0x120   : > { %v1531_v28 = vmax.f32 %v1322_v55, %v1427_v25  ;;  %v1012_v43 = vsel %vm911_vm2, %v1010_v33, %v1011_v58  ;;  %4744 = vrot.lane.b32.xlu0 %v1863_v31, %s5326_s6  ;;  %v1014_v17 = vsel %vm911_vm2, %v1011_v58, %v1013_v14  ;;  %v1222_v25 = vrot.slane %v6778_v12, 2 }
 0x121   : > { %v595_v0 = vmax.f32 %v547_v34, %v6733_v61  ;;  %v6796_v53 = vmax.f32 %v594_v13, %v6784_v63  ;;  %v1114_v60 = vmax.f32 %v839_v39, %v1012_v43  ;;  %v1115_v38 = vmax.f32 %v840_v24, %v1014_v17 }
 0x122   : > { %v1740_v29 = vmax.f32 %v1531_v28, %v1636_v5  ;;  %v1221_v47 = vsel %vm1120_vm3, %v1219_v11, %v1220_v36  ;;  %v1428_v34 = vrot.slane %v839_v39, 3  ;;  %v1223_v13 = vsel %vm1120_vm3, %v1220_v36, %v1222_v25  ;;  %v842_v5 = vld [vmem:[#allocation3 + $0x1d8] sm:$0x3f] }
 0x123   : > { %9087 = vst [vmem:[#allocation66_spill] sm:$0xff] %v6796_v53  ;;  %v6802_v10 = vmax.f32 %v595_v0, %v6790_v37  ;;  %v678_v55 = vmax.f32 %v6560_v48, %v6796_v53  ;;  %v1323_v33 = vmax.f32 %v1114_v60, %v1221_v47  ;;  %v1429_v2 = vrot.slane %v840_v24, 3 }
 0x124   : > { %v1864_v31 = vrot.slane %v1740_v29, 6  ;;  %v1431_v58 = vrot.slane %v6778_v12, 3  ;;  %v1324_v28 = vmax.f32 %v1115_v38, %v1223_v13  ;;  %v1637_v43 = vrot.slane %v839_v39, 4 }
 0x125   : > { %v679_v11 = vmax.f32 %v6563_v44, %v6802_v10  ;;  %v1638_v17 = vrot.slane %v840_v24, 4  ;;  %1904 = vst.msk [vmem:[#allocation3 + $0x1c8] sm:$0xff] %vm343_vm0, %v678_v55  ;;  %v1430_v60 = vsel %vm1329_vm4, %v1428_v34, %v1429_v2  ;;  %v1640_v36 = vrot.slane %v6778_v12, 4 }
 0x126   : > { %v1865_v0 = vsel %vm1795_vm6, %v1862_v57, %v1864_v31  ;;  %v1432_v29 = vsel %vm1329_vm4, %v1429_v2, %v1431_v58  ;;  %v1532_v47 = vmax.f32 %v1323_v33, %v1430_v60  ;;  %v1015_v39 = vrot.slane %v842_v5, 1 }
 0x127   : > { %4746 = vrot.lane.b32.xlu1 %v1865_v0, %s5326_s6  ;;  %v1533_v53 = vmax.f32 %v1324_v28, %v1432_v29  ;;  %v1639_v8 = vsel %vm1538_vm5, %v1637_v43, %v1638_v17  ;;  %1905 = vst.msk [vmem:[#allocation3 + $0x1d0] sm:$0xff] %vm343_vm0, %v679_v11  ;;  %v1641_v24 = vsel %vm1538_vm5, %v1638_v17, %v1640_v36  ;;  %v1224_v38 = vrot.slane %v842_v5, 2  ;;  %v843_v0 = vld [vmem:[#allocation3 + $0x1e0] sm:$0xff]  ;;  %v844_v43 = vld [vmem:[#allocation3 + $0x1e8] sm:$0xff] }
 0x128   : > { %v1433_v55 = vrot.slane %v842_v5, 3  ;;  %v1642_v57 = vrot.slane %v842_v5, 4  ;;  %v1741_v31 = vmax.f32 %v1532_v47, %v1639_v8  ;;  %v1016_v2 = vsel %vm911_vm2, %v1013_v14, %v1015_v39  ;;  %v6827_v8 = vld [vmem:[#allocation3 + $0x1f0] sm:$0xff]  ;;  %v453_v39 = vld [vmem:[#allocation2 + $0x198] sm:$0xff] }
 0x129   : > { %v1742_v34 = vmax.f32 %v1533_v53, %v1641_v24  ;;  %v500_v13 = vmax.f32 %v6618_v16, %v6664_v52  ;;  %v1116_v33 = vmax.f32 %v6778_v12, %v1016_v2  ;;  %v1225_v28 = vsel %vm1120_vm3, %v1222_v25, %v1224_v38  ;;  %v452_v12 = vld [vmem:[#allocation2 + $0x190] sm:$0xff] }
 0x12a   : > { %v1866_v11 = vrot.slane %v1741_v31, 6  ;;  %v1434_v17 = vsel %vm1329_vm4, %v1431_v58, %v1433_v55  ;;  %v501_v5 = vmax.f32 %v6621_v21, %v6670_v15  ;;  %v1017_v29 = vrot.slane %v843_v0, 1 }
 0x12b   : > { %v1867_v60 = vrot.slane %v1742_v34, 6  ;;  %v1325_v53 = vmax.f32 %v1116_v33, %v1225_v28  ;;  %v548_v14 = vmax.f32 %v500_v13, %v6727_v1  ;;  %v1643_v52 = vsel %vm1538_vm5, %v1640_v36, %v1642_v57 }
 0x12c   : > { %v549_v25 = vmax.f32 %v501_v5, %v6733_v61  ;;  %v1018_v47 = vrot.slane %v844_v43, 1  ;;  %v504_v21 = vmax.f32 %v6727_v1, %v6784_v63  ;;  %v1020_v24 = vrot.slane %v6827_v8, 1 }
 0x12d   : > { %v1868_v16 = vsel %vm1795_vm6, %v1866_v11, %v1867_v60  ;;  %v1534_v58 = vmax.f32 %v1325_v53, %v1434_v17  ;;  %v596_v15 = vmax.f32 %v548_v14, %v6784_v63  ;;  %v1226_v36 = vrot.slane %v843_v0, 2  ;;  %v846_v14 = vld [vmem:[#allocation3 + $0x1f8] sm:$0x3f] }
 0x12e   : > { %4748 = vrot.lane.b32.xlu0 %v1868_v16, %s5326_s6  ;;  %v597_v38 = vmax.f32 %v549_v25, %v6790_v37  ;;  %v1019_v55 = vsel %vm911_vm2, %v1017_v29, %v1018_v47  ;;  %v1227_v57 = vrot.slane %v844_v43, 2  ;;  %v1021_v34 = vsel %vm911_vm2, %v1018_v47, %v1020_v24  ;;  %v7553_v63 = vld [vmem:[#allocation3 + $0x1d8] sm:$0x3f] }
 0x12f   : > { %v1743_v31 = vmax.f32 %v1534_v58, %v1643_v52  ;;  %v6840_v61 = vmax.f32 %v596_v15, %v452_v12  ;;  %v1117_v2 = vmax.f32 %v843_v0, %v1019_v55  ;;  %v1118_v33 = vmax.f32 %v844_v43, %v1021_v34 }
 0x130   : > { %v6843_v13 = vmax.f32 %v597_v38, %v453_v39  ;;  %v1228_v28 = vsel %vm1120_vm3, %v1226_v36, %v1227_v57  ;;  %v1229_v11 = vrot.slane %v6827_v8, 2  ;;  %v1435_v53 = vrot.slane %v843_v0, 3 }
 0x131   : > { %v1869_v17 = vrot.slane %v1743_v31, 6  ;;  %v680_v37 = vmax.f32 %v6624_v46, %v6840_v61  ;;  %v1326_v5 = vmax.f32 %v1117_v2, %v1228_v28  ;;  %v1436_v52 = vrot.slane %v844_v43, 3  ;;  %v6863_v28 = vld [vmem:[#allocation3] sm:$0xff] }
 0x132   : > { %v681_v29 = vmax.f32 %v6631_v62, %v6843_v13  ;;  %v1230_v16 = vsel %vm1120_vm3, %v1227_v57, %v1229_v11  ;;  %v1438_v12 = vrot.slane %v6827_v8, 3  ;;  %v1644_v58 = vrot.slane %v843_v0, 4 }
 0x133   : > { %v1870_v25 = vsel %vm1795_vm6, %v1867_v60, %v1869_v17  ;;  %v1327_v47 = vmax.f32 %v1118_v33, %v1230_v16  ;;  %v1645_v39 = vrot.slane %v844_v43, 4  ;;  %1906 = vst.msk [vmem:[#allocation3 + $0x1e8] sm:$0xff] %vm343_vm0, %v680_v37  ;;  %v1437_v15 = vsel %vm1329_vm4, %v1435_v53, %v1436_v52  ;;  %v1909_v16 = vld [vmem:[#allocation3 + $0x8] sm:$0xff] }
 0x134   : > { %4750 = vrot.lane.b32.xlu1 %v1870_v25, %s5326_s6  ;;  %v1439_v38 = vsel %vm1329_vm4, %v1436_v52, %v1438_v12  ;;  %v1647_v55 = vrot.slane %v6827_v8, 4  ;;  %1907 = vst.msk [vmem:[#allocation3 + $0x1f0] sm:$0xff] %vm343_vm0, %v681_v29  ;;  %v1022_v36 = vrot.slane %v846_v14, 1  ;;  %v1535_v57 = vmax.f32 %v1326_v5, %v1437_v15  ;;  %v1910_v5 = vld [vmem:[#allocation3 + $0x10] sm:$0xff]  ;;  %v1911_v52 = vld [vmem:[#allocation3 + $0x18] sm:$0x3f] }
 0x135   : > { %v1536_v31 = vmax.f32 %v1327_v47, %v1439_v38  ;;  %v1646_v60 = vsel %vm1538_vm5, %v1644_v58, %v1645_v39  ;;  %v1231_v34 = vrot.slane %v846_v14, 2  ;;  %v1440_v2 = vrot.slane %v846_v14, 3  ;;  %v9088_v58 = vld [vmem:[#allocation25_spill] sm:$0xff] }
 0x136   : > { %v1648_v0 = vsel %vm1538_vm5, %v1645_v39, %v1647_v55  ;;  %v1023_v43 = vsel %vm911_vm2, %v1020_v24, %v1022_v36  ;;  %v1649_v33 = vrot.slane %v846_v14, 4  ;;  %v1744_v17 = vmax.f32 %v1535_v57, %v1646_v60  ;;  %v9090_v39 = vld [vmem:[#allocation26_spill] sm:$0xff] }
 0x137   : > { %v1745_v37 = vmax.f32 %v1536_v31, %v1648_v0  ;;  %v1119_v53 = vmax.f32 %v6827_v8, %v1023_v43  ;;  %v1232_v29 = vsel %vm1120_vm3, %v1229_v11, %v1231_v34  ;;  %v1441_v25 = vsel %vm1329_vm4, %v1438_v12, %v1440_v2 }
 0x138   : > { %v1650_v47 = vsel %vm1538_vm5, %v1647_v55, %v1649_v33  ;;  %v9089_v24 = vmax.f32 %v9088_v58, %v5701_v49  ;;  %v9091_v15 = vmax.f32 %v9090_v39, %v5704_v3  ;;  %v1871_v8 = vrot.slane %v1744_v17, 6 }
 0x139   : > { %v1872_v36 = vrot.slane %v1745_v37, 6  ;;  %v1328_v11 = vmax.f32 %v1119_v53, %v1232_v29  ;;  %v2036_v57 = vrot.slane %v6863_v28, 1  ;;  %v2037_v31 = vrot.slane %v1909_v16, 1 }
 0x13a   : > { %v686_v14 = vmax.f32 %v9089_v24, %v5985_v27  ;;  %v687_v38 = vmax.f32 %v9091_v15, %v5992_v19  ;;  %v2039_v60 = vrot.slane %v1910_v5, 1  ;;  %v2041_v12 = vrot.slane %v1911_v52, 1 }
 0x13b   : > { %v2244_v55 = vrot.slane %v6863_v28, 2  ;;  %v1873_v49 = vsel %vm1795_vm6, %v1871_v8, %v1872_v36  ;;  %v1537_v27 = vmax.f32 %v1328_v11, %v1441_v25  ;;  %v2245_v34 = vrot.slane %v1909_v16, 2 }
 0x13c   : > { %3172 = vst.msk [vmem:[#allocation3 + $0x8] sm:$0xff] %vm343_vm0, %v686_v14  ;;  %3173 = vst.msk [vmem:[#allocation3 + $0x10] sm:$0xff] %vm343_vm0, %v687_v38  ;;  %v2247_v3 = vrot.slane %v1910_v5, 2  ;;  %4752 = vrot.lane.b32.xlu0 %v1873_v49, %s5326_s6  ;;  %v2038_v19 = vsel %vm911_vm2, %v2036_v57, %v2037_v31  ;;  %v2040_v0 = vsel %vm911_vm2, %v2037_v31, %v2039_v60  ;;  %v2249_v2 = vrot.slane %v1911_v52, 2  ;;  %v6893_v49 = vld [vmem:[#allocation3 + $0x20] sm:$0xff] }
 0x13d   : > { %v2042_v43 = vsel %vm911_vm2, %v2039_v60, %v2041_v12  ;;  %v1746_v33 = vmax.f32 %v1537_v27, %v1650_v47  ;;  %v2196_v17 = vmax.f32 %v6863_v28, %v2038_v19  ;;  %v2197_v37 = vmax.f32 %v1909_v16, %v2040_v0  ;;  %v6895_v27 = vld [vmem:[#allocation3 + $0x28] sm:$0xff] }
 0x13e   : > { %v2198_v53 = vmax.f32 %v1910_v5, %v2042_v43  ;;  %v2246_v29 = vsel %vm1120_vm3, %v2244_v55, %v2245_v34  ;;  %v2248_v25 = vsel %vm1120_vm3, %v2245_v34, %v2247_v3  ;;  %v2250_v58 = vsel %vm1120_vm3, %v2247_v3, %v2249_v2  ;;  %v9092_v0 = vld [vmem:[#allocation36_spill] sm:$0xff] }
 0x13f   : > { %v2452_v24 = vrot.slane %v6863_v28, 3  ;;  %v1874_v14 = vrot.slane %v1746_v33, 6  ;;  %v2404_v39 = vmax.f32 %v2196_v17, %v2246_v29  ;;  %v2405_v15 = vmax.f32 %v2197_v37, %v2248_v25  ;;  %v6908_v33 = vld [vmem:[#allocation3 + $0x38] sm:$0x3f] }
 0x140   : > { %v2406_v38 = vmax.f32 %v2198_v53, %v2250_v58  ;;  %v2453_v8 = vrot.slane %v1909_v16, 3  ;;  %v2455_v11 = vrot.slane %v1910_v5, 3  ;;  %v2457_v57 = vrot.slane %v1911_v52, 3 }
 0x141   : > { %v2660_v47 = vrot.slane %v6863_v28, 4  ;;  %v1875_v31 = vsel %vm1795_vm6, %v1872_v36, %v1874_v14  ;;  %v2661_v60 = vrot.slane %v1909_v16, 4  ;;  %v2663_v12 = vrot.slane %v1910_v5, 4  ;;  %v6905_v16 = vld [vmem:[#allocation3 + $0x30] sm:$0xff] }
 0x142   : > { %v2665_v55 = vrot.slane %v1911_v52, 4  ;;  %4754 = vrot.lane.b32.xlu1 %v1875_v31, %s5326_s6  ;;  %v2454_v34 = vsel %vm1329_vm4, %v2452_v24, %v2453_v8  ;;  %v2456_v3 = vsel %vm1329_vm4, %v2453_v8, %v2455_v11  ;;  %v2458_v19 = vsel %vm1329_vm4, %v2455_v11, %v2457_v57 }
 0x143   : > { %v9093_v28 = vmax.f32 %v9092_v0, %v5879_v7  ;;  %v2612_v5 = vmax.f32 %v2404_v39, %v2454_v34  ;;  %v2613_v52 = vmax.f32 %v2405_v15, %v2456_v3  ;;  %v2614_v43 = vmax.f32 %v2406_v38, %v2458_v19 }
 0x144   : > { %v2662_v2 = vsel %vm1538_vm5, %v2660_v47, %v2661_v60  ;;  %v2664_v17 = vsel %vm1538_vm5, %v2661_v60, %v2663_v12  ;;  %v2666_v37 = vsel %vm1538_vm5, %v2663_v12, %v2665_v55  ;;  %v2043_v53 = vrot.slane %v6893_v49, 1 }
 0x145   : > { %v689_v36 = vmax.f32 %v9093_v28, %v6065_v51  ;;  %v2044_v29 = vrot.slane %v6895_v27, 1  ;;  %v2820_v7 = vmax.f32 %v2612_v5, %v2662_v2  ;;  %v2821_v51 = vmax.f32 %v2613_v52, %v2664_v17 }
 0x146   : > { %v2822_v25 = vmax.f32 %v2614_v43, %v2666_v37  ;;  %v2046_v58 = vrot.slane %v6905_v16, 1  ;;  %v2048_v14 = vrot.slane %v6908_v33, 1  ;;  %v2251_v39 = vrot.slane %v6893_v49, 2 }
 0x147   : > { %3175 = vst.msk [vmem:[#allocation3 + $0x30] sm:$0xff] %vm343_vm0, %v689_v36  ;;  %v2045_v24 = vsel %vm911_vm2, %v2043_v53, %v2044_v29  ;;  %v2252_v15 = vrot.slane %v6895_v27, 2  ;;  %v2900_v38 = vrot.slane %v2821_v51, 4  ;;  %v2254_v12 = vrot.slane %v6905_v16, 2 }
 0x148   : > { %v2901_v8 = vrot.slane %v2822_v25, 4  ;;  %v2047_v11 = vsel %vm911_vm2, %v2044_v29, %v2046_v58  ;;  %v2199_v57 = vmax.f32 %v6893_v49, %v2045_v24  ;;  %v2049_v47 = vsel %vm911_vm2, %v2046_v58, %v2048_v14 }
 0x149   : > { %v2200_v31 = vmax.f32 %v6895_v27, %v2047_v11  ;;  %v2253_v60 = vsel %vm1120_vm3, %v2251_v39, %v2252_v15  ;;  %v2996_v34 = vmax.f32 %v2820_v7, %v2900_v38  ;;  %v2201_v19 = vmax.f32 %v6905_v16, %v2049_v47  ;;  %v6947_v47 = vld [vmem:[#allocation3 + $0x58] sm:$0x3f] }
 0x14a   : > { %v2902_v55 = vsel %vm1538_vm5, %v2900_v38, %v2901_v8  ;;  %v2998_v3 = vmax.f32 %v2822_v25, %v2901_v8  ;;  %v2255_v28 = vsel %vm1120_vm3, %v2252_v15, %v2254_v12  ;;  %v2256_v36 = vrot.slane %v6908_v33, 2  ;;  %v6941_v8 = vld [vmem:[#allocation3 + $0x40] sm:$0xff] }
 0x14b   : > { %v2997_v0 = vmax.f32 %v2821_v51, %v2902_v55  ;;  %v2407_v5 = vmax.f32 %v2199_v57, %v2253_v60  ;;  %v3092_v52 = vrot.slane %v2996_v34, 4  ;;  %v2408_v2 = vmax.f32 %v2200_v31, %v2255_v28  ;;  %v9094_v55 = vld [vmem:[#allocation35_spill] sm:$0xff] }
 0x14c   : > { %v3095_v43 = vrot.slane %v2998_v3, 4  ;;  %v2459_v17 = vrot.slane %v6893_v49, 3  ;;  %v2257_v53 = vsel %vm1120_vm3, %v2254_v12, %v2256_v36  ;;  %v2460_v29 = vrot.slane %v6895_v27, 3 }
 0x14d   : > { %v3093_v37 = vrot.slane %v2997_v0, 4  ;;  %v2462_v7 = vrot.slane %v6905_v16, 3  ;;  %v2409_v25 = vmax.f32 %v2201_v19, %v2257_v53  ;;  %v2464_v51 = vrot.slane %v6908_v33, 3 }
 0x14e   : > { %v2667_v58 = vrot.slane %v6893_v49, 4  ;;  %v2668_v24 = vrot.slane %v6895_v27, 4  ;;  %v2461_v15 = vsel %vm1329_vm4, %v2459_v17, %v2460_v29  ;;  %v2670_v27 = vrot.slane %v6905_v16, 4 }
 0x14f   : > { %v3094_v14 = vsel %vm1538_vm5, %v3092_v52, %v3093_v37  ;;  %v3096_v39 = vsel %vm1538_vm5, %v3093_v37, %v3095_v43  ;;  %v2463_v38 = vsel %vm1329_vm4, %v2460_v29, %v2462_v7  ;;  %v2465_v11 = vsel %vm1329_vm4, %v2462_v7, %v2464_v51 }
 0x150   : > { %4788 = vrot.lane.b32.xlu0 %v3094_v14, %s5327_s11  ;;  %4790 = vrot.lane.b32.xlu1 %v3096_v39, %s5327_s11  ;;  %v2615_v49 = vmax.f32 %v2407_v5, %v2461_v15  ;;  %v2616_v57 = vmax.f32 %v2408_v2, %v2463_v38  ;;  %v2617_v31 = vmax.f32 %v2409_v25, %v2465_v11  ;;  %v2672_v12 = vrot.slane %v6908_v33, 4 }
 0x151   : > { %v2669_v60 = vsel %vm1538_vm5, %v2667_v58, %v2668_v24  ;;  %v9095_v34 = vmax.f32 %v9094_v55, %v5876_v20  ;;  %v2671_v19 = vsel %vm1538_vm5, %v2668_v24, %v2670_v27  ;;  %v2050_v28 = vrot.slane %v6941_v8, 1 }
 0x152   : > { %v2823_v0 = vmax.f32 %v2615_v49, %v2669_v60  ;;  %v2051_v36 = vrot.slane %v6379_v56, 1  ;;  %v2673_v16 = vsel %vm1538_vm5, %v2670_v27, %v2672_v12  ;;  %v2824_v5 = vmax.f32 %v2616_v57, %v2671_v19 }
 0x153   : > { %v688_v3 = vmax.f32 %v9095_v34, %v6060_v59  ;;  %v2053_v52 = vrot.slane %v6381_v9, 1  ;;  %v2055_v33 = vrot.slane %v6947_v47, 1  ;;  %v2825_v43 = vmax.f32 %v2617_v31, %v2673_v16 }
 0x154   : > { %v2052_v20 = vsel %vm911_vm2, %v2050_v28, %v2051_v36  ;;  %v2258_v59 = vrot.slane %v6941_v8, 2  ;;  %v2259_v2 = vrot.slane %v6379_v56, 2  ;;  %v2903_v17 = vrot.slane %v2824_v5, 4 }
 0x155   : > { %3174 = vst.msk [vmem:[#allocation3 + $0x28] sm:$0xff] %vm343_vm0, %v688_v3  ;;  %v2054_v37 = vsel %vm911_vm2, %v2051_v36, %v2053_v52  ;;  %v2056_v53 = vsel %vm911_vm2, %v2053_v52, %v2055_v33  ;;  %v2202_v29 = vmax.f32 %v6941_v8, %v2052_v20  ;;  %v2904_v7 = vrot.slane %v2825_v43, 4  ;;  %v6981_v52 = vld [vmem:[#allocation3 + $0x60] sm:$0xff] }
 0x156   : > { %v2203_v25 = vmax.f32 %v6379_v56, %v2054_v37  ;;  %v2204_v51 = vmax.f32 %v6381_v9, %v2056_v53  ;;  %v2260_v58 = vsel %vm1120_vm3, %v2258_v59, %v2259_v2  ;;  %v2999_v24 = vmax.f32 %v2823_v0, %v2903_v17  ;;  %v6991_v53 = vld [vmem:[#allocation3 + $0x78] sm:$0x3f] }
 0x157   : > { %v2261_v14 = vrot.slane %v6381_v9, 2  ;;  %v2263_v39 = vrot.slane %v6947_v47, 2  ;;  %v2410_v15 = vmax.f32 %v2202_v29, %v2260_v58  ;;  %v2905_v38 = vsel %vm1538_vm5, %v2903_v17, %v2904_v7 }
 0x158   : > { %v3001_v11 = vmax.f32 %v2825_v43, %v2904_v7  ;;  %v2466_v49 = vrot.slane %v6941_v8, 3  ;;  %v2467_v57 = vrot.slane %v6379_v56, 3  ;;  %v3000_v27 = vmax.f32 %v2824_v5, %v2905_v38 }
 0x159   : > { %v3097_v31 = vrot.slane %v2999_v24, 4  ;;  %v2262_v60 = vsel %vm1120_vm3, %v2259_v2, %v2261_v14  ;;  %v2264_v12 = vsel %vm1120_vm3, %v2261_v14, %v2263_v39  ;;  %v2469_v28 = vrot.slane %v6381_v9, 3 }
 0x15a   : > { %v3100_v55 = vrot.slane %v3001_v11, 4  ;;  %v2411_v34 = vmax.f32 %v2203_v25, %v2262_v60  ;;  %v2412_v3 = vmax.f32 %v2204_v51, %v2264_v12  ;;  %v2468_v19 = vsel %vm1329_vm4, %v2466_v49, %v2467_v57 }
 0x15b   : > { %v3098_v0 = vrot.slane %v3000_v27, 4  ;;  %v2471_v36 = vrot.slane %v6947_v47, 3  ;;  %v2618_v16 = vmax.f32 %v2410_v15, %v2468_v19  ;;  %v2674_v5 = vrot.slane %v6941_v8, 4 }
 0x15c   : > { %v2675_v33 = vrot.slane %v6379_v56, 4  ;;  %v2677_v43 = vrot.slane %v6381_v9, 4  ;;  %v2679_v20 = vrot.slane %v6947_v47, 4  ;;  %v2470_v17 = vsel %vm1329_vm4, %v2467_v57, %v2469_v28 }
 0x15d   : > { %v3099_v59 = vsel %vm1538_vm5, %v3097_v31, %v3098_v0  ;;  %v3101_v2 = vsel %vm1538_vm5, %v3098_v0, %v3100_v55  ;;  %v2472_v37 = vsel %vm1329_vm4, %v2469_v28, %v2471_v36  ;;  %v2619_v8 = vmax.f32 %v2411_v34, %v2470_v17 }
 0x15e   : > { %4792 = vrot.lane.b32.xlu0 %v3099_v59, %s5327_s11  ;;  %4794 = vrot.lane.b32.xlu1 %v3101_v2, %s5327_s11  ;;  %v2620_v56 = vmax.f32 %v2412_v3, %v2472_v37  ;;  %v2676_v9 = vsel %vm1538_vm5, %v2674_v5, %v2675_v33  ;;  %v2057_v47 = vrot.slane %v6981_v52, 1  ;;  %v2678_v29 = vsel %vm1538_vm5, %v2675_v33, %v2677_v43 }
 0x15f   : > { %v2680_v7 = vsel %vm1538_vm5, %v2677_v43, %v2679_v20  ;;  %v2826_v25 = vmax.f32 %v2618_v16, %v2676_v9  ;;  %v2058_v51 = vrot.slane %v6456_v45, 1  ;;  %v2827_v58 = vmax.f32 %v2619_v8, %v2678_v29 }
 0x160   : > { %v2828_v24 = vmax.f32 %v2620_v56, %v2680_v7  ;;  %v2060_v14 = vrot.slane %v6458_v54, 1  ;;  %v2062_v39 = vrot.slane %v6991_v53, 1  ;;  %v2265_v38 = vrot.slane %v6981_v52, 2 }
 0x161   : > { %v2059_v15 = vsel %vm911_vm2, %v2057_v47, %v2058_v51  ;;  %v2266_v11 = vrot.slane %v6456_v45, 2  ;;  %v2268_v49 = vrot.slane %v6458_v54, 2  ;;  %v2906_v57 = vrot.slane %v2827_v58, 4 }
 0x162   : > { %v2907_v27 = vrot.slane %v2828_v24, 4  ;;  %v2061_v31 = vsel %vm911_vm2, %v2058_v51, %v2060_v14  ;;  %v2063_v60 = vsel %vm911_vm2, %v2060_v14, %v2062_v39  ;;  %v2205_v12 = vmax.f32 %v6981_v52, %v2059_v15  ;;  %v7027_v39 = vld [vmem:[#allocation3 + $0x80] sm:$0xff]  ;;  %v7029_v15 = vld [vmem:[#allocation3 + $0x88] sm:$0xff] }
 0x163   : > { %v2206_v55 = vmax.f32 %v6456_v45, %v2061_v31  ;;  %v2207_v34 = vmax.f32 %v6458_v54, %v2063_v60  ;;  %v2267_v3 = vsel %vm1120_vm3, %v2265_v38, %v2266_v11  ;;  %v3002_v0 = vmax.f32 %v2826_v25, %v2906_v57 }
 0x164   : > { %v2908_v19 = vsel %vm1538_vm5, %v2906_v57, %v2907_v27  ;;  %v3004_v28 = vmax.f32 %v2828_v24, %v2907_v27  ;;  %v2269_v36 = vsel %vm1120_vm3, %v2266_v11, %v2268_v49  ;;  %v2270_v5 = vrot.slane %v6991_v53, 2  ;;  %v7036_v57 = vld [vmem:[#allocation3 + $0x98] sm:$0x3f] }
 0x165   : > { %v3003_v16 = vmax.f32 %v2827_v58, %v2908_v19  ;;  %v2413_v33 = vmax.f32 %v2205_v12, %v2267_v3  ;;  %v2414_v43 = vmax.f32 %v2206_v55, %v2269_v36  ;;  %v3102_v20 = vrot.slane %v3002_v0, 4 }
 0x166   : > { %v3105_v59 = vrot.slane %v3004_v28, 4  ;;  %v2473_v2 = vrot.slane %v6981_v52, 3  ;;  %v2474_v17 = vrot.slane %v6456_v45, 3  ;;  %v2271_v8 = vsel %vm1120_vm3, %v2268_v49, %v2270_v5  ;;  %v7034_v49 = vld [vmem:[#allocation3 + $0x90] sm:$0xff] }
 0x167   : > { %v3103_v37 = vrot.slane %v3003_v16, 4  ;;  %v2476_v56 = vrot.slane %v6458_v54, 3  ;;  %v2478_v9 = vrot.slane %v6991_v53, 3  ;;  %v2415_v47 = vmax.f32 %v2207_v34, %v2271_v8 }
 0x168   : > { %v2475_v29 = vsel %vm1329_vm4, %v2473_v2, %v2474_v17  ;;  %v2681_v7 = vrot.slane %v6981_v52, 4  ;;  %v2682_v25 = vrot.slane %v6456_v45, 4  ;;  %v2684_v45 = vrot.slane %v6458_v54, 4 }
 0x169   : > { %v3104_v51 = vsel %vm1538_vm5, %v3102_v20, %v3103_v37  ;;  %v3106_v58 = vsel %vm1538_vm5, %v3103_v37, %v3105_v59  ;;  %v2477_v24 = vsel %vm1329_vm4, %v2474_v17, %v2476_v56  ;;  %v2479_v14 = vsel %vm1329_vm4, %v2476_v56, %v2478_v9 }
 0x16a   : > { %4796 = vrot.lane.b32.xlu0 %v3104_v51, %s5327_s11  ;;  %4798 = vrot.lane.b32.xlu1 %v3106_v58, %s5327_s11  ;;  %v2621_v38 = vmax.f32 %v2413_v33, %v2475_v29  ;;  %v2622_v52 = vmax.f32 %v2414_v43, %v2477_v24  ;;  %v2623_v11 = vmax.f32 %v2415_v47, %v2479_v14  ;;  %v2686_v31 = vrot.slane %v6991_v53, 4 }
 0x16b   : > { %v2683_v27 = vsel %vm1538_vm5, %v2681_v7, %v2682_v25  ;;  %v694_v60 = vmax.f32 %v5999_v23, %v6230_v40  ;;  %v695_v12 = vmax.f32 %v6008_v35, %v6236_v18  ;;  %v2685_v55 = vsel %vm1538_vm5, %v2682_v25, %v2684_v45 }
 0x16c   : > { %v2829_v34 = vmax.f32 %v2621_v38, %v2683_v27  ;;  %v2064_v3 = vrot.slane %v7027_v39, 1  ;;  %v2065_v54 = vrot.slane %v7029_v15, 1  ;;  %v2687_v19 = vsel %vm1538_vm5, %v2684_v45, %v2686_v31 }
 0x16d   : > { %v2830_v0 = vmax.f32 %v2622_v52, %v2685_v55  ;;  %v2067_v28 = vrot.slane %v7034_v49, 1  ;;  %v2069_v53 = vrot.slane %v7036_v57, 1  ;;  %3180 = vst.msk [vmem:[#allocation3 + $0x88] sm:$0xff] %vm343_vm0, %v694_v60  ;;  %3181 = vst.msk [vmem:[#allocation3 + $0x90] sm:$0xff] %vm343_vm0, %v695_v12  ;;  %v2831_v23 = vmax.f32 %v2623_v11, %v2687_v19  ;;  %v7071_v12 = vld [vmem:[#allocation3 + $0xa0] sm:$0xff] }
 0x16e   : > { %v2066_v35 = vsel %vm911_vm2, %v2064_v3, %v2065_v54  ;;  %v2272_v40 = vrot.slane %v7027_v39, 2  ;;  %v2273_v18 = vrot.slane %v7029_v15, 2  ;;  %v2275_v37 = vrot.slane %v7034_v49, 2 }
 0x16f   : > { %v2909_v36 = vrot.slane %v2830_v0, 4  ;;  %v2068_v16 = vsel %vm911_vm2, %v2065_v54, %v2067_v28  ;;  %v2070_v5 = vsel %vm911_vm2, %v2067_v28, %v2069_v53  ;;  %v2208_v33 = vmax.f32 %v7027_v39, %v2066_v35  ;;  %v7083_v35 = vld [vmem:[#allocation3 + $0xb0] sm:$0xff] }
 0x170   : > { %v2910_v43 = vrot.slane %v2831_v23, 4  ;;  %v2209_v20 = vmax.f32 %v7029_v15, %v2068_v16  ;;  %v2210_v59 = vmax.f32 %v7034_v49, %v2070_v5  ;;  %v2274_v2 = vsel %vm1120_vm3, %v2272_v40, %v2273_v18 }
 0x171   : > { %v3005_v17 = vmax.f32 %v2829_v34, %v2909_v36  ;;  %v2277_v8 = vrot.slane %v7036_v57, 2  ;;  %v2416_v56 = vmax.f32 %v2208_v33, %v2274_v2  ;;  %v2480_v29 = vrot.slane %v7027_v39, 3 }
 0x172   : > { %v2911_v9 = vsel %vm1538_vm5, %v2909_v36, %v2910_v43  ;;  %v3007_v47 = vmax.f32 %v2831_v23, %v2910_v43  ;;  %v2481_v7 = vrot.slane %v7029_v15, 3  ;;  %v2276_v58 = vsel %vm1120_vm3, %v2273_v18, %v2275_v37  ;;  %v7081_v23 = vld [vmem:[#allocation3 + $0xa8] sm:$0xff] }
 0x173   : > { %v3006_v25 = vmax.f32 %v2830_v0, %v2911_v9  ;;  %v3107_v51 = vrot.slane %v3005_v17, 4  ;;  %v2278_v24 = vsel %vm1120_vm3, %v2275_v37, %v2277_v8  ;;  %v2417_v38 = vmax.f32 %v2209_v20, %v2276_v58 }
 0x174   : > { %v3110_v14 = vrot.slane %v3007_v47, 4  ;;  %v2418_v52 = vmax.f32 %v2210_v59, %v2278_v24  ;;  %v2482_v11 = vsel %vm1329_vm4, %v2480_v29, %v2481_v7  ;;  %v2483_v27 = vrot.slane %v7034_v49, 3 }
 0x175   : > { %v3108_v45 = vrot.slane %v3006_v25, 4  ;;  %v2485_v31 = vrot.slane %v7036_v57, 3  ;;  %v2624_v60 = vmax.f32 %v2416_v56, %v2482_v11  ;;  %v2688_v55 = vrot.slane %v7027_v39, 4 }
 0x176   : > { %v2689_v34 = vrot.slane %v7029_v15, 4  ;;  %v2691_v3 = vrot.slane %v7034_v49, 4  ;;  %v2693_v54 = vrot.slane %v7036_v57, 4  ;;  %v2484_v28 = vsel %vm1329_vm4, %v2481_v7, %v2483_v27  ;;  %v7088_v57 = vld [vmem:[#allocation3 + $0xb8] sm:$0x3f] }
 0x177   : > { %v3109_v19 = vsel %vm1538_vm5, %v3107_v51, %v3108_v45  ;;  %v3111_v0 = vsel %vm1538_vm5, %v3108_v45, %v3110_v14  ;;  %v2486_v53 = vsel %vm1329_vm4, %v2483_v27, %v2485_v31  ;;  %v2625_v39 = vmax.f32 %v2417_v38, %v2484_v28 }
 0x178   : > { %4800 = vrot.lane.b32.xlu0 %v3109_v19, %s5327_s11  ;;  %4802 = vrot.lane.b32.xlu1 %v3111_v0, %s5327_s11  ;;  %v2626_v15 = vmax.f32 %v2418_v52, %v2486_v53  ;;  %v2690_v49 = vsel %vm1538_vm5, %v2688_v55, %v2689_v34  ;;  %v2071_v40 = vrot.slane %v7071_v12, 1  ;;  %v2692_v18 = vsel %vm1538_vm5, %v2689_v34, %v2691_v3 }
 0x179   : > { %v2694_v36 = vsel %vm1538_vm5, %v2691_v3, %v2693_v54  ;;  %v2832_v16 = vmax.f32 %v2624_v60, %v2690_v49  ;;  %v697_v5 = vmax.f32 %v6073_v42, %v6297_v6  ;;  %v2833_v33 = vmax.f32 %v2625_v39, %v2692_v18 }
 0x17a   : > { %v2834_v43 = vmax.f32 %v2626_v15, %v2694_v36  ;;  %v2072_v20 = vrot.slane %v7081_v23, 1  ;;  %v2074_v59 = vrot.slane %v7083_v35, 1  ;;  %v2076_v2 = vrot.slane %v7088_v57, 1 }
 0x17b   : > { %v2279_v17 = vrot.slane %v7071_v12, 2  ;;  %v2280_v37 = vrot.slane %v7081_v23, 2  ;;  %v2282_v8 = vrot.slane %v7083_v35, 2  ;;  %3183 = vst.msk [vmem:[#allocation3 + $0xb0] sm:$0xff] %vm343_vm0, %v697_v5  ;;  %v2912_v56 = vrot.slane %v2833_v33, 4 }
 0x17c   : > { %v2913_v9 = vrot.slane %v2834_v43, 4  ;;  %v2073_v42 = vsel %vm911_vm2, %v2071_v40, %v2072_v20  ;;  %v2075_v6 = vsel %vm911_vm2, %v2072_v20, %v2074_v59  ;;  %v2077_v47 = vsel %vm911_vm2, %v2074_v59, %v2076_v2 }
 0x17d   : > { %v2211_v29 = vmax.f32 %v7071_v12, %v2073_v42  ;;  %v2212_v7 = vmax.f32 %v7081_v23, %v2075_v6  ;;  %v2281_v25 = vsel %vm1120_vm3, %v2279_v17, %v2280_v37  ;;  %v3008_v58 = vmax.f32 %v2832_v16, %v2912_v56  ;;  %v7135_v17 = vld [vmem:[#allocation3 + $0xd0] sm:$0xff] }
 0x17e   : > { %v2914_v51 = vsel %vm1538_vm5, %v2912_v56, %v2913_v9  ;;  %v3010_v24 = vmax.f32 %v2834_v43, %v2913_v9  ;;  %v2213_v14 = vmax.f32 %v7083_v35, %v2077_v47  ;;  %v2283_v52 = vsel %vm1120_vm3, %v2280_v37, %v2282_v8  ;;  %v7137_v37 = vld [vmem:[#allocation3 + $0xd8] sm:$0x3f]  ;;  %v9096_v9 = vld [vmem:[#allocation41_spill] sm:$0xff] }
 0x17f   : > { %v3009_v38 = vmax.f32 %v2833_v33, %v2914_v51  ;;  %v2284_v11 = vrot.slane %v7088_v57, 2  ;;  %v2419_v45 = vmax.f32 %v2211_v29, %v2281_v25  ;;  %v3112_v27 = vrot.slane %v3008_v58, 4  ;;  %v7127_v33 = vld [vmem:[#allocation3 + $0xc0] sm:$0xff] }
 0x180   : > { %v3115_v31 = vrot.slane %v3010_v24, 4  ;;  %v2420_v60 = vmax.f32 %v2212_v7, %v2283_v52  ;;  %v2487_v55 = vrot.slane %v7071_v12, 3  ;;  %v2488_v54 = vrot.slane %v7081_v23, 3 }
 0x181   : > { %v3113_v34 = vrot.slane %v3009_v38, 4  ;;  %v2285_v3 = vsel %vm1120_vm3, %v2282_v8, %v2284_v11  ;;  %v2490_v19 = vrot.slane %v7083_v35, 3  ;;  %v2492_v28 = vrot.slane %v7088_v57, 3 }
 0x182   : > { %v2421_v0 = vmax.f32 %v2213_v14, %v2285_v3  ;;  %v2695_v53 = vrot.slane %v7071_v12, 4  ;;  %v2696_v39 = vrot.slane %v7081_v23, 4  ;;  %v2489_v40 = vsel %vm1329_vm4, %v2487_v55, %v2488_v54  ;;  %v7129_v23 = vld [vmem:[#allocation3 + $0xc8] sm:$0xff] }
 0x183   : > { %v3114_v15 = vsel %vm1538_vm5, %v3112_v27, %v3113_v34  ;;  %v3116_v49 = vsel %vm1538_vm5, %v3113_v34, %v3115_v31  ;;  %v2491_v18 = vsel %vm1329_vm4, %v2488_v54, %v2490_v19  ;;  %v2493_v36 = vsel %vm1329_vm4, %v2490_v19, %v2492_v28 }
 0x184   : > { %4804 = vrot.lane.b32.xlu0 %v3114_v15, %s5327_s11  ;;  %4806 = vrot.lane.b32.xlu1 %v3116_v49, %s5327_s11  ;;  %v2627_v16 = vmax.f32 %v2419_v45, %v2489_v40  ;;  %v2628_v5 = vmax.f32 %v2420_v60, %v2491_v18  ;;  %v2698_v12 = vrot.slane %v7083_v35, 4  ;;  %v2629_v43 = vmax.f32 %v2421_v0, %v2493_v36 }
 0x185   : > { %v2697_v20 = vsel %vm1538_vm5, %v2695_v53, %v2696_v39  ;;  %v2700_v59 = vrot.slane %v7088_v57, 4  ;;  %v696_v2 = vmax.f32 %v6087_v41, %v6294_v32  ;;  %v698_v35 = vmax.f32 %v6119_v30, %v6406_v22 }
 0x186   : > { %v2699_v8 = vsel %vm1538_vm5, %v2696_v39, %v2698_v12  ;;  %v2835_v56 = vmax.f32 %v2627_v16, %v2697_v20  ;;  %v699_v42 = vmax.f32 %v9096_v9, %v6409_v50  ;;  %v2078_v41 = vrot.slane %v7127_v33, 1 }
 0x187   : > { %v2701_v6 = vsel %vm1538_vm5, %v2698_v12, %v2700_v59  ;;  %v2836_v47 = vmax.f32 %v2628_v5, %v2699_v8  ;;  %3182 = vst.msk [vmem:[#allocation3 + $0xa8] sm:$0xff] %vm343_vm0, %v696_v2  ;;  %v2079_v32 = vrot.slane %v7129_v23, 1  ;;  %v2081_v29 = vrot.slane %v7135_v17, 1  ;;  %3184 = vst.msk [vmem:[#allocation3 + $0xc8] sm:$0xff] %vm343_vm0, %v698_v35 }
 0x188   : > { %v2837_v57 = vmax.f32 %v2629_v43, %v2701_v6  ;;  %v2083_v7 = vrot.slane %v7137_v37, 1  ;;  %v2286_v25 = vrot.slane %v7127_v33, 2  ;;  %3185 = vst.msk [vmem:[#allocation3 + $0xd0] sm:$0xff] %vm343_vm0, %v699_v42  ;;  %v2287_v50 = vrot.slane %v7129_v23, 2  ;;  %v7185_v42 = vld [vmem:[#allocation3 + $0xf0] sm:$0xff] }
 0x189   : > { %v2915_v30 = vrot.slane %v2836_v47, 4  ;;  %v2080_v22 = vsel %vm911_vm2, %v2078_v41, %v2079_v32  ;;  %v2289_v51 = vrot.slane %v7135_v17, 2  ;;  %v2082_v24 = vsel %vm911_vm2, %v2079_v32, %v2081_v29  ;;  %v7187_v6 = vld [vmem:[#allocation3 + $0xf8] sm:$0x3f] }
 0x18a   : > { %v2916_v58 = vrot.slane %v2837_v57, 4  ;;  %v2084_v14 = vsel %vm911_vm2, %v2081_v29, %v2083_v7  ;;  %v2214_v38 = vmax.f32 %v7127_v33, %v2080_v22  ;;  %v2215_v11 = vmax.f32 %v7129_v23, %v2082_v24  ;;  %v9097_v32 = vld [vmem:[#allocation42_spill] sm:$0xff] }
 0x18b   : > { %v3011_v52 = vmax.f32 %v2835_v56, %v2915_v30  ;;  %v2216_v45 = vmax.f32 %v7135_v17, %v2084_v14  ;;  %v2288_v27 = vsel %vm1120_vm3, %v2286_v25, %v2287_v50  ;;  %v2290_v55 = vsel %vm1120_vm3, %v2287_v50, %v2289_v51  ;;  %v7178_v56 = vld [vmem:[#allocation3 + $0xe0] sm:$0xff]  ;;  %v9098_v29 = vld [vmem:[#allocation38_spill] sm:$0xff] }
 0x18c   : > { %v2917_v31 = vsel %vm1538_vm5, %v2915_v30, %v2916_v58  ;;  %v3013_v60 = vmax.f32 %v2837_v57, %v2916_v58  ;;  %v2291_v34 = vrot.slane %v7137_v37, 2  ;;  %v2422_v19 = vmax.f32 %v2214_v38, %v2288_v27 }
 0x18d   : > { %v3012_v3 = vmax.f32 %v2836_v47, %v2917_v31  ;;  %v3117_v54 = vrot.slane %v3011_v52, 4  ;;  %v2423_v0 = vmax.f32 %v2215_v11, %v2290_v55  ;;  %v2494_v39 = vrot.slane %v7127_v33, 3 }
 0x18e   : > { %v3120_v28 = vrot.slane %v3013_v60, 4  ;;  %v2292_v53 = vsel %vm1120_vm3, %v2289_v51, %v2291_v34  ;;  %v2495_v15 = vrot.slane %v7129_v23, 3  ;;  %v2497_v18 = vrot.slane %v7135_v17, 3 }
 0x18f   : > { %v3118_v49 = vrot.slane %v3012_v3, 4  ;;  %v2424_v40 = vmax.f32 %v2216_v45, %v2292_v53  ;;  %v2499_v36 = vrot.slane %v7137_v37, 3  ;;  %v2702_v5 = vrot.slane %v7127_v33, 4 }
 0x190   : > { %v2496_v16 = vsel %vm1329_vm4, %v2494_v39, %v2495_v15  ;;  %v2703_v12 = vrot.slane %v7129_v23, 4  ;;  %v2705_v43 = vrot.slane %v7135_v17, 4  ;;  %v2498_v2 = vsel %vm1329_vm4, %v2495_v15, %v2497_v18  ;;  %v7183_v17 = vld [vmem:[#allocation3 + $0xe8] sm:$0xff] }
 0x191   : > { %v3119_v20 = vsel %vm1538_vm5, %v3117_v54, %v3118_v49  ;;  %v3121_v59 = vsel %vm1538_vm5, %v3118_v49, %v3120_v28  ;;  %v2500_v8 = vsel %vm1329_vm4, %v2497_v18, %v2499_v36  ;;  %v2630_v35 = vmax.f32 %v2422_v19, %v2496_v16 }
 0x192   : > { %4808 = vrot.lane.b32.xlu0 %v3119_v20, %s5327_s11  ;;  %4810 = vrot.lane.b32.xlu1 %v3121_v59, %s5327_s11  ;;  %v2631_v33 = vmax.f32 %v2423_v0, %v2498_v2  ;;  %v2632_v9 = vmax.f32 %v2424_v40, %v2500_v8  ;;  %v2707_v23 = vrot.slane %v7137_v37, 4  ;;  %v2704_v47 = vsel %vm1538_vm5, %v2702_v5, %v2703_v12 }
 0x193   : > { %v2706_v41 = vsel %vm1538_vm5, %v2703_v12, %v2705_v43  ;;  %v700_v57 = vmax.f32 %v9097_v32, %v6486_v26  ;;  %v701_v7 = vmax.f32 %v9098_v29, %v6490_v4  ;;  %v2838_v30 = vmax.f32 %v2630_v35, %v2704_v47  ;;  %v7227_v47 = vld [vmem:[#allocation3 + $0x100] sm:$0xff]  ;;  %v7234_v29 = vld [vmem:[#allocation3 + $0x110] sm:$0xff] }
 0x194   : > { %v2708_v25 = vsel %vm1538_vm5, %v2705_v43, %v2707_v23  ;;  %v2839_v37 = vmax.f32 %v2631_v33, %v2706_v41  ;;  %v2085_v22 = vrot.slane %v7178_v56, 1  ;;  %v2086_v51 = vrot.slane %v7183_v17, 1  ;;  %v7229_v41 = vld [vmem:[#allocation3 + $0x108] sm:$0xff] }
 0x195   : > { %v2840_v50 = vmax.f32 %v2632_v9, %v2708_v25  ;;  %v2088_v58 = vrot.slane %v7185_v42, 1  ;;  %v2090_v24 = vrot.slane %v7187_v6, 1  ;;  %3186 = vst.msk [vmem:[#allocation3 + $0xe8] sm:$0xff] %vm343_vm0, %v700_v57  ;;  %3187 = vst.msk [vmem:[#allocation3 + $0xf0] sm:$0xff] %vm343_vm0, %v701_v7  ;;  %v2293_v4 = vrot.slane %v7178_v56, 2 }
 0x196   : > { %v2918_v26 = vrot.slane %v2839_v37, 4  ;;  %v2294_v14 = vrot.slane %v7183_v17, 2  ;;  %v2296_v38 = vrot.slane %v7185_v42, 2  ;;  %v2087_v11 = vsel %vm911_vm2, %v2085_v22, %v2086_v51  ;;  %v7236_v7 = vld [vmem:[#allocation3 + $0x118] sm:$0x3f] }
 0x197   : > { %v2919_v52 = vrot.slane %v2840_v50, 4  ;;  %v2089_v45 = vsel %vm911_vm2, %v2086_v51, %v2088_v58  ;;  %v2091_v27 = vsel %vm911_vm2, %v2088_v58, %v2090_v24  ;;  %v2217_v60 = vmax.f32 %v7178_v56, %v2087_v11 }
 0x198   : > { %v3014_v31 = vmax.f32 %v2838_v30, %v2918_v26  ;;  %v2218_v55 = vmax.f32 %v7183_v17, %v2089_v45  ;;  %v2219_v34 = vmax.f32 %v7185_v42, %v2091_v27  ;;  %v2295_v19 = vsel %vm1120_vm3, %v2293_v4, %v2294_v14 }
 0x199   : > { %v2920_v3 = vsel %vm1538_vm5, %v2918_v26, %v2919_v52  ;;  %v3016_v54 = vmax.f32 %v2840_v50, %v2919_v52  ;;  %v2297_v0 = vsel %vm1120_vm3, %v2294_v14, %v2296_v38  ;;  %v2298_v39 = vrot.slane %v7187_v6, 2  ;;  %v9100_v50 = vld [vmem:[#allocation33_spill] sm:$0xff] }
 0x19a   : > { %v3015_v28 = vmax.f32 %v2839_v37, %v2920_v3  ;;  %v3122_v53 = vrot.slane %v3014_v31, 4  ;;  %v2425_v15 = vmax.f32 %v2217_v60, %v2295_v19  ;;  %v2426_v40 = vmax.f32 %v2218_v55, %v2297_v0  ;;  %v9099_v37 = vld [vmem:[#allocation28_spill] sm:$0xff] }
 0x19b   : > { %v3125_v49 = vrot.slane %v3016_v54, 4  ;;  %v2501_v18 = vrot.slane %v7178_v56, 3  ;;  %v2502_v36 = vrot.slane %v7183_v17, 3  ;;  %v2299_v5 = vsel %vm1120_vm3, %v2296_v38, %v2298_v39 }
 0x19c   : > { %v3123_v16 = vrot.slane %v3015_v28, 4  ;;  %v2504_v12 = vrot.slane %v7185_v42, 3  ;;  %v2506_v43 = vrot.slane %v7187_v6, 3  ;;  %v2427_v20 = vmax.f32 %v2219_v34, %v2299_v5 }
 0x19d   : > { %v2503_v59 = vsel %vm1329_vm4, %v2501_v18, %v2502_v36  ;;  %v2709_v2 = vrot.slane %v7178_v56, 4  ;;  %v2710_v8 = vrot.slane %v7183_v17, 4  ;;  %v2712_v17 = vrot.slane %v7185_v42, 4 }
 0x19e   : > { %v3124_v35 = vsel %vm1538_vm5, %v3122_v53, %v3123_v16  ;;  %v3126_v33 = vsel %vm1538_vm5, %v3123_v16, %v3125_v49  ;;  %v2505_v9 = vsel %vm1329_vm4, %v2502_v36, %v2504_v12  ;;  %v2507_v23 = vsel %vm1329_vm4, %v2504_v12, %v2506_v43 }
 0x19f   : > { %4812 = vrot.lane.b32.xlu0 %v3124_v35, %s5327_s11  ;;  %4814 = vrot.lane.b32.xlu1 %v3126_v33, %s5327_s11  ;;  %v2633_v32 = vmax.f32 %v2425_v15, %v2503_v59  ;;  %v2634_v56 = vmax.f32 %v2426_v40, %v2505_v9  ;;  %v2635_v57 = vmax.f32 %v2427_v20, %v2507_v23  ;;  %v2714_v30 = vrot.slane %v7187_v6, 4  ;;  %v7271_v9 = vld [vmem:[#allocation3 + $0x120] sm:$0xff] }
 0x1a0   : > { %v2711_v25 = vsel %vm1538_vm5, %v2709_v2, %v2710_v8  ;;  %v702_v22 = vmax.f32 %v9099_v37, %v6560_v48  ;;  %v703_v51 = vmax.f32 %v9100_v50, %v6563_v44  ;;  %v2713_v58 = vsel %vm1538_vm5, %v2710_v8, %v2712_v17  ;;  %v7286_v50 = vld [vmem:[#allocation3 + $0x130] sm:$0xff] }
 0x1a1   : > { %v2841_v24 = vmax.f32 %v2633_v32, %v2711_v25  ;;  %v2092_v26 = vrot.slane %v7227_v47, 1  ;;  %v2093_v42 = vrot.slane %v7229_v41, 1  ;;  %v2715_v4 = vsel %vm1538_vm5, %v2712_v17, %v2714_v30 }
 0x1a2   : > { %v2842_v14 = vmax.f32 %v2634_v56, %v2713_v58  ;;  %v2095_v38 = vrot.slane %v7234_v29, 1  ;;  %v2097_v6 = vrot.slane %v7236_v7, 1  ;;  %3188 = vst.msk [vmem:[#allocation3 + $0x108] sm:$0xff] %vm343_vm0, %v702_v22  ;;  %3189 = vst.msk [vmem:[#allocation3 + $0x110] sm:$0xff] %vm343_vm0, %v703_v51  ;;  %v2843_v48 = vmax.f32 %v2635_v57, %v2715_v4  ;;  %v7281_v22 = vld [vmem:[#allocation3 + $0x128] sm:$0xff] }
 0x1a3   : > { %v2094_v44 = vsel %vm911_vm2, %v2092_v26, %v2093_v42  ;;  %v2300_v52 = vrot.slane %v7227_v47, 2  ;;  %v2301_v11 = vrot.slane %v7229_v41, 2  ;;  %v2303_v0 = vrot.slane %v7234_v29, 2 }
 0x1a4   : > { %v2921_v45 = vrot.slane %v2842_v14, 4  ;;  %v2096_v27 = vsel %vm911_vm2, %v2093_v42, %v2095_v38  ;;  %v2098_v31 = vsel %vm911_vm2, %v2095_v38, %v2097_v6  ;;  %v2220_v60 = vmax.f32 %v7227_v47, %v2094_v44  ;;  %v9101_v42 = vld [vmem:[#allocation44_spill] sm:$0xff]  ;;  %v9102_v6 = vld [vmem:[#allocation45_spill] sm:$0xff] }
 0x1a5   : > { %v2922_v55 = vrot.slane %v2843_v48, 4  ;;  %v2221_v34 = vmax.f32 %v7229_v41, %v2096_v27  ;;  %v2222_v3 = vmax.f32 %v7234_v29, %v2098_v31  ;;  %v2302_v54 = vsel %vm1120_vm3, %v2300_v52, %v2301_v11 }
 0x1a6   : > { %v3017_v19 = vmax.f32 %v2841_v24, %v2921_v45  ;;  %v2305_v28 = vrot.slane %v7236_v7, 2  ;;  %v2428_v53 = vmax.f32 %v2220_v60, %v2302_v54  ;;  %v2508_v49 = vrot.slane %v7227_v47, 3 }
 0x1a7   : > { %v2923_v39 = vsel %vm1538_vm5, %v2921_v45, %v2922_v55  ;;  %v3019_v15 = vmax.f32 %v2843_v48, %v2922_v55  ;;  %v2509_v40 = vrot.slane %v7229_v41, 3  ;;  %v2304_v16 = vsel %vm1120_vm3, %v2301_v11, %v2303_v0 }
 0x1a8   : > { %v3018_v18 = vmax.f32 %v2842_v14, %v2923_v39  ;;  %v3127_v36 = vrot.slane %v3017_v19, 4  ;;  %v2306_v5 = vsel %vm1120_vm3, %v2303_v0, %v2305_v28  ;;  %v2429_v43 = vmax.f32 %v2221_v34, %v2304_v16 }
 0x1a9   : > { %v3130_v12 = vrot.slane %v3019_v15, 4  ;;  %v2430_v20 = vmax.f32 %v2222_v3, %v2306_v5  ;;  %v2510_v59 = vsel %vm1329_vm4, %v2508_v49, %v2509_v40  ;;  %v2511_v8 = vrot.slane %v7234_v29, 3 }
 0x1aa   : > { %v3128_v2 = vrot.slane %v3018_v18, 4  ;;  %v2513_v35 = vrot.slane %v7236_v7, 3  ;;  %v2636_v33 = vmax.f32 %v2428_v53, %v2510_v59  ;;  %v2716_v23 = vrot.slane %v7227_v47, 4 }
 0x1ab   : > { %v2717_v32 = vrot.slane %v7229_v41, 4  ;;  %v2719_v56 = vrot.slane %v7234_v29, 4  ;;  %v2721_v57 = vrot.slane %v7236_v7, 4  ;;  %v2512_v30 = vsel %vm1329_vm4, %v2509_v40, %v2511_v8  ;;  %v7288_v7 = vld [vmem:[#allocation3 + $0x138] sm:$0x3f] }
 0x1ac   : > { %v3129_v17 = vsel %vm1538_vm5, %v3127_v36, %v3128_v2  ;;  %v3131_v25 = vsel %vm1538_vm5, %v3128_v2, %v3130_v12  ;;  %v2514_v37 = vsel %vm1329_vm4, %v2511_v8, %v2513_v35  ;;  %v2637_v47 = vmax.f32 %v2429_v43, %v2512_v30 }
 0x1ad   : > { %4816 = vrot.lane.b32.xlu0 %v3129_v17, %s5327_s11  ;;  %4818 = vrot.lane.b32.xlu1 %v3131_v25, %s5327_s11  ;;  %v2638_v41 = vmax.f32 %v2430_v20, %v2514_v37  ;;  %v2718_v29 = vsel %vm1538_vm5, %v2716_v23, %v2717_v32  ;;  %v2099_v51 = vrot.slane %v7271_v9, 1  ;;  %v2720_v58 = vsel %vm1538_vm5, %v2717_v32, %v2719_v56 }
 0x1ae   : > { %v2722_v24 = vsel %vm1538_vm5, %v2719_v56, %v2721_v57  ;;  %v2844_v26 = vmax.f32 %v2636_v33, %v2718_v29  ;;  %v704_v4 = vmax.f32 %v9101_v42, %v6624_v46  ;;  %v2845_v14 = vmax.f32 %v2637_v47, %v2720_v58  ;;  %v7332_v47 = vld [vmem:[#allocation3 + $0x148] sm:$0xff]  ;;  %v7336_v58 = vld [vmem:[#allocation3 + $0x150] sm:$0xff] }
 0x1af   : > { %v2846_v38 = vmax.f32 %v2638_v41, %v2722_v24  ;;  %v705_v48 = vmax.f32 %v9102_v6, %v6631_v62  ;;  %v2100_v44 = vrot.slane %v7281_v22, 1  ;;  %v2102_v52 = vrot.slane %v7286_v50, 1  ;;  %v7338_v24 = vld [vmem:[#allocation3 + $0x158] sm:$0x3f]  ;;  %v9106_v6 = vld [vmem:[#allocation29_spill] sm:$0xff] }
 0x1b0   : > { %v2104_v11 = vrot.slane %v7288_v7, 1  ;;  %v2307_v45 = vrot.slane %v7271_v9, 2  ;;  %v2308_v27 = vrot.slane %v7281_v22, 2  ;;  %3190 = vst.msk [vmem:[#allocation3 + $0x128] sm:$0xff] %vm343_vm0, %v704_v4  ;;  %v2924_v31 = vrot.slane %v2845_v14, 4  ;;  %v9103_v4 = vld [vmem:[#allocation58_spill] sm:$0xff] }
 0x1b1   : > { %v2925_v60 = vrot.slane %v2846_v38, 4  ;;  %v2101_v46 = vsel %vm911_vm2, %v2099_v51, %v2100_v44  ;;  %v2310_v55 = vrot.slane %v7286_v50, 2  ;;  %3191 = vst.msk [vmem:[#allocation3 + $0x130] sm:$0xff] %vm343_vm0, %v705_v48  ;;  %v2103_v62 = vsel %vm911_vm2, %v2100_v44, %v2102_v52 }
 0x1b2   : > { %v2105_v34 = vsel %vm911_vm2, %v2102_v52, %v2104_v11  ;;  %v2223_v3 = vmax.f32 %v7271_v9, %v2101_v46  ;;  %v2309_v54 = vsel %vm1120_vm3, %v2307_v45, %v2308_v27  ;;  %v3020_v0 = vmax.f32 %v2844_v26, %v2924_v31 }
 0x1b3   : > { %v2926_v19 = vsel %vm1538_vm5, %v2924_v31, %v2925_v60  ;;  %v3022_v28 = vmax.f32 %v2846_v38, %v2925_v60  ;;  %v2224_v53 = vmax.f32 %v7281_v22, %v2103_v62  ;;  %v2225_v15 = vmax.f32 %v7286_v50, %v2105_v34  ;;  %v9105_v38 = vld [vmem:[#allocation59_spill] sm:$0xff] }
 0x1b4   : > { %v3021_v39 = vmax.f32 %v2845_v14, %v2926_v19  ;;  %v2311_v49 = vsel %vm1120_vm3, %v2308_v27, %v2310_v55  ;;  %v2312_v40 = vrot.slane %v7288_v7, 2  ;;  %v3132_v18 = vrot.slane %v3020_v0, 4  ;;  %v9104_v14 = vld [vmem:[#allocation32_spill] sm:$0xff] }
 0x1b5   : > { %v3135_v36 = vrot.slane %v3022_v28, 4  ;;  %v2431_v16 = vmax.f32 %v2223_v3, %v2309_v54  ;;  %v2432_v5 = vmax.f32 %v2224_v53, %v2311_v49  ;;  %v2515_v20 = vrot.slane %v7271_v9, 3 }
 0x1b6   : > { %v3133_v12 = vrot.slane %v3021_v39, 4  ;;  %v2313_v43 = vsel %vm1120_vm3, %v2310_v55, %v2312_v40  ;;  %v2516_v59 = vrot.slane %v7281_v22, 3  ;;  %v2518_v8 = vrot.slane %v7286_v50, 3 }
 0x1b7   : > { %v2433_v2 = vmax.f32 %v2225_v15, %v2313_v43  ;;  %v2520_v35 = vrot.slane %v7288_v7, 3  ;;  %v2723_v33 = vrot.slane %v7271_v9, 4  ;;  %v2724_v57 = vrot.slane %v7281_v22, 4  ;;  %v7330_v9 = vld [vmem:[#allocation3 + $0x140] sm:$0xff] }
 0x1b8   : > { %v3134_v23 = vsel %vm1538_vm5, %v3132_v18, %v3133_v12  ;;  %v3136_v32 = vsel %vm1538_vm5, %v3133_v12, %v3135_v36  ;;  %v2517_v56 = vsel %vm1329_vm4, %v2515_v20, %v2516_v59  ;;  %v2519_v17 = vsel %vm1329_vm4, %v2516_v59, %v2518_v8 }
 0x1b9   : > { %4820 = vrot.lane.b32.xlu0 %v3134_v23, %s5327_s11  ;;  %4822 = vrot.lane.b32.xlu1 %v3136_v32, %s5327_s11  ;;  %v2521_v25 = vsel %vm1329_vm4, %v2518_v8, %v2520_v35  ;;  %v2639_v30 = vmax.f32 %v2431_v16, %v2517_v56  ;;  %v2726_v37 = vrot.slane %v7286_v50, 4  ;;  %v2640_v41 = vmax.f32 %v2432_v5, %v2519_v17 }
 0x1ba   : > { %v2641_v29 = vmax.f32 %v2433_v2, %v2521_v25  ;;  %v2725_v51 = vsel %vm1538_vm5, %v2723_v33, %v2724_v57  ;;  %v2728_v22 = vrot.slane %v7288_v7, 4  ;;  %v706_v50 = vmax.f32 %v9104_v14, %v9103_v4  ;;  %v7387_v4 = vld [vmem:[#allocation3 + $0x178] sm:$0x3f] }
 0x1bb   : > { %v2727_v26 = vsel %vm1538_vm5, %v2724_v57, %v2726_v37  ;;  %v2847_v42 = vmax.f32 %v2639_v30, %v2725_v51  ;;  %v707_v48 = vmax.f32 %v9106_v6, %v9105_v38  ;;  %v2106_v11 = vrot.slane %v7330_v9, 1  ;;  %v7378_v51 = vld [vmem:[#allocation3 + $0x160] sm:$0xff]  ;;  %v9107_v38 = vld [vmem:[#allocation62_spill] sm:$0xff] }
 0x1bc   : > { %v2729_v44 = vsel %vm1538_vm5, %v2726_v37, %v2728_v22  ;;  %v2848_v52 = vmax.f32 %v2640_v41, %v2727_v26  ;;  %v2107_v7 = vrot.slane %v7332_v47, 1  ;;  %v2109_v27 = vrot.slane %v7336_v58, 1  ;;  %3192 = vst.msk [vmem:[#allocation3 + $0x148] sm:$0xff] %vm343_vm0, %v706_v50  ;;  %v9108_v6 = vld [vmem:[#allocation39_spill] sm:$0xff] }
 0x1bd   : > { %v2849_v45 = vmax.f32 %v2641_v29, %v2729_v44  ;;  %v2111_v31 = vrot.slane %v7338_v24, 1  ;;  %v2314_v60 = vrot.slane %v7330_v9, 2  ;;  %3193 = vst.msk [vmem:[#allocation3 + $0x150] sm:$0xff] %vm343_vm0, %v707_v48  ;;  %v2315_v62 = vrot.slane %v7332_v47, 2  ;;  %v9109_v44 = vld [vmem:[#allocation63_spill] sm:$0xff] }
 0x1be   : > { %v2927_v46 = vrot.slane %v2848_v52, 4  ;;  %v2108_v55 = vsel %vm911_vm2, %v2106_v11, %v2107_v7  ;;  %v2317_v34 = vrot.slane %v7336_v58, 2  ;;  %v2110_v54 = vsel %vm911_vm2, %v2107_v7, %v2109_v27 }
 0x1bf   : > { %v2928_v3 = vrot.slane %v2849_v45, 4  ;;  %v2112_v19 = vsel %vm911_vm2, %v2109_v27, %v2111_v31  ;;  %v2226_v0 = vmax.f32 %v7330_v9, %v2108_v55  ;;  %v2227_v53 = vmax.f32 %v7332_v47, %v2110_v54 }
 0x1c0   : > { %v3023_v28 = vmax.f32 %v2847_v42, %v2927_v46  ;;  %v2228_v39 = vmax.f32 %v7336_v58, %v2112_v19  ;;  %v2316_v15 = vsel %vm1120_vm3, %v2314_v60, %v2315_v62  ;;  %v2318_v18 = vsel %vm1120_vm3, %v2315_v62, %v2317_v34  ;;  %v7385_v42 = vld [vmem:[#allocation3 + $0x170] sm:$0xff] }
 0x1c1   : > { %v2929_v49 = vsel %vm1538_vm5, %v2927_v46, %v2928_v3  ;;  %v3025_v40 = vmax.f32 %v2849_v45, %v2928_v3  ;;  %v2319_v36 = vrot.slane %v7338_v24, 2  ;;  %v2434_v12 = vmax.f32 %v2226_v0, %v2316_v15 }
 0x1c2   : > { %v3024_v16 = vmax.f32 %v2848_v52, %v2929_v49  ;;  %v3137_v5 = vrot.slane %v3023_v28, 4  ;;  %v2435_v43 = vmax.f32 %v2227_v53, %v2318_v18  ;;  %v2522_v2 = vrot.slane %v7330_v9, 3  ;;  %v9110_v52 = vld [vmem:[#allocation40_spill] sm:$0xff] }
 0x1c3   : > { %v3140_v20 = vrot.slane %v3025_v40, 4  ;;  %v2320_v59 = vsel %vm1120_vm3, %v2317_v34, %v2319_v36  ;;  %v2523_v8 = vrot.slane %v7332_v47, 3  ;;  %v2525_v23 = vrot.slane %v7336_v58, 3 }
 0x1c4   : > { %v3138_v35 = vrot.slane %v3024_v16, 4  ;;  %v2436_v33 = vmax.f32 %v2228_v39, %v2320_v59  ;;  %v2527_v32 = vrot.slane %v7338_v24, 3  ;;  %v2730_v57 = vrot.slane %v7330_v9, 4 }
 0x1c5   : > { %v2524_v56 = vsel %vm1329_vm4, %v2522_v2, %v2523_v8  ;;  %v2731_v17 = vrot.slane %v7332_v47, 4  ;;  %v2733_v25 = vrot.slane %v7336_v58, 4  ;;  %v2526_v41 = vsel %vm1329_vm4, %v2523_v8, %v2525_v23  ;;  %v7383_v58 = vld [vmem:[#allocation3 + $0x168] sm:$0xff] }
 0x1c6   : > { %v3139_v30 = vsel %vm1538_vm5, %v3137_v5, %v3138_v35  ;;  %v3141_v37 = vsel %vm1538_vm5, %v3138_v35, %v3140_v20  ;;  %v2528_v29 = vsel %vm1329_vm4, %v2525_v23, %v2527_v32  ;;  %v2642_v22 = vmax.f32 %v2434_v12, %v2524_v56 }
 0x1c7   : > { %4824 = vrot.lane.b32.xlu0 %v3139_v30, %s5327_s11  ;;  %4826 = vrot.lane.b32.xlu1 %v3141_v37, %s5327_s11  ;;  %v2643_v9 = vmax.f32 %v2435_v43, %v2526_v41  ;;  %v2644_v26 = vmax.f32 %v2436_v33, %v2528_v29  ;;  %v2735_v47 = vrot.slane %v7338_v24, 4  ;;  %v2732_v14 = vsel %vm1538_vm5, %v2730_v57, %v2731_v17 }
 0x1c8   : > { %v2734_v50 = vsel %vm1538_vm5, %v2731_v17, %v2733_v25  ;;  %v708_v48 = vmax.f32 %v9108_v6, %v9107_v38  ;;  %v709_v11 = vmax.f32 %v9110_v52, %v9109_v44  ;;  %v2850_v45 = vmax.f32 %v2642_v22, %v2732_v14  ;;  %v7434_v38 = vld [vmem:[#allocation3 + $0x190] sm:$0xff]  ;;  %v7436_v6 = vld [vmem:[#allocation3 + $0x198] sm:$0x3f] }
 0x1c9   : > { %v2736_v7 = vsel %vm1538_vm5, %v2733_v25, %v2735_v47  ;;  %v2851_v24 = vmax.f32 %v2643_v9, %v2734_v50  ;;  %v2113_v27 = vrot.slane %v7378_v51, 1  ;;  %v2114_v60 = vrot.slane %v7383_v58, 1  ;;  %v7429_v47 = vld [vmem:[#allocation3 + $0x188] sm:$0xff]  ;;  %v9111_v52 = vld [vmem:[#allocation66_spill] sm:$0xff] }
 0x1ca   : > { %v2852_v31 = vmax.f32 %v2644_v26, %v2736_v7  ;;  %v2116_v46 = vrot.slane %v7385_v42, 1  ;;  %v2118_v55 = vrot.slane %v7387_v4, 1  ;;  %3194 = vst.msk [vmem:[#allocation3 + $0x168] sm:$0xff] %vm343_vm0, %v708_v48  ;;  %3195 = vst.msk [vmem:[#allocation3 + $0x170] sm:$0xff] %vm343_vm0, %v709_v11  ;;  %v2321_v34 = vrot.slane %v7378_v51, 2  ;;  %v7427_v26 = vld [vmem:[#allocation3 + $0x180] sm:$0xff] }
 0x1cb   : > { %v2930_v62 = vrot.slane %v2851_v24, 4  ;;  %v2322_v3 = vrot.slane %v7383_v58, 2  ;;  %v2324_v54 = vrot.slane %v7385_v42, 2  ;;  %v2115_v0 = vsel %vm911_vm2, %v2113_v27, %v2114_v60  ;;  %v9112_v11 = vld [vmem:[#allocation52_spill] sm:$0xff] }
 0x1cc   : > { %v2931_v19 = vrot.slane %v2852_v31, 4  ;;  %v2117_v28 = vsel %vm911_vm2, %v2114_v60, %v2116_v46  ;;  %v2119_v53 = vsel %vm911_vm2, %v2116_v46, %v2118_v55  ;;  %v2229_v15 = vmax.f32 %v7378_v51, %v2115_v0 }
 0x1cd   : > { %v3026_v39 = vmax.f32 %v2850_v45, %v2930_v62  ;;  %v2230_v49 = vmax.f32 %v7383_v58, %v2117_v28  ;;  %v2231_v40 = vmax.f32 %v7385_v42, %v2119_v53  ;;  %v2323_v16 = vsel %vm1120_vm3, %v2321_v34, %v2322_v3  ;;  %v9113_v45 = vld [vmem:[#allocation53_spill] sm:$0xff] }
 0x1ce   : > { %v2932_v18 = vsel %vm1538_vm5, %v2930_v62, %v2931_v19  ;;  %v3028_v36 = vmax.f32 %v2852_v31, %v2931_v19  ;;  %v2325_v5 = vsel %vm1120_vm3, %v2322_v3, %v2324_v54  ;;  %v2326_v20 = vrot.slane %v7387_v4, 2 }
 0x1cf   : > { %v3027_v12 = vmax.f32 %v2851_v24, %v2932_v18  ;;  %v3142_v43 = vrot.slane %v3026_v39, 4  ;;  %v2437_v59 = vmax.f32 %v2229_v15, %v2323_v16  ;;  %v2438_v8 = vmax.f32 %v2230_v49, %v2325_v5 }
 0x1d0   : > { %v3145_v2 = vrot.slane %v3028_v36, 4  ;;  %v2529_v35 = vrot.slane %v7378_v51, 3  ;;  %v2530_v33 = vrot.slane %v7383_v58, 3  ;;  %v2327_v32 = vsel %vm1120_vm3, %v2324_v54, %v2326_v20 }
 0x1d1   : > { %v3143_v23 = vrot.slane %v3027_v12, 4  ;;  %v2532_v56 = vrot.slane %v7385_v42, 3  ;;  %v2534_v57 = vrot.slane %v7387_v4, 3  ;;  %v2439_v17 = vmax.f32 %v2231_v40, %v2327_v32 }
 0x1d2   : > { %v2531_v25 = vsel %vm1329_vm4, %v2529_v35, %v2530_v33  ;;  %v2737_v30 = vrot.slane %v7378_v51, 4  ;;  %v2738_v37 = vrot.slane %v7383_v58, 4  ;;  %v2740_v58 = vrot.slane %v7385_v42, 4 }
 0x1d3   : > { %v3144_v41 = vsel %vm1538_vm5, %v3142_v43, %v3143_v23  ;;  %v3146_v29 = vsel %vm1538_vm5, %v3143_v23, %v3145_v2  ;;  %v2533_v22 = vsel %vm1329_vm4, %v2530_v33, %v2532_v56  ;;  %v2535_v9 = vsel %vm1329_vm4, %v2532_v56, %v2534_v57 }
 0x1d4   : > { %4828 = vrot.lane.b32.xlu0 %v3144_v41, %s5327_s11  ;;  %4830 = vrot.lane.b32.xlu1 %v3146_v29, %s5327_s11  ;;  %v2645_v14 = vmax.f32 %v2437_v59, %v2531_v25  ;;  %v2646_v51 = vmax.f32 %v2438_v8, %v2533_v22  ;;  %v2647_v50 = vmax.f32 %v2439_v17, %v2535_v9  ;;  %v2742_v44 = vrot.slane %v7387_v4, 4 }
 0x1d5   : > { %v2739_v48 = vsel %vm1538_vm5, %v2737_v30, %v2738_v37  ;;  %v710_v7 = vmax.f32 %v9112_v11, %v9111_v52  ;;  %v711_v24 = vmax.f32 %v9113_v45, %v6802_v10  ;;  %v2741_v27 = vsel %vm1538_vm5, %v2738_v37, %v2740_v58  ;;  %v7488_v52 = vld [vmem:[#allocation3 + $0x1b8] sm:$0x3f] }
 0x1d6   : > { %v2853_v31 = vmax.f32 %v2645_v14, %v2739_v48  ;;  %v2120_v60 = vrot.slane %v7427_v26, 1  ;;  %v2121_v42 = vrot.slane %v7429_v47, 1  ;;  %v2743_v46 = vsel %vm1538_vm5, %v2740_v58, %v2742_v44  ;;  %v7475_v14 = vld [vmem:[#allocation3 + $0x1a0] sm:$0xff]  ;;  %v7484_v44 = vld [vmem:[#allocation3 + $0x1a8] sm:$0xff]  ;;  %v7490_v11 = vld [vmem:[#allocation2 + $0x178] sm:$0xff] }
 0x1d7   : > { %v2854_v55 = vmax.f32 %v2646_v51, %v2741_v27  ;;  %v2123_v62 = vrot.slane %v7434_v38, 1  ;;  %v2125_v4 = vrot.slane %v7436_v6, 1  ;;  %3196 = vst.msk [vmem:[#allocation3 + $0x188] sm:$0xff] %vm343_vm0, %v710_v7  ;;  %3197 = vst.msk [vmem:[#allocation3 + $0x190] sm:$0xff] %vm343_vm0, %v711_v24  ;;  %v2855_v34 = vmax.f32 %v2647_v50, %v2743_v46  ;;  %v7492_v7 = vld [vmem:[#allocation2 + $0x188] sm:$0xff] }
 0x1d8   : > { %v2122_v10 = vsel %vm911_vm2, %v2120_v60, %v2121_v42  ;;  %v2328_v3 = vrot.slane %v7427_v26, 2  ;;  %v2329_v54 = vrot.slane %v7429_v47, 2  ;;  %v2331_v36 = vrot.slane %v7434_v38, 2 }
 0x1d9   : > { %v2933_v19 = vrot.slane %v2854_v55, 4  ;;  %v2124_v0 = vsel %vm911_vm2, %v2121_v42, %v2123_v62  ;;  %v2126_v28 = vsel %vm911_vm2, %v2123_v62, %v2125_v4  ;;  %v2232_v53 = vmax.f32 %v7427_v26, %v2122_v10  ;;  %v9115_v4 = vld [vmem:[#allocation57_spill] sm:$0xff] }
 0x1da   : > { %v2934_v39 = vrot.slane %v2855_v34, 4  ;;  %v2233_v15 = vmax.f32 %v7429_v47, %v2124_v0  ;;  %v2234_v49 = vmax.f32 %v7434_v38, %v2126_v28  ;;  %v2330_v40 = vsel %vm1120_vm3, %v2328_v3, %v2329_v54 }
 0x1db   : > { %v3029_v18 = vmax.f32 %v2853_v31, %v2933_v19  ;;  %v2333_v16 = vrot.slane %v7436_v6, 2  ;;  %v2440_v5 = vmax.f32 %v2232_v53, %v2330_v40  ;;  %v2536_v20 = vrot.slane %v7427_v26, 3 }
 0x1dc   : > { %v2935_v12 = vsel %vm1538_vm5, %v2933_v19, %v2934_v39  ;;  %v3031_v43 = vmax.f32 %v2855_v34, %v2934_v39  ;;  %v2537_v59 = vrot.slane %v7429_v47, 3  ;;  %v2332_v35 = vsel %vm1120_vm3, %v2329_v54, %v2331_v36 }
 0x1dd   : > { %v3030_v2 = vmax.f32 %v2854_v55, %v2935_v12  ;;  %v3147_v8 = vrot.slane %v3029_v18, 4  ;;  %v2334_v33 = vsel %vm1120_vm3, %v2331_v36, %v2333_v16  ;;  %v2441_v32 = vmax.f32 %v2233_v15, %v2332_v35  ;;  %v9114_v55 = vld [vmem:[#allocation56_spill] sm:$0xff] }
 0x1de   : > { %v3150_v23 = vrot.slane %v3031_v43, 4  ;;  %v2442_v56 = vmax.f32 %v2234_v49, %v2334_v33  ;;  %v2538_v57 = vsel %vm1329_vm4, %v2536_v20, %v2537_v59  ;;  %v2539_v25 = vrot.slane %v7434_v38, 3 }
 0x1df   : > { %v3148_v17 = vrot.slane %v3030_v2, 4  ;;  %v2541_v30 = vrot.slane %v7436_v6, 3  ;;  %v2648_v37 = vmax.f32 %v2440_v5, %v2538_v57  ;;  %v2744_v41 = vrot.slane %v7427_v26, 4 }
 0x1e0   : > { %v2745_v29 = vrot.slane %v7429_v47, 4  ;;  %v2747_v22 = vrot.slane %v7434_v38, 4  ;;  %v2749_v9 = vrot.slane %v7436_v6, 4  ;;  %v2540_v58 = vsel %vm1329_vm4, %v2537_v59, %v2539_v25  ;;  %v7486_v6 = vld [vmem:[#allocation3 + $0x1b0] sm:$0xff] }
 0x1e1   : > { %v3149_v51 = vsel %vm1538_vm5, %v3147_v8, %v3148_v17  ;;  %v3151_v50 = vsel %vm1538_vm5, %v3148_v17, %v3150_v23  ;;  %v2542_v48 = vsel %vm1329_vm4, %v2539_v25, %v2541_v30  ;;  %v2649_v26 = vmax.f32 %v2441_v32, %v2540_v58 }
 0x1e2   : > { %4832 = vrot.lane.b32.xlu0 %v3149_v51, %s5327_s11  ;;  %4834 = vrot.lane.b32.xlu1 %v3151_v50, %s5327_s11  ;;  %v2650_v47 = vmax.f32 %v2442_v56, %v2542_v48  ;;  %v2746_v38 = vsel %vm1538_vm5, %v2744_v41, %v2745_v29  ;;  %v505_v45 = vmax.f32 %v7490_v11, %v7492_v7  ;;  %v2127_v31 = vrot.slane %v7475_v14, 1 }
 0x1e3   : > { %v2748_v24 = vsel %vm1538_vm5, %v2745_v29, %v2747_v22  ;;  %v2750_v27 = vsel %vm1538_vm5, %v2747_v22, %v2749_v9  ;;  %v2856_v60 = vmax.f32 %v2648_v37, %v2746_v38  ;;  %v712_v62 = vmax.f32 %v9114_v55, %v6840_v61  ;;  %v7536_v38 = vld [vmem:[#allocation3 + $0x1c0] sm:$0xff] }
 0x1e4   : > { %v2857_v42 = vmax.f32 %v2649_v26, %v2748_v24  ;;  %v2858_v46 = vmax.f32 %v2650_v47, %v2750_v27  ;;  %v713_v34 = vmax.f32 %v9115_v4, %v6843_v13  ;;  %v2128_v10 = vrot.slane %v7484_v44, 1  ;;  %v5255_v24 = vld [vmem:[#allocation2 + $0x190] sm:$0xff] }
 0x1e5   : > { %v2130_v3 = vrot.slane %v7486_v6, 1  ;;  %v2132_v54 = vrot.slane %v7488_v52, 1  ;;  %v2335_v28 = vrot.slane %v7475_v14, 2  ;;  %v2336_v53 = vrot.slane %v7484_v44, 2  ;;  %3198 = vst.msk [vmem:[#allocation3 + $0x1a8] sm:$0xff] %vm343_vm0, %v712_v62  ;;  %v5257_v62 = vld [vmem:[#allocation2 + $0x160] sm:$0xff] }
 0x1e6   : > { %v2936_v19 = vrot.slane %v2857_v42, 4  ;;  %v2937_v0 = vrot.slane %v2858_v46, 4  ;;  %v2129_v39 = vsel %vm911_vm2, %v2127_v31, %v2128_v10  ;;  %v2338_v15 = vrot.slane %v7486_v6, 2  ;;  %3199 = vst.msk [vmem:[#allocation3 + $0x1b0] sm:$0xff] %vm343_vm0, %v713_v34  ;;  %v5256_v31 = vld [vmem:[#allocation2 + $0x198] sm:$0xff]  ;;  %v5258_v4 = vld [vmem:[#allocation2 + $0x170] sm:$0xff] }
 0x1e7   : > { %v2131_v61 = vsel %vm911_vm2, %v2128_v10, %v2130_v3  ;;  %v2133_v13 = vsel %vm911_vm2, %v2130_v3, %v2132_v54  ;;  %v2235_v36 = vmax.f32 %v7475_v14, %v2129_v39  ;;  %v2337_v43 = vsel %vm1120_vm3, %v2335_v28, %v2336_v53  ;;  %v5259_v10 = vld [vmem:[#allocation2 + $0x168] sm:$0xff] }
 0x1e8   : > { %v2938_v49 = vsel %vm1538_vm5, %v2936_v19, %v2937_v0  ;;  %v3032_v40 = vmax.f32 %v2856_v60, %v2936_v19  ;;  %v3034_v18 = vmax.f32 %v2858_v46, %v2937_v0  ;;  %v2236_v5 = vmax.f32 %v7484_v44, %v2131_v61  ;;  %v7549_v46 = vld [vmem:[#allocation3 + $0x1d0] sm:$0xff]  ;;  %v5260_v19 = vld [vmem:[#allocation2 + $0x180] sm:$0xff] }
 0x1e9   : > { %v3033_v16 = vmax.f32 %v2857_v42, %v2938_v49  ;;  %v2237_v12 = vmax.f32 %v7486_v6, %v2133_v13  ;;  %v2339_v2 = vsel %vm1120_vm3, %v2336_v53, %v2338_v15  ;;  %v2340_v8 = vrot.slane %v7488_v52, 2  ;;  %v7560_v61 = vld [vmem:[#allocation2 + $0x1a0] sm:$0xff] }
 0x1ea   : > { %v3152_v20 = vrot.slane %v3032_v40, 4  ;;  %v3155_v59 = vrot.slane %v3034_v18, 4  ;;  %v2443_v33 = vmax.f32 %v2235_v36, %v2337_v43  ;;  %v2444_v23 = vmax.f32 %v2236_v5, %v2339_v2 }
 0x1eb   : > { %v3153_v35 = vrot.slane %v3033_v16, 4  ;;  %v2543_v32 = vrot.slane %v7475_v14, 3  ;;  %v2341_v56 = vsel %vm1120_vm3, %v2338_v15, %v2340_v8  ;;  %v2544_v57 = vrot.slane %v7484_v44, 3 }
 0x1ec   : > { %v2546_v17 = vrot.slane %v7486_v6, 3  ;;  %v2548_v25 = vrot.slane %v7488_v52, 3  ;;  %v2445_v41 = vmax.f32 %v2237_v12, %v2341_v56  ;;  %v2751_v29 = vrot.slane %v7475_v14, 4  ;;  %v7538_v14 = vld [vmem:[#allocation3 + $0x1c8] sm:$0xff] }
 0x1ed   : > { %v3154_v30 = vsel %vm1538_vm5, %v3152_v20, %v3153_v35  ;;  %v3156_v37 = vsel %vm1538_vm5, %v3153_v35, %v3155_v59  ;;  %v2545_v22 = vsel %vm1329_vm4, %v2543_v32, %v2544_v57  ;;  %v2752_v50 = vrot.slane %v7484_v44, 4 }
 0x1ee   : > { %4836 = vrot.lane.b32.xlu0 %v3154_v30, %s5327_s11  ;;  %4838 = vrot.lane.b32.xlu1 %v3156_v37, %s5327_s11  ;;  %v2547_v9 = vsel %vm1329_vm4, %v2544_v57, %v2546_v17  ;;  %v2549_v51 = vsel %vm1329_vm4, %v2546_v17, %v2548_v25  ;;  %v2651_v58 = vmax.f32 %v2443_v33, %v2545_v22  ;;  %v2754_v47 = vrot.slane %v7486_v6, 4  ;;  %v9116_v57 = vld [vmem:[#allocation60_spill] sm:$0xff]  ;;  %v9117_v25 = vld [vmem:[#allocation61_spill] sm:$0xff] }
 0x1ef   : > { %v2652_v48 = vmax.f32 %v2444_v23, %v2547_v9  ;;  %v2653_v26 = vmax.f32 %v2445_v41, %v2549_v51  ;;  %v7543_v27 = vmax.f32 %v504_v21, %v5255_v24  ;;  %v7545_v60 = vmax.f32 %v505_v45, %v5256_v31 }
 0x1f0   : > { %v2753_v44 = vsel %vm1538_vm5, %v2751_v29, %v2752_v50  ;;  %v2756_v42 = vrot.slane %v7488_v52, 4  ;;  %v2755_v6 = vsel %vm1538_vm5, %v2752_v50, %v2754_v47  ;;  %v502_v34 = vmax.f32 %v5257_v62, %v5258_v4 }
 0x1f1   : > { %v2859_v55 = vmax.f32 %v2651_v58, %v2753_v44  ;;  %v503_v1 = vmax.f32 %v5259_v10, %v7490_v11  ;;  %v2860_v45 = vmax.f32 %v2652_v48, %v2755_v6  ;;  %v2134_v3 = vrot.slane %v7536_v38, 1  ;;  %v7562_v11 = vld [vmem:[#allocation2 + $0x1a8] sm:$0xff] }
 0x1f2   : > { %v2757_v21 = vsel %vm1538_vm5, %v2754_v47, %v2756_v42  ;;  %v2135_v52 = vrot.slane %v7538_v14, 1  ;;  %v550_v0 = vmax.f32 %v502_v34, %v5260_v19  ;;  %v2137_v53 = vrot.slane %v7549_v46, 1 }
 0x1f3   : > { %v2861_v54 = vmax.f32 %v2653_v26, %v2757_v21  ;;  %v551_v28 = vmax.f32 %v503_v1, %v7492_v7  ;;  %v2939_v39 = vrot.slane %v2860_v45, 4  ;;  %v2139_v15 = vrot.slane %v7553_v63, 1 }
 0x1f4   : > { %v2136_v13 = vsel %vm911_vm2, %v2134_v3, %v2135_v52  ;;  %v2342_v49 = vrot.slane %v7536_v38, 2  ;;  %v598_v18 = vmax.f32 %v550_v0, %v5255_v24  ;;  %v2138_v16 = vsel %vm911_vm2, %v2135_v52, %v2137_v53  ;;  %v456_v3 = vld [vmem:[#allocation2 + $0x1b0] sm:$0xff]  ;;  %v7600_v52 = vld [vmem:[#allocation3 + $0x1e0] sm:$0xff] }
 0x1f5   : > { %v2940_v40 = vrot.slane %v2861_v54, 4  ;;  %v599_v36 = vmax.f32 %v551_v28, %v5256_v31  ;;  %v3035_v5 = vmax.f32 %v2859_v55, %v2939_v39  ;;  %v2140_v7 = vsel %vm911_vm2, %v2137_v53, %v2139_v15  ;;  %v457_v28 = vld [vmem:[#allocation2 + $0x1b8] sm:$0xff]  ;;  %v7607_v53 = vld [vmem:[#allocation3 + $0x1f0] sm:$0xff] }
 0x1f6   : > { %v2238_v12 = vmax.f32 %v7536_v38, %v2136_v13  ;;  %v2239_v43 = vmax.f32 %v7538_v14, %v2138_v16  ;;  %v646_v2 = vmax.f32 %v598_v18, %v7560_v61  ;;  %v2240_v23 = vmax.f32 %v7549_v46, %v2140_v7 }
 0x1f7   : > { %v2941_v20 = vsel %vm1538_vm5, %v2939_v39, %v2940_v40  ;;  %v3037_v59 = vmax.f32 %v2861_v54, %v2940_v40  ;;  %v647_v8 = vmax.f32 %v599_v36, %v7562_v11  ;;  %v3157_v33 = vrot.slane %v3035_v5, 4  ;;  %v7602_v54 = vld [vmem:[#allocation3 + $0x1e8] sm:$0xff] }
 0x1f8   : > { %v3036_v35 = vmax.f32 %v2860_v45, %v2941_v20  ;;  %v2343_v32 = vrot.slane %v7538_v14, 2  ;;  %v714_v17 = vmax.f32 %v9116_v57, %v646_v2  ;;  %v2345_v37 = vrot.slane %v7549_v46, 2 }
 0x1f9   : > { %v3160_v56 = vrot.slane %v3037_v59, 4  ;;  %v715_v30 = vmax.f32 %v9117_v25, %v647_v8  ;;  %v2347_v22 = vrot.slane %v7553_v63, 2  ;;  %v2550_v9 = vrot.slane %v7536_v38, 3  ;;  %v9119_v59 = vld [vmem:[#allocation65_spill] sm:$0xff] }
 0x1fa   : > { %v3158_v41 = vrot.slane %v3036_v35, 4  ;;  %v2344_v29 = vsel %vm1120_vm3, %v2342_v49, %v2343_v32  ;;  %v2346_v51 = vsel %vm1120_vm3, %v2343_v32, %v2345_v37  ;;  %v2551_v58 = vrot.slane %v7538_v14, 3  ;;  %3200 = vst.msk [vmem:[#allocation3 + $0x1c8] sm:$0xff] %vm343_vm0, %v714_v17 }
 0x1fb   : > { %v2446_v50 = vmax.f32 %v2238_v12, %v2344_v29  ;;  %v2553_v48 = vrot.slane %v7549_v46, 3  ;;  %3201 = vst.msk [vmem:[#allocation3 + $0x1d0] sm:$0xff] %vm343_vm0, %v715_v30  ;;  %v2348_v24 = vsel %vm1120_vm3, %v2345_v37, %v2347_v22  ;;  %v2447_v31 = vmax.f32 %v2239_v43, %v2346_v51  ;;  %v9118_v12 = vld [vmem:[#allocation64_spill] sm:$0xff] }
 0x1fc   : > { %v3159_v26 = vsel %vm1538_vm5, %v3157_v33, %v3158_v41  ;;  %v3161_v47 = vsel %vm1538_vm5, %v3158_v41, %v3160_v56  ;;  %v2448_v44 = vmax.f32 %v2240_v23, %v2348_v24  ;;  %v2552_v42 = vsel %vm1329_vm4, %v2550_v9, %v2551_v58 }
 0x1fd   : > { %4840 = vrot.lane.b32.xlu0 %v3159_v26, %s5327_s11  ;;  %4842 = vrot.lane.b32.xlu1 %v3161_v47, %s5327_s11  ;;  %v2554_v6 = vsel %vm1329_vm4, %v2551_v58, %v2553_v48  ;;  %v2555_v55 = vrot.slane %v7553_v63, 3  ;;  %v2654_v62 = vmax.f32 %v2446_v50, %v2552_v42  ;;  %v2758_v34 = vrot.slane %v7536_v38, 4 }
 0x1fe   : > { %v2655_v4 = vmax.f32 %v2447_v31, %v2554_v6  ;;  %v2759_v10 = vrot.slane %v7538_v14, 4  ;;  %v2761_v21 = vrot.slane %v7549_v46, 4  ;;  %v2763_v45 = vrot.slane %v7553_v63, 4  ;;  %v7609_v14 = vld [vmem:[#allocation3 + $0x1f8] sm:$0x3f] }
 0x1ff   : > { %v2556_v1 = vsel %vm1329_vm4, %v2553_v48, %v2555_v55  ;;  %v600_v38 = vmax.f32 %v7543_v27, %v7560_v61  ;;  %v601_v13 = vmax.f32 %v7545_v60, %v7562_v11  ;;  %v2141_v18 = vrot.slane %v7600_v52, 1 }
 0x200   : > { %v2656_v19 = vmax.f32 %v2448_v44, %v2556_v1  ;;  %v2760_v0 = vsel %vm1538_vm5, %v2758_v34, %v2759_v10  ;;  %v2762_v46 = vsel %vm1538_vm5, %v2759_v10, %v2761_v21  ;;  %v2764_v63 = vsel %vm1538_vm5, %v2761_v21, %v2763_v45  ;;  %v7648_v34 = vld [vmem:[#allocation3] sm:$0xff] }
 0x201   : > { %v2862_v39 = vmax.f32 %v2654_v62, %v2760_v0  ;;  %v2863_v15 = vmax.f32 %v2655_v4, %v2762_v46  ;;  %v648_v40 = vmax.f32 %v600_v38, %v456_v3  ;;  %v649_v36 = vmax.f32 %v601_v13, %v457_v28  ;;  %v7652_v3 = vld [vmem:[#allocation3 + $0x8] sm:$0xff]  ;;  %v7656_v28 = vld [vmem:[#allocation3 + $0x10] sm:$0xff]  ;;  %v7658_v38 = vld [vmem:[#allocation3 + $0x18] sm:$0x3f] }
 0x202   : > { %v2864_v49 = vmax.f32 %v2656_v19, %v2764_v63  ;;  %v2142_v27 = vrot.slane %v7602_v54, 1  ;;  %v2144_v61 = vrot.slane %v7607_v53, 1  ;;  %v2146_v16 = vrot.slane %v7609_v14, 1 }
 0x203   : > { %v2942_v5 = vrot.slane %v2863_v15, 4  ;;  %v716_v43 = vmax.f32 %v9118_v12, %v648_v40  ;;  %v2349_v20 = vrot.slane %v7600_v52, 2  ;;  %v717_v60 = vmax.f32 %v9119_v59, %v649_v36 }
 0x204   : > { %v2943_v7 = vrot.slane %v2864_v49, 4  ;;  %v2143_v11 = vsel %vm911_vm2, %v2141_v18, %v2142_v27  ;;  %v2145_v2 = vsel %vm911_vm2, %v2142_v27, %v2144_v61  ;;  %v2147_v8 = vsel %vm911_vm2, %v2144_v61, %v2146_v16 }
 0x205   : > { %v3038_v33 = vmax.f32 %v2862_v39, %v2942_v5  ;;  %v2241_v32 = vmax.f32 %v7600_v52, %v2143_v11  ;;  %3202 = vst.msk [vmem:[#allocation3 + $0x1e8] sm:$0xff] %vm343_vm0, %v716_v43  ;;  %v2242_v57 = vmax.f32 %v7602_v54, %v2145_v2  ;;  %v2243_v17 = vmax.f32 %v7607_v53, %v2147_v8 }
 0x206   : > { %v2944_v35 = vsel %vm1538_vm5, %v2942_v5, %v2943_v7  ;;  %v3040_v23 = vmax.f32 %v2864_v49, %v2943_v7  ;;  %v2350_v25 = vrot.slane %v7602_v54, 2  ;;  %3203 = vst.msk [vmem:[#allocation3 + $0x1f0] sm:$0xff] %vm343_vm0, %v717_v60  ;;  %v2352_v41 = vrot.slane %v7607_v53, 2 }
 0x207   : > { %v3039_v56 = vmax.f32 %v2863_v15, %v2944_v35  ;;  %v3162_v30 = vrot.slane %v3038_v33, 4  ;;  %v2354_v29 = vrot.slane %v7609_v14, 2  ;;  %v2557_v51 = vrot.slane %v7600_v52, 3 }
 0x208   : > { %v3165_v37 = vrot.slane %v3040_v23, 4  ;;  %v2351_v9 = vsel %vm1120_vm3, %v2349_v20, %v2350_v25  ;;  %v2558_v50 = vrot.slane %v7602_v54, 3  ;;  %v2353_v58 = vsel %vm1120_vm3, %v2350_v25, %v2352_v41 }
 0x209   : > { %v3163_v22 = vrot.slane %v3039_v56, 4  ;;  %v2355_v48 = vsel %vm1120_vm3, %v2352_v41, %v2354_v29  ;;  %v2449_v26 = vmax.f32 %v2241_v32, %v2351_v9  ;;  %v2560_v47 = vrot.slane %v7607_v53, 3 }
 0x20a   : > { %v2450_v44 = vmax.f32 %v2242_v57, %v2353_v58  ;;  %v2451_v42 = vmax.f32 %v2243_v17, %v2355_v48  ;;  %v2559_v6 = vsel %vm1329_vm4, %v2557_v51, %v2558_v50  ;;  %v2562_v62 = vrot.slane %v7609_v14, 3 }
 0x20b   : > { %v3164_v24 = vsel %vm1538_vm5, %v3162_v30, %v3163_v22  ;;  %v3166_v31 = vsel %vm1538_vm5, %v3163_v22, %v3165_v37  ;;  %v2561_v55 = vsel %vm1329_vm4, %v2558_v50, %v2560_v47  ;;  %v2765_v4 = vrot.slane %v7600_v52, 4 }
 0x20c   : > { %4844 = vrot.lane.b32.xlu0 %v3164_v24, %s5327_s11  ;;  %4846 = vrot.lane.b32.xlu1 %v3166_v31, %s5327_s11  ;;  %v2657_v10 = vmax.f32 %v2449_v26, %v2559_v6  ;;  %v2658_v1 = vmax.f32 %v2450_v44, %v2561_v55  ;;  %v2766_v21 = vrot.slane %v7602_v54, 4  ;;  %v2768_v45 = vrot.slane %v7607_v53, 4 }
 0x20d   : > { %v2563_v19 = vsel %vm1329_vm4, %v2560_v47, %v2562_v62  ;;  %v2770_v0 = vrot.slane %v7609_v14, 4  ;;  %v3332_v39 = vrot.slane %v7648_v34, 1  ;;  %v3333_v15 = vrot.slane %v7652_v3, 1  ;;  %v7696_v62 = vld [vmem:[#allocation3 + $0x20] sm:$0xff] }
 0x20e   : > { %v2659_v46 = vmax.f32 %v2451_v42, %v2563_v19  ;;  %v2767_v52 = vsel %vm1538_vm5, %v2765_v4, %v2766_v21  ;;  %v2769_v63 = vsel %vm1538_vm5, %v2766_v21, %v2768_v45  ;;  %v3335_v14 = vrot.slane %v7656_v28, 1  ;;  %v7698_v4 = vld [vmem:[#allocation3 + $0x28] sm:$0xff]  ;;  %v7703_v21 = vld [vmem:[#allocation3 + $0x30] sm:$0xff] }
 0x20f   : > { %v2771_v54 = vsel %vm1538_vm5, %v2768_v45, %v2770_v0  ;;  %v2865_v53 = vmax.f32 %v2657_v10, %v2767_v52  ;;  %v2866_v13 = vmax.f32 %v2658_v1, %v2769_v63  ;;  %v3337_v40 = vrot.slane %v7658_v38, 1  ;;  %v7705_v45 = vld [vmem:[#allocation3 + $0x38] sm:$0x3f] }
 0x210   : > { %v2867_v49 = vmax.f32 %v2659_v46, %v2771_v54  ;;  %v3572_v18 = vrot.slane %v7648_v34, 2  ;;  %v3334_v27 = vsel %vm911_vm2, %v3332_v39, %v3333_v15  ;;  %v3573_v61 = vrot.slane %v7652_v3, 2 }
 0x211   : > { %v2945_v36 = vrot.slane %v2866_v13, 4  ;;  %v3575_v16 = vrot.slane %v7656_v28, 2  ;;  %v3336_v7 = vsel %vm911_vm2, %v3333_v15, %v3335_v14  ;;  %v3338_v12 = vsel %vm911_vm2, %v3335_v14, %v3337_v40 }
 0x212   : > { %v2946_v5 = vrot.slane %v2867_v49, 4  ;;  %v3508_v43 = vmax.f32 %v7648_v34, %v3334_v27  ;;  %v3509_v59 = vmax.f32 %v7652_v3, %v3336_v7  ;;  %v3510_v60 = vmax.f32 %v7656_v28, %v3338_v12 }
 0x213   : > { %v3041_v20 = vmax.f32 %v2865_v53, %v2945_v36  ;;  %v3574_v11 = vsel %vm1120_vm3, %v3572_v18, %v3573_v61  ;;  %v3576_v35 = vsel %vm1120_vm3, %v3573_v61, %v3575_v16  ;;  %v3577_v33 = vrot.slane %v7658_v38, 2 }
 0x214   : > { %v2947_v2 = vsel %vm1538_vm5, %v2945_v36, %v2946_v5  ;;  %v3043_v8 = vmax.f32 %v2867_v49, %v2946_v5  ;;  %v3748_v56 = vmax.f32 %v3508_v43, %v3574_v11  ;;  %v3749_v57 = vmax.f32 %v3509_v59, %v3576_v35 }
 0x215   : > { %v3042_v23 = vmax.f32 %v2866_v13, %v2947_v2  ;;  %v3167_v32 = vrot.slane %v3041_v20, 4  ;;  %v3578_v25 = vsel %vm1120_vm3, %v3575_v16, %v3577_v33  ;;  %v3812_v30 = vrot.slane %v7648_v34, 3 }
 0x216   : > { %v3170_v17 = vrot.slane %v3043_v8, 4  ;;  %v3813_v37 = vrot.slane %v7652_v3, 3  ;;  %v3750_v29 = vmax.f32 %v3510_v60, %v3578_v25  ;;  %v3815_v22 = vrot.slane %v7656_v28, 3 }
 0x217   : > { %v3168_v41 = vrot.slane %v3042_v23, 4  ;;  %v3817_v9 = vrot.slane %v7658_v38, 3  ;;  %v4052_v50 = vrot.slane %v7648_v34, 4  ;;  %v4053_v58 = vrot.slane %v7652_v3, 4 }
 0x218   : > { %v3814_v51 = vsel %vm1329_vm4, %v3812_v30, %v3813_v37  ;;  %v4055_v48 = vrot.slane %v7656_v28, 4  ;;  %v3816_v24 = vsel %vm1329_vm4, %v3813_v37, %v3815_v22  ;;  %v4057_v55 = vrot.slane %v7658_v38, 4 }
 0x219   : > { %v3169_v26 = vsel %vm1538_vm5, %v3167_v32, %v3168_v41  ;;  %v3171_v47 = vsel %vm1538_vm5, %v3168_v41, %v3170_v17  ;;  %v3818_v31 = vsel %vm1329_vm4, %v3815_v22, %v3817_v9  ;;  %v3988_v44 = vmax.f32 %v3748_v56, %v3814_v51  ;;  %v7729_v22 = vpop.permute.xlu0 %4692 }
 0x21a   : > { %4848 = vrot.lane.b32.xlu0 %v3169_v26, %s5327_s11  ;;  %4850 = vrot.lane.b32.xlu1 %v3171_v47, %s5327_s11  ;;  %v3989_v42 = vmax.f32 %v3749_v57, %v3816_v24  ;;  %v3990_v6 = vmax.f32 %v3750_v29, %v3818_v31  ;;  %v4054_v34 = vsel %vm1538_vm5, %v4052_v50, %v4053_v58  ;;  %v3339_v52 = vrot.slane %v7696_v62, 1 }
 0x21b   : > { %v4056_v10 = vsel %vm1538_vm5, %v4053_v58, %v4055_v48  ;;  %v3511_v1 = vmax.f32 %v7658_v38, %v3337_v40  ;;  %v4058_v3 = vsel %vm1538_vm5, %v4055_v48, %v4057_v55  ;;  %v4228_v19 = vmax.f32 %v3988_v44, %v4054_v34 }
 0x21c   : > { %v4229_v0 = vmax.f32 %v3989_v42, %v4056_v10  ;;  %v4230_v28 = vmax.f32 %v3990_v6, %v4058_v3  ;;  %v3340_v63 = vrot.slane %v7698_v4, 1  ;;  %v3342_v53 = vrot.slane %v7703_v21, 1  ;;  %v7751_v3 = vld [vmem:[#allocation3 + $0x50] sm:$0xff] }
 0x21d   : > { %v3751_v46 = vmax.f32 %v3511_v1, %v3577_v33  ;;  %v4340_v39 = vrot.slane %v4228_v19, 4  ;;  %v3344_v38 = vrot.slane %v7705_v45, 1  ;;  %v3579_v14 = vrot.slane %v7696_v62, 2 }
 0x21e   : > { %v4341_v54 = vrot.slane %v4229_v0, 4  ;;  %v4343_v13 = vrot.slane %v4230_v28, 4  ;;  %v3341_v49 = vsel %vm911_vm2, %v3339_v52, %v3340_v63  ;;  %v3343_v18 = vsel %vm911_vm2, %v3340_v63, %v3342_v53 }
 0x21f   : > { %v3991_v15 = vmax.f32 %v3751_v46, %v3817_v9  ;;  %v3345_v36 = vsel %vm911_vm2, %v3342_v53, %v3344_v38  ;;  %v3512_v27 = vmax.f32 %v7696_v62, %v3341_v49  ;;  %v3513_v43 = vmax.f32 %v7698_v4, %v3343_v18  ;;  %v7731_v9 = vpop.permute.xlu1 %4696 }
 0x220   : > { %v4342_v40 = vsel %vm1538_vm5, %v4340_v39, %v4341_v54  ;;  %v4344_v61 = vsel %vm1538_vm5, %v4341_v54, %v4343_v13  ;;  %v4470_v7 = vmax.f32 %v4230_v28, %v4343_v13  ;;  %v3514_v20 = vmax.f32 %v7703_v21, %v3345_v36  ;;  %v7759_v54 = vpop.permute.xlu0 %4694 }
 0x221   : > { %v4468_v16 = vmax.f32 %v4228_v19, %v4342_v40  ;;  %v4231_v5 = vmax.f32 %v3991_v15, %v4057_v55  ;;  %v4469_v12 = vmax.f32 %v4229_v0, %v4344_v61  ;;  %v3580_v59 = vrot.slane %v7698_v4, 2 }
 0x222   : > { %v3582_v2 = vrot.slane %v7703_v21, 2  ;;  %v3584_v8 = vrot.slane %v7705_v45, 2  ;;  %v3819_v23 = vrot.slane %v7696_v62, 3  ;;  %v3820_v32 = vrot.slane %v7698_v4, 3 }
 0x223   : > { %v4516_v60 = vmax.f32 %v4468_v16, %v4229_v0  ;;  %v4518_v11 = vmax.f32 %v4470_v7, %v4231_v5  ;;  %v4517_v35 = vmax.f32 %v4469_v12, %v4230_v28  ;;  %v3581_v33 = vsel %vm1120_vm3, %v3579_v14, %v3580_v59  ;;  %v7761_v53 = vpop.permute.xlu1 %4698 }
 0x224   : > { %v3583_v17 = vsel %vm1120_vm3, %v3580_v59, %v3582_v2  ;;  %v3585_v25 = vsel %vm1120_vm3, %v3582_v2, %v3584_v8  ;;  %v3752_v37 = vmax.f32 %v3512_v27, %v3581_v33  ;;  %v3821_v51 = vsel %vm1329_vm4, %v3819_v23, %v3820_v32  ;;  %v7778_v23 = vpop.permute.xlu0 %4700 }
 0x225   : > { %v4612_v56 = vrot.slane %v4516_v60, 2  ;;  %v4615_v57 = vrot.slane %v4518_v11, 2  ;;  %v4613_v30 = vrot.slane %v4517_v35, 2  ;;  %v3753_v41 = vmax.f32 %v3513_v43, %v3583_v17 }
 0x226   : > { %v3754_v29 = vmax.f32 %v3514_v20, %v3585_v25  ;;  %v3822_v50 = vrot.slane %v7703_v21, 3  ;;  %v3824_v58 = vrot.slane %v7705_v45, 3  ;;  %v4059_v48 = vrot.slane %v7696_v62, 4  ;;  %v7746_v62 = vld [vmem:[#allocation3 + $0x40] sm:$0xff] }
 0x227   : > { %v4614_v26 = vsel %vm1120_vm3, %v4612_v56, %v4613_v30  ;;  %v4616_v47 = vsel %vm1120_vm3, %v4613_v30, %v4615_v57  ;;  %v3992_v24 = vmax.f32 %v3752_v37, %v3821_v51  ;;  %v4060_v31 = vrot.slane %v7698_v4, 4  ;;  %v7749_v4 = vld [vmem:[#allocation3 + $0x48] sm:$0xff] }
 0x228   : > { %4884 = vrot.lane.b32.xlu0 %v4614_v26, %s5328_s17  ;;  %4886 = vrot.lane.b32.xlu1 %v4616_v47, %s5328_s17  ;;  %v3823_v44 = vsel %vm1329_vm4, %v3820_v32, %v3822_v50  ;;  %v3825_v42 = vsel %vm1329_vm4, %v3822_v50, %v3824_v58  ;;  %v4062_v6 = vrot.slane %v7703_v21, 4  ;;  %v4064_v55 = vrot.slane %v7705_v45, 4  ;;  %v7756_v21 = vld [vmem:[#allocation3 + $0x58] sm:$0x3f]  ;;  %v7780_v32 = vpop.permute.xlu1 %4702 }
 0x229   : > { %v3993_v34 = vmax.f32 %v3753_v41, %v3823_v44  ;;  %v3994_v10 = vmax.f32 %v3754_v29, %v3825_v42  ;;  %v4061_v1 = vsel %vm1538_vm5, %v4059_v48, %v4060_v31  ;;  %v3515_v46 = vmax.f32 %v7705_v45, %v3344_v38 }
 0x22a   : > { %v4063_v19 = vsel %vm1538_vm5, %v4060_v31, %v4062_v6  ;;  %v4065_v0 = vsel %vm1538_vm5, %v4062_v6, %v4064_v55  ;;  %v4232_v28 = vmax.f32 %v3992_v24, %v4061_v1  ;;  %v3346_v39 = vrot.slane %v7746_v62, 1 }
 0x22b   : > { %v4233_v52 = vmax.f32 %v3993_v34, %v4063_v19  ;;  %v4234_v63 = vmax.f32 %v3994_v10, %v4065_v0  ;;  %v3755_v15 = vmax.f32 %v3515_v46, %v3584_v8  ;;  %v3347_v49 = vrot.slane %v7749_v4, 1  ;;  %v7798_v0 = vpop.permute.xlu0 %4704 }
 0x22c   : > { %v4345_v13 = vrot.slane %v4232_v28, 4  ;;  %v3349_v14 = vrot.slane %v7751_v3, 1  ;;  %v3351_v45 = vrot.slane %v7756_v21, 1  ;;  %v3586_v38 = vrot.slane %v7746_v62, 2 }
 0x22d   : > { %v4346_v40 = vrot.slane %v4233_v52, 4  ;;  %v4348_v18 = vrot.slane %v4234_v63, 4  ;;  %v3995_v36 = vmax.f32 %v3755_v15, %v3824_v58  ;;  %v3348_v27 = vsel %vm911_vm2, %v3346_v39, %v3347_v49  ;;  %v7804_v39 = vld [vmem:[#allocation3 + $0x60] sm:$0xff] }
 0x22e   : > { %v3350_v61 = vsel %vm911_vm2, %v3347_v49, %v3349_v14  ;;  %v3587_v16 = vrot.slane %v7749_v4, 2  ;;  %v3352_v43 = vsel %vm911_vm2, %v3349_v14, %v3351_v45  ;;  %v3516_v11 = vmax.f32 %v7746_v62, %v3348_v27  ;;  %v7811_v49 = vld [vmem:[#allocation3 + $0x70] sm:$0xff]  ;;  %v7813_v14 = vld [vmem:[#allocation3 + $0x78] sm:$0x3f] }
 0x22f   : > { %v4347_v5 = vsel %vm1538_vm5, %v4345_v13, %v4346_v40  ;;  %v4349_v7 = vsel %vm1538_vm5, %v4346_v40, %v4348_v18  ;;  %v4473_v12 = vmax.f32 %v4234_v63, %v4348_v18  ;;  %v4235_v60 = vmax.f32 %v3995_v36, %v4064_v55  ;;  %v7806_v13 = vld [vmem:[#allocation3 + $0x68] sm:$0xff] }
 0x230   : > { %v4471_v20 = vmax.f32 %v4232_v28, %v4347_v5  ;;  %v4472_v59 = vmax.f32 %v4233_v52, %v4349_v7  ;;  %v3517_v2 = vmax.f32 %v7749_v4, %v3350_v61  ;;  %v3518_v8 = vmax.f32 %v7751_v3, %v3352_v43  ;;  %v7800_v28 = vpop.permute.xlu1 %4706 }
 0x231   : > { %v3588_v35 = vsel %vm1120_vm3, %v3586_v38, %v3587_v16  ;;  %v3589_v33 = vrot.slane %v7751_v3, 2  ;;  %v4521_v17 = vmax.f32 %v4473_v12, %v4235_v60  ;;  %v3591_v25 = vrot.slane %v7756_v21, 2  ;;  %v7822_v60 = vpop.permute.xlu0 %4708 }
 0x232   : > { %v4519_v56 = vmax.f32 %v4471_v20, %v4233_v52  ;;  %v4520_v57 = vmax.f32 %v4472_v59, %v4234_v63  ;;  %v3756_v37 = vmax.f32 %v3516_v11, %v3588_v35  ;;  %v3826_v41 = vrot.slane %v7746_v62, 3 }
 0x233   : > { %v3590_v30 = vsel %vm1120_vm3, %v3587_v16, %v3589_v33  ;;  %v3827_v29 = vrot.slane %v7749_v4, 3  ;;  %v4620_v58 = vrot.slane %v4521_v17, 2  ;;  %v3592_v48 = vsel %vm1120_vm3, %v3589_v33, %v3591_v25 }
 0x234   : > { %v4617_v51 = vrot.slane %v4519_v56, 2  ;;  %v4618_v50 = vrot.slane %v4520_v57, 2  ;;  %v3757_v26 = vmax.f32 %v3517_v2, %v3590_v30  ;;  %v3758_v47 = vmax.f32 %v3518_v8, %v3592_v48  ;;  %v7824_v11 = vpop.permute.xlu1 %4710 }
 0x235   : > { %v3828_v24 = vsel %vm1329_vm4, %v3826_v41, %v3827_v29  ;;  %v3829_v31 = vrot.slane %v7751_v3, 3  ;;  %v3831_v6 = vrot.slane %v7756_v21, 3  ;;  %v4066_v10 = vrot.slane %v7746_v62, 4 }
 0x236   : > { %v4619_v44 = vsel %vm1120_vm3, %v4617_v51, %v4618_v50  ;;  %v4621_v42 = vsel %vm1120_vm3, %v4618_v50, %v4620_v58  ;;  %v3996_v55 = vmax.f32 %v3756_v37, %v3828_v24  ;;  %v4067_v1 = vrot.slane %v7749_v4, 4 }
 0x237   : > { %4888 = vrot.lane.b32.xlu0 %v4619_v44, %s5328_s17  ;;  %4890 = vrot.lane.b32.xlu1 %v4621_v42, %s5328_s17  ;;  %v3830_v34 = vsel %vm1329_vm4, %v3827_v29, %v3829_v31  ;;  %v4069_v19 = vrot.slane %v7751_v3, 4  ;;  %v3832_v46 = vsel %vm1329_vm4, %v3829_v31, %v3831_v6  ;;  %v4071_v63 = vrot.slane %v7756_v21, 4 }
 0x238   : > { %v3997_v52 = vmax.f32 %v3757_v26, %v3830_v34  ;;  %v3998_v15 = vmax.f32 %v3758_v47, %v3832_v46  ;;  %v4068_v62 = vsel %vm1538_vm5, %v4066_v10, %v4067_v1  ;;  %v3519_v3 = vmax.f32 %v7756_v21, %v3351_v45  ;;  %v7841_v34 = vpop.permute.xlu0 %4712  ;;  %v7843_v10 = vpop.permute.xlu1 %4714 }
 0x239   : > { %v4070_v4 = vsel %vm1538_vm5, %v4067_v1, %v4069_v19  ;;  %v4072_v40 = vsel %vm1538_vm5, %v4069_v19, %v4071_v63  ;;  %v4236_v18 = vmax.f32 %v3996_v55, %v4068_v62  ;;  %v3353_v61 = vrot.slane %v7804_v39, 1 }
 0x23a   : > { %v4237_v38 = vmax.f32 %v3997_v52, %v4070_v4  ;;  %v4238_v36 = vmax.f32 %v3998_v15, %v4072_v40  ;;  %v3759_v27 = vmax.f32 %v3519_v3, %v3591_v25  ;;  %v3354_v16 = vrot.slane %v7806_v13, 1 }
 0x23b   : > { %v4350_v5 = vrot.slane %v4236_v18, 4  ;;  %v3356_v12 = vrot.slane %v7811_v49, 1  ;;  %v3358_v21 = vrot.slane %v7813_v14, 1  ;;  %v3593_v59 = vrot.slane %v7804_v39, 2 }
 0x23c   : > { %v4351_v7 = vrot.slane %v4237_v38, 4  ;;  %v4353_v45 = vrot.slane %v4238_v36, 4  ;;  %v3999_v43 = vmax.f32 %v3759_v27, %v3831_v6  ;;  %v3355_v20 = vsel %vm911_vm2, %v3353_v61, %v3354_v16 }
 0x23d   : > { %v3357_v8 = vsel %vm911_vm2, %v3354_v16, %v3356_v12  ;;  %v3359_v35 = vsel %vm911_vm2, %v3356_v12, %v3358_v21  ;;  %v3520_v33 = vmax.f32 %v7804_v39, %v3355_v20  ;;  %v3594_v29 = vrot.slane %v7806_v13, 2 }
 0x23e   : > { %v4352_v2 = vsel %vm1538_vm5, %v4350_v5, %v4351_v7  ;;  %v4354_v56 = vsel %vm1538_vm5, %v4351_v7, %v4353_v45  ;;  %v4239_v17 = vmax.f32 %v3999_v43, %v4071_v63  ;;  %v4476_v25 = vmax.f32 %v4238_v36, %v4353_v45  ;;  %v7861_v45 = vld [vmem:[#allocation3 + $0x88] sm:$0xff] }
 0x23f   : > { %v4474_v57 = vmax.f32 %v4236_v18, %v4352_v2  ;;  %v4475_v30 = vmax.f32 %v4237_v38, %v4354_v56  ;;  %v3521_v37 = vmax.f32 %v7806_v13, %v3357_v8  ;;  %v3522_v41 = vmax.f32 %v7811_v49, %v3359_v35  ;;  %v7870_v8 = vpop.permute.xlu0 %4716  ;;  %v7872_v35 = vpop.permute.xlu1 %4718 }
 0x240   : > { %v4524_v50 = vmax.f32 %v4476_v25, %v4239_v17  ;;  %v3596_v58 = vrot.slane %v7811_v49, 2  ;;  %v3598_v48 = vrot.slane %v7813_v14, 2  ;;  %v3595_v47 = vsel %vm1120_vm3, %v3593_v59, %v3594_v29 }
 0x241   : > { %v4522_v51 = vmax.f32 %v4474_v57, %v4237_v38  ;;  %v4523_v26 = vmax.f32 %v4475_v30, %v4238_v36  ;;  %v3833_v24 = vrot.slane %v7804_v39, 3  ;;  %v3834_v31 = vrot.slane %v7806_v13, 3 }
 0x242   : > { %v4625_v42 = vrot.slane %v4524_v50, 2  ;;  %v3597_v6 = vsel %vm1120_vm3, %v3594_v29, %v3596_v58  ;;  %v3599_v55 = vsel %vm1120_vm3, %v3596_v58, %v3598_v48  ;;  %v3760_v19 = vmax.f32 %v3520_v33, %v3595_v47 }
 0x243   : > { %v4622_v44 = vrot.slane %v4522_v51, 2  ;;  %v4623_v1 = vrot.slane %v4523_v26, 2  ;;  %v3761_v46 = vmax.f32 %v3521_v37, %v3597_v6  ;;  %v3762_v52 = vmax.f32 %v3522_v41, %v3599_v55 }
 0x244   : > { %v3835_v63 = vsel %vm1329_vm4, %v3833_v24, %v3834_v31  ;;  %v3836_v15 = vrot.slane %v7811_v49, 3  ;;  %v3838_v62 = vrot.slane %v7813_v14, 3  ;;  %v4073_v4 = vrot.slane %v7804_v39, 4  ;;  %v7858_v39 = vld [vmem:[#allocation3 + $0x80] sm:$0xff] }
 0x245   : > { %v4624_v3 = vsel %vm1120_vm3, %v4622_v44, %v4623_v1  ;;  %v4626_v40 = vsel %vm1120_vm3, %v4623_v1, %v4625_v42  ;;  %v4000_v18 = vmax.f32 %v3760_v19, %v3835_v63  ;;  %v4074_v38 = vrot.slane %v7806_v13, 4  ;;  %v7863_v13 = vld [vmem:[#allocation3 + $0x90] sm:$0xff]  ;;  %v7886_v1 = vpop.permute.xlu0 %4720  ;;  %v7888_v19 = vpop.permute.xlu1 %4722 }
 0x246   : > { %4892 = vrot.lane.b32.xlu0 %v4624_v3, %s5328_s17  ;;  %4894 = vrot.lane.b32.xlu1 %v4626_v40, %s5328_s17  ;;  %v3837_v36 = vsel %vm1329_vm4, %v3834_v31, %v3836_v15  ;;  %v3839_v27 = vsel %vm1329_vm4, %v3836_v15, %v3838_v62  ;;  %v4076_v61 = vrot.slane %v7811_v49, 4  ;;  %v4078_v16 = vrot.slane %v7813_v14, 4  ;;  %v7868_v49 = vld [vmem:[#allocation3 + $0x98] sm:$0x3f] }
 0x247   : > { %v4001_v5 = vmax.f32 %v3761_v46, %v3837_v36  ;;  %v4002_v7 = vmax.f32 %v3762_v52, %v3839_v27  ;;  %v4075_v12 = vsel %vm1538_vm5, %v4073_v4, %v4074_v38  ;;  %v3523_v2 = vmax.f32 %v7813_v14, %v3358_v21 }
 0x248   : > { %v4077_v43 = vsel %vm1538_vm5, %v4074_v38, %v4076_v61  ;;  %v4079_v20 = vsel %vm1538_vm5, %v4076_v61, %v4078_v16  ;;  %v4240_v59 = vmax.f32 %v4000_v18, %v4075_v12  ;;  %v3360_v57 = vrot.slane %v7858_v39, 1 }
 0x249   : > { %v4241_v33 = vmax.f32 %v4001_v5, %v4077_v43  ;;  %v4242_v56 = vmax.f32 %v4002_v7, %v4079_v20  ;;  %v3763_v25 = vmax.f32 %v3523_v2, %v3598_v48  ;;  %v3361_v30 = vrot.slane %v7861_v45, 1 }
 0x24a   : > { %v4355_v17 = vrot.slane %v4240_v59, 4  ;;  %v3363_v37 = vrot.slane %v7863_v13, 1  ;;  %v3365_v14 = vrot.slane %v7868_v49, 1  ;;  %v3600_v21 = vrot.slane %v7858_v39, 2 }
 0x24b   : > { %v4356_v41 = vrot.slane %v4241_v33, 4  ;;  %v4358_v29 = vrot.slane %v4242_v56, 4  ;;  %v4003_v51 = vmax.f32 %v3763_v25, %v3838_v62  ;;  %v3362_v50 = vsel %vm911_vm2, %v3360_v57, %v3361_v30 }
 0x24c   : > { %v3364_v58 = vsel %vm911_vm2, %v3361_v30, %v3363_v37  ;;  %v3601_v26 = vrot.slane %v7861_v45, 2  ;;  %v3366_v31 = vsel %vm911_vm2, %v3363_v37, %v3365_v14  ;;  %v3524_v55 = vmax.f32 %v7858_v39, %v3362_v50 }
 0x24d   : > { %v4357_v47 = vsel %vm1538_vm5, %v4355_v17, %v4356_v41  ;;  %v4359_v48 = vsel %vm1538_vm5, %v4356_v41, %v4358_v29  ;;  %v4479_v24 = vmax.f32 %v4242_v56, %v4358_v29  ;;  %v4243_v6 = vmax.f32 %v4003_v51, %v4078_v16  ;;  %v7910_v41 = vpop.permute.xlu0 %4724  ;;  %v7912_v29 = vpop.permute.xlu1 %4726 }
 0x24e   : > { %v4477_v44 = vmax.f32 %v4240_v59, %v4357_v47  ;;  %v4478_v42 = vmax.f32 %v4241_v33, %v4359_v48  ;;  %v3525_v46 = vmax.f32 %v7861_v45, %v3364_v58  ;;  %v3526_v52 = vmax.f32 %v7863_v13, %v3366_v31  ;;  %9120 = vst [vmem:[#allocation25_spill] sm:$0xff] %v7910_v41  ;;  %v7916_v58 = vld [vmem:[#allocation3 + $0xa0] sm:$0xff]  ;;  %v7923_v48 = vld [vmem:[#allocation3 + $0xb0] sm:$0xff] }
 0x24f   : > { %v3602_v63 = vsel %vm1120_vm3, %v3600_v21, %v3601_v26  ;;  %v3603_v15 = vrot.slane %v7863_v13, 2  ;;  %v4527_v3 = vmax.f32 %v4479_v24, %v4243_v6  ;;  %v3605_v40 = vrot.slane %v7868_v49, 2  ;;  %9121 = vst [vmem:[#allocation26_spill] sm:$0xff] %v7912_v29  ;;  %v7925_v24 = vld [vmem:[#allocation3 + $0xb8] sm:$0x3f] }
 0x250   : > { %v4525_v62 = vmax.f32 %v4477_v44, %v4241_v33  ;;  %v4526_v4 = vmax.f32 %v4478_v42, %v4242_v56  ;;  %v3764_v38 = vmax.f32 %v3524_v55, %v3602_v63  ;;  %v3840_v36 = vrot.slane %v7858_v39, 3 }
 0x251   : > { %v3604_v18 = vsel %vm1120_vm3, %v3601_v26, %v3603_v15  ;;  %v3841_v27 = vrot.slane %v7861_v45, 3  ;;  %v4630_v5 = vrot.slane %v4527_v3, 2  ;;  %v3606_v7 = vsel %vm1120_vm3, %v3603_v15, %v3605_v40  ;;  %v7918_v26 = vld [vmem:[#allocation3 + $0xa8] sm:$0xff] }
 0x252   : > { %v4627_v61 = vrot.slane %v4525_v62, 2  ;;  %v4628_v16 = vrot.slane %v4526_v4, 2  ;;  %v3765_v12 = vmax.f32 %v3525_v46, %v3604_v18  ;;  %v3766_v43 = vmax.f32 %v3526_v52, %v3606_v7 }
 0x253   : > { %v3842_v20 = vsel %vm1329_vm4, %v3840_v36, %v3841_v27  ;;  %v3843_v59 = vrot.slane %v7863_v13, 3  ;;  %v3845_v56 = vrot.slane %v7868_v49, 3  ;;  %v4080_v25 = vrot.slane %v7858_v39, 4  ;;  %v7936_v36 = vpop.permute.xlu1 %4730 }
 0x254   : > { %v4629_v2 = vsel %vm1120_vm3, %v4627_v61, %v4628_v16  ;;  %v4631_v33 = vsel %vm1120_vm3, %v4628_v16, %v4630_v5  ;;  %v4004_v57 = vmax.f32 %v3764_v38, %v3842_v20  ;;  %v4081_v30 = vrot.slane %v7861_v45, 4  ;;  %v7934_v38 = vpop.permute.xlu0 %4728  ;;  %9123 = vst [vmem:[#allocation35_spill] sm:$0xff] %v7936_v36 }
 0x255   : > { %4896 = vrot.lane.b32.xlu0 %v4629_v2, %s5328_s17  ;;  %4898 = vrot.lane.b32.xlu1 %v4631_v33, %s5328_s17  ;;  %v3844_v17 = vsel %vm1329_vm4, %v3841_v27, %v3843_v59  ;;  %v4083_v37 = vrot.slane %v7863_v13, 4  ;;  %v3846_v21 = vsel %vm1329_vm4, %v3843_v59, %v3845_v56  ;;  %v4085_v50 = vrot.slane %v7868_v49, 4  ;;  %9122 = vst [vmem:[#allocation36_spill] sm:$0xff] %v7934_v38 }
 0x256   : > { %v4005_v51 = vmax.f32 %v3765_v12, %v3844_v17  ;;  %v4006_v47 = vmax.f32 %v3766_v43, %v3846_v21  ;;  %v4082_v39 = vsel %vm1538_vm5, %v4080_v25, %v4081_v30  ;;  %v3527_v13 = vmax.f32 %v7868_v49, %v3365_v14 }
 0x257   : > { %v4084_v45 = vsel %vm1538_vm5, %v4081_v30, %v4083_v37  ;;  %v4086_v31 = vsel %vm1538_vm5, %v4083_v37, %v4085_v50  ;;  %v4244_v44 = vmax.f32 %v4004_v57, %v4082_v39  ;;  %v3367_v46 = vrot.slane %v7916_v58, 1 }
 0x258   : > { %v4245_v42 = vmax.f32 %v4005_v51, %v4084_v45  ;;  %v4246_v6 = vmax.f32 %v4006_v47, %v4086_v31  ;;  %v3767_v55 = vmax.f32 %v3527_v13, %v3605_v40  ;;  %v3368_v52 = vrot.slane %v7918_v26, 1  ;;  %v7953_v13 = vpop.permute.xlu0 %4732  ;;  %v7955_v31 = vpop.permute.xlu1 %4734 }
 0x259   : > { %v4360_v63 = vrot.slane %v4244_v44, 4  ;;  %v3370_v62 = vrot.slane %v7923_v48, 1  ;;  %v3372_v49 = vrot.slane %v7925_v24, 1  ;;  %v3607_v18 = vrot.slane %v7916_v58, 2  ;;  %9124 = vst [vmem:[#allocation41_spill] sm:$0xff] %v7953_v13  ;;  %9125 = vst [vmem:[#allocation42_spill] sm:$0xff] %v7955_v31 }
 0x25a   : > { %v4361_v15 = vrot.slane %v4245_v42, 4  ;;  %v4363_v14 = vrot.slane %v4246_v6, 4  ;;  %v4007_v4 = vmax.f32 %v3767_v55, %v3845_v56  ;;  %v3369_v3 = vsel %vm911_vm2, %v3367_v46, %v3368_v52 }
 0x25b   : > { %v3371_v27 = vsel %vm911_vm2, %v3368_v52, %v3370_v62  ;;  %v3373_v61 = vsel %vm911_vm2, %v3370_v62, %v3372_v49  ;;  %v3528_v16 = vmax.f32 %v7916_v58, %v3369_v3  ;;  %v3608_v33 = vrot.slane %v7918_v26, 2 }
 0x25c   : > { %v4362_v40 = vsel %vm1538_vm5, %v4360_v63, %v4361_v15  ;;  %v4364_v5 = vsel %vm1538_vm5, %v4361_v15, %v4363_v14  ;;  %v4247_v12 = vmax.f32 %v4007_v4, %v4085_v50  ;;  %v4482_v43 = vmax.f32 %v4246_v6, %v4363_v14 }
 0x25d   : > { %v4480_v7 = vmax.f32 %v4244_v44, %v4362_v40  ;;  %v4481_v20 = vmax.f32 %v4245_v42, %v4364_v5  ;;  %v3529_v59 = vmax.f32 %v7918_v26, %v3371_v27  ;;  %v3530_v2 = vmax.f32 %v7923_v48, %v3373_v61 }
 0x25e   : > { %v4530_v57 = vmax.f32 %v4482_v43, %v4247_v12  ;;  %v3610_v17 = vrot.slane %v7923_v48, 2  ;;  %v3612_v25 = vrot.slane %v7925_v24, 2  ;;  %v3609_v37 = vsel %vm1120_vm3, %v3607_v18, %v3608_v33  ;;  %v7973_v12 = vld [vmem:[#allocation3 + $0xc8] sm:$0xff] }
 0x25f   : > { %v4528_v56 = vmax.f32 %v4480_v7, %v4245_v42  ;;  %v4529_v30 = vmax.f32 %v4481_v20, %v4246_v6  ;;  %v3847_v21 = vrot.slane %v7916_v58, 3  ;;  %v3848_v51 = vrot.slane %v7918_v26, 3 }
 0x260   : > { %v4635_v47 = vrot.slane %v4530_v57, 2  ;;  %v3611_v39 = vsel %vm1120_vm3, %v3608_v33, %v3610_v17  ;;  %v3613_v45 = vsel %vm1120_vm3, %v3610_v17, %v3612_v25  ;;  %v3768_v42 = vmax.f32 %v3528_v16, %v3609_v37  ;;  %v7982_v33 = vpop.permute.xlu0 %4736 }
 0x261   : > { %v4632_v50 = vrot.slane %v4528_v56, 2  ;;  %v4633_v44 = vrot.slane %v4529_v30, 2  ;;  %v3769_v55 = vmax.f32 %v3529_v59, %v3611_v39  ;;  %v3770_v6 = vmax.f32 %v3530_v2, %v3613_v45  ;;  %9126 = vst [vmem:[#allocation38_spill] sm:$0xff] %v7982_v33  ;;  %v7984_v56 = vpop.permute.xlu1 %4738 }
 0x262   : > { %v3849_v46 = vsel %vm1329_vm4, %v3847_v21, %v3848_v51  ;;  %v3850_v52 = vrot.slane %v7923_v48, 3  ;;  %v3852_v63 = vrot.slane %v7925_v24, 3  ;;  %v4087_v15 = vrot.slane %v7916_v58, 4  ;;  %v7970_v58 = vld [vmem:[#allocation3 + $0xc0] sm:$0xff]  ;;  %9127 = vst [vmem:[#allocation28_spill] sm:$0xff] %v7984_v56 }
 0x263   : > { %v4634_v62 = vsel %vm1120_vm3, %v4632_v50, %v4633_v44  ;;  %v4636_v14 = vsel %vm1120_vm3, %v4633_v44, %v4635_v47  ;;  %v4008_v4 = vmax.f32 %v3768_v42, %v3849_v46  ;;  %v4088_v3 = vrot.slane %v7918_v26, 4  ;;  %v7975_v26 = vld [vmem:[#allocation3 + $0xd0] sm:$0xff] }
 0x264   : > { %4900 = vrot.lane.b32.xlu0 %v4634_v62, %s5328_s17  ;;  %4902 = vrot.lane.b32.xlu1 %v4636_v14, %s5328_s17  ;;  %v3851_v18 = vsel %vm1329_vm4, %v3848_v51, %v3850_v52  ;;  %v3853_v40 = vsel %vm1329_vm4, %v3850_v52, %v3852_v63  ;;  %v4090_v27 = vrot.slane %v7923_v48, 4  ;;  %v4092_v61 = vrot.slane %v7925_v24, 4  ;;  %v7980_v48 = vld [vmem:[#allocation3 + $0xd8] sm:$0x3f] }
 0x265   : > { %v4009_v16 = vmax.f32 %v3769_v55, %v3851_v18  ;;  %v4010_v5 = vmax.f32 %v3770_v6, %v3853_v40  ;;  %v4089_v7 = vsel %vm1538_vm5, %v4087_v15, %v4088_v3  ;;  %v3531_v2 = vmax.f32 %v7925_v24, %v3372_v49 }
 0x266   : > { %v4091_v43 = vsel %vm1538_vm5, %v4088_v3, %v4090_v27  ;;  %v4093_v20 = vsel %vm1538_vm5, %v4090_v27, %v4092_v61  ;;  %v4248_v59 = vmax.f32 %v4008_v4, %v4089_v7  ;;  %v3374_v30 = vrot.slane %v7970_v58, 1  ;;  %v7998_v3 = vpop.permute.xlu0 %4740 }
 0x267   : > { %v4249_v57 = vmax.f32 %v4009_v16, %v4091_v43  ;;  %v4250_v17 = vmax.f32 %v4010_v5, %v4093_v20  ;;  %v3771_v21 = vmax.f32 %v3531_v2, %v3612_v25  ;;  %v3375_v51 = vrot.slane %v7973_v12, 1  ;;  %9128 = vst [vmem:[#allocation33_spill] sm:$0xff] %v7998_v3 }
 0x268   : > { %v4365_v37 = vrot.slane %v4248_v59, 4  ;;  %v3377_v50 = vrot.slane %v7975_v26, 1  ;;  %v3379_v24 = vrot.slane %v7980_v48, 1  ;;  %v3614_v49 = vrot.slane %v7970_v58, 2 }
 0x269   : > { %v4366_v47 = vrot.slane %v4249_v57, 4  ;;  %v4368_v39 = vrot.slane %v4250_v17, 4  ;;  %v4011_v45 = vmax.f32 %v3771_v21, %v3852_v63  ;;  %v3376_v44 = vsel %vm911_vm2, %v3374_v30, %v3375_v51  ;;  %v8000_v63 = vpop.permute.xlu1 %4742 }
 0x26a   : > { %v3378_v42 = vsel %vm911_vm2, %v3375_v51, %v3377_v50  ;;  %v3615_v55 = vrot.slane %v7973_v12, 2  ;;  %v3380_v52 = vsel %vm911_vm2, %v3377_v50, %v3379_v24  ;;  %v3532_v4 = vmax.f32 %v7970_v58, %v3376_v44  ;;  %9129 = vst [vmem:[#allocation44_spill] sm:$0xff] %v8000_v63 }
 0x26b   : > { %v4367_v6 = vsel %vm1538_vm5, %v4365_v37, %v4366_v47  ;;  %v4369_v25 = vsel %vm1538_vm5, %v4366_v47, %v4368_v39  ;;  %v4485_v46 = vmax.f32 %v4250_v17, %v4368_v39  ;;  %v4251_v14 = vmax.f32 %v4011_v45, %v4092_v61 }
 0x26c   : > { %v4483_v15 = vmax.f32 %v4248_v59, %v4367_v6  ;;  %v4484_v62 = vmax.f32 %v4249_v57, %v4369_v25  ;;  %v3533_v18 = vmax.f32 %v7973_v12, %v3378_v42  ;;  %v3534_v40 = vmax.f32 %v7975_v26, %v3380_v52 }
 0x26d   : > { %v3616_v27 = vsel %vm1120_vm3, %v3614_v49, %v3615_v55  ;;  %v3617_v16 = vrot.slane %v7975_v26, 2  ;;  %v4533_v43 = vmax.f32 %v4485_v46, %v4251_v14  ;;  %v3619_v20 = vrot.slane %v7980_v48, 2  ;;  %v8018_v6 = vpop.permute.xlu1 %4746 }
 0x26e   : > { %v4531_v5 = vmax.f32 %v4483_v15, %v4249_v57  ;;  %v4532_v7 = vmax.f32 %v4484_v62, %v4250_v17  ;;  %v3772_v59 = vmax.f32 %v3532_v4, %v3616_v27  ;;  %v3854_v2 = vrot.slane %v7970_v58, 3  ;;  %9131 = vst [vmem:[#allocation58_spill] sm:$0xff] %v8018_v6 }
 0x26f   : > { %v3618_v61 = vsel %vm1120_vm3, %v3615_v55, %v3617_v16  ;;  %v3855_v30 = vrot.slane %v7973_v12, 3  ;;  %v4640_v51 = vrot.slane %v4533_v43, 2  ;;  %v3620_v50 = vsel %vm1120_vm3, %v3617_v16, %v3619_v20  ;;  %v8016_v55 = vpop.permute.xlu0 %4744 }
 0x270   : > { %v4637_v37 = vrot.slane %v4531_v5, 2  ;;  %v4638_v21 = vrot.slane %v4532_v7, 2  ;;  %v3773_v47 = vmax.f32 %v3533_v18, %v3618_v61  ;;  %v3774_v39 = vmax.f32 %v3534_v40, %v3620_v50  ;;  %9130 = vst [vmem:[#allocation45_spill] sm:$0xff] %v8016_v55  ;;  %v8028_v18 = vld [vmem:[#allocation3 + $0xe0] sm:$0xff]  ;;  %v8030_v40 = vld [vmem:[#allocation3 + $0xe8] sm:$0xff]  ;;  %v8035_v7 = vld [vmem:[#allocation3 + $0xf0] sm:$0xff] }
 0x271   : > { %v3856_v57 = vsel %vm1329_vm4, %v3854_v2, %v3855_v30  ;;  %v3857_v17 = vrot.slane %v7975_v26, 3  ;;  %v3859_v44 = vrot.slane %v7980_v48, 3  ;;  %v4094_v46 = vrot.slane %v7970_v58, 4 }
 0x272   : > { %v4639_v49 = vsel %vm1120_vm3, %v4637_v37, %v4638_v21  ;;  %v4641_v45 = vsel %vm1120_vm3, %v4638_v21, %v4640_v51  ;;  %v4012_v42 = vmax.f32 %v3772_v59, %v3856_v57  ;;  %v4095_v52 = vrot.slane %v7973_v12, 4  ;;  %v8037_v12 = vld [vmem:[#allocation3 + $0xf8] sm:$0x3f] }
 0x273   : > { %4904 = vrot.lane.b32.xlu0 %v4639_v49, %s5328_s17  ;;  %4906 = vrot.lane.b32.xlu1 %v4641_v45, %s5328_s17  ;;  %v3858_v25 = vsel %vm1329_vm4, %v3855_v30, %v3857_v17  ;;  %v4097_v15 = vrot.slane %v7975_v26, 4  ;;  %v3860_v62 = vsel %vm1329_vm4, %v3857_v17, %v3859_v44  ;;  %v4099_v4 = vrot.slane %v7980_v48, 4 }
 0x274   : > { %v4013_v14 = vmax.f32 %v3773_v47, %v3858_v25  ;;  %v4014_v27 = vmax.f32 %v3774_v39, %v3860_v62  ;;  %v4096_v16 = vsel %vm1538_vm5, %v4094_v46, %v4095_v52  ;;  %v3535_v58 = vmax.f32 %v7980_v48, %v3379_v24  ;;  %v8044_v24 = vpop.permute.xlu0 %4748  ;;  %v8046_v47 = vpop.permute.xlu1 %4750 }
 0x275   : > { %v4098_v5 = vsel %vm1538_vm5, %v4095_v52, %v4097_v15  ;;  %v4100_v26 = vsel %vm1538_vm5, %v4097_v15, %v4099_v4  ;;  %v4252_v43 = vmax.f32 %v4012_v42, %v4096_v16  ;;  %v3381_v30 = vrot.slane %v8028_v18, 1  ;;  %9132 = vst [vmem:[#allocation32_spill] sm:$0xff] %v8044_v24  ;;  %9133 = vst [vmem:[#allocation59_spill] sm:$0xff] %v8046_v47 }
 0x276   : > { %v4253_v61 = vmax.f32 %v4013_v14, %v4098_v5  ;;  %v4254_v59 = vmax.f32 %v4014_v27, %v4100_v26  ;;  %v3775_v2 = vmax.f32 %v3535_v58, %v3619_v20  ;;  %v3382_v37 = vrot.slane %v8030_v40, 1 }
 0x277   : > { %v4370_v21 = vrot.slane %v4252_v43, 4  ;;  %v3384_v50 = vrot.slane %v8035_v7, 1  ;;  %v3386_v48 = vrot.slane %v8037_v12, 1  ;;  %v3621_v20 = vrot.slane %v8028_v18, 2 }
 0x278   : > { %v4371_v51 = vrot.slane %v4253_v61, 4  ;;  %v4373_v39 = vrot.slane %v4254_v59, 4  ;;  %v4015_v57 = vmax.f32 %v3775_v2, %v3859_v44  ;;  %v3383_v17 = vsel %vm911_vm2, %v3381_v30, %v3382_v37 }
 0x279   : > { %v3385_v45 = vsel %vm911_vm2, %v3382_v37, %v3384_v50  ;;  %v3387_v42 = vsel %vm911_vm2, %v3384_v50, %v3386_v48  ;;  %v3536_v25 = vmax.f32 %v8028_v18, %v3383_v17  ;;  %v3622_v16 = vrot.slane %v8030_v40, 2 }
 0x27a   : > { %v4372_v49 = vsel %vm1538_vm5, %v4370_v21, %v4371_v51  ;;  %v4374_v46 = vsel %vm1538_vm5, %v4371_v51, %v4373_v39  ;;  %v4255_v15 = vmax.f32 %v4015_v57, %v4099_v4  ;;  %v4488_v62 = vmax.f32 %v4254_v59, %v4373_v39  ;;  %v8063_v21 = vpop.permute.xlu0 %4752  ;;  %v8065_v51 = vpop.permute.xlu1 %4754 }
 0x27b   : > { %v4486_v52 = vmax.f32 %v4252_v43, %v4372_v49  ;;  %v4487_v14 = vmax.f32 %v4253_v61, %v4374_v46  ;;  %v3537_v44 = vmax.f32 %v8030_v40, %v3385_v45  ;;  %v3538_v27 = vmax.f32 %v8035_v7, %v3387_v42  ;;  %9134 = vst [vmem:[#allocation29_spill] sm:$0xff] %v8063_v21 }
 0x27c   : > { %v4536_v58 = vmax.f32 %v4488_v62, %v4255_v15  ;;  %v3624_v26 = vrot.slane %v8035_v7, 2  ;;  %v3626_v2 = vrot.slane %v8037_v12, 2  ;;  %v3623_v37 = vsel %vm1120_vm3, %v3621_v20, %v3622_v16  ;;  %9135 = vst [vmem:[#allocation62_spill] sm:$0xff] %v8065_v51 }
 0x27d   : > { %v4534_v5 = vmax.f32 %v4486_v52, %v4253_v61  ;;  %v4535_v30 = vmax.f32 %v4487_v14, %v4254_v59  ;;  %v3861_v43 = vrot.slane %v8028_v18, 3  ;;  %v3862_v4 = vrot.slane %v8030_v40, 3 }
 0x27e   : > { %v4645_v39 = vrot.slane %v4536_v58, 2  ;;  %v3625_v61 = vsel %vm1120_vm3, %v3622_v16, %v3624_v26  ;;  %v3627_v57 = vsel %vm1120_vm3, %v3624_v26, %v3626_v2  ;;  %v3776_v49 = vmax.f32 %v3536_v25, %v3623_v37  ;;  %v8085_v37 = vld [vmem:[#allocation3 + $0x108] sm:$0xff] }
 0x27f   : > { %v4642_v50 = vrot.slane %v4534_v5, 2  ;;  %v4643_v17 = vrot.slane %v4535_v30, 2  ;;  %v3777_v45 = vmax.f32 %v3537_v44, %v3625_v61  ;;  %v3778_v59 = vmax.f32 %v3538_v27, %v3627_v57  ;;  %v8096_v57 = vld [vmem:[#allocation3 + $0x118] sm:$0x3f] }
 0x280   : > { %v3863_v20 = vsel %vm1329_vm4, %v3861_v43, %v3862_v4  ;;  %v3864_v42 = vrot.slane %v8035_v7, 3  ;;  %v3866_v46 = vrot.slane %v8037_v12, 3  ;;  %v4101_v52 = vrot.slane %v8028_v18, 4  ;;  %v8082_v18 = vld [vmem:[#allocation3 + $0x100] sm:$0xff]  ;;  %v8089_v43 = vpop.permute.xlu0 %4788 }
 0x281   : > { %v4644_v15 = vsel %vm1120_vm3, %v4642_v50, %v4643_v17  ;;  %v4646_v62 = vsel %vm1120_vm3, %v4643_v17, %v4645_v39  ;;  %v4016_v14 = vmax.f32 %v3776_v49, %v3863_v20  ;;  %v4102_v16 = vrot.slane %v8030_v40, 4  ;;  %v8087_v40 = vld [vmem:[#allocation3 + $0x110] sm:$0xff]  ;;  %v8091_v50 = vpop.permute.xlu1 %4790 }
 0x282   : > { %4908 = vrot.lane.b32.xlu0 %v4644_v15, %s5328_s17  ;;  %4910 = vrot.lane.b32.xlu1 %v4646_v62, %s5328_s17  ;;  %v3865_v25 = vsel %vm1329_vm4, %v3862_v4, %v3864_v42  ;;  %v3867_v44 = vsel %vm1329_vm4, %v3864_v42, %v3866_v46  ;;  %v4104_v27 = vrot.slane %v8035_v7, 4  ;;  %v4106_v5 = vrot.slane %v8037_v12, 4 }
 0x283   : > { %v4017_v58 = vmax.f32 %v3777_v45, %v3865_v25  ;;  %v4018_v26 = vmax.f32 %v3778_v59, %v3867_v44  ;;  %v4103_v30 = vsel %vm1538_vm5, %v4101_v52, %v4102_v16  ;;  %v3539_v61 = vmax.f32 %v8037_v12, %v3386_v48 }
 0x284   : > { %v4105_v4 = vsel %vm1538_vm5, %v4102_v16, %v4104_v27  ;;  %v4107_v7 = vsel %vm1538_vm5, %v4104_v27, %v4106_v5  ;;  %v4256_v39 = vmax.f32 %v4016_v14, %v4103_v30  ;;  %v3388_v45 = vrot.slane %v8082_v18, 1  ;;  %v8109_v30 = vpop.permute.xlu0 %4792 }
 0x285   : > { %v4257_v17 = vmax.f32 %v4017_v58, %v4105_v4  ;;  %v4258_v49 = vmax.f32 %v4018_v26, %v4107_v7  ;;  %v3779_v20 = vmax.f32 %v3539_v61, %v3626_v2  ;;  %v3389_v42 = vrot.slane %v8085_v37, 1  ;;  %v8111_v4 = vpop.permute.xlu1 %4794 }
 0x286   : > { %v4375_v59 = vrot.slane %v4256_v39, 4  ;;  %v3391_v52 = vrot.slane %v8087_v40, 1  ;;  %v3393_v16 = vrot.slane %v8096_v57, 1  ;;  %v3628_v14 = vrot.slane %v8082_v18, 2 }
 0x287   : > { %v4376_v15 = vrot.slane %v4257_v17, 4  ;;  %v4378_v62 = vrot.slane %v4258_v49, 4  ;;  %v4019_v25 = vmax.f32 %v3779_v20, %v3866_v46  ;;  %v3390_v12 = vsel %vm911_vm2, %v3388_v45, %v3389_v42 }
 0x288   : > { %v3392_v48 = vsel %vm911_vm2, %v3389_v42, %v3391_v52  ;;  %v3629_v44 = vrot.slane %v8085_v37, 2  ;;  %v3394_v26 = vsel %vm911_vm2, %v3391_v52, %v3393_v16  ;;  %v3540_v45 = vmax.f32 %v8082_v18, %v3390_v12 }
 0x289   : > { %v4377_v27 = vsel %vm1538_vm5, %v4375_v59, %v4376_v15  ;;  %v4379_v2 = vsel %vm1538_vm5, %v4376_v15, %v4378_v62  ;;  %v4491_v58 = vmax.f32 %v4258_v49, %v4378_v62  ;;  %v4259_v46 = vmax.f32 %v4019_v25, %v4106_v5 }
 0x28a   : > { %v4489_v7 = vmax.f32 %v4256_v39, %v4377_v27  ;;  %v4490_v61 = vmax.f32 %v4257_v17, %v4379_v2  ;;  %v3541_v20 = vmax.f32 %v8085_v37, %v3392_v48  ;;  %v3542_v42 = vmax.f32 %v8087_v40, %v3394_v26 }
 0x28b   : > { %v3630_v59 = vsel %vm1120_vm3, %v3628_v14, %v3629_v44  ;;  %v3631_v15 = vrot.slane %v8087_v40, 2  ;;  %v4539_v52 = vmax.f32 %v4491_v58, %v4259_v46  ;;  %v3633_v21 = vrot.slane %v8096_v57, 2  ;;  %v8125_v58 = vpop.permute.xlu0 %4796 }
 0x28c   : > { %v4537_v62 = vmax.f32 %v4489_v7, %v4257_v17  ;;  %v4538_v51 = vmax.f32 %v4490_v61, %v4258_v49  ;;  %v3780_v39 = vmax.f32 %v3540_v45, %v3630_v59  ;;  %v3868_v5 = vrot.slane %v8082_v18, 3  ;;  %v8127_v7 = vpop.permute.xlu1 %4798 }
 0x28d   : > { %v3632_v47 = vsel %vm1120_vm3, %v3629_v44, %v3631_v15  ;;  %v3869_v25 = vrot.slane %v8085_v37, 3  ;;  %v4650_v27 = vrot.slane %v4539_v52, 2  ;;  %v3634_v2 = vsel %vm1120_vm3, %v3631_v15, %v3633_v21  ;;  %v8140_v52 = vld [vmem:[#allocation3 + $0x120] sm:$0xff] }
 0x28e   : > { %v4647_v12 = vrot.slane %v4537_v62, 2  ;;  %v4648_v48 = vrot.slane %v4538_v51, 2  ;;  %v3781_v14 = vmax.f32 %v3541_v20, %v3632_v47  ;;  %v3782_v26 = vmax.f32 %v3542_v42, %v3634_v2 }
 0x28f   : > { %v3870_v17 = vsel %vm1329_vm4, %v3868_v5, %v3869_v25  ;;  %v3871_v49 = vrot.slane %v8087_v40, 3  ;;  %v3873_v46 = vrot.slane %v8096_v57, 3  ;;  %v4108_v45 = vrot.slane %v8082_v18, 4 }
 0x290   : > { %v4649_v44 = vsel %vm1120_vm3, %v4647_v12, %v4648_v48  ;;  %v4651_v61 = vsel %vm1120_vm3, %v4648_v48, %v4650_v27  ;;  %v4020_v51 = vmax.f32 %v3780_v39, %v3870_v17  ;;  %v4109_v20 = vrot.slane %v8085_v37, 4  ;;  %v8142_v39 = vld [vmem:[#allocation3 + $0x128] sm:$0xff]  ;;  %v8147_v48 = vld [vmem:[#allocation3 + $0x130] sm:$0xff]  ;;  %v8149_v37 = vld [vmem:[#allocation3 + $0x138] sm:$0x3f] }
 0x291   : > { %4912 = vrot.lane.b32.xlu0 %v4649_v44, %s5328_s17  ;;  %4914 = vrot.lane.b32.xlu1 %v4651_v61, %s5328_s17  ;;  %v3872_v47 = vsel %vm1329_vm4, %v3869_v25, %v3871_v49  ;;  %v4111_v42 = vrot.slane %v8087_v40, 4  ;;  %v3874_v59 = vsel %vm1329_vm4, %v3871_v49, %v3873_v46  ;;  %v4113_v62 = vrot.slane %v8096_v57, 4  ;;  %v8154_v44 = vpop.permute.xlu0 %4800  ;;  %v8156_v61 = vpop.permute.xlu1 %4802 }
 0x292   : > { %v4021_v15 = vmax.f32 %v3781_v14, %v3872_v47  ;;  %v4022_v5 = vmax.f32 %v3782_v26, %v3874_v59  ;;  %v4110_v12 = vsel %vm1538_vm5, %v4108_v45, %v4109_v20  ;;  %v3543_v18 = vmax.f32 %v8096_v57, %v3393_v16 }
 0x293   : > { %v4112_v25 = vsel %vm1538_vm5, %v4109_v20, %v4111_v42  ;;  %v4114_v40 = vsel %vm1538_vm5, %v4111_v42, %v4113_v62  ;;  %v4260_v27 = vmax.f32 %v4020_v51, %v4110_v12  ;;  %v3395_v49 = vrot.slane %v8140_v52, 1 }
 0x294   : > { %v4261_v2 = vmax.f32 %v4021_v15, %v4112_v25  ;;  %v4262_v14 = vmax.f32 %v4022_v5, %v4114_v40  ;;  %v3783_v17 = vmax.f32 %v3543_v18, %v3633_v21  ;;  %v3396_v26 = vrot.slane %v8142_v39, 1 }
 0x295   : > { %v4380_v47 = vrot.slane %v4260_v27, 4  ;;  %v3398_v16 = vrot.slane %v8147_v48, 1  ;;  %v3400_v45 = vrot.slane %v8149_v37, 1  ;;  %v3635_v21 = vrot.slane %v8140_v52, 2  ;;  %v8172_v63 = vpop.permute.xlu0 %4804 }
 0x296   : > { %v4381_v57 = vrot.slane %v4261_v2, 4  ;;  %v4383_v20 = vrot.slane %v4262_v14, 4  ;;  %v4023_v42 = vmax.f32 %v3783_v17, %v3873_v46  ;;  %v3397_v51 = vsel %vm911_vm2, %v3395_v49, %v3396_v26 }
 0x297   : > { %v3399_v15 = vsel %vm911_vm2, %v3396_v26, %v3398_v16  ;;  %v3401_v5 = vsel %vm911_vm2, %v3398_v16, %v3400_v45  ;;  %v3544_v12 = vmax.f32 %v8140_v52, %v3397_v51  ;;  %v3636_v49 = vrot.slane %v8142_v39, 2  ;;  %v8174_v51 = vpop.permute.xlu1 %4806 }
 0x298   : > { %v4382_v59 = vsel %vm1538_vm5, %v4380_v47, %v4381_v57  ;;  %v4384_v25 = vsel %vm1538_vm5, %v4381_v57, %v4383_v20  ;;  %v4263_v40 = vmax.f32 %v4023_v42, %v4113_v62  ;;  %v4494_v24 = vmax.f32 %v4262_v14, %v4383_v20 }
 0x299   : > { %v4492_v18 = vmax.f32 %v4260_v27, %v4382_v59  ;;  %v4493_v6 = vmax.f32 %v4261_v2, %v4384_v25  ;;  %v3545_v46 = vmax.f32 %v8142_v39, %v3399_v15  ;;  %v3546_v17 = vmax.f32 %v8147_v48, %v3401_v5 }
 0x29a   : > { %v4542_v47 = vmax.f32 %v4494_v24, %v4263_v40  ;;  %v3638_v26 = vrot.slane %v8147_v48, 2  ;;  %v3640_v16 = vrot.slane %v8149_v37, 2  ;;  %v3637_v62 = vsel %vm1120_vm3, %v3635_v21, %v3636_v49 }
 0x29b   : > { %v4540_v55 = vmax.f32 %v4492_v18, %v4261_v2  ;;  %v4541_v27 = vmax.f32 %v4493_v6, %v4262_v14  ;;  %v3875_v57 = vrot.slane %v8140_v52, 3  ;;  %v3876_v20 = vrot.slane %v8142_v39, 3 }
 0x29c   : > { %v4655_v59 = vrot.slane %v4542_v47, 2  ;;  %v3639_v2 = vsel %vm1120_vm3, %v3636_v49, %v3638_v26  ;;  %v3641_v24 = vsel %vm1120_vm3, %v3638_v26, %v3640_v16  ;;  %v3784_v5 = vmax.f32 %v3544_v12, %v3637_v62  ;;  %v8198_v62 = vpop.permute.xlu1 %4810 }
 0x29d   : > { %v4652_v42 = vrot.slane %v4540_v55, 2  ;;  %v4653_v15 = vrot.slane %v4541_v27, 2  ;;  %v3785_v25 = vmax.f32 %v3545_v46, %v3639_v2  ;;  %v3786_v18 = vmax.f32 %v3546_v17, %v3641_v24  ;;  %v8196_v27 = vpop.permute.xlu0 %4808 }
 0x29e   : > { %v3877_v40 = vsel %vm1329_vm4, %v3875_v57, %v3876_v20  ;;  %v3878_v6 = vrot.slane %v8147_v48, 3  ;;  %v3880_v14 = vrot.slane %v8149_v37, 3  ;;  %v4115_v21 = vrot.slane %v8140_v52, 4  ;;  %v8194_v52 = vld [vmem:[#allocation3 + $0x140] sm:$0xff] }
 0x29f   : > { %v4654_v3 = vsel %vm1120_vm3, %v4652_v42, %v4653_v15  ;;  %v4656_v55 = vsel %vm1120_vm3, %v4653_v15, %v4655_v59  ;;  %v4024_v47 = vmax.f32 %v3784_v5, %v3877_v40  ;;  %v4116_v49 = vrot.slane %v8142_v39, 4  ;;  %v8201_v42 = vld [vmem:[#allocation3 + $0x148] sm:$0xff]  ;;  %v8203_v59 = vld [vmem:[#allocation3 + $0x150] sm:$0xff]  ;;  %v8208_v15 = vld [vmem:[#allocation3 + $0x158] sm:$0x3f] }
 0x2a0   : > { %4916 = vrot.lane.b32.xlu0 %v4654_v3, %s5328_s17  ;;  %4918 = vrot.lane.b32.xlu1 %v4656_v55, %s5328_s17  ;;  %v3879_v12 = vsel %vm1329_vm4, %v3876_v20, %v3878_v6  ;;  %v3881_v46 = vsel %vm1329_vm4, %v3878_v6, %v3880_v14  ;;  %v4118_v17 = vrot.slane %v8147_v48, 4  ;;  %v4120_v26 = vrot.slane %v8149_v37, 4 }
 0x2a1   : > { %v4025_v57 = vmax.f32 %v3785_v25, %v3879_v12  ;;  %v4026_v39 = vmax.f32 %v3786_v18, %v3881_v46  ;;  %v4117_v3 = vsel %vm1538_vm5, %v4115_v21, %v4116_v49  ;;  %v3547_v24 = vmax.f32 %v8149_v37, %v3400_v45 }
 0x2a2   : > { %v4119_v20 = vsel %vm1538_vm5, %v4116_v49, %v4118_v17  ;;  %v4121_v48 = vsel %vm1538_vm5, %v4118_v17, %v4120_v26  ;;  %v4264_v2 = vmax.f32 %v4024_v47, %v4117_v3  ;;  %v3402_v25 = vrot.slane %v8194_v52, 1 }
 0x2a3   : > { %v4265_v5 = vmax.f32 %v4025_v57, %v4119_v20  ;;  %v4266_v40 = vmax.f32 %v4026_v39, %v4121_v48  ;;  %v3787_v6 = vmax.f32 %v3547_v24, %v3640_v16  ;;  %v3403_v21 = vrot.slane %v8201_v42, 1  ;;  %v8218_v39 = vpop.permute.xlu0 %4812  ;;  %v8220_v16 = vpop.permute.xlu1 %4814 }
 0x2a4   : > { %v4385_v18 = vrot.slane %v4264_v2, 4  ;;  %v3405_v55 = vrot.slane %v8203_v59, 1  ;;  %v3407_v49 = vrot.slane %v8208_v15, 1  ;;  %v3642_v47 = vrot.slane %v8194_v52, 2 }
 0x2a5   : > { %v4386_v12 = vrot.slane %v4265_v5, 4  ;;  %v4388_v46 = vrot.slane %v4266_v40, 4  ;;  %v4027_v17 = vmax.f32 %v3787_v6, %v3880_v14  ;;  %v3404_v37 = vsel %vm911_vm2, %v3402_v25, %v3403_v21 }
 0x2a6   : > { %v3406_v45 = vsel %vm911_vm2, %v3403_v21, %v3405_v55  ;;  %v3643_v57 = vrot.slane %v8201_v42, 2  ;;  %v3408_v24 = vsel %vm911_vm2, %v3405_v55, %v3407_v49  ;;  %v3548_v25 = vmax.f32 %v8194_v52, %v3404_v37 }
 0x2a7   : > { %v4387_v3 = vsel %vm1538_vm5, %v4385_v18, %v4386_v12  ;;  %v4389_v20 = vsel %vm1538_vm5, %v4386_v12, %v4388_v46  ;;  %v4497_v48 = vmax.f32 %v4266_v40, %v4388_v46  ;;  %v4267_v14 = vmax.f32 %v4027_v17, %v4120_v26 }
 0x2a8   : > { %v4495_v56 = vmax.f32 %v4264_v2, %v4387_v3  ;;  %v4496_v33 = vmax.f32 %v4265_v5, %v4389_v20  ;;  %v3549_v6 = vmax.f32 %v8201_v42, %v3406_v45  ;;  %v3550_v21 = vmax.f32 %v8203_v59, %v3408_v24  ;;  %v8237_v20 = vpop.permute.xlu1 %4818 }
 0x2a9   : > { %v3644_v31 = vsel %vm1120_vm3, %v3642_v47, %v3643_v57  ;;  %v3645_v13 = vrot.slane %v8203_v59, 2  ;;  %v4545_v38 = vmax.f32 %v4497_v48, %v4267_v14  ;;  %v3647_v12 = vrot.slane %v8208_v15, 2  ;;  %v8235_v47 = vpop.permute.xlu0 %4816  ;;  %9136 = vst [vmem:[#allocation39_spill] sm:$0xff] %v8237_v20 }
 0x2aa   : > { %v4543_v36 = vmax.f32 %v4495_v56, %v4265_v5  ;;  %v4544_v18 = vmax.f32 %v4496_v33, %v4266_v40  ;;  %v3788_v2 = vmax.f32 %v3548_v25, %v3644_v31  ;;  %v3882_v26 = vrot.slane %v8194_v52, 3 }
 0x2ab   : > { %v3646_v55 = vsel %vm1120_vm3, %v3643_v57, %v3645_v13  ;;  %v3883_v46 = vrot.slane %v8201_v42, 3  ;;  %v4660_v45 = vrot.slane %v4545_v38, 2  ;;  %v3648_v3 = vsel %vm1120_vm3, %v3645_v13, %v3647_v12 }
 0x2ac   : > { %v4657_v17 = vrot.slane %v4543_v36, 2  ;;  %v4658_v37 = vrot.slane %v4544_v18, 2  ;;  %v3789_v33 = vmax.f32 %v3549_v6, %v3646_v55  ;;  %v3790_v56 = vmax.f32 %v3550_v21, %v3648_v3  ;;  %v8252_v18 = vld [vmem:[#allocation3 + $0x160] sm:$0xff]  ;;  %v8254_v55 = vld [vmem:[#allocation3 + $0x168] sm:$0xff] }
 0x2ad   : > { %v3884_v5 = vsel %vm1329_vm4, %v3882_v26, %v3883_v46  ;;  %v3885_v40 = vrot.slane %v8203_v59, 3  ;;  %v3887_v36 = vrot.slane %v8208_v15, 3  ;;  %v4122_v13 = vrot.slane %v8194_v52, 4  ;;  %v8264_v3 = vpop.permute.xlu0 %4820 }
 0x2ae   : > { %v4659_v31 = vsel %vm1120_vm3, %v4657_v17, %v4658_v37  ;;  %v4661_v57 = vsel %vm1120_vm3, %v4658_v37, %v4660_v45  ;;  %v4028_v48 = vmax.f32 %v3788_v2, %v3884_v5  ;;  %v4123_v24 = vrot.slane %v8201_v42, 4  ;;  %v8259_v17 = vld [vmem:[#allocation3 + $0x170] sm:$0xff]  ;;  %v8261_v42 = vld [vmem:[#allocation3 + $0x178] sm:$0x3f]  ;;  %9137 = vst [vmem:[#allocation63_spill] sm:$0xff] %v8264_v3 }
 0x2af   : > { %4920 = vrot.lane.b32.xlu0 %v4659_v31, %s5328_s17  ;;  %4922 = vrot.lane.b32.xlu1 %v4661_v57, %s5328_s17  ;;  %v3886_v38 = vsel %vm1329_vm4, %v3883_v46, %v3885_v40  ;;  %v4125_v14 = vrot.slane %v8203_v59, 4  ;;  %v3888_v25 = vsel %vm1329_vm4, %v3885_v40, %v3887_v36  ;;  %v4127_v21 = vrot.slane %v8208_v15, 4 }
 0x2b0   : > { %v4029_v6 = vmax.f32 %v3789_v33, %v3886_v38  ;;  %v4030_v2 = vmax.f32 %v3790_v56, %v3888_v25  ;;  %v4124_v26 = vsel %vm1538_vm5, %v4122_v13, %v4123_v24  ;;  %v3551_v52 = vmax.f32 %v8208_v15, %v3407_v49  ;;  %v8266_v33 = vpop.permute.xlu1 %4822 }
 0x2b1   : > { %v4126_v46 = vsel %vm1538_vm5, %v4123_v24, %v4125_v14  ;;  %v4128_v59 = vsel %vm1538_vm5, %v4125_v14, %v4127_v21  ;;  %v4268_v37 = vmax.f32 %v4028_v48, %v4124_v26  ;;  %9138 = vst [vmem:[#allocation40_spill] sm:$0xff] %v8266_v33  ;;  %v3409_v40 = vrot.slane %v8252_v18, 1  ;;  %v8282_v3 = vpop.permute.xlu0 %4824 }
 0x2b2   : > { %v4269_v45 = vmax.f32 %v4029_v6, %v4126_v46  ;;  %v4270_v5 = vmax.f32 %v4030_v2, %v4128_v59  ;;  %v3791_v56 = vmax.f32 %v3551_v52, %v3647_v12  ;;  %v3410_v31 = vrot.slane %v8254_v55, 1  ;;  %9139 = vst [vmem:[#allocation66_spill] sm:$0xff] %v8282_v3 }
 0x2b3   : > { %v4390_v57 = vrot.slane %v4268_v37, 4  ;;  %v3412_v49 = vrot.slane %v8259_v17, 1  ;;  %v3414_v38 = vrot.slane %v8261_v42, 1  ;;  %v3649_v14 = vrot.slane %v8252_v18, 2 }
 0x2b4   : > { %v4391_v15 = vrot.slane %v4269_v45, 4  ;;  %v4393_v13 = vrot.slane %v4270_v5, 4  ;;  %v4031_v24 = vmax.f32 %v3791_v56, %v3887_v36  ;;  %v3411_v48 = vsel %vm911_vm2, %v3409_v40, %v3410_v31 }
 0x2b5   : > { %v3413_v12 = vsel %vm911_vm2, %v3410_v31, %v3412_v49  ;;  %v3415_v6 = vsel %vm911_vm2, %v3412_v49, %v3414_v38  ;;  %v3552_v2 = vmax.f32 %v8252_v18, %v3411_v48  ;;  %v3650_v40 = vrot.slane %v8254_v55, 2 }
 0x2b6   : > { %v4392_v25 = vsel %vm1538_vm5, %v4390_v57, %v4391_v15  ;;  %v4394_v26 = vsel %vm1538_vm5, %v4391_v15, %v4393_v13  ;;  %v4271_v52 = vmax.f32 %v4031_v24, %v4127_v21  ;;  %v4500_v59 = vmax.f32 %v4270_v5, %v4393_v13  ;;  %v8284_v57 = vpop.permute.xlu1 %4826 }
 0x2b7   : > { %v4498_v46 = vmax.f32 %v4268_v37, %v4392_v25  ;;  %v4499_v33 = vmax.f32 %v4269_v45, %v4394_v26  ;;  %v3553_v36 = vmax.f32 %v8254_v55, %v3413_v12  ;;  %v3554_v56 = vmax.f32 %v8259_v17, %v3415_v6  ;;  %9140 = vst [vmem:[#allocation52_spill] sm:$0xff] %v8284_v57 }
 0x2b8   : > { %v4548_v49 = vmax.f32 %v4500_v59, %v4271_v52  ;;  %v3652_v48 = vrot.slane %v8259_v17, 2  ;;  %v3654_v15 = vrot.slane %v8261_v42, 2  ;;  %v3651_v21 = vsel %vm1120_vm3, %v3649_v14, %v3650_v40 }
 0x2b9   : > { %v4546_v31 = vmax.f32 %v4498_v46, %v4269_v45  ;;  %v4547_v37 = vmax.f32 %v4499_v33, %v4270_v5  ;;  %v3889_v13 = vrot.slane %v8252_v18, 3  ;;  %v3890_v24 = vrot.slane %v8254_v55, 3 }
 0x2ba   : > { %v4665_v12 = vrot.slane %v4548_v49, 2  ;;  %v3653_v6 = vsel %vm1120_vm3, %v3650_v40, %v3652_v48  ;;  %v3655_v26 = vsel %vm1120_vm3, %v3652_v48, %v3654_v15  ;;  %v3792_v45 = vmax.f32 %v3552_v2, %v3651_v21  ;;  %v8300_v48 = vpop.permute.xlu0 %4828  ;;  %v8302_v2 = vpop.permute.xlu1 %4830 }
 0x2bb   : > { %v4662_v25 = vrot.slane %v4546_v31, 2  ;;  %v4663_v57 = vrot.slane %v4547_v37, 2  ;;  %v3793_v46 = vmax.f32 %v3553_v36, %v3653_v6  ;;  %v3794_v52 = vmax.f32 %v3554_v56, %v3655_v26  ;;  %9141 = vst [vmem:[#allocation53_spill] sm:$0xff] %v8300_v48  ;;  %9142 = vst [vmem:[#allocation56_spill] sm:$0xff] %v8302_v2 }
 0x2bc   : > { %v3891_v59 = vsel %vm1329_vm4, %v3889_v13, %v3890_v24  ;;  %v3892_v33 = vrot.slane %v8259_v17, 3  ;;  %v3894_v5 = vrot.slane %v8261_v42, 3  ;;  %v4129_v14 = vrot.slane %v8252_v18, 4 }
 0x2bd   : > { %v4664_v3 = vsel %vm1120_vm3, %v4662_v25, %v4663_v57  ;;  %v4666_v31 = vsel %vm1120_vm3, %v4663_v57, %v4665_v12  ;;  %v4032_v49 = vmax.f32 %v3792_v45, %v3891_v59  ;;  %v4130_v40 = vrot.slane %v8254_v55, 4  ;;  %v8310_v57 = vld [vmem:[#allocation3 + $0x180] sm:$0xff]  ;;  %v8313_v25 = vld [vmem:[#allocation3 + $0x188] sm:$0xff]  ;;  %v8315_v12 = vld [vmem:[#allocation3 + $0x190] sm:$0xff] }
 0x2be   : > { %4924 = vrot.lane.b32.xlu0 %v4664_v3, %s5328_s17  ;;  %4926 = vrot.lane.b32.xlu1 %v4666_v31, %s5328_s17  ;;  %v3893_v36 = vsel %vm1329_vm4, %v3890_v24, %v3892_v33  ;;  %v3895_v56 = vsel %vm1329_vm4, %v3892_v33, %v3894_v5  ;;  %v4132_v18 = vrot.slane %v8259_v17, 4  ;;  %v4134_v37 = vrot.slane %v8261_v42, 4  ;;  %v8320_v17 = vld [vmem:[#allocation3 + $0x198] sm:$0x3f] }
 0x2bf   : > { %v4033_v21 = vmax.f32 %v3793_v46, %v3893_v36  ;;  %v4034_v55 = vmax.f32 %v3794_v52, %v3895_v56  ;;  %v4131_v13 = vsel %vm1538_vm5, %v4129_v14, %v4130_v40  ;;  %v3555_v26 = vmax.f32 %v8261_v42, %v3414_v38  ;;  %v8329_v42 = vpop.permute.xlu1 %4834 }
 0x2c0   : > { %v4133_v3 = vsel %vm1538_vm5, %v4130_v40, %v4132_v18  ;;  %v4135_v24 = vsel %vm1538_vm5, %v4132_v18, %v4134_v37  ;;  %v4272_v6 = vmax.f32 %v4032_v49, %v4131_v13  ;;  %v3416_v46 = vrot.slane %v8310_v57, 1  ;;  %v8327_v18 = vpop.permute.xlu0 %4832  ;;  %9144 = vst [vmem:[#allocation60_spill] sm:$0xff] %v8329_v42 }
 0x2c1   : > { %v4273_v45 = vmax.f32 %v4033_v21, %v4133_v3  ;;  %v4274_v59 = vmax.f32 %v4034_v55, %v4135_v24  ;;  %v3795_v33 = vmax.f32 %v3555_v26, %v3654_v15  ;;  %v3417_v14 = vrot.slane %v8313_v25, 1  ;;  %9143 = vst [vmem:[#allocation57_spill] sm:$0xff] %v8327_v18 }
 0x2c2   : > { %v4395_v52 = vrot.slane %v4272_v6, 4  ;;  %v3419_v31 = vrot.slane %v8315_v12, 1  ;;  %v3421_v40 = vrot.slane %v8320_v17, 1  ;;  %v3656_v49 = vrot.slane %v8310_v57, 2 }
 0x2c3   : > { %v4396_v36 = vrot.slane %v4273_v45, 4  ;;  %v4398_v56 = vrot.slane %v4274_v59, 4  ;;  %v4035_v38 = vmax.f32 %v3795_v33, %v3894_v5  ;;  %v3418_v21 = vsel %vm911_vm2, %v3416_v46, %v3417_v14 }
 0x2c4   : > { %v3420_v55 = vsel %vm911_vm2, %v3417_v14, %v3419_v31  ;;  %v3657_v15 = vrot.slane %v8313_v25, 2  ;;  %v3422_v26 = vsel %vm911_vm2, %v3419_v31, %v3421_v40  ;;  %v3556_v5 = vmax.f32 %v8310_v57, %v3418_v21  ;;  %v8348_v21 = vpop.permute.xlu0 %4836 }
 0x2c5   : > { %v4397_v13 = vsel %vm1538_vm5, %v4395_v52, %v4396_v36  ;;  %v4399_v3 = vsel %vm1538_vm5, %v4396_v36, %v4398_v56  ;;  %v4503_v24 = vmax.f32 %v4274_v59, %v4398_v56  ;;  %v4275_v48 = vmax.f32 %v4035_v38, %v4134_v37  ;;  %9145 = vst [vmem:[#allocation61_spill] sm:$0xff] %v8348_v21 }
 0x2c6   : > { %v4501_v2 = vmax.f32 %v4272_v6, %v4397_v13  ;;  %v4502_v18 = vmax.f32 %v4273_v45, %v4399_v3  ;;  %v3557_v46 = vmax.f32 %v8313_v25, %v3420_v55  ;;  %v3558_v33 = vmax.f32 %v8315_v12, %v3422_v26  ;;  %v8350_v55 = vpop.permute.xlu1 %4838 }
 0x2c7   : > { %v3658_v14 = vsel %vm1120_vm3, %v3656_v49, %v3657_v15  ;;  %v3659_v52 = vrot.slane %v8315_v12, 2  ;;  %v4551_v56 = vmax.f32 %v4503_v24, %v4275_v48  ;;  %v3661_v29 = vrot.slane %v8320_v17, 2  ;;  %9146 = vst [vmem:[#allocation64_spill] sm:$0xff] %v8350_v55 }
 0x2c8   : > { %v4549_v42 = vmax.f32 %v4501_v2, %v4273_v45  ;;  %v4550_v36 = vmax.f32 %v4502_v18, %v4274_v59  ;;  %v3796_v6 = vmax.f32 %v3556_v5, %v3658_v14  ;;  %v3896_v37 = vrot.slane %v8310_v57, 3 }
 0x2c9   : > { %v3660_v31 = vsel %vm1120_vm3, %v3657_v15, %v3659_v52  ;;  %v3897_v38 = vrot.slane %v8313_v25, 3  ;;  %v4670_v3 = vrot.slane %v4551_v56, 2  ;;  %v3662_v2 = vsel %vm1120_vm3, %v3659_v52, %v3661_v29 }
 0x2ca   : > { %v4667_v13 = vrot.slane %v4549_v42, 2  ;;  %v4668_v49 = vrot.slane %v4550_v36, 2  ;;  %v3797_v45 = vmax.f32 %v3557_v46, %v3660_v31  ;;  %v3798_v48 = vmax.f32 %v3558_v33, %v3662_v2  ;;  %v8366_v31 = vld [vmem:[#allocation3 + $0x1a0] sm:$0xff] }
 0x2cb   : > { %v3898_v59 = vsel %vm1329_vm4, %v3896_v37, %v3897_v38  ;;  %v3899_v18 = vrot.slane %v8315_v12, 3  ;;  %v3901_v26 = vrot.slane %v8320_v17, 3  ;;  %v4136_v46 = vrot.slane %v8310_v57, 4  ;;  %v9147_v37 = vld [vmem:[#allocation7_spill] sm:$0xff] }
 0x2cc   : > { %v4669_v15 = vsel %vm1120_vm3, %v4667_v13, %v4668_v49  ;;  %v4671_v24 = vsel %vm1120_vm3, %v4668_v49, %v4670_v3  ;;  %v4036_v5 = vmax.f32 %v3796_v6, %v3898_v59  ;;  %v4137_v33 = vrot.slane %v8313_v25, 4  ;;  %v8368_v6 = vld [vmem:[#allocation3 + $0x1a8] sm:$0xff]  ;;  %v8379_v49 = vpop.permute.xlu0 %4840  ;;  %v8381_v3 = vpop.permute.xlu1 %4842 }
 0x2cd   : > { %4928 = vrot.lane.b32.xlu0 %v4669_v15, %s5328_s17  ;;  %4930 = vrot.lane.b32.xlu1 %v4671_v24, %s5328_s17  ;;  %v3900_v42 = vsel %vm1329_vm4, %v3897_v38, %v3899_v18  ;;  %v4139_v14 = vrot.slane %v8315_v12, 4  ;;  %v3902_v52 = vsel %vm1329_vm4, %v3899_v18, %v3901_v26  ;;  %v4141_v56 = vrot.slane %v8320_v17, 4  ;;  %v8377_v12 = vld [vmem:[#allocation3 + $0x1b0] sm:$0xff]  ;;  %9148 = vst [vmem:[#allocation65_spill] sm:$0xff] %v8379_v49  ;;  %v8387_v18 = vld [vmem:[#allocation3 + $0x1b8] sm:$0x3f] }
 0x2ce   : > { %v4037_v36 = vmax.f32 %v3797_v45, %v3900_v42  ;;  %v8373_v13 = vsel %vm343_vm0, %v9147_v37, %v7729_v22  ;;  %v4038_v38 = vmax.f32 %v3798_v48, %v3902_v52  ;;  %v4138_v57 = vsel %vm1538_vm5, %v4136_v46, %v4137_v33  ;;  %9149 = vst [vmem:[#allocation7_spill] sm:$0xff] %v8381_v3  ;;  %v9150_v48 = vld [vmem:[#allocation9_spill] sm:$0xff] }
 0x2cf   : > { %v4140_v25 = vsel %vm1538_vm5, %v4137_v33, %v4139_v14  ;;  %v4142_v2 = vsel %vm1538_vm5, %v4139_v14, %v4141_v56  ;;  %v4276_v45 = vmax.f32 %v4036_v5, %v4138_v57  ;;  %v3559_v22 = vmax.f32 %v8320_v17, %v3421_v40 }
 0x2d0   : > { %v4277_v59 = vmax.f32 %v4037_v36, %v4140_v25  ;;  %v8392_v15 = vsel %vm343_vm0, %v9150_v48, %v7731_v9  ;;  %v4278_v24 = vmax.f32 %v4038_v38, %v4142_v2  ;;  %v3423_v42 = vrot.slane %v8366_v31, 1  ;;  %v8405_v3 = vpop.permute.xlu0 %4844 }
 0x2d1   : > { %v3424_v46 = vrot.slane %v8368_v6, 1  ;;  %v4400_v33 = vrot.slane %v4276_v45, 4  ;;  %v3799_v5 = vmax.f32 %v3559_v22, %v3661_v29  ;;  %v3426_v52 = vrot.slane %v8377_v12, 1  ;;  %9151 = vst [vmem:[#allocation9_spill] sm:$0xff] %v8405_v3 }
 0x2d2   : > { %v4401_v14 = vrot.slane %v4277_v59, 4  ;;  %v4403_v36 = vrot.slane %v4278_v24, 4  ;;  %v3428_v40 = vrot.slane %v8387_v18, 1  ;;  %v3663_v37 = vrot.slane %v8366_v31, 2 }
 0x2d3   : > { %v3425_v17 = vsel %vm911_vm2, %v3423_v42, %v3424_v46  ;;  %v4039_v57 = vmax.f32 %v3799_v5, %v3901_v26  ;;  %v3427_v38 = vsel %vm911_vm2, %v3424_v46, %v3426_v52  ;;  %v8407_v42 = vpop.permute.xlu1 %4846  ;;  %v3664_v46 = vrot.slane %v8368_v6, 2 }
 0x2d4   : > { %v4402_v9 = vsel %vm1538_vm5, %v4400_v33, %v4401_v14  ;;  %v3560_v25 = vmax.f32 %v8366_v31, %v3425_v17  ;;  %v4404_v2 = vsel %vm1538_vm5, %v4401_v14, %v4403_v36  ;;  %v4506_v29 = vmax.f32 %v4278_v24, %v4403_v36  ;;  %9152 = vst [vmem:[#allocation67_spill] sm:$0xff] %v8407_v42 }
 0x2d5   : > { %v4504_v48 = vmax.f32 %v4276_v45, %v4402_v9  ;;  %v3429_v22 = vsel %vm911_vm2, %v3426_v52, %v3428_v40  ;;  %v4505_v49 = vmax.f32 %v4277_v59, %v4404_v2  ;;  %v4279_v55 = vmax.f32 %v4039_v57, %v4141_v56 }
 0x2d6   : > { %v3561_v21 = vmax.f32 %v8368_v6, %v3427_v38  ;;  %v3562_v26 = vmax.f32 %v8377_v12, %v3429_v22  ;;  %v3666_v5 = vrot.slane %v8377_v12, 2  ;;  %v3668_v45 = vrot.slane %v8387_v18, 2 }
 0x2d7   : > { %v4552_v33 = vmax.f32 %v4504_v48, %v4277_v59  ;;  %v4553_v14 = vmax.f32 %v4505_v49, %v4278_v24  ;;  %v4554_v36 = vmax.f32 %v4506_v29, %v4279_v55  ;;  %v3903_v52 = vrot.slane %v8366_v31, 3  ;;  %v8422_v24 = vpop.permute.xlu0 %4848  ;;  %v8424_v29 = vpop.permute.xlu1 %4850 }
 0x2d8   : > { %v3904_v17 = vrot.slane %v8368_v6, 3  ;;  %v3665_v56 = vsel %vm1120_vm3, %v3663_v37, %v3664_v46  ;;  %v3667_v57 = vsel %vm1120_vm3, %v3664_v46, %v3666_v5  ;;  %v3669_v38 = vsel %vm1120_vm3, %v3666_v5, %v3668_v45  ;;  %9153 = vst [vmem:[#allocation68_spill] sm:$0xff] %v8422_v24  ;;  %9154 = vst [vmem:[#allocation69_spill] sm:$0xff] %v8424_v29 }
 0x2d9   : > { %v4672_v9 = vrot.slane %v4552_v33, 2  ;;  %v4673_v59 = vrot.slane %v4553_v14, 2  ;;  %v4675_v2 = vrot.slane %v4554_v36, 2  ;;  %v3800_v48 = vmax.f32 %v3560_v25, %v3665_v56  ;;  %v8435_v36 = vld [vmem:[#allocation3 + $0x1c0] sm:$0xff] }
 0x2da   : > { %v3801_v22 = vmax.f32 %v3561_v21, %v3667_v57  ;;  %v3802_v42 = vmax.f32 %v3562_v26, %v3669_v38  ;;  %v3905_v3 = vsel %vm1329_vm4, %v3903_v52, %v3904_v17  ;;  %v3906_v55 = vrot.slane %v8377_v12, 3  ;;  %v9155_v52 = vld [vmem:[#allocation8_spill] sm:$0xff]  ;;  %v9156_v38 = vld [vmem:[#allocation10_spill] sm:$0xff] }
 0x2db   : > { %v3908_v49 = vrot.slane %v8387_v18, 3  ;;  %v4674_v37 = vsel %vm1120_vm3, %v4672_v9, %v4673_v59  ;;  %v4676_v33 = vsel %vm1120_vm3, %v4673_v59, %v4675_v2  ;;  %v4040_v46 = vmax.f32 %v3800_v48, %v3905_v3  ;;  %v8443_v57 = vld [vmem:[#allocation3 + $0x1c8] sm:$0xff]  ;;  %v8455_v2 = vld [vmem:[#allocation3 + $0x1d8] sm:$0x3f] }
 0x2dc   : > { %v4143_v5 = vrot.slane %v8366_v31, 4  ;;  %4932 = vrot.lane.b32.xlu0 %v4674_v37, %s5328_s17  ;;  %4934 = vrot.lane.b32.xlu1 %v4676_v33, %s5328_s17  ;;  %v3907_v21 = vsel %vm1329_vm4, %v3904_v17, %v3906_v55  ;;  %v4144_v26 = vrot.slane %v8368_v6, 4  ;;  %v4146_v14 = vrot.slane %v8377_v12, 4  ;;  %v8445_v17 = vld [vmem:[#allocation3 + $0x1d0] sm:$0xff] }
 0x2dd   : > { %v3909_v25 = vsel %vm1329_vm4, %v3906_v55, %v3908_v49  ;;  %v8440_v3 = vsel %vm343_vm0, %v9155_v52, %v7759_v54  ;;  %v4041_v31 = vmax.f32 %v3801_v22, %v3907_v21  ;;  %v4148_v56 = vrot.slane %v8387_v18, 4 }
 0x2de   : > { %v4042_v9 = vmax.f32 %v3802_v42, %v3909_v25  ;;  %v8450_v6 = vsel %vm343_vm0, %v9156_v38, %v7761_v53  ;;  %v4145_v12 = vsel %vm1538_vm5, %v4143_v5, %v4144_v26  ;;  %v4147_v59 = vsel %vm1538_vm5, %v4144_v26, %v4146_v14  ;;  %v8461_v25 = vpop.permute.xlu0 %4884  ;;  %v8463_v5 = vpop.permute.xlu1 %4886 }
 0x2df   : > { %v3563_v54 = vmax.f32 %v8387_v18, %v3428_v40  ;;  %v4149_v42 = vsel %vm1538_vm5, %v4146_v14, %v4148_v56  ;;  %v4280_v48 = vmax.f32 %v4040_v46, %v4145_v12  ;;  %v4281_v22 = vmax.f32 %v4041_v31, %v4147_v59  ;;  %9157 = vst [vmem:[#allocation8_spill] sm:$0xff] %v8461_v25 }
 0x2e0   : > { %v3430_v55 = vrot.slane %v8435_v36, 1  ;;  %v4282_v37 = vmax.f32 %v4042_v9, %v4149_v42  ;;  %v3431_v21 = vrot.slane %v8443_v57, 1  ;;  %v3433_v53 = vrot.slane %v8445_v17, 1  ;;  %9158 = vst [vmem:[#allocation10_spill] sm:$0xff] %v8463_v5 }
 0x2e1   : > { %v3803_v33 = vmax.f32 %v3563_v54, %v3668_v45  ;;  %v4405_v26 = vrot.slane %v4280_v48, 4  ;;  %v4406_v18 = vrot.slane %v4281_v22, 4  ;;  %v8981_v40 = vrot.slane %v8455_v2, 1 }
 0x2e2   : > { %v3670_v14 = vrot.slane %v8435_v36, 2  ;;  %v4408_v46 = vrot.slane %v4282_v37, 4  ;;  %v3432_v31 = vsel %vm911_vm2, %v3430_v55, %v3431_v21  ;;  %v3434_v45 = vsel %vm911_vm2, %v3431_v21, %v3433_v53 }
 0x2e3   : > { %v4043_v52 = vmax.f32 %v3803_v33, %v3908_v49  ;;  %v4407_v9 = vsel %vm1538_vm5, %v4405_v26, %v4406_v18  ;;  %v3436_v38 = vsel %vm911_vm2, %v3433_v53, %v8981_v40  ;;  %v3564_v12 = vmax.f32 %v8435_v36, %v3432_v31  ;;  %v8481_v40 = vpop.permute.xlu0 %4888 }
 0x2e4   : > { %v3565_v59 = vmax.f32 %v8443_v57, %v3434_v45  ;;  %v4409_v54 = vsel %vm1538_vm5, %v4406_v18, %v4408_v46  ;;  %v4507_v42 = vmax.f32 %v4280_v48, %v4407_v9  ;;  %v4509_v24 = vmax.f32 %v4282_v37, %v4408_v46  ;;  %9159 = vst [vmem:[#allocation70_spill] sm:$0xff] %v8481_v40  ;;  %v8483_v45 = vpop.permute.xlu1 %4890 }
 0x2e5   : > { %v4283_v29 = vmax.f32 %v4043_v52, %v4148_v56  ;;  %v4508_v49 = vmax.f32 %v4281_v22, %v4409_v54  ;;  %v3566_v55 = vmax.f32 %v8445_v17, %v3436_v38  ;;  %v3671_v33 = vrot.slane %v8443_v57, 2  ;;  %9160 = vst [vmem:[#allocation71_spill] sm:$0xff] %v8483_v45 }
 0x2e6   : > { %v3673_v21 = vrot.slane %v8445_v17, 2  ;;  %v4555_v26 = vmax.f32 %v4507_v42, %v4281_v22  ;;  %v3675_v53 = vrot.slane %v8455_v2, 2  ;;  %v3910_v31 = vrot.slane %v8435_v36, 3 }
 0x2e7   : > { %v4557_v41 = vmax.f32 %v4509_v24, %v4283_v29  ;;  %v4556_v48 = vmax.f32 %v4508_v49, %v4282_v37  ;;  %v3672_v56 = vsel %vm1120_vm3, %v3670_v14, %v3671_v33  ;;  %v3911_v46 = vrot.slane %v8443_v57, 3 }
 0x2e8   : > { %v3674_v18 = vsel %vm1120_vm3, %v3671_v33, %v3673_v21  ;;  %v4677_v52 = vrot.slane %v4555_v26, 2  ;;  %v3676_v22 = vsel %vm1120_vm3, %v3673_v21, %v3675_v53  ;;  %v3804_v24 = vmax.f32 %v3564_v12, %v3672_v56  ;;  %v8513_v56 = vpop.permute.xlu1 %4894 }
 0x2e9   : > { %v4680_v9 = vrot.slane %v4557_v41, 2  ;;  %v4678_v29 = vrot.slane %v4556_v48, 2  ;;  %v3805_v38 = vmax.f32 %v3565_v59, %v3674_v18  ;;  %v3806_v54 = vmax.f32 %v3566_v55, %v3676_v22  ;;  %v9161_v59 = vld [vmem:[#allocation11_spill] sm:$0xff]  ;;  %9163 = vst [vmem:[#allocation72_spill] sm:$0xff] %v8513_v56  ;;  %v8517_v22 = vld [vmem:[#allocation3 + $0x1f0] sm:$0xff] }
 0x2ea   : > { %v3912_v42 = vsel %vm1329_vm4, %v3910_v31, %v3911_v46  ;;  %v3913_v40 = vrot.slane %v8445_v17, 3  ;;  %v3915_v37 = vrot.slane %v8455_v2, 3  ;;  %v4150_v14 = vrot.slane %v8435_v36, 4  ;;  %v8507_v48 = vld [vmem:[#allocation3 + $0x1e0] sm:$0xff] }
 0x2eb   : > { %v4044_v49 = vmax.f32 %v3804_v24, %v3912_v42  ;;  %v4679_v33 = vsel %vm1120_vm3, %v4677_v52, %v4678_v29  ;;  %v4681_v26 = vsel %vm1120_vm3, %v4678_v29, %v4680_v9  ;;  %v4151_v41 = vrot.slane %v8443_v57, 4  ;;  %v8509_v57 = vld [vmem:[#allocation3 + $0x1e8] sm:$0xff] }
 0x2ec   : > { %v4153_v12 = vrot.slane %v8445_v17, 4  ;;  %v8500_v55 = vsel %vm343_vm0, %v9161_v59, %v7778_v23  ;;  %4936 = vrot.lane.b32.xlu0 %v4679_v33, %s5328_s17  ;;  %4938 = vrot.lane.b32.xlu1 %v4681_v26, %s5328_s17  ;;  %v3914_v21 = vsel %vm1329_vm4, %v3911_v46, %v3913_v40  ;;  %v3916_v36 = vsel %vm1329_vm4, %v3913_v40, %v3915_v37  ;;  %v8511_v17 = vpop.permute.xlu0 %4892  ;;  %v8519_v46 = vld [vmem:[#allocation3 + $0x1f8] sm:$0x3f]  ;;  %v9164_v40 = vld [vmem:[#allocation12_spill] sm:$0xff] }
 0x2ed   : > { %v4155_v31 = vrot.slane %v8455_v2, 4  ;;  %9162 = vst [vmem:[#allocation11_spill] sm:$0xff] %v8511_v17  ;;  %v4045_v23 = vmax.f32 %v3805_v38, %v3914_v21  ;;  %v4046_v18 = vmax.f32 %v3806_v54, %v3916_v36  ;;  %v4152_v52 = vsel %vm1538_vm5, %v4150_v14, %v4151_v41 }
 0x2ee   : > { %v4154_v9 = vsel %vm1538_vm5, %v4151_v41, %v4153_v12  ;;  %v8524_v24 = vsel %vm343_vm0, %v9164_v40, %v7780_v32  ;;  %v4284_v42 = vmax.f32 %v4044_v49, %v4152_v52  ;;  %v9165_v33 = vrot.slane %v8455_v2, 1 }
 0x2ef   : > { %v4156_v29 = vsel %vm1538_vm5, %v4153_v12, %v4155_v31  ;;  %v4285_v54 = vmax.f32 %v4045_v23, %v4154_v9  ;;  %v3437_v26 = vrot.slane %v8507_v48, 1  ;;  %v3438_v41 = vrot.slane %v8509_v57, 1 }
 0x2f0   : > { %v3567_v38 = vmax.f32 %v8455_v2, %v9165_v33  ;;  %v4286_v14 = vmax.f32 %v4046_v18, %v4156_v29  ;;  %v4410_v59 = vrot.slane %v4284_v42, 4  ;;  %v3440_v36 = vrot.slane %v8517_v22, 1  ;;  %v8539_v9 = vpop.permute.xlu0 %4896 }
 0x2f1   : > { %v3442_v32 = vrot.slane %v8519_v46, 1  ;;  %v4411_v40 = vrot.slane %v4285_v54, 4  ;;  %v3439_v49 = vsel %vm911_vm2, %v3437_v26, %v3438_v41  ;;  %v3677_v12 = vrot.slane %v8507_v48, 2  ;;  %9166 = vst [vmem:[#allocation12_spill] sm:$0xff] %v8539_v9 }
 0x2f2   : > { %v3807_v21 = vmax.f32 %v3567_v38, %v3675_v53  ;;  %v4413_v56 = vrot.slane %v4286_v14, 4  ;;  %v3441_v2 = vsel %vm911_vm2, %v3438_v41, %v3440_v36  ;;  %v3568_v18 = vmax.f32 %v8507_v48, %v3439_v49  ;;  %v8541_v53 = vpop.permute.xlu1 %4898 }
 0x2f3   : > { %v3443_v23 = vsel %vm911_vm2, %v3440_v36, %v3442_v32  ;;  %9167 = vst [vmem:[#allocation73_spill] sm:$0xff] %v8541_v53  ;;  %v4412_v29 = vsel %vm1538_vm5, %v4410_v59, %v4411_v40  ;;  %v3569_v26 = vmax.f32 %v8509_v57, %v3441_v2  ;;  %v3680_v36 = vrot.slane %v8517_v22, 2 }
 0x2f4   : > { %v4047_v52 = vmax.f32 %v3807_v21, %v3915_v37  ;;  %v4414_v33 = vsel %vm1538_vm5, %v4411_v40, %v4413_v56  ;;  %v4512_v38 = vmax.f32 %v4286_v14, %v4413_v56  ;;  %v4510_v17 = vmax.f32 %v4284_v42, %v4412_v29  ;;  %v8556_v25 = vpop.permute.xlu0 %4900 }
 0x2f5   : > { %v4511_v45 = vmax.f32 %v4285_v54, %v4414_v33  ;;  %v3570_v41 = vmax.f32 %v8517_v22, %v3443_v23  ;;  %v3678_v21 = vrot.slane %v8509_v57, 2  ;;  %v3682_v49 = vrot.slane %v8519_v46, 2 }
 0x2f6   : > { %v4287_v37 = vmax.f32 %v4047_v52, %v4155_v31  ;;  %v3917_v53 = vrot.slane %v8507_v48, 3  ;;  %v4558_v9 = vmax.f32 %v4510_v17, %v4285_v54  ;;  %v3918_v56 = vrot.slane %v8509_v57, 3  ;;  %v8558_v20 = vpop.permute.xlu1 %4902 }
 0x2f7   : > { %v4559_v59 = vmax.f32 %v4511_v45, %v4286_v14  ;;  %v3679_v40 = vsel %vm1120_vm3, %v3677_v12, %v3678_v21  ;;  %v3681_v42 = vsel %vm1120_vm3, %v3678_v21, %v3680_v36  ;;  %v3683_v31 = vsel %vm1120_vm3, %v3680_v36, %v3682_v49 }
 0x2f8   : > { %v4560_v5 = vmax.f32 %v4512_v38, %v4287_v37  ;;  %v3920_v52 = vrot.slane %v8517_v22, 3  ;;  %v4682_v2 = vrot.slane %v4558_v9, 2  ;;  %v3808_v33 = vmax.f32 %v3568_v18, %v3679_v40  ;;  %v9169_v40 = vld [vmem:[#allocation14_spill] sm:$0xff] }
 0x2f9   : > { %v4683_v23 = vrot.slane %v4559_v59, 2  ;;  %v3809_v45 = vmax.f32 %v3569_v26, %v3681_v42  ;;  %v3810_v17 = vmax.f32 %v3570_v41, %v3683_v31  ;;  %v3919_v54 = vsel %vm1329_vm4, %v3917_v53, %v3918_v56  ;;  %v9168_v41 = vld [vmem:[#allocation13_spill] sm:$0xff] }
 0x2fa   : > { %v4685_v29 = vrot.slane %v4560_v5, 2  ;;  %v3921_v14 = vsel %vm1329_vm4, %v3918_v56, %v3920_v52  ;;  %v3922_v37 = vrot.slane %v8519_v46, 3  ;;  %v4048_v9 = vmax.f32 %v3808_v33, %v3919_v54 }
 0x2fb   : > { %v4684_v12 = vsel %vm1120_vm3, %v4682_v2, %v4683_v23  ;;  %v4049_v5 = vmax.f32 %v3809_v45, %v3921_v14  ;;  %v4157_v18 = vrot.slane %v8507_v48, 4  ;;  %v4158_v26 = vrot.slane %v8509_v57, 4  ;;  %v9172_v45 = vld [vmem:[#allocation17_spill] sm:$0xff] }
 0x2fc   : > { %v4686_v38 = vsel %vm1120_vm3, %v4683_v23, %v4685_v29  ;;  %4940 = vrot.lane.b32.xlu0 %v4684_v12, %s5328_s17  ;;  %v4160_v53 = vrot.slane %v8517_v22, 4  ;;  %v4986_v21 = vsel %vm343_vm0, %v9168_v41, %v7798_v0  ;;  %v3923_v36 = vsel %vm1329_vm4, %v3920_v52, %v3922_v37  ;;  %v8582_v29 = vpop.permute.xlu0 %4904  ;;  %v8584_v52 = vpop.permute.xlu1 %4906  ;;  %v9177_v41 = vld [vmem:[#allocation22_spill] sm:$0xff] }
 0x2fd   : > { %4942 = vrot.lane.b32.xlu1 %v4686_v38, %s5328_s17  ;;  %v4162_v59 = vrot.slane %v8519_v46, 4  ;;  %v3571_v56 = vmax.f32 %v8519_v46, %v3442_v32  ;;  %v4987_v42 = vsel %vm343_vm0, %v9169_v40, %v7800_v28  ;;  %v4050_v31 = vmax.f32 %v3810_v17, %v3923_v36  ;;  %v9170_v46 = vld [vmem:[#allocation15_spill] sm:$0xff]  ;;  %v9171_v28 = vld [vmem:[#allocation16_spill] sm:$0xff]  ;;  %v9173_v38 = vld [vmem:[#allocation18_spill] sm:$0xff] }
 0x2fe   : > { %v4159_v48 = vsel %vm1538_vm5, %v4157_v18, %v4158_v26  ;;  %v4161_v57 = vsel %vm1538_vm5, %v4158_v26, %v4160_v53  ;;  %v4988_v32 = vsel %vm343_vm0, %v9170_v46, %v7822_v60  ;;  %v4989_v33 = vsel %vm343_vm0, %v9171_v28, %v7824_v11  ;;  %v9174_v60 = vld [vmem:[#allocation19_spill] sm:$0xff]  ;;  %v9175_v18 = vld [vmem:[#allocation20_spill] sm:$0xff] }
 0x2ff   : > { %v4163_v22 = vsel %vm1538_vm5, %v4160_v53, %v4162_v59  ;;  %v4288_v2 = vmax.f32 %v4048_v9, %v4159_v48  ;;  %v4289_v23 = vmax.f32 %v4049_v5, %v4161_v57  ;;  %v3811_v0 = vmax.f32 %v3571_v56, %v3682_v49  ;;  %v9182_v28 = vld [vmem:[#allocation71_spill] sm:$0xff] }
 0x300   : > { %v4990_v17 = vsel %vm343_vm0, %v9172_v45, %v7841_v34  ;;  %v4290_v54 = vmax.f32 %v4050_v31, %v4163_v22  ;;  %v4991_v9 = vsel %vm343_vm0, %v9173_v38, %v7843_v10  ;;  %v4992_v5 = vsel %vm343_vm0, %v9174_v60, %v7870_v8  ;;  %v9176_v34 = vld [vmem:[#allocation21_spill] sm:$0xff]  ;;  %v4909_v48 = vpop.permute.xlu0 %4908  ;;  %v4911_v57 = vpop.permute.xlu1 %4910  ;;  %v9183_v45 = vld [vmem:[#allocation11_spill] sm:$0xff] }
 0x301   : > { %v4415_v49 = vrot.slane %v4288_v2, 4  ;;  %v4416_v14 = vrot.slane %v4289_v23, 4  ;;  %v4051_v12 = vmax.f32 %v3811_v0, %v3922_v37  ;;  %v4993_v11 = vsel %vm343_vm0, %v9175_v18, %v7872_v35  ;;  %v9180_v0 = vld [vmem:[#allocation10_spill] sm:$0xff]  ;;  %v9186_v38 = vld [vmem:[#allocation73_spill] sm:$0xff] }
 0x302   : > { %v4418_v26 = vrot.slane %v4290_v54, 4  ;;  %v4994_v53 = vsel %vm343_vm0, %v9176_v34, %v7886_v1  ;;  %v4995_v37 = vsel %vm343_vm0, %v9177_v41, %v7888_v19  ;;  %v5013_v8 = vsel %vm5012_vm7, %v8373_v13, %v8089_v43  ;;  %v9187_v34 = vld [vmem:[#allocation25_spill] sm:$0xff]  ;;  %v9189_v41 = vld [vmem:[#allocation26_spill] sm:$0xff] }
 0x303   : > { %v4417_v36 = vsel %vm1538_vm5, %v4415_v49, %v4416_v14  ;;  %v4291_v10 = vmax.f32 %v4051_v12, %v4162_v59  ;;  %v5014_v1 = vsel %vm5012_vm7, %v8440_v3, %v8091_v50  ;;  %v5015_v19 = vsel %vm5012_vm7, %v8392_v15, %v8109_v30 }
 0x304   : > { %v4419_v35 = vsel %vm1538_vm5, %v4416_v14, %v4418_v26  ;;  %v4513_v56 = vmax.f32 %v4288_v2, %v4417_v36  ;;  %v4515_v40 = vmax.f32 %v4290_v54, %v4418_v26  ;;  %v5016_v59 = vsel %vm5012_vm7, %v8450_v6, %v8111_v4  ;;  %v4913_v46 = vpop.permute.xlu0 %4912  ;;  %v9185_v14 = vld [vmem:[#allocation12_spill] sm:$0xff] }
 0x305   : > { %v4514_v31 = vmax.f32 %v4289_v23, %v4419_v35  ;;  %v5017_v43 = vsel %vm5012_vm7, %v8500_v55, %v8125_v58  ;;  %v5018_v13 = vsel %vm5012_vm7, %v8524_v24, %v8127_v7  ;;  %v5019_v15 = vsel %vm5012_vm7, %v4986_v21, %v8154_v44  ;;  %v9178_v21 = vld [vmem:[#allocation39_spill] sm:$0xff]  ;;  %v9192_v35 = vld [vmem:[#allocation40_spill] sm:$0xff] }
 0x306   : > { %v4561_v50 = vmax.f32 %v4513_v56, %v4289_v23  ;;  %v4563_v3 = vmax.f32 %v4515_v40, %v4291_v10  ;;  %v5020_v4 = vsel %vm5012_vm7, %v4987_v42, %v8156_v61  ;;  %v5021_v6 = vsel %vm5012_vm7, %v4988_v32, %v8172_v63  ;;  %v9179_v23 = vld [vmem:[#allocation8_spill] sm:$0xff]  ;;  %v9191_v10 = vld [vmem:[#allocation63_spill] sm:$0xff] }
 0x307   : > { %v4562_v30 = vmax.f32 %v4514_v31, %v4290_v54  ;;  %v5022_v55 = vsel %vm5012_vm7, %v4989_v33, %v8174_v51  ;;  %v5023_v7 = vsel %vm5012_vm7, %v4990_v17, %v8196_v27  ;;  %v5024_v2 = vsel %vm5012_vm7, %v4991_v9, %v8198_v62  ;;  %v9184_v54 = vld [vmem:[#allocation72_spill] sm:$0xff] }
 0x308   : > { %v4687_v22 = vrot.slane %v4561_v50, 2  ;;  %v4690_v58 = vrot.slane %v4563_v3, 2  ;;  %v5025_v44 = vsel %vm5012_vm7, %v4992_v5, %v8218_v39  ;;  %v5026_v61 = vsel %vm5012_vm7, %v4993_v11, %v8220_v16  ;;  %v4915_v16 = vpop.permute.xlu1 %4914  ;;  %v9193_v31 = vld [vmem:[#allocation36_spill] sm:$0xff]  ;;  %v9197_v3 = vld [vmem:[#allocation66_spill] sm:$0xff] }
 0x309   : > { %v4688_v24 = vrot.slane %v4562_v30, 2  ;;  %v5027_v63 = vsel %vm5012_vm7, %v4994_v53, %v8235_v47  ;;  %v5028_v42 = vsel %vm5012_vm7, %v4995_v37, %v9178_v21  ;;  %v5046_v62 = vsel %vm5045_vm8, %v5013_v8, %v9179_v23  ;;  %v9181_v47 = vld [vmem:[#allocation70_spill] sm:$0xff]  ;;  %v9190_v37 = vld [vmem:[#allocation24_spill] sm:$0xff]  ;;  %v9203_v21 = vld [vmem:[#allocation53_spill] sm:$0xff] }
 0x30a   : > { %v5047_v39 = vsel %vm5045_vm8, %v5014_v1, %v9180_v0  ;;  %5079 = vst.msk [vmem:[%s8661_s24] sm:$0xff] %vm5078_vm9, %v5046_v62  ;;  %v5048_v32 = vsel %vm5045_vm8, %v5015_v19, %v9181_v47  ;;  %v5049_v33 = vsel %vm5045_vm8, %v5016_v59, %v9182_v28  ;;  %v5050_v17 = vsel %vm5045_vm8, %v5017_v43, %v9183_v45  ;;  %v9195_v43 = vld [vmem:[#allocation35_spill] sm:$0xff]  ;;  %v9209_v45 = vld [vmem:[#allocation57_spill] sm:$0xff] }
 0x30b   : > { %v4689_v51 = vsel %vm1120_vm3, %v4687_v22, %v4688_v24  ;;  %v4691_v27 = vsel %vm1120_vm3, %v4688_v24, %v4690_v58  ;;  %5080 = vst.msk [vmem:[%s8661_s24 + $0x8] sm:$0xff] %vm5078_vm9, %v5047_v39  ;;  %5081 = vst.msk [vmem:[%s8661_s24 + $0x10] sm:$0xff] %vm5078_vm9, %v5048_v32  ;;  %v5051_v49 = vsel %vm5045_vm8, %v5018_v13, %v9184_v54  ;;  %v9196_v13 = vld [vmem:[#allocation31_spill] sm:$0xff]  ;;  %v9200_v24 = vld [vmem:[#allocation37_spill] sm:$0xff] }
 0x30c   : > { %4944 = vrot.lane.b32.xlu0 %v4689_v51, %s5328_s17  ;;  %4946 = vrot.lane.b32.xlu1 %v4691_v27, %s5328_s17  ;;  %5082 = vst.msk [vmem:[%s8661_s24 + $0x18] sm:$0xff] %vm5078_vm9, %v5049_v33  ;;  %5083 = vst.msk [vmem:[%s8661_s24 + $0x20] sm:$0xff] %vm5078_vm9, %v5050_v17  ;;  %v5052_v12 = vsel %vm5045_vm8, %v5019_v15, %v9185_v14  ;;  %v5053_v9 = vsel %vm5045_vm8, %v5020_v4, %v9186_v38  ;;  %v9198_v15 = vld [vmem:[#allocation52_spill] sm:$0xff]  ;;  %v9208_v28 = vld [vmem:[#allocation43_spill] sm:$0xff] }
 0x30d   : > { %v5054_v60 = vsel %vm5045_vm8, %v5021_v6, %v8556_v25  ;;  %5084 = vst.msk [vmem:[%s8661_s24 + $0x28] sm:$0xff] %vm5078_vm9, %v5051_v49  ;;  %5085 = vst.msk [vmem:[%s8661_s24 + $0x30] sm:$0xff] %vm5078_vm9, %v5052_v12  ;;  %v5055_v5 = vsel %vm5045_vm8, %v5022_v55, %v8558_v20  ;;  %v5056_v18 = vsel %vm5045_vm8, %v5023_v7, %v8582_v29  ;;  %v9199_v7 = vld [vmem:[#allocation41_spill] sm:$0xff]  ;;  %v9204_v51 = vld [vmem:[#allocation56_spill] sm:$0xff] }
 0x30e   : > { %5086 = vst.msk [vmem:[%s8661_s24 + $0x38] sm:$0xff] %vm5078_vm9, %v5053_v9  ;;  %5087 = vst.msk [vmem:[%s8661_s24 + $0x40] sm:$0xff] %vm5078_vm9, %v5054_v60  ;;  %v5057_v25 = vsel %vm5045_vm8, %v5024_v2, %v8584_v52  ;;  %v5058_v11 = vsel %vm5045_vm8, %v5025_v44, %v4909_v48  ;;  %v5059_v20 = vsel %vm5045_vm8, %v5026_v61, %v4911_v57  ;;  %v9188_v52 = vld [vmem:[#allocation23_spill] sm:$0xff]  ;;  %v9194_v48 = vld [vmem:[#allocation30_spill] sm:$0xff] }
 0x30f   : > { %5088 = vst.msk [vmem:[%s8661_s24 + $0x48] sm:$0xff] %vm5078_vm9, %v5055_v5  ;;  %5089 = vst.msk [vmem:[%s8661_s24 + $0x50] sm:$0xff] %vm5078_vm9, %v5056_v18  ;;  %v5060_v26 = vsel %vm5045_vm8, %v5027_v63, %v4913_v46  ;;  %v5061_v29 = vsel %vm5045_vm8, %v5028_v42, %v4915_v16  ;;  %v4996_v53 = vsel %vm343_vm0, %v9188_v52, %v9187_v34  ;;  %v9201_v44 = vld [vmem:[#allocation42_spill] sm:$0xff]  ;;  %v9202_v61 = vld [vmem:[#allocation27_spill] sm:$0xff] }
 0x310   : > { %5090 = vst.msk [vmem:[%s8661_s24 + $0x58] sm:$0xff] %vm5078_vm9, %v5057_v25  ;;  %5091 = vst.msk [vmem:[%s8661_s24 + $0x60] sm:$0xff] %vm5078_vm9, %v5058_v11  ;;  %v4997_v36 = vsel %vm343_vm0, %v9190_v37, %v9189_v41  ;;  %v5029_v8 = vsel %vm5012_vm7, %v4996_v53, %v9191_v10  ;;  %v4998_v57 = vsel %vm343_vm0, %v9194_v48, %v9193_v31  ;;  %v9205_v46 = vld [vmem:[#allocation38_spill] sm:$0xff]  ;;  %v9207_v32 = vld [vmem:[#allocation28_spill] sm:$0xff] }
 0x311   : > { %5092 = vst.msk [vmem:[%s8661_s24 + $0x68] sm:$0xff] %vm5078_vm9, %v5059_v20  ;;  %5093 = vst.msk [vmem:[%s8661_s24 + $0x70] sm:$0xff] %vm5078_vm9, %v5060_v26  ;;  %v5030_v56 = vsel %vm5012_vm7, %v4997_v36, %v9192_v35  ;;  %v4999_v50 = vsel %vm343_vm0, %v9196_v13, %v9195_v43  ;;  %v5031_v30 = vsel %vm5012_vm7, %v4998_v57, %v9197_v3  ;;  %v9206_v16 = vld [vmem:[#allocation34_spill] sm:$0xff]  ;;  %v9210_v54 = vld [vmem:[#allocation60_spill] sm:$0xff] }
 0x312   : > { %5094 = vst.msk [vmem:[%s8661_s24 + $0x78] sm:$0xff] %vm5078_vm9, %v5061_v29  ;;  %v4917_v40 = vpop.permute.xlu0 %4916  ;;  %v4919_v1 = vpop.permute.xlu1 %4918  ;;  %v5032_v4 = vsel %vm5012_vm7, %v4999_v50, %v9198_v15  ;;  %v5000_v2 = vsel %vm343_vm0, %v9200_v24, %v9199_v7  ;;  %v5001_v63 = vsel %vm343_vm0, %v9202_v61, %v9201_v44  ;;  %v5002_v47 = vsel %vm343_vm0, %v9206_v16, %v9205_v46  ;;  %v9211_v60 = vld [vmem:[#allocation33_spill] sm:$0xff]  ;;  %v9212_v5 = vld [vmem:[#allocation46_spill] sm:$0xff]  ;;  %v9213_v25 = vld [vmem:[#allocation44_spill] sm:$0xff] }
 0x313   : > { %v5062_v19 = vsel %vm5045_vm8, %v5029_v8, %v4917_v40  ;;  %v5063_v59 = vsel %vm5045_vm8, %v5030_v56, %v4919_v1  ;;  %v5033_v42 = vsel %vm5012_vm7, %v5000_v2, %v9203_v21  ;;  %v5034_v27 = vsel %vm5012_vm7, %v5001_v63, %v9204_v51  ;;  %v9214_v11 = vld [vmem:[#allocation47_spill] sm:$0xff]  ;;  %v9215_v26 = vld [vmem:[#allocation61_spill] sm:$0xff]  ;;  %v9216_v34 = vld [vmem:[#allocation64_spill] sm:$0xff] }
 0x314   : > { %5095 = vst.msk [vmem:[%s8661_s24 + $0x80] sm:$0xff] %vm5078_vm9, %v5062_v19  ;;  %5096 = vst.msk [vmem:[%s8661_s24 + $0x88] sm:$0xff] %vm5078_vm9, %v5063_v59  ;;  %v5003_v33 = vsel %vm343_vm0, %v9208_v28, %v9207_v32  ;;  %v5035_v17 = vsel %vm5012_vm7, %v5002_v47, %v9209_v45  ;;  %v5004_v18 = vsel %vm343_vm0, %v9212_v5, %v9211_v60  ;;  %v9217_v10 = vld [vmem:[#allocation45_spill] sm:$0xff]  ;;  %v9218_v8 = vld [vmem:[#allocation48_spill] sm:$0xff] }
 0x315   : > { %v5036_v49 = vsel %vm5012_vm7, %v5003_v33, %v9210_v54  ;;  %v5005_v20 = vsel %vm343_vm0, %v9214_v11, %v9213_v25  ;;  %v5037_v29 = vsel %vm5012_vm7, %v5004_v18, %v9215_v26  ;;  %v5006_v35 = vsel %vm343_vm0, %v9218_v8, %v9217_v10  ;;  %v9219_v56 = vld [vmem:[#allocation58_spill] sm:$0xff]  ;;  %v9220_v40 = vld [vmem:[#allocation49_spill] sm:$0xff]  ;;  %v9222_v31 = vld [vmem:[#allocation7_spill] sm:$0xff] }
 0x316   : > { %v5038_v52 = vsel %vm5012_vm7, %v5005_v20, %v9216_v34  ;;  %v5007_v1 = vsel %vm343_vm0, %v9220_v40, %v9219_v56  ;;  %v9221_v19 = vld [vmem:[#allocation65_spill] sm:$0xff]  ;;  %v9223_v3 = vld [vmem:[#allocation32_spill] sm:$0xff]  ;;  %v9228_v7 = vld [vmem:[#allocation67_spill] sm:$0xff] }
 0x317   : > { %v5039_v59 = vsel %vm5012_vm7, %v5006_v35, %v9221_v19  ;;  %v5040_v48 = vsel %vm5012_vm7, %v5007_v1, %v9222_v31  ;;  %v9229_v21 = vld [vmem:[#allocation29_spill] sm:$0xff] }
 0x318   : > { %v9234_v46 = vld [vmem:[#allocation69_spill] sm:$0xff] }
 0x321   : > { %v4921_v6 = vpop.permute.xlu0 %4920  ;;  %v4923_v22 = vpop.permute.xlu1 %4922 }
 0x322   : > { %v5064_v58 = vsel %vm5045_vm8, %v5031_v30, %v4921_v6  ;;  %v5065_v55 = vsel %vm5045_vm8, %v5032_v4, %v4923_v22  ;;  %v9224_v30 = vld [vmem:[#allocation50_spill] sm:$0xff]  ;;  %v9225_v4 = vld [vmem:[#allocation59_spill] sm:$0xff] }
 0x323   : > { %5097 = vst.msk [vmem:[%s8661_s24 + $0x90] sm:$0xff] %vm5078_vm9, %v5064_v58  ;;  %5098 = vst.msk [vmem:[%s8661_s24 + $0x98] sm:$0xff] %vm5078_vm9, %v5065_v55  ;;  %v5008_v15 = vsel %vm343_vm0, %v9224_v30, %v9223_v3  ;;  %v9226_v6 = vld [vmem:[#allocation51_spill] sm:$0xff]  ;;  %v9227_v58 = vld [vmem:[#allocation9_spill] sm:$0xff] }
 0x324   : > { %v5009_v22 = vsel %vm343_vm0, %v9226_v6, %v9225_v4  ;;  %v5041_v55 = vsel %vm5012_vm7, %v5008_v15, %v9227_v58 }
 0x325   : > { %v5042_v24 = vsel %vm5012_vm7, %v5009_v22, %v9228_v7 }
 0x330   : > { %v4925_v23 = vpop.permute.xlu0 %4924  ;;  %v4927_v62 = vpop.permute.xlu1 %4926 }
 0x331   : > { %v5066_v0 = vsel %vm5045_vm8, %v5033_v42, %v4925_v23  ;;  %v5067_v39 = vsel %vm5045_vm8, %v5034_v27, %v4927_v62  ;;  %v9230_v42 = vld [vmem:[#allocation54_spill] sm:$0xff]  ;;  %v9232_v23 = vld [vmem:[#allocation55_spill] sm:$0xff] }
 0x332   : > { %5099 = vst.msk [vmem:[%s8661_s24 + $0xa0] sm:$0xff] %vm5078_vm9, %v5066_v0  ;;  %5100 = vst.msk [vmem:[%s8661_s24 + $0xa8] sm:$0xff] %vm5078_vm9, %v5067_v39  ;;  %v5010_v51 = vsel %vm343_vm0, %v9230_v42, %v9229_v21  ;;  %v9231_v27 = vld [vmem:[#allocation62_spill] sm:$0xff]  ;;  %v9233_v0 = vld [vmem:[#allocation68_spill] sm:$0xff] }
 0x333   : > { %v5011_v62 = vsel %vm343_vm0, %v9232_v23, %v9231_v27  ;;  %v5043_v39 = vsel %vm5012_vm7, %v5010_v51, %v9233_v0 }
 0x334   : > { %v5044_v16 = vsel %vm5012_vm7, %v5011_v62, %v9234_v46 }
 0x33f   : > { %v4929_v14 = vpop.permute.xlu0 %4928  ;;  %v4931_v12 = vpop.permute.xlu1 %4930 }
 0x340   : > { %v5068_v38 = vsel %vm5045_vm8, %v5035_v17, %v4929_v14  ;;  %v5069_v9 = vsel %vm5045_vm8, %v5036_v49, %v4931_v12 }
 0x341   : > { %5101 = vst.msk [vmem:[%s8661_s24 + $0xb0] sm:$0xff] %vm5078_vm9, %v5068_v38  ;;  %5102 = vst.msk [vmem:[%s8661_s24 + $0xb8] sm:$0xff] %vm5078_vm9, %v5069_v9 }
 0x34e   : > { %v4933_v53 = vpop.permute.xlu0 %4932  ;;  %v4935_v41 = vpop.permute.xlu1 %4934 }
 0x34f   : > { %v5070_v37 = vsel %vm5045_vm8, %v5037_v29, %v4933_v53  ;;  %v5071_v36 = vsel %vm5045_vm8, %v5038_v52, %v4935_v41 }
 0x350   : > { %5103 = vst.msk [vmem:[%s8661_s24 + $0xc0] sm:$0xff] %vm5078_vm9, %v5070_v37  ;;  %5104 = vst.msk [vmem:[%s8661_s24 + $0xc8] sm:$0xff] %vm5078_vm9, %v5071_v36 }
 0x35e   : > { %v4937_v57 = vpop.permute.xlu0 %4936  ;;  %v4939_v43 = vpop.permute.xlu1 %4938 }
 0x35f   : > { %v5072_v13 = vsel %vm5045_vm8, %v5039_v59, %v4937_v57  ;;  %v5073_v50 = vsel %vm5045_vm8, %v5040_v48, %v4939_v43 }
 0x360   : > { %5105 = vst.msk [vmem:[%s8661_s24 + $0xd0] sm:$0xff] %vm5078_vm9, %v5072_v13  ;;  %5106 = vst.msk [vmem:[%s8661_s24 + $0xd8] sm:$0xff] %vm5078_vm9, %v5073_v50 }
 0x36e   : > { %v4941_v2 = vpop.permute.xlu0 %4940 }
 0x36f   : > { %v4943_v44 = vpop.permute.xlu1 %4942  ;;  %v5074_v61 = vsel %vm5045_vm8, %v5041_v55, %v4941_v2 }
 0x370   : > { %v5075_v63 = vsel %vm5045_vm8, %v5042_v24, %v4943_v44  ;;  %5107 = vst.msk [vmem:[%s8661_s24 + $0xe0] sm:$0xff] %vm5078_vm9, %v5074_v61 }
 0x371   : > { %5108 = vst.msk [vmem:[%s8661_s24 + $0xe8] sm:$0xff] %vm5078_vm9, %v5075_v63 }
 0x37e   : > { %v4945_v47 = vpop.permute.xlu0 %4944  ;;  %v4947_v32 = vpop.permute.xlu1 %4946 }
 0x37f   : > { %v5076_v28 = vsel %vm5045_vm8, %v5043_v39, %v4945_v47  ;;  %v5077_v33 = vsel %vm5045_vm8, %v5044_v16, %v4947_v32 }
 0x380   : > { %5109 = vst.msk [vmem:[%s8661_s24 + $0xf0] sm:$0xff] %vm5078_vm9, %v5076_v28  ;;  %5110 = vst.msk [vmem:[%s8661_s24 + $0xf8] sm:$0xff] %vm5078_vm9, %v5077_v33 }
 0x381   : > { %5274 = shalt.err (!%p5271_p3)
}
 0x382   : > { %s5275_s8 = scalar_lea.hbm %s8842_s29, 4096  ;;  %s5279_s11 = scalar_lea.hbm %s8903_s3, 8192 }
 0x383   : > { %p5276_p4 = scmp.ne.s32.totalorder %s8842_s29, %s5275_s8  ;;  %p5280_p9 = scmp.lt.u32.totalorder %s8842_s29, %s8903_s3 }
 0x384   : > { %p5281_p10 = scmp.lt.u32.totalorder %s5279_s11, %s5275_s8  ;;  %p5283_p12 = scmp.lt.u32.totalorder %s5275_s8, %s8842_s29 }
 0x385   : > { %p5277_p7 = pnand %p5276_p4, %p5389_p5 }
 0x386   : > { %p5282_p11 = por %p5281_p10, %p5280_p9 }
 0x387   : > { %p5278_p8 = pneg %p5277_p7 }
 0x388   : > { %p5284_p13 = por %p5283_p12, %p5282_p11 }
 0x38a   : > { %p5285_p0 = pnand %p5284_p13, %p5278_p8 }
 0x38c   : > { %5288 = shalt.err (!%p5285_p0)
}
 0x38d   : > { %s5330_s20 = smov 128  }
 0x38e   : > { %5203 = dma.vmem_to_hbm [thread:$0]  (%p5389_p5), %s8848_s26, 4096, %s8842_s29, %s8858_s16, %s5330_s20, %s5330_s20, %s5326_s6  }
 0x38f PF: > { %p5209_p1 = scmp.ge.s32.totalorder %s5323_s15, 2  ;;  %s5140_s24 = sand.u32 1, %s5311_s12  }
 0x390   : > { %s5141_s25 = scalar_lea.sflag [#allocation5], %s5140_s24 }
 0x391   : > { %p5206_p2 = pnand %p5209_p1, %p5393_p6 }
 0x393   : > { %5306 = dma.done.wait (!%p5206_p2), %s5141_s25, 4096  }
 0x394   : > { %5308 = vsyncadd (!%p5206_p2), %s5141_s25, 4294963200  ;;  %p13_p3 = scmp.ge.s32.totalorder %s5376_s18, 4   ;;  %s9235_s12 = smov %s5315_s13 }
 0x395   : > { %s9236_s13 = smov %s5319_s14  ;;  %s9237_s14 = smov %s5387_s21 }
 0x396   : > { %s9238_s15 = smov %s5376_s18  ;;  %15 = sbr.rel (!%p13_p3) target bundleno = 3 (0x3), region = 69 }
 0x39d   :  { %5146 = vsyncpa [#allocation5], 1 }
 0x39e   :  { %5148 = vsyncpa [#allocation5 + $0x1], 1 }

</bundles_post_ra>
